<compile_context>
chip_gen: v6e
topology: v6e:2x2x1
jax: 0.10.0
libtpu: 0.0.40
codegen_flags: <defaults>
</compile_context>

<pallas_src>
import functools

import jax
import jax.numpy as jnp
from jax.experimental import pallas as pl
from jax.experimental.pallas import tpu as pltpu


_NEG_SLOPE = 0.2
_BN_EPS = 1e-5


# ----------------------------------------------------------------------------
# Small helpers
# ----------------------------------------------------------------------------
def _round_up(x, m):
    return ((x + m - 1) // m) * m


def _pick_tm(m):
    """Largest M tile <= 512 that divides M exactly (keeps BN partial sums and
    edge tiles exact; conv M = N*Ho*Wo is highly composite in practice)."""
    for t in (512, 256, 128, 64, 32, 16):
        if m % t == 0:
            return t
    return m                                     # tiny / odd M: one full block


def _pick_tk(k):
    """K tile: full K when small, else a lane-aligned divisor near 9*128."""
    if k <= 1152:
        return k
    for t in (1152, 1024, 768, 576, 512, 384, 256, 128):
        if k % t == 0:
            return t
    return k


# ----------------------------------------------------------------------------
# Kernels
# ----------------------------------------------------------------------------
def _conv_act_kernel(a_ref, w_ref, b_ref, o_ref, *scratch, multi_k, neg_slope):
    """conv-as-GEMM + bias + LeakyReLU (layers without BatchNorm)."""
    if multi_k:
        acc_ref, = scratch
        k = pl.program_id(1)

        @pl.when(k == 0)
        def _():
            acc_ref[...] = jnp.zeros_like(acc_ref)

        acc_ref[...] += jnp.dot(a_ref[...], w_ref[...],
                                preferred_element_type=jnp.float32)

        @pl.when(k == pl.num_programs(1) - 1)
        def _():
            y = acc_ref[...] + b_ref[...]
            o_ref[...] = jnp.where(y >= 0, y, y * neg_slope).astype(o_ref.dtype)
    else:
        y = jnp.dot(a_ref[...], w_ref[...],
                    preferred_element_type=jnp.float32) + b_ref[...]
        o_ref[...] = jnp.where(y >= 0, y, y * neg_slope).astype(o_ref.dtype)


def _conv_stats_kernel(a_ref, w_ref, o_ref, sum_ref, sumsq_ref, *scratch,
                       multi_k):
    """conv-as-GEMM producing the raw (pre-BN) output plus per-M-tile sum and
    sum-of-squares (f32).  BN statistics are finished outside and applied by
    the _bn_act_kernel second pass."""

    def _epilogue(y):
        cp = y.shape[-1]
        o_ref[...] = y.astype(o_ref.dtype)
        s = jnp.sum(y, axis=0, keepdims=True)                 # (1, Cp)
        ss = jnp.sum(y * y, axis=0, keepdims=True)            # (1, Cp)
        # Replicate across 8 sublanes so the stats output block is (1, 8, Cp)
        # (layout-legal); the wrapper reads row 0 of each tile.
        sum_ref[...] = jnp.broadcast_to(s[:, None, :], (1, 8, cp))
        sumsq_ref[...] = jnp.broadcast_to(ss[:, None, :], (1, 8, cp))

    if multi_k:
        acc_ref, = scratch
        k = pl.program_id(1)

        @pl.when(k == 0)
        def _():
            acc_ref[...] = jnp.zeros_like(acc_ref)

        acc_ref[...] += jnp.dot(a_ref[...], w_ref[...],
                                preferred_element_type=jnp.float32)

        @pl.when(k == pl.num_programs(1) - 1)
        def _():
            _epilogue(acc_ref[...])
    else:
        _epilogue(jnp.dot(a_ref[...], w_ref[...],
                          preferred_element_type=jnp.float32))


def _bn_act_kernel(y_ref, scale_ref, shift_ref, o_ref, *, neg_slope):
    """Second BN pass: per-channel affine (folded mean/var/gamma/beta) + LeakyReLU."""
    y = y_ref[...].astype(jnp.float32) * scale_ref[...] + shift_ref[...]
    o_ref[...] = jnp.where(y >= 0, y, y * neg_slope).astype(o_ref.dtype)


def _tail_kernel(x_ref, w1_ref, b1_ref, w2_ref, b2_ref, o_ref, *, neg_slope):
    """AdaptiveAvgPool2d(1) -> 1x1 conv(512->1024) -> LeakyReLU ->
    1x1 conv(1024->1) -> sigmoid, fused into one tiny kernel."""
    pooled = jnp.mean(x_ref[...].astype(jnp.float32), axis=1)          # (N, C)
    h = jnp.dot(pooled, w1_ref[...],
                preferred_element_type=jnp.float32) + b1_ref[...]      # (N, 1024)
    h = jnp.where(h >= 0, h, h * neg_slope)
    # 1024 -> 1 as a VPU multiply + lane reduce (no degenerate MXU matmul).
    logit = jnp.sum(h * w2_ref[...], axis=-1, keepdims=True) + b2_ref[...]
    o_ref[...] = jax.nn.sigmoid(logit).astype(o_ref.dtype)


# ----------------------------------------------------------------------------
# pallas_call wrappers
# ----------------------------------------------------------------------------
def _conv_gemm_act(patches, weights, bias, *, neg_slope):
    m, k = patches.shape
    cp = weights.shape[1]
    tm, tk = _pick_tm(m), _pick_tk(k)
    gm, kt = m // tm, k // tk
    multi_k = kt > 1
    kernel = functools.partial(_conv_act_kernel, multi_k=multi_k,
                               neg_slope=neg_slope)
    return pl.pallas_call(
        kernel,
        out_shape=jax.ShapeDtypeStruct((m, cp), jnp.bfloat16),
        grid_spec=pltpu.PrefetchScalarGridSpec(
            num_scalar_prefetch=0,
            grid=(gm, kt),
            in_specs=[
                pl.BlockSpec((tm, tk), lambda i, j: (i, j)),
                pl.BlockSpec((tk, cp), lambda i, j: (j, 0)),
                pl.BlockSpec((1, cp), lambda i, j: (0, 0)),
            ],
            out_specs=pl.BlockSpec((tm, cp), lambda i, j: (i, 0)),
            scratch_shapes=([pltpu.VMEM((tm, cp), jnp.float32)]
                            if multi_k else []),
        ),
        compiler_params=pltpu.CompilerParams(
            dimension_semantics=("parallel", "arbitrary"),
            vmem_limit_bytes=32 << 20),
    )(patches, weights, bias)


def _conv_gemm_stats(patches, weights):
    m, k = patches.shape
    cp = weights.shape[1]
    tm, tk = _pick_tm(m), _pick_tk(k)
    gm, kt = m // tm, k // tk
    multi_k = kt > 1
    kernel = functools.partial(_conv_stats_kernel, multi_k=multi_k)
    y, sums, sumsqs = pl.pallas_call(
        kernel,
        out_shape=(jax.ShapeDtypeStruct((m, cp), jnp.bfloat16),
                   jax.ShapeDtypeStruct((gm, 8, cp), jnp.float32),
                   jax.ShapeDtypeStruct((gm, 8, cp), jnp.float32)),
        grid_spec=pltpu.PrefetchScalarGridSpec(
            num_scalar_prefetch=0,
            grid=(gm, kt),
            in_specs=[
                pl.BlockSpec((tm, tk), lambda i, j: (i, j)),
                pl.BlockSpec((tk, cp), lambda i, j: (j, 0)),
            ],
            out_specs=(pl.BlockSpec((tm, cp), lambda i, j: (i, 0)),
                       pl.BlockSpec((1, 8, cp), lambda i, j: (i, 0, 0)),
                       pl.BlockSpec((1, 8, cp), lambda i, j: (i, 0, 0))),
            scratch_shapes=([pltpu.VMEM((tm, cp), jnp.float32)]
                            if multi_k else []),
        ),
        compiler_params=pltpu.CompilerParams(
            dimension_semantics=("parallel", "arbitrary"),
            vmem_limit_bytes=32 << 20),
    )(patches, weights)
    return y, sums[:, 0, :], sumsqs[:, 0, :], tm


def _bn_act(y, scale, shift, *, tm, neg_slope):
    m, cp = y.shape
    gm = m // tm
    return pl.pallas_call(
        functools.partial(_bn_act_kernel, neg_slope=neg_slope),
        out_shape=jax.ShapeDtypeStruct((m, cp), jnp.bfloat16),
        grid_spec=pltpu.PrefetchScalarGridSpec(
            num_scalar_prefetch=0,
            grid=(gm,),
            in_specs=[pl.BlockSpec((tm, cp), lambda i: (i, 0)),
                      pl.BlockSpec((1, cp), lambda i: (0, 0)),
                      pl.BlockSpec((1, cp), lambda i: (0, 0))],
            out_specs=pl.BlockSpec((tm, cp), lambda i: (i, 0)),
        ),
        compiler_params=pltpu.CompilerParams(
            dimension_semantics=("parallel",)),
    )(y, scale, shift)


# ----------------------------------------------------------------------------
# JAX glue: im2col and per-layer wrappers
# ----------------------------------------------------------------------------
def _im2col(x_nhwc, stride):
    """3x3 / padding=1 patch extraction -> (N*Ho*Wo, 9*C), (kh, kw, c) order."""
    n, h, w, c = x_nhwc.shape
    xp = jnp.pad(x_nhwc, ((0, 0), (1, 1), (1, 1), (0, 0)))
    ho = (h - 1) // stride + 1
    wo = (w - 1) // stride + 1
    cols = []
    for kh in range(3):
        for kw in range(3):
            cols.append(xp[:, kh:kh + (ho - 1) * stride + 1:stride,
                           kw:kw + (wo - 1) * stride + 1:stride, :])
    cols = jnp.concatenate(cols, axis=-1)            # (N, Ho, Wo, 9*C)
    return cols.reshape(n * ho * wo, 9 * c), (n, ho, wo)


def _conv_layer(x_nhwc, layer_params, *, stride, use_bn, neg_slope=_NEG_SLOPE):
    w, b, gamma, beta = layer_params                 # w: (3, 3, Cin, Cout)
    cin_p = x_nhwc.shape[-1]
    kh, kw, cin, cout = w.shape
    cout_p = _round_up(cout, 128)

    # Zero-pad Cin to the (possibly channel-padded) activation width and Cout
    # up to a multiple of 128 so all stores are lane-dense; padded channels
    # stay exactly zero through the network.
    w_p = jnp.pad(w, ((0, 0), (0, 0), (0, cin_p - cin), (0, cout_p - cout)))
    w_p = w_p.reshape(kh * kw * cin_p, cout_p).astype(jnp.bfloat16)

    patches, (n, ho, wo) = _im2col(x_nhwc, stride)
    m = n * ho * wo

    if use_bn:
        # Conv bias is dropped: a bias added before BatchNorm cancels exactly
        # in the batch-statistics normalization (PyTorch training-mode fwd).
        y, sums, sumsqs, tm = _conv_gemm_stats(patches, w_p)
        total = jnp.sum(sums, axis=0, keepdims=True)             # (1, Cp)
        total_sq = jnp.sum(sumsqs, axis=0, keepdims=True)        # (1, Cp)
        mean = total / m
        var = jnp.maximum(total_sq / m - mean * mean, 0.0)       # biased var
        gamma_p = jnp.pad(gamma.reshape(1, -1), ((0, 0), (0, cout_p - cout)))
        beta_p = jnp.pad(beta.reshape(1, -1), ((0, 0), (0, cout_p - cout)))
        scale = gamma_p * jax.lax.rsqrt(var + _BN_EPS)
        shift = beta_p - mean * scale
        out = _bn_act(y, scale, shift, tm=tm, neg_slope=neg_slope)
    else:
        b_p = jnp.pad(b.reshape(1, -1), ((0, 0), (0, cout_p - cout)))
        out = _conv_gemm_act(patches, w_p, b_p, neg_slope=neg_slope)

    return out.reshape(n, ho, wo, cout_p)


# Body config: (stride, use_bn) and (Cin, Cout) for the eight 3x3 convs.
_BODY_CFG = [(1, False), (2, True), (1, True), (2, True),
             (1, True), (2, True), (1, True), (2, True)]
_BODY_CH = [(3, 64), (64, 64), (64, 128), (128, 128),
            (128, 256), (256, 256), (256, 512), (512, 512)]


def discriminator_forward(x_nchw, params):
    # NCHW -> NHWC, bf16 activations (all accumulation inside kernels is f32).
    x = jnp.transpose(x_nchw, (0, 2, 3, 1)).astype(jnp.bfloat16)
    for (stride, use_bn), p in zip(_BODY_CFG, params["body"]):
        x = _conv_layer(x, p, stride=stride, use_bn=use_bn)

    n, h, w, c = x.shape                           # c == 512 (no padding here)
    x = x.reshape(n, h * w, c)

    # Fused tail: avg-pool + 512->1024 (+LeakyReLU) + 1024->1 + sigmoid.
    w1, b1, w2, b2 = params["head"]
    out = pl.pallas_call(
        functools.partial(_tail_kernel, neg_slope=_NEG_SLOPE),
        out_shape=jax.ShapeDtypeStruct((n, 1), jnp.float32),
    )(x, w1, b1.reshape(1, -1), w2, b2.reshape(1, 1))
    return out.reshape(-1)                         # (N,) like .view(batch_size)


# ----------------------------------------------------------------------------
# Deterministic parameter init (synthetic; no checkpoint loading)
# ----------------------------------------------------------------------------
def init_params(key):
    keys = jax.random.split(key, len(_BODY_CH) + 2)
    body = []
    for k, (cin, cout) in zip(keys[:len(_BODY_CH)], _BODY_CH):
        w = (jax.random.normal(k, (3, 3, cin, cout)) * 0.05).astype(jnp.float32)
        body.append((w,
                     jnp.zeros((cout,), jnp.float32),    # conv bias
                     jnp.ones((cout,), jnp.float32),     # BN gamma
                     jnp.zeros((cout,), jnp.float32)))   # BN beta
    w1 = (jax.random.normal(keys[-2], (512, 1024)) * 0.05).astype(jnp.float32)
    b1 = jnp.zeros((1024,), jnp.float32)
    w2 = (jax.random.normal(keys[-1], (1, 1024)) * 0.05).astype(jnp.float32)
    b2 = jnp.zeros((1,), jnp.float32)
    return {"body": body, "head": (w1, b1, w2, b2)}


if __name__ == "__main__":
    key = jax.random.PRNGKey(0)
    kx, kp = jax.random.split(key)
    x = jax.random.normal(kx, (2, 3, 16, 16), jnp.float32)   # NCHW, like PyTorch
    params = init_params(kp)

    fwd = jax.jit(discriminator_forward)
    out = jax.block_until_ready(fwd(x, params))

    assert out.shape == (2,), out.shape
    assert bool(jnp.all(jnp.isfinite(out)))
    assert bool(jnp.all((out >= 0.0) & (out <= 1.0)))        # sigmoid range
    print("KERNEL_OK")
</pallas_src>

<mosaic_0001>
module attributes {stable_mosaic.version = 11 : i64} {
  func.func @_conv_act_kernel(%arg0: i32, %arg1: i32, %arg2: memref<512x27xbf16, #tpu.memory_space<vmem>>, %arg3: memref<27x128xbf16, #tpu.memory_space<vmem>>, %arg4: memref<1x128xf32, #tpu.memory_space<vmem>>, %arg5: memref<512x128xbf16, #tpu.memory_space<vmem>>) attributes {dimension_semantics = [#tpu.dimension_semantics<parallel>, #tpu.dimension_semantics<arbitrary>], iteration_bounds = array<i64: 1, 1>, scalar_prefetch = 0 : i64, scratch_operands = 0 : i64, tpu.core_type = #tpu.core_type<tc>, window_params = [{transform_indices = @transform_0, window_bounds = array<i64: 512, 27>}, {transform_indices = @transform_1, window_bounds = array<i64: 27, 128>}, {pipeline_mode = #tpu.pipeline_mode<synchronous>, transform_indices = @transform_2, window_bounds = array<i64: 1, 128>}, {transform_indices = @transform_3, window_bounds = array<i64: 512, 128>}]} {
    %c0 = arith.constant 0 : index
    %c0_0 = arith.constant 0 : index
    %0 = vector.load %arg2[%c0, %c0_0] : memref<512x27xbf16, #tpu.memory_space<vmem>>, vector<512x27xbf16>
    %c0_1 = arith.constant 0 : index
    %c0_2 = arith.constant 0 : index
    %1 = vector.load %arg3[%c0_1, %c0_2] : memref<27x128xbf16, #tpu.memory_space<vmem>>, vector<27x128xbf16>
    %cst = arith.constant dense<0.000000e+00> : vector<512x128xf32>
    %2 = tpu.matmul %0, %1, %cst {dimension_numbers = #tpu.dot_dimension_numbers<[1], [0], [0], [1], [0, 0, 1, 1], [], []>} : vector<512x27xbf16>, vector<27x128xbf16>, vector<512x128xf32> -> vector<512x128xf32>
    %c0_3 = arith.constant 0 : index
    %c0_4 = arith.constant 0 : index
    %3 = vector.load %arg4[%c0_3, %c0_4] : memref<1x128xf32, #tpu.memory_space<vmem>>, vector<1x128xf32>
    %4 = vector.broadcast %3 : vector<1x128xf32> to vector<512x128xf32>
    %5 = arith.addf %2, %4 : vector<512x128xf32>
    %cst_5 = arith.constant 0.000000e+00 : f32
    %6 = vector.broadcast %cst_5 : f32 to vector<512x128xf32>
    %7 = arith.cmpf oge, %5, %6 : vector<512x128xf32>
    %cst_6 = arith.constant 2.000000e-01 : f32
    %8 = vector.broadcast %cst_6 : f32 to vector<512x128xf32>
    %9 = arith.mulf %5, %8 : vector<512x128xf32>
    %10 = arith.select %7, %5, %9 : vector<512x128xi1>, vector<512x128xf32>
    %11 = arith.truncf %10 : vector<512x128xf32> to vector<512x128xbf16>
    %c0_7 = arith.constant 0 : index
    %c0_8 = arith.constant 0 : index
    %12 = vector.load %arg5[%c0_7, %c0_8] : memref<512x128xbf16, #tpu.memory_space<vmem>>, vector<512x128xbf16>
    tpu.vector_store %arg5[%c0_7, %c0_8], %11 {strides = array<i32>} : memref<512x128xbf16, #tpu.memory_space<vmem>>, vector<512x128xbf16>,
    return
  }
  func.func @transform_0(%arg0: i32, %arg1: i32) -> (i32, i32) {
    %c0_i32 = arith.constant 0 : i32
    return %arg0, %arg1 : i32, i32
  }
  func.func @transform_1(%arg0: i32, %arg1: i32) -> (i32, i32) {
    %c0_i32 = arith.constant 0 : i32
    %c0_i32_0 = arith.constant 0 : i32
    return %arg1, %c0_i32 : i32, i32
  }
  func.func @transform_2(%arg0: i32, %arg1: i32) -> (i32, i32) {
    %c0_i32 = arith.constant 0 : i32
    %c0_i32_0 = arith.constant 0 : i32
    %c0_i32_1 = arith.constant 0 : i32
    return %c0_i32, %c0_i32_0 : i32, i32
  }
  func.func @transform_3(%arg0: i32, %arg1: i32) -> (i32, i32) {
    %c0_i32 = arith.constant 0 : i32
    %c0_i32_0 = arith.constant 0 : i32
    return %arg0, %c0_i32 : i32, i32
  }
}

module attributes {stable_mosaic.version = 11 : i64} {
  func.func @_conv_stats_kernel(%arg0: i32, %arg1: i32, %arg2: memref<128x1152xbf16, #tpu.memory_space<vmem>>, %arg3: memref<1152x128xbf16, #tpu.memory_space<vmem>>, %arg4: memref<128x128xbf16, #tpu.memory_space<vmem>>, %arg5: memref<1x8x128xf32, #tpu.memory_space<vmem>>, %arg6: memref<1x8x128xf32, #tpu.memory_space<vmem>>) attributes {dimension_semantics = [#tpu.dimension_semantics<parallel>, #tpu.dimension_semantics<arbitrary>], iteration_bounds = array<i64: 1, 1>, scalar_prefetch = 0 : i64, scratch_operands = 0 : i64, tpu.core_type = #tpu.core_type<tc>, window_params = [{transform_indices = @transform_0, window_bounds = array<i64: 128, 1152>}, {transform_indices = @transform_1, window_bounds = array<i64: 1152, 128>}, {transform_indices = @transform_2, window_bounds = array<i64: 128, 128>}, {transform_indices = @transform_3, window_bounds = array<i64: 1, 8, 128>}, {transform_indices = @transform_4, window_bounds = array<i64: 1, 8, 128>}]} {
    %c0 = arith.constant 0 : index
    %c0_0 = arith.constant 0 : index
    %0 = vector.load %arg2[%c0, %c0_0] : memref<128x1152xbf16, #tpu.memory_space<vmem>>, vector<128x1152xbf16>
    %c0_1 = arith.constant 0 : index
    %c0_2 = arith.constant 0 : index
    %1 = vector.load %arg3[%c0_1, %c0_2] : memref<1152x128xbf16, #tpu.memory_space<vmem>>, vector<1152x128xbf16>
    %cst = arith.constant dense<0.000000e+00> : vector<128x128xf32>
    %2 = tpu.matmul %0, %1, %cst {dimension_numbers = #tpu.dot_dimension_numbers<[1], [0], [0], [1], [0, 0, 1, 1], [], []>} : vector<128x1152xbf16>, vector<1152x128xbf16>, vector<128x128xf32> -> vector<128x128xf32>
    %3 = arith.truncf %2 : vector<128x128xf32> to vector<128x128xbf16>
    %c0_3 = arith.constant 0 : index
    %c0_4 = arith.constant 0 : index
    %4 = vector.load %arg4[%c0_3, %c0_4] : memref<128x128xbf16, #tpu.memory_space<vmem>>, vector<128x128xbf16>
    tpu.vector_store %arg4[%c0_3, %c0_4], %3 {strides = array<i32>} : memref<128x128xbf16, #tpu.memory_space<vmem>>, vector<128x128xbf16>,
    %cst_5 = arith.constant dense<0.000000e+00> : vector<128xf32>
    %5 = vector.multi_reduction <add>, %2, %cst_5 [0] : vector<128x128xf32> to vector<128xf32>
    %6 = vector.shape_cast %5 : vector<128xf32> to vector<1x128xf32>
    %7 = arith.mulf %2, %2 : vector<128x128xf32>
    %cst_6 = arith.constant dense<0.000000e+00> : vector<128xf32>
    %8 = vector.multi_reduction <add>, %7, %cst_6 [0] : vector<128x128xf32> to vector<128xf32>
    %9 = vector.shape_cast %8 : vector<128xf32> to vector<1x128xf32>
    %10 = vector.shape_cast %6 : vector<1x128xf32> to vector<1x1x128xf32>
    %11 = vector.shape_cast %10 : vector<1x1x128xf32> to vector<1x1x128xf32>
    %12 = vector.broadcast %11 : vector<1x1x128xf32> to vector<1x8x128xf32>
    %c0_7 = arith.constant 0 : index
    %c0_8 = arith.constant 0 : index
    %c0_9 = arith.constant 0 : index
    %13 = vector.load %arg5[%c0_7, %c0_8, %c0_9] : memref<1x8x128xf32, #tpu.memory_space<vmem>>, vector<1x8x128xf32>
    tpu.vector_store %arg5[%c0_7, %c0_8, %c0_9], %12 {strides = array<i32>} : memref<1x8x128xf32, #tpu.memory_space<vmem>>, vector<1x8x128xf32>,
    %14 = vector.shape_cast %9 : vector<1x128xf32> to vector<1x1x128xf32>
    %15 = vector.shape_cast %14 : vector<1x1x128xf32> to vector<1x1x128xf32>
    %16 = vector.broadcast %15 : vector<1x1x128xf32> to vector<1x8x128xf32>
    %c0_10 = arith.constant 0 : index
    %c0_11 = arith.constant 0 : index
    %c0_12 = arith.constant 0 : index
    %17 = vector.load %arg6[%c0_10, %c0_11, %c0_12] : memref<1x8x128xf32, #tpu.memory_space<vmem>>, vector<1x8x128xf32>
    tpu.vector_store %arg6[%c0_10, %c0_11, %c0_12], %16 {strides = array<i32>} : memref<1x8x128xf32, #tpu.memory_space<vmem>>, vector<1x8x128xf32>,
    return
  }
  func.func @transform_0(%arg0: i32, %arg1: i32) -> (i32, i32) {
    %c0_i32 = arith.constant 0 : i32
    return %arg0, %arg1 : i32, i32
  }
  func.func @transform_1(%arg0: i32, %arg1: i32) -> (i32, i32) {
    %c0_i32 = arith.constant 0 : i32
    %c0_i32_0 = arith.constant 0 : i32
    return %arg1, %c0_i32 : i32, i32
  }
  func.func @transform_2(%arg0: i32, %arg1: i32) -> (i32, i32) {
    %c0_i32 = arith.constant 0 : i32
    %c0_i32_0 = arith.constant 0 : i32
    return %arg0, %c0_i32 : i32, i32
  }
  func.func @transform_3(%arg0: i32, %arg1: i32) -> (i32, i32, i32) {
    %c0_i32 = arith.constant 0 : i32
    %c0_i32_0 = arith.constant 0 : i32
    %c0_i32_1 = arith.constant 0 : i32
    return %arg0, %c0_i32, %c0_i32_0 : i32, i32, i32
  }
  func.func @transform_4(%arg0: i32, %arg1: i32) -> (i32, i32, i32) {
    %c0_i32 = arith.constant 0 : i32
    %c0_i32_0 = arith.constant 0 : i32
    %c0_i32_1 = arith.constant 0 : i32
    return %arg0, %c0_i32, %c0_i32_0 : i32, i32, i32
  }
}

module attributes {stable_mosaic.version = 11 : i64} {
  func.func @_bn_act_kernel(%arg0: i32, %arg1: memref<128x128xbf16, #tpu.memory_space<vmem>>, %arg2: memref<1x128xf32, #tpu.memory_space<vmem>>, %arg3: memref<1x128xf32, #tpu.memory_space<vmem>>, %arg4: memref<128x128xbf16, #tpu.memory_space<vmem>>) attributes {dimension_semantics = [#tpu.dimension_semantics<parallel>], iteration_bounds = array<i64: 1>, scalar_prefetch = 0 : i64, scratch_operands = 0 : i64, tpu.core_type = #tpu.core_type<tc>, window_params = [{transform_indices = @transform_0, window_bounds = array<i64: 128, 128>}, {pipeline_mode = #tpu.pipeline_mode<synchronous>, transform_indices = @transform_1, window_bounds = array<i64: 1, 128>}, {pipeline_mode = #tpu.pipeline_mode<synchronous>, transform_indices = @transform_2, window_bounds = array<i64: 1, 128>}, {transform_indices = @transform_3, window_bounds = array<i64: 128, 128>}]} {
    %c0 = arith.constant 0 : index
    %c0_0 = arith.constant 0 : index
    %0 = vector.load %arg1[%c0, %c0_0] : memref<128x128xbf16, #tpu.memory_space<vmem>>, vector<128x128xbf16>
    %1 = arith.extf %0 : vector<128x128xbf16> to vector<128x128xf32>
    %c0_1 = arith.constant 0 : index
    %c0_2 = arith.constant 0 : index
    %2 = vector.load %arg2[%c0_1, %c0_2] : memref<1x128xf32, #tpu.memory_space<vmem>>, vector<1x128xf32>
    %3 = vector.broadcast %2 : vector<1x128xf32> to vector<128x128xf32>
    %4 = arith.mulf %1, %3 : vector<128x128xf32>
    %c0_3 = arith.constant 0 : index
    %c0_4 = arith.constant 0 : index
    %5 = vector.load %arg3[%c0_3, %c0_4] : memref<1x128xf32, #tpu.memory_space<vmem>>, vector<1x128xf32>
    %6 = vector.broadcast %5 : vector<1x128xf32> to vector<128x128xf32>
    %7 = arith.addf %4, %6 : vector<128x128xf32>
    %cst = arith.constant 0.000000e+00 : f32
    %8 = vector.broadcast %cst : f32 to vector<128x128xf32>
    %9 = arith.cmpf oge, %7, %8 : vector<128x128xf32>
    %cst_5 = arith.constant 2.000000e-01 : f32
    %10 = vector.broadcast %cst_5 : f32 to vector<128x128xf32>
    %11 = arith.mulf %7, %10 : vector<128x128xf32>
    %12 = arith.select %9, %7, %11 : vector<128x128xi1>, vector<128x128xf32>
    %13 = arith.truncf %12 : vector<128x128xf32> to vector<128x128xbf16>
    %c0_6 = arith.constant 0 : index
    %c0_7 = arith.constant 0 : index
    %14 = vector.load %arg4[%c0_6, %c0_7] : memref<128x128xbf16, #tpu.memory_space<vmem>>, vector<128x128xbf16>
    tpu.vector_store %arg4[%c0_6, %c0_7], %13 {strides = array<i32>} : memref<128x128xbf16, #tpu.memory_space<vmem>>, vector<128x128xbf16>,
    return
  }
  func.func @transform_0(%arg0: i32) -> (i32, i32) {
    %c0_i32 = arith.constant 0 : i32
    %c0_i32_0 = arith.constant 0 : i32
    return %arg0, %c0_i32 : i32, i32
  }
  func.func @transform_1(%arg0: i32) -> (i32, i32) {
    %c0_i32 = arith.constant 0 : i32
    %c0_i32_0 = arith.constant 0 : i32
    %c0_i32_1 = arith.constant 0 : i32
    return %c0_i32, %c0_i32_0 : i32, i32
  }
  func.func @transform_2(%arg0: i32) -> (i32, i32) {
    %c0_i32 = arith.constant 0 : i32
    %c0_i32_0 = arith.constant 0 : i32
    %c0_i32_1 = arith.constant 0 : i32
    return %c0_i32, %c0_i32_0 : i32, i32
  }
  func.func @transform_3(%arg0: i32) -> (i32, i32) {
    %c0_i32 = arith.constant 0 : i32
    %c0_i32_0 = arith.constant 0 : i32
    return %arg0, %c0_i32 : i32, i32
  }
}

module attributes {stable_mosaic.version = 11 : i64} {
  func.func @_bn_act_kernel(%arg0: i32, %arg1: memref<32x128xbf16, #tpu.memory_space<vmem>>, %arg2: memref<1x128xf32, #tpu.memory_space<vmem>>, %arg3: memref<1x128xf32, #tpu.memory_space<vmem>>, %arg4: memref<32x128xbf16, #tpu.memory_space<vmem>>) attributes {dimension_semantics = [#tpu.dimension_semantics<parallel>], iteration_bounds = array<i64: 1>, scalar_prefetch = 0 : i64, scratch_operands = 0 : i64, tpu.core_type = #tpu.core_type<tc>, window_params = [{transform_indices = @transform_0, window_bounds = array<i64: 32, 128>}, {pipeline_mode = #tpu.pipeline_mode<synchronous>, transform_indices = @transform_1, window_bounds = array<i64: 1, 128>}, {pipeline_mode = #tpu.pipeline_mode<synchronous>, transform_indices = @transform_2, window_bounds = array<i64: 1, 128>}, {transform_indices = @transform_3, window_bounds = array<i64: 32, 128>}]} {
    %c0 = arith.constant 0 : index
    %c0_0 = arith.constant 0 : index
    %0 = vector.load %arg1[%c0, %c0_0] : memref<32x128xbf16, #tpu.memory_space<vmem>>, vector<32x128xbf16>
    %1 = arith.extf %0 : vector<32x128xbf16> to vector<32x128xf32>
    %c0_1 = arith.constant 0 : index
    %c0_2 = arith.constant 0 : index
    %2 = vector.load %arg2[%c0_1, %c0_2] : memref<1x128xf32, #tpu.memory_space<vmem>>, vector<1x128xf32>
    %3 = vector.broadcast %2 : vector<1x128xf32> to vector<32x128xf32>
    %4 = arith.mulf %1, %3 : vector<32x128xf32>
    %c0_3 = arith.constant 0 : index
    %c0_4 = arith.constant 0 : index
    %5 = vector.load %arg3[%c0_3, %c0_4] : memref<1x128xf32, #tpu.memory_space<vmem>>, vector<1x128xf32>
    %6 = vector.broadcast %5 : vector<1x128xf32> to vector<32x128xf32>
    %7 = arith.addf %4, %6 : vector<32x128xf32>
    %cst = arith.constant 0.000000e+00 : f32
    %8 = vector.broadcast %cst : f32 to vector<32x128xf32>
    %9 = arith.cmpf oge, %7, %8 : vector<32x128xf32>
    %cst_5 = arith.constant 2.000000e-01 : f32
    %10 = vector.broadcast %cst_5 : f32 to vector<32x128xf32>
    %11 = arith.mulf %7, %10 : vector<32x128xf32>
    %12 = arith.select %9, %7, %11 : vector<32x128xi1>, vector<32x128xf32>
    %13 = arith.truncf %12 : vector<32x128xf32> to vector<32x128xbf16>
    %c0_6 = arith.constant 0 : index
    %c0_7 = arith.constant 0 : index
    %14 = vector.load %arg4[%c0_6, %c0_7] : memref<32x128xbf16, #tpu.memory_space<vmem>>, vector<32x128xbf16>
    tpu.vector_store %arg4[%c0_6, %c0_7], %13 {strides = array<i32>} : memref<32x128xbf16, #tpu.memory_space<vmem>>, vector<32x128xbf16>,
    return
  }
  func.func @transform_0(%arg0: i32) -> (i32, i32) {
    %c0_i32 = arith.constant 0 : i32
    %c0_i32_0 = arith.constant 0 : i32
    return %arg0, %c0_i32 : i32, i32
  }
  func.func @transform_1(%arg0: i32) -> (i32, i32) {
    %c0_i32 = arith.constant 0 : i32
    %c0_i32_0 = arith.constant 0 : i32
    %c0_i32_1 = arith.constant 0 : i32
    return %c0_i32, %c0_i32_0 : i32, i32
  }
  func.func @transform_2(%arg0: i32) -> (i32, i32) {
    %c0_i32 = arith.constant 0 : i32
    %c0_i32_0 = arith.constant 0 : i32
    %c0_i32_1 = arith.constant 0 : i32
    return %c0_i32, %c0_i32_0 : i32, i32
  }
  func.func @transform_3(%arg0: i32) -> (i32, i32) {
    %c0_i32 = arith.constant 0 : i32
    %c0_i32_0 = arith.constant 0 : i32
    return %arg0, %c0_i32 : i32, i32
  }
}

module attributes {stable_mosaic.version = 11 : i64} {
  func.func @_conv_stats_kernel(%arg0: i32, %arg1: i32, %arg2: memref<32x1152xbf16, #tpu.memory_space<vmem>>, %arg3: memref<1152x128xbf16, #tpu.memory_space<vmem>>, %arg4: memref<32x128xbf16, #tpu.memory_space<vmem>>, %arg5: memref<1x8x128xf32, #tpu.memory_space<vmem>>, %arg6: memref<1x8x128xf32, #tpu.memory_space<vmem>>) attributes {dimension_semantics = [#tpu.dimension_semantics<parallel>, #tpu.dimension_semantics<arbitrary>], iteration_bounds = array<i64: 1, 1>, scalar_prefetch = 0 : i64, scratch_operands = 0 : i64, tpu.core_type = #tpu.core_type<tc>, window_params = [{transform_indices = @transform_0, window_bounds = array<i64: 32, 1152>}, {transform_indices = @transform_1, window_bounds = array<i64: 1152, 128>}, {transform_indices = @transform_2, window_bounds = array<i64: 32, 128>}, {transform_indices = @transform_3, window_bounds = array<i64: 1, 8, 128>}, {transform_indices = @transform_4, window_bounds = array<i64: 1, 8, 128>}]} {
    %c0 = arith.constant 0 : index
    %c0_0 = arith.constant 0 : index
    %0 = vector.load %arg2[%c0, %c0_0] : memref<32x1152xbf16, #tpu.memory_space<vmem>>, vector<32x1152xbf16>
    %c0_1 = arith.constant 0 : index
    %c0_2 = arith.constant 0 : index
    %1 = vector.load %arg3[%c0_1, %c0_2] : memref<1152x128xbf16, #tpu.memory_space<vmem>>, vector<1152x128xbf16>
    %cst = arith.constant dense<0.000000e+00> : vector<32x128xf32>
    %2 = tpu.matmul %0, %1, %cst {dimension_numbers = #tpu.dot_dimension_numbers<[1], [0], [0], [1], [0, 0, 1, 1], [], []>} : vector<32x1152xbf16>, vector<1152x128xbf16>, vector<32x128xf32> -> vector<32x128xf32>
    %3 = arith.truncf %2 : vector<32x128xf32> to vector<32x128xbf16>
    %c0_3 = arith.constant 0 : index
    %c0_4 = arith.constant 0 : index
    %4 = vector.load %arg4[%c0_3, %c0_4] : memref<32x128xbf16, #tpu.memory_space<vmem>>, vector<32x128xbf16>
    tpu.vector_store %arg4[%c0_3, %c0_4], %3 {strides = array<i32>} : memref<32x128xbf16, #tpu.memory_space<vmem>>, vector<32x128xbf16>,
    %cst_5 = arith.constant dense<0.000000e+00> : vector<128xf32>
    %5 = vector.multi_reduction <add>, %2, %cst_5 [0] : vector<32x128xf32> to vector<128xf32>
    %6 = vector.shape_cast %5 : vector<128xf32> to vector<1x128xf32>
    %7 = arith.mulf %2, %2 : vector<32x128xf32>
    %cst_6 = arith.constant dense<0.000000e+00> : vector<128xf32>
    %8 = vector.multi_reduction <add>, %7, %cst_6 [0] : vector<32x128xf32> to vector<128xf32>
    %9 = vector.shape_cast %8 : vector<128xf32> to vector<1x128xf32>
    %10 = vector.shape_cast %6 : vector<1x128xf32> to vector<1x1x128xf32>
    %11 = vector.shape_cast %10 : vector<1x1x128xf32> to vector<1x1x128xf32>
    %12 = vector.broadcast %11 : vector<1x1x128xf32> to vector<1x8x128xf32>
    %c0_7 = arith.constant 0 : index
    %c0_8 = arith.constant 0 : index
    %c0_9 = arith.constant 0 : index
    %13 = vector.load %arg5[%c0_7, %c0_8, %c0_9] : memref<1x8x128xf32, #tpu.memory_space<vmem>>, vector<1x8x128xf32>
    tpu.vector_store %arg5[%c0_7, %c0_8, %c0_9], %12 {strides = array<i32>} : memref<1x8x128xf32, #tpu.memory_space<vmem>>, vector<1x8x128xf32>,
    %14 = vector.shape_cast %9 : vector<1x128xf32> to vector<1x1x128xf32>
    %15 = vector.shape_cast %14 : vector<1x1x128xf32> to vector<1x1x128xf32>
    %16 = vector.broadcast %15 : vector<1x1x128xf32> to vector<1x8x128xf32>
    %c0_10 = arith.constant 0 : index
    %c0_11 = arith.constant 0 : index
    %c0_12 = arith.constant 0 : index
    %17 = vector.load %arg6[%c0_10, %c0_11, %c0_12] : memref<1x8x128xf32, #tpu.memory_space<vmem>>, vector<1x8x128xf32>
    tpu.vector_store %arg6[%c0_10, %c0_11, %c0_12], %16 {strides = array<i32>} : memref<1x8x128xf32, #tpu.memory_space<vmem>>, vector<1x8x128xf32>,
    return
  }
  func.func @transform_0(%arg0: i32, %arg1: i32) -> (i32, i32) {
    %c0_i32 = arith.constant 0 : i32
    return %arg0, %arg1 : i32, i32
  }
  func.func @transform_1(%arg0: i32, %arg1: i32) -> (i32, i32) {
    %c0_i32 = arith.constant 0 : i32
    %c0_i32_0 = arith.constant 0 : i32
    return %arg1, %c0_i32 : i32, i32
  }
  func.func @transform_2(%arg0: i32, %arg1: i32) -> (i32, i32) {
    %c0_i32 = arith.constant 0 : i32
    %c0_i32_0 = arith.constant 0 : i32
    return %arg0, %c0_i32 : i32, i32
  }
  func.func @transform_3(%arg0: i32, %arg1: i32) -> (i32, i32, i32) {
    %c0_i32 = arith.constant 0 : i32
    %c0_i32_0 = arith.constant 0 : i32
    %c0_i32_1 = arith.constant 0 : i32
    return %arg0, %c0_i32, %c0_i32_0 : i32, i32, i32
  }
  func.func @transform_4(%arg0: i32, %arg1: i32) -> (i32, i32, i32) {
    %c0_i32 = arith.constant 0 : i32
    %c0_i32_0 = arith.constant 0 : i32
    %c0_i32_1 = arith.constant 0 : i32
    return %arg0, %c0_i32, %c0_i32_0 : i32, i32, i32
  }
}

module attributes {stable_mosaic.version = 11 : i64} {
  func.func @_conv_stats_kernel(%arg0: i32, %arg1: i32, %arg2: memref<32x1152xbf16, #tpu.memory_space<vmem>>, %arg3: memref<1152x256xbf16, #tpu.memory_space<vmem>>, %arg4: memref<32x256xbf16, #tpu.memory_space<vmem>>, %arg5: memref<1x8x256xf32, #tpu.memory_space<vmem>>, %arg6: memref<1x8x256xf32, #tpu.memory_space<vmem>>) attributes {dimension_semantics = [#tpu.dimension_semantics<parallel>, #tpu.dimension_semantics<arbitrary>], iteration_bounds = array<i64: 1, 1>, scalar_prefetch = 0 : i64, scratch_operands = 0 : i64, tpu.core_type = #tpu.core_type<tc>, window_params = [{transform_indices = @transform_0, window_bounds = array<i64: 32, 1152>}, {transform_indices = @transform_1, window_bounds = array<i64: 1152, 256>}, {transform_indices = @transform_2, window_bounds = array<i64: 32, 256>}, {transform_indices = @transform_3, window_bounds = array<i64: 1, 8, 256>}, {transform_indices = @transform_4, window_bounds = array<i64: 1, 8, 256>}]} {
    %c0 = arith.constant 0 : index
    %c0_0 = arith.constant 0 : index
    %0 = vector.load %arg2[%c0, %c0_0] : memref<32x1152xbf16, #tpu.memory_space<vmem>>, vector<32x1152xbf16>
    %c0_1 = arith.constant 0 : index
    %c0_2 = arith.constant 0 : index
    %1 = vector.load %arg3[%c0_1, %c0_2] : memref<1152x256xbf16, #tpu.memory_space<vmem>>, vector<1152x256xbf16>
    %cst = arith.constant dense<0.000000e+00> : vector<32x256xf32>
    %2 = tpu.matmul %0, %1, %cst {dimension_numbers = #tpu.dot_dimension_numbers<[1], [0], [0], [1], [0, 0, 1, 1], [], []>} : vector<32x1152xbf16>, vector<1152x256xbf16>, vector<32x256xf32> -> vector<32x256xf32>
    %3 = arith.truncf %2 : vector<32x256xf32> to vector<32x256xbf16>
    %c0_3 = arith.constant 0 : index
    %c0_4 = arith.constant 0 : index
    %4 = vector.load %arg4[%c0_3, %c0_4] : memref<32x256xbf16, #tpu.memory_space<vmem>>, vector<32x256xbf16>
    tpu.vector_store %arg4[%c0_3, %c0_4], %3 {strides = array<i32>} : memref<32x256xbf16, #tpu.memory_space<vmem>>, vector<32x256xbf16>,
    %cst_5 = arith.constant dense<0.000000e+00> : vector<256xf32>
    %5 = vector.multi_reduction <add>, %2, %cst_5 [0] : vector<32x256xf32> to vector<256xf32>
    %6 = vector.shape_cast %5 : vector<256xf32> to vector<1x256xf32>
    %7 = arith.mulf %2, %2 : vector<32x256xf32>
    %cst_6 = arith.constant dense<0.000000e+00> : vector<256xf32>
    %8 = vector.multi_reduction <add>, %7, %cst_6 [0] : vector<32x256xf32> to vector<256xf32>
    %9 = vector.shape_cast %8 : vector<256xf32> to vector<1x256xf32>
    %10 = vector.shape_cast %6 : vector<1x256xf32> to vector<1x1x256xf32>
    %11 = vector.shape_cast %10 : vector<1x1x256xf32> to vector<1x1x256xf32>
    %12 = vector.broadcast %11 : vector<1x1x256xf32> to vector<1x8x256xf32>
    %c0_7 = arith.constant 0 : index
    %c0_8 = arith.constant 0 : index
    %c0_9 = arith.constant 0 : index
    %13 = vector.load %arg5[%c0_7, %c0_8, %c0_9] : memref<1x8x256xf32, #tpu.memory_space<vmem>>, vector<1x8x256xf32>
    tpu.vector_store %arg5[%c0_7, %c0_8, %c0_9], %12 {strides = array<i32>} : memref<1x8x256xf32, #tpu.memory_space<vmem>>, vector<1x8x256xf32>,
    %14 = vector.shape_cast %9 : vector<1x256xf32> to vector<1x1x256xf32>
    %15 = vector.shape_cast %14 : vector<1x1x256xf32> to vector<1x1x256xf32>
    %16 = vector.broadcast %15 : vector<1x1x256xf32> to vector<1x8x256xf32>
    %c0_10 = arith.constant 0 : index
    %c0_11 = arith.constant 0 : index
    %c0_12 = arith.constant 0 : index
    %17 = vector.load %arg6[%c0_10, %c0_11, %c0_12] : memref<1x8x256xf32, #tpu.memory_space<vmem>>, vector<1x8x256xf32>
    tpu.vector_store %arg6[%c0_10, %c0_11, %c0_12], %16 {strides = array<i32>} : memref<1x8x256xf32, #tpu.memory_space<vmem>>, vector<1x8x256xf32>,
    return
  }
  func.func @transform_0(%arg0: i32, %arg1: i32) -> (i32, i32) {
    %c0_i32 = arith.constant 0 : i32
    return %arg0, %arg1 : i32, i32
  }
  func.func @transform_1(%arg0: i32, %arg1: i32) -> (i32, i32) {
    %c0_i32 = arith.constant 0 : i32
    %c0_i32_0 = arith.constant 0 : i32
    return %arg1, %c0_i32 : i32, i32
  }
  func.func @transform_2(%arg0: i32, %arg1: i32) -> (i32, i32) {
    %c0_i32 = arith.constant 0 : i32
    %c0_i32_0 = arith.constant 0 : i32
    return %arg0, %c0_i32 : i32, i32
  }
  func.func @transform_3(%arg0: i32, %arg1: i32) -> (i32, i32, i32) {
    %c0_i32 = arith.constant 0 : i32
    %c0_i32_0 = arith.constant 0 : i32
    %c0_i32_1 = arith.constant 0 : i32
    return %arg0, %c0_i32, %c0_i32_0 : i32, i32, i32
  }
  func.func @transform_4(%arg0: i32, %arg1: i32) -> (i32, i32, i32) {
    %c0_i32 = arith.constant 0 : i32
    %c0_i32_0 = arith.constant 0 : i32
    %c0_i32_1 = arith.constant 0 : i32
    return %arg0, %c0_i32, %c0_i32_0 : i32, i32, i32
  }
}

module attributes {stable_mosaic.version = 11 : i64} {
  func.func @_bn_act_kernel(%arg0: i32, %arg1: memref<32x256xbf16, #tpu.memory_space<vmem>>, %arg2: memref<1x256xf32, #tpu.memory_space<vmem>>, %arg3: memref<1x256xf32, #tpu.memory_space<vmem>>, %arg4: memref<32x256xbf16, #tpu.memory_space<vmem>>) attributes {dimension_semantics = [#tpu.dimension_semantics<parallel>], iteration_bounds = array<i64: 1>, scalar_prefetch = 0 : i64, scratch_operands = 0 : i64, tpu.core_type = #tpu.core_type<tc>, window_params = [{transform_indices = @transform_0, window_bounds = array<i64: 32, 256>}, {pipeline_mode = #tpu.pipeline_mode<synchronous>, transform_indices = @transform_1, window_bounds = array<i64: 1, 256>}, {pipeline_mode = #tpu.pipeline_mode<synchronous>, transform_indices = @transform_2, window_bounds = array<i64: 1, 256>}, {transform_indices = @transform_3, window_bounds = array<i64: 32, 256>}]} {
    %c0 = arith.constant 0 : index
    %c0_0 = arith.constant 0 : index
    %0 = vector.load %arg1[%c0, %c0_0] : memref<32x256xbf16, #tpu.memory_space<vmem>>, vector<32x256xbf16>
    %1 = arith.extf %0 : vector<32x256xbf16> to vector<32x256xf32>
    %c0_1 = arith.constant 0 : index
    %c0_2 = arith.constant 0 : index
    %2 = vector.load %arg2[%c0_1, %c0_2] : memref<1x256xf32, #tpu.memory_space<vmem>>, vector<1x256xf32>
    %3 = vector.broadcast %2 : vector<1x256xf32> to vector<32x256xf32>
    %4 = arith.mulf %1, %3 : vector<32x256xf32>
    %c0_3 = arith.constant 0 : index
    %c0_4 = arith.constant 0 : index
    %5 = vector.load %arg3[%c0_3, %c0_4] : memref<1x256xf32, #tpu.memory_space<vmem>>, vector<1x256xf32>
    %6 = vector.broadcast %5 : vector<1x256xf32> to vector<32x256xf32>
    %7 = arith.addf %4, %6 : vector<32x256xf32>
    %cst = arith.constant 0.000000e+00 : f32
    %8 = vector.broadcast %cst : f32 to vector<32x256xf32>
    %9 = arith.cmpf oge, %7, %8 : vector<32x256xf32>
    %cst_5 = arith.constant 2.000000e-01 : f32
    %10 = vector.broadcast %cst_5 : f32 to vector<32x256xf32>
    %11 = arith.mulf %7, %10 : vector<32x256xf32>
    %12 = arith.select %9, %7, %11 : vector<32x256xi1>, vector<32x256xf32>
    %13 = arith.truncf %12 : vector<32x256xf32> to vector<32x256xbf16>
    %c0_6 = arith.constant 0 : index
    %c0_7 = arith.constant 0 : index
    %14 = vector.load %arg4[%c0_6, %c0_7] : memref<32x256xbf16, #tpu.memory_space<vmem>>, vector<32x256xbf16>
    tpu.vector_store %arg4[%c0_6, %c0_7], %13 {strides = array<i32>} : memref<32x256xbf16, #tpu.memory_space<vmem>>, vector<32x256xbf16>,
    return
  }
  func.func @transform_0(%arg0: i32) -> (i32, i32) {
    %c0_i32 = arith.constant 0 : i32
    %c0_i32_0 = arith.constant 0 : i32
    return %arg0, %c0_i32 : i32, i32
  }
  func.func @transform_1(%arg0: i32) -> (i32, i32) {
    %c0_i32 = arith.constant 0 : i32
    %c0_i32_0 = arith.constant 0 : i32
    %c0_i32_1 = arith.constant 0 : i32
    return %c0_i32, %c0_i32_0 : i32, i32
  }
  func.func @transform_2(%arg0: i32) -> (i32, i32) {
    %c0_i32 = arith.constant 0 : i32
    %c0_i32_0 = arith.constant 0 : i32
    %c0_i32_1 = arith.constant 0 : i32
    return %c0_i32, %c0_i32_0 : i32, i32
  }
  func.func @transform_3(%arg0: i32) -> (i32, i32) {
    %c0_i32 = arith.constant 0 : i32
    %c0_i32_0 = arith.constant 0 : i32
    return %arg0, %c0_i32 : i32, i32
  }
}

module attributes {stable_mosaic.version = 11 : i64} {
  func.func @_conv_stats_kernel(%arg0: i32, %arg1: i32, %arg2: memref<8x1152xbf16, #tpu.memory_space<vmem>>, %arg3: memref<1152x256xbf16, #tpu.memory_space<vmem>>, %arg4: memref<8x256xbf16, #tpu.memory_space<vmem>>, %arg5: memref<1x8x256xf32, #tpu.memory_space<vmem>>, %arg6: memref<1x8x256xf32, #tpu.memory_space<vmem>>, %arg7: memref<8x256xf32, #tpu.memory_space<vmem>>) attributes {dimension_semantics = [#tpu.dimension_semantics<parallel>, #tpu.dimension_semantics<arbitrary>], iteration_bounds = array<i64: 1, 2>, scalar_prefetch = 0 : i64, scratch_operands = 1 : i64, tpu.core_type = #tpu.core_type<tc>, window_params = [{transform_indices = @transform_0, window_bounds = array<i64: 8, 1152>}, {transform_indices = @transform_1, window_bounds = array<i64: 1152, 256>}, {transform_indices = @transform_2, window_bounds = array<i64: 8, 256>}, {transform_indices = @transform_3, window_bounds = array<i64: 1, 8, 256>}, {transform_indices = @transform_4, window_bounds = array<i64: 1, 8, 256>}]} {
    %c0_i32 = arith.constant 0 : i32
    %0 = arith.cmpi eq, %arg1, %c0_i32 : i32
    %1 = arith.extui %0 : i1 to i32
    %c0_i32_0 = arith.constant 0 : i32
    %2 = arith.cmpi ne, %1, %c0_i32_0 : i32
    scf.if %2 {
      %cst_9 = arith.constant 0.000000e+00 : f32
      %12 = vector.broadcast %cst_9 : f32 to vector<8x256xf32>
      %c0_10 = arith.constant 0 : index
      %c0_11 = arith.constant 0 : index
      %13 = vector.load %arg7[%c0_10, %c0_11] : memref<8x256xf32, #tpu.memory_space<vmem>>, vector<8x256xf32>
      tpu.vector_store %arg7[%c0_10, %c0_11], %12 {strides = array<i32>} : memref<8x256xf32, #tpu.memory_space<vmem>>, vector<8x256xf32>,
    } else {
    }
    %c0 = arith.constant 0 : index
    %c0_1 = arith.constant 0 : index
    %3 = vector.load %arg7[%c0, %c0_1] : memref<8x256xf32, #tpu.memory_space<vmem>>, vector<8x256xf32>
    %c0_2 = arith.constant 0 : index
    %c0_3 = arith.constant 0 : index
    %4 = vector.load %arg2[%c0_2, %c0_3] : memref<8x1152xbf16, #tpu.memory_space<vmem>>, vector<8x1152xbf16>
    %c0_4 = arith.constant 0 : index
    %c0_5 = arith.constant 0 : index
    %5 = vector.load %arg3[%c0_4, %c0_5] : memref<1152x256xbf16, #tpu.memory_space<vmem>>, vector<1152x256xbf16>
    %cst = arith.constant dense<0.000000e+00> : vector<8x256xf32>
    %6 = tpu.matmul %4, %5, %cst {dimension_numbers = #tpu.dot_dimension_numbers<[1], [0], [0], [1], [0, 0, 1, 1], [], []>} : vector<8x1152xbf16>, vector<1152x256xbf16>, vector<8x256xf32> -> vector<8x256xf32>
    %7 = arith.addf %3, %6 : vector<8x256xf32>
    %c0_6 = arith.constant 0 : index
    %c0_7 = arith.constant 0 : index
    %8 = vector.load %arg7[%c0_6, %c0_7] : memref<8x256xf32, #tpu.memory_space<vmem>>, vector<8x256xf32>
    tpu.vector_store %arg7[%c0_6, %c0_7], %7 {strides = array<i32>} : memref<8x256xf32, #tpu.memory_space<vmem>>, vector<8x256xf32>,
    %c1_i32 = arith.constant 1 : i32
    %9 = arith.cmpi eq, %arg1, %c1_i32 : i32
    %10 = arith.extui %9 : i1 to i32
    %c0_i32_8 = arith.constant 0 : i32
    %11 = arith.cmpi ne, %10, %c0_i32_8 : i32
    scf.if %11 {
      %c0_9 = arith.constant 0 : index
      %c0_10 = arith.constant 0 : index
      %12 = vector.load %arg7[%c0_9, %c0_10] : memref<8x256xf32, #tpu.memory_space<vmem>>, vector<8x256xf32>
      %13 = arith.truncf %12 : vector<8x256xf32> to vector<8x256xbf16>
      %c0_11 = arith.constant 0 : index
      %c0_12 = arith.constant 0 : index
      %14 = vector.load %arg4[%c0_11, %c0_12] : memref<8x256xbf16, #tpu.memory_space<vmem>>, vector<8x256xbf16>
      tpu.vector_store %arg4[%c0_11, %c0_12], %13 {strides = array<i32>} : memref<8x256xbf16, #tpu.memory_space<vmem>>, vector<8x256xbf16>,
      %cst_13 = arith.constant dense<0.000000e+00> : vector<256xf32>
      %15 = vector.multi_reduction <add>, %12, %cst_13 [0] : vector<8x256xf32> to vector<256xf32>
      %16 = vector.shape_cast %15 : vector<256xf32> to vector<1x256xf32>
      %17 = arith.mulf %12, %12 : vector<8x256xf32>
      %cst_14 = arith.constant dense<0.000000e+00> : vector<256xf32>
      %18 = vector.multi_reduction <add>, %17, %cst_14 [0] : vector<8x256xf32> to vector<256xf32>
      %19 = vector.shape_cast %18 : vector<256xf32> to vector<1x256xf32>
      %20 = vector.shape_cast %16 : vector<1x256xf32> to vector<1x1x256xf32>
      %21 = vector.shape_cast %20 : vector<1x1x256xf32> to vector<1x1x256xf32>
      %22 = vector.broadcast %21 : vector<1x1x256xf32> to vector<1x8x256xf32>
      %c0_15 = arith.constant 0 : index
      %c0_16 = arith.constant 0 : index
      %c0_17 = arith.constant 0 : index
      %23 = vector.load %arg5[%c0_15, %c0_16, %c0_17] : memref<1x8x256xf32, #tpu.memory_space<vmem>>, vector<1x8x256xf32>
      tpu.vector_store %arg5[%c0_15, %c0_16, %c0_17], %22 {strides = array<i32>} : memref<1x8x256xf32, #tpu.memory_space<vmem>>, vector<1x8x256xf32>,
      %24 = vector.shape_cast %19 : vector<1x256xf32> to vector<1x1x256xf32>
      %25 = vector.shape_cast %24 : vector<1x1x256xf32> to vector<1x1x256xf32>
      %26 = vector.broadcast %25 : vector<1x1x256xf32> to vector<1x8x256xf32>
      %c0_18 = arith.constant 0 : index
      %c0_19 = arith.constant 0 : index
      %c0_20 = arith.constant 0 : index
      %27 = vector.load %arg6[%c0_18, %c0_19, %c0_20] : memref<1x8x256xf32, #tpu.memory_space<vmem>>, vector<1x8x256xf32>
      tpu.vector_store %arg6[%c0_18, %c0_19, %c0_20], %26 {strides = array<i32>} : memref<1x8x256xf32, #tpu.memory_space<vmem>>, vector<1x8x256xf32>,
    } else {
    }
    return
  }
  func.func @transform_0(%arg0: i32, %arg1: i32) -> (i32, i32) {
    %c0_i32 = arith.constant 0 : i32
    return %arg0, %arg1 : i32, i32
  }
  func.func @transform_1(%arg0: i32, %arg1: i32) -> (i32, i32) {
    %c0_i32 = arith.constant 0 : i32
    %c0_i32_0 = arith.constant 0 : i32
    return %arg1, %c0_i32 : i32, i32
  }
  func.func @transform_2(%arg0: i32, %arg1: i32) -> (i32, i32) {
    %c0_i32 = arith.constant 0 : i32
    %c0_i32_0 = arith.constant 0 : i32
    return %arg0, %c0_i32 : i32, i32
  }
  func.func @transform_3(%arg0: i32, %arg1: i32) -> (i32, i32, i32) {
    %c0_i32 = arith.constant 0 : i32
    %c0_i32_0 = arith.constant 0 : i32
    %c0_i32_1 = arith.constant 0 : i32
    return %arg0, %c0_i32, %c0_i32_0 : i32, i32, i32
  }
  func.func @transform_4(%arg0: i32, %arg1: i32) -> (i32, i32, i32) {
    %c0_i32 = arith.constant 0 : i32
    %c0_i32_0 = arith.constant 0 : i32
    %c0_i32_1 = arith.constant 0 : i32
    return %arg0, %c0_i32, %c0_i32_0 : i32, i32, i32
  }
}

module attributes {stable_mosaic.version = 11 : i64} {
  func.func @_bn_act_kernel(%arg0: i32, %arg1: memref<8x256xbf16, #tpu.memory_space<vmem>>, %arg2: memref<1x256xf32, #tpu.memory_space<vmem>>, %arg3: memref<1x256xf32, #tpu.memory_space<vmem>>, %arg4: memref<8x256xbf16, #tpu.memory_space<vmem>>) attributes {dimension_semantics = [#tpu.dimension_semantics<parallel>], iteration_bounds = array<i64: 1>, scalar_prefetch = 0 : i64, scratch_operands = 0 : i64, tpu.core_type = #tpu.core_type<tc>, window_params = [{transform_indices = @transform_0, window_bounds = array<i64: 8, 256>}, {pipeline_mode = #tpu.pipeline_mode<synchronous>, transform_indices = @transform_1, window_bounds = array<i64: 1, 256>}, {pipeline_mode = #tpu.pipeline_mode<synchronous>, transform_indices = @transform_2, window_bounds = array<i64: 1, 256>}, {transform_indices = @transform_3, window_bounds = array<i64: 8, 256>}]} {
    %c0 = arith.constant 0 : index
    %c0_0 = arith.constant 0 : index
    %0 = vector.load %arg1[%c0, %c0_0] : memref<8x256xbf16, #tpu.memory_space<vmem>>, vector<8x256xbf16>
    %1 = arith.extf %0 : vector<8x256xbf16> to vector<8x256xf32>
    %c0_1 = arith.constant 0 : index
    %c0_2 = arith.constant 0 : index
    %2 = vector.load %arg2[%c0_1, %c0_2] : memref<1x256xf32, #tpu.memory_space<vmem>>, vector<1x256xf32>
    %3 = vector.broadcast %2 : vector<1x256xf32> to vector<8x256xf32>
    %4 = arith.mulf %1, %3 : vector<8x256xf32>
    %c0_3 = arith.constant 0 : index
    %c0_4 = arith.constant 0 : index
    %5 = vector.load %arg3[%c0_3, %c0_4] : memref<1x256xf32, #tpu.memory_space<vmem>>, vector<1x256xf32>
    %6 = vector.broadcast %5 : vector<1x256xf32> to vector<8x256xf32>
    %7 = arith.addf %4, %6 : vector<8x256xf32>
    %cst = arith.constant 0.000000e+00 : f32
    %8 = vector.broadcast %cst : f32 to vector<8x256xf32>
    %9 = arith.cmpf oge, %7, %8 : vector<8x256xf32>
    %cst_5 = arith.constant 2.000000e-01 : f32
    %10 = vector.broadcast %cst_5 : f32 to vector<8x256xf32>
    %11 = arith.mulf %7, %10 : vector<8x256xf32>
    %12 = arith.select %9, %7, %11 : vector<8x256xi1>, vector<8x256xf32>
    %13 = arith.truncf %12 : vector<8x256xf32> to vector<8x256xbf16>
    %c0_6 = arith.constant 0 : index
    %c0_7 = arith.constant 0 : index
    %14 = vector.load %arg4[%c0_6, %c0_7] : memref<8x256xbf16, #tpu.memory_space<vmem>>, vector<8x256xbf16>
    tpu.vector_store %arg4[%c0_6, %c0_7], %13 {strides = array<i32>} : memref<8x256xbf16, #tpu.memory_space<vmem>>, vector<8x256xbf16>,
    return
  }
  func.func @transform_0(%arg0: i32) -> (i32, i32) {
    %c0_i32 = arith.constant 0 : i32
    %c0_i32_0 = arith.constant 0 : i32
    return %arg0, %c0_i32 : i32, i32
  }
  func.func @transform_1(%arg0: i32) -> (i32, i32) {
    %c0_i32 = arith.constant 0 : i32
    %c0_i32_0 = arith.constant 0 : i32
    %c0_i32_1 = arith.constant 0 : i32
    return %c0_i32, %c0_i32_0 : i32, i32
  }
  func.func @transform_2(%arg0: i32) -> (i32, i32) {
    %c0_i32 = arith.constant 0 : i32
    %c0_i32_0 = arith.constant 0 : i32
    %c0_i32_1 = arith.constant 0 : i32
    return %c0_i32, %c0_i32_0 : i32, i32
  }
  func.func @transform_3(%arg0: i32) -> (i32, i32) {
    %c0_i32 = arith.constant 0 : i32
    %c0_i32_0 = arith.constant 0 : i32
    return %arg0, %c0_i32 : i32, i32
  }
}

module attributes {stable_mosaic.version = 11 : i64} {
  func.func @_conv_stats_kernel(%arg0: i32, %arg1: i32, %arg2: memref<8x1152xbf16, #tpu.memory_space<vmem>>, %arg3: memref<1152x512xbf16, #tpu.memory_space<vmem>>, %arg4: memref<8x512xbf16, #tpu.memory_space<vmem>>, %arg5: memref<1x8x512xf32, #tpu.memory_space<vmem>>, %arg6: memref<1x8x512xf32, #tpu.memory_space<vmem>>, %arg7: memref<8x512xf32, #tpu.memory_space<vmem>>) attributes {dimension_semantics = [#tpu.dimension_semantics<parallel>, #tpu.dimension_semantics<arbitrary>], iteration_bounds = array<i64: 1, 2>, scalar_prefetch = 0 : i64, scratch_operands = 1 : i64, tpu.core_type = #tpu.core_type<tc>, window_params = [{transform_indices = @transform_0, window_bounds = array<i64: 8, 1152>}, {transform_indices = @transform_1, window_bounds = array<i64: 1152, 512>}, {transform_indices = @transform_2, window_bounds = array<i64: 8, 512>}, {transform_indices = @transform_3, window_bounds = array<i64: 1, 8, 512>}, {transform_indices = @transform_4, window_bounds = array<i64: 1, 8, 512>}]} {
    %c0_i32 = arith.constant 0 : i32
    %0 = arith.cmpi eq, %arg1, %c0_i32 : i32
    %1 = arith.extui %0 : i1 to i32
    %c0_i32_0 = arith.constant 0 : i32
    %2 = arith.cmpi ne, %1, %c0_i32_0 : i32
    scf.if %2 {
      %cst_9 = arith.constant 0.000000e+00 : f32
      %12 = vector.broadcast %cst_9 : f32 to vector<8x512xf32>
      %c0_10 = arith.constant 0 : index
      %c0_11 = arith.constant 0 : index
      %13 = vector.load %arg7[%c0_10, %c0_11] : memref<8x512xf32, #tpu.memory_space<vmem>>, vector<8x512xf32>
      tpu.vector_store %arg7[%c0_10, %c0_11], %12 {strides = array<i32>} : memref<8x512xf32, #tpu.memory_space<vmem>>, vector<8x512xf32>,
    } else {
    }
    %c0 = arith.constant 0 : index
    %c0_1 = arith.constant 0 : index
    %3 = vector.load %arg7[%c0, %c0_1] : memref<8x512xf32, #tpu.memory_space<vmem>>, vector<8x512xf32>
    %c0_2 = arith.constant 0 : index
    %c0_3 = arith.constant 0 : index
    %4 = vector.load %arg2[%c0_2, %c0_3] : memref<8x1152xbf16, #tpu.memory_space<vmem>>, vector<8x1152xbf16>
    %c0_4 = arith.constant 0 : index
    %c0_5 = arith.constant 0 : index
    %5 = vector.load %arg3[%c0_4, %c0_5] : memref<1152x512xbf16, #tpu.memory_space<vmem>>, vector<1152x512xbf16>
    %cst = arith.constant dense<0.000000e+00> : vector<8x512xf32>
    %6 = tpu.matmul %4, %5, %cst {dimension_numbers = #tpu.dot_dimension_numbers<[1], [0], [0], [1], [0, 0, 1, 1], [], []>} : vector<8x1152xbf16>, vector<1152x512xbf16>, vector<8x512xf32> -> vector<8x512xf32>
    %7 = arith.addf %3, %6 : vector<8x512xf32>
    %c0_6 = arith.constant 0 : index
    %c0_7 = arith.constant 0 : index
    %8 = vector.load %arg7[%c0_6, %c0_7] : memref<8x512xf32, #tpu.memory_space<vmem>>, vector<8x512xf32>
    tpu.vector_store %arg7[%c0_6, %c0_7], %7 {strides = array<i32>} : memref<8x512xf32, #tpu.memory_space<vmem>>, vector<8x512xf32>,
    %c1_i32 = arith.constant 1 : i32
    %9 = arith.cmpi eq, %arg1, %c1_i32 : i32
    %10 = arith.extui %9 : i1 to i32
    %c0_i32_8 = arith.constant 0 : i32
    %11 = arith.cmpi ne, %10, %c0_i32_8 : i32
    scf.if %11 {
      %c0_9 = arith.constant 0 : index
      %c0_10 = arith.constant 0 : index
      %12 = vector.load %arg7[%c0_9, %c0_10] : memref<8x512xf32, #tpu.memory_space<vmem>>, vector<8x512xf32>
      %13 = arith.truncf %12 : vector<8x512xf32> to vector<8x512xbf16>
      %c0_11 = arith.constant 0 : index
      %c0_12 = arith.constant 0 : index
      %14 = vector.load %arg4[%c0_11, %c0_12] : memref<8x512xbf16, #tpu.memory_space<vmem>>, vector<8x512xbf16>
      tpu.vector_store %arg4[%c0_11, %c0_12], %13 {strides = array<i32>} : memref<8x512xbf16, #tpu.memory_space<vmem>>, vector<8x512xbf16>,
      %cst_13 = arith.constant dense<0.000000e+00> : vector<512xf32>
      %15 = vector.multi_reduction <add>, %12, %cst_13 [0] : vector<8x512xf32> to vector<512xf32>
      %16 = vector.shape_cast %15 : vector<512xf32> to vector<1x512xf32>
      %17 = arith.mulf %12, %12 : vector<8x512xf32>
      %cst_14 = arith.constant dense<0.000000e+00> : vector<512xf32>
      %18 = vector.multi_reduction <add>, %17, %cst_14 [0] : vector<8x512xf32> to vector<512xf32>
      %19 = vector.shape_cast %18 : vector<512xf32> to vector<1x512xf32>
      %20 = vector.shape_cast %16 : vector<1x512xf32> to vector<1x1x512xf32>
      %21 = vector.shape_cast %20 : vector<1x1x512xf32> to vector<1x1x512xf32>
      %22 = vector.broadcast %21 : vector<1x1x512xf32> to vector<1x8x512xf32>
      %c0_15 = arith.constant 0 : index
      %c0_16 = arith.constant 0 : index
      %c0_17 = arith.constant 0 : index
      %23 = vector.load %arg5[%c0_15, %c0_16, %c0_17] : memref<1x8x512xf32, #tpu.memory_space<vmem>>, vector<1x8x512xf32>
      tpu.vector_store %arg5[%c0_15, %c0_16, %c0_17], %22 {strides = array<i32>} : memref<1x8x512xf32, #tpu.memory_space<vmem>>, vector<1x8x512xf32>,
      %24 = vector.shape_cast %19 : vector<1x512xf32> to vector<1x1x512xf32>
      %25 = vector.shape_cast %24 : vector<1x1x512xf32> to vector<1x1x512xf32>
      %26 = vector.broadcast %25 : vector<1x1x512xf32> to vector<1x8x512xf32>
      %c0_18 = arith.constant 0 : index
      %c0_19 = arith.constant 0 : index
      %c0_20 = arith.constant 0 : index
      %27 = vector.load %arg6[%c0_18, %c0_19, %c0_20] : memref<1x8x512xf32, #tpu.memory_space<vmem>>, vector<1x8x512xf32>
      tpu.vector_store %arg6[%c0_18, %c0_19, %c0_20], %26 {strides = array<i32>} : memref<1x8x512xf32, #tpu.memory_space<vmem>>, vector<1x8x512xf32>,
    } else {
    }
    return
  }
  func.func @transform_0(%arg0: i32, %arg1: i32) -> (i32, i32) {
    %c0_i32 = arith.constant 0 : i32
    return %arg0, %arg1 : i32, i32
  }
  func.func @transform_1(%arg0: i32, %arg1: i32) -> (i32, i32) {
    %c0_i32 = arith.constant 0 : i32
    %c0_i32_0 = arith.constant 0 : i32
    return %arg1, %c0_i32 : i32, i32
  }
  func.func @transform_2(%arg0: i32, %arg1: i32) -> (i32, i32) {
    %c0_i32 = arith.constant 0 : i32
    %c0_i32_0 = arith.constant 0 : i32
    return %arg0, %c0_i32 : i32, i32
  }
  func.func @transform_3(%arg0: i32, %arg1: i32) -> (i32, i32, i32) {
    %c0_i32 = arith.constant 0 : i32
    %c0_i32_0 = arith.constant 0 : i32
    %c0_i32_1 = arith.constant 0 : i32
    return %arg0, %c0_i32, %c0_i32_0 : i32, i32, i32
  }
  func.func @transform_4(%arg0: i32, %arg1: i32) -> (i32, i32, i32) {
    %c0_i32 = arith.constant 0 : i32
    %c0_i32_0 = arith.constant 0 : i32
    %c0_i32_1 = arith.constant 0 : i32
    return %arg0, %c0_i32, %c0_i32_0 : i32, i32, i32
  }
}

module attributes {stable_mosaic.version = 11 : i64} {
  func.func @_bn_act_kernel(%arg0: i32, %arg1: memref<8x512xbf16, #tpu.memory_space<vmem>>, %arg2: memref<1x512xf32, #tpu.memory_space<vmem>>, %arg3: memref<1x512xf32, #tpu.memory_space<vmem>>, %arg4: memref<8x512xbf16, #tpu.memory_space<vmem>>) attributes {dimension_semantics = [#tpu.dimension_semantics<parallel>], iteration_bounds = array<i64: 1>, scalar_prefetch = 0 : i64, scratch_operands = 0 : i64, tpu.core_type = #tpu.core_type<tc>, window_params = [{transform_indices = @transform_0, window_bounds = array<i64: 8, 512>}, {pipeline_mode = #tpu.pipeline_mode<synchronous>, transform_indices = @transform_1, window_bounds = array<i64: 1, 512>}, {pipeline_mode = #tpu.pipeline_mode<synchronous>, transform_indices = @transform_2, window_bounds = array<i64: 1, 512>}, {transform_indices = @transform_3, window_bounds = array<i64: 8, 512>}]} {
    %c0 = arith.constant 0 : index
    %c0_0 = arith.constant 0 : index
    %0 = vector.load %arg1[%c0, %c0_0] : memref<8x512xbf16, #tpu.memory_space<vmem>>, vector<8x512xbf16>
    %1 = arith.extf %0 : vector<8x512xbf16> to vector<8x512xf32>
    %c0_1 = arith.constant 0 : index
    %c0_2 = arith.constant 0 : index
    %2 = vector.load %arg2[%c0_1, %c0_2] : memref<1x512xf32, #tpu.memory_space<vmem>>, vector<1x512xf32>
    %3 = vector.broadcast %2 : vector<1x512xf32> to vector<8x512xf32>
    %4 = arith.mulf %1, %3 : vector<8x512xf32>
    %c0_3 = arith.constant 0 : index
    %c0_4 = arith.constant 0 : index
    %5 = vector.load %arg3[%c0_3, %c0_4] : memref<1x512xf32, #tpu.memory_space<vmem>>, vector<1x512xf32>
    %6 = vector.broadcast %5 : vector<1x512xf32> to vector<8x512xf32>
    %7 = arith.addf %4, %6 : vector<8x512xf32>
    %cst = arith.constant 0.000000e+00 : f32
    %8 = vector.broadcast %cst : f32 to vector<8x512xf32>
    %9 = arith.cmpf oge, %7, %8 : vector<8x512xf32>
    %cst_5 = arith.constant 2.000000e-01 : f32
    %10 = vector.broadcast %cst_5 : f32 to vector<8x512xf32>
    %11 = arith.mulf %7, %10 : vector<8x512xf32>
    %12 = arith.select %9, %7, %11 : vector<8x512xi1>, vector<8x512xf32>
    %13 = arith.truncf %12 : vector<8x512xf32> to vector<8x512xbf16>
    %c0_6 = arith.constant 0 : index
    %c0_7 = arith.constant 0 : index
    %14 = vector.load %arg4[%c0_6, %c0_7] : memref<8x512xbf16, #tpu.memory_space<vmem>>, vector<8x512xbf16>
    tpu.vector_store %arg4[%c0_6, %c0_7], %13 {strides = array<i32>} : memref<8x512xbf16, #tpu.memory_space<vmem>>, vector<8x512xbf16>,
    return
  }
  func.func @transform_0(%arg0: i32) -> (i32, i32) {
    %c0_i32 = arith.constant 0 : i32
    %c0_i32_0 = arith.constant 0 : i32
    return %arg0, %c0_i32 : i32, i32
  }
  func.func @transform_1(%arg0: i32) -> (i32, i32) {
    %c0_i32 = arith.constant 0 : i32
    %c0_i32_0 = arith.constant 0 : i32
    %c0_i32_1 = arith.constant 0 : i32
    return %c0_i32, %c0_i32_0 : i32, i32
  }
  func.func @transform_2(%arg0: i32) -> (i32, i32) {
    %c0_i32 = arith.constant 0 : i32
    %c0_i32_0 = arith.constant 0 : i32
    %c0_i32_1 = arith.constant 0 : i32
    return %c0_i32, %c0_i32_0 : i32, i32
  }
  func.func @transform_3(%arg0: i32) -> (i32, i32) {
    %c0_i32 = arith.constant 0 : i32
    %c0_i32_0 = arith.constant 0 : i32
    return %arg0, %c0_i32 : i32, i32
  }
}

module attributes {stable_mosaic.version = 11 : i64} {
  func.func @_bn_act_kernel(%arg0: i32, %arg1: memref<2x512xbf16, #tpu.memory_space<vmem>>, %arg2: memref<1x512xf32, #tpu.memory_space<vmem>>, %arg3: memref<1x512xf32, #tpu.memory_space<vmem>>, %arg4: memref<2x512xbf16, #tpu.memory_space<vmem>>) attributes {dimension_semantics = [#tpu.dimension_semantics<parallel>], iteration_bounds = array<i64: 1>, scalar_prefetch = 0 : i64, scratch_operands = 0 : i64, tpu.core_type = #tpu.core_type<tc>, window_params = [{transform_indices = @transform_0, window_bounds = array<i64: 2, 512>}, {pipeline_mode = #tpu.pipeline_mode<synchronous>, transform_indices = @transform_1, window_bounds = array<i64: 1, 512>}, {pipeline_mode = #tpu.pipeline_mode<synchronous>, transform_indices = @transform_2, window_bounds = array<i64: 1, 512>}, {transform_indices = @transform_3, window_bounds = array<i64: 2, 512>}]} {
    %c0 = arith.constant 0 : index
    %c0_0 = arith.constant 0 : index
    %0 = vector.load %arg1[%c0, %c0_0] : memref<2x512xbf16, #tpu.memory_space<vmem>>, vector<2x512xbf16>
    %1 = arith.extf %0 : vector<2x512xbf16> to vector<2x512xf32>
    %c0_1 = arith.constant 0 : index
    %c0_2 = arith.constant 0 : index
    %2 = vector.load %arg2[%c0_1, %c0_2] : memref<1x512xf32, #tpu.memory_space<vmem>>, vector<1x512xf32>
    %3 = vector.broadcast %2 : vector<1x512xf32> to vector<2x512xf32>
    %4 = arith.mulf %1, %3 : vector<2x512xf32>
    %c0_3 = arith.constant 0 : index
    %c0_4 = arith.constant 0 : index
    %5 = vector.load %arg3[%c0_3, %c0_4] : memref<1x512xf32, #tpu.memory_space<vmem>>, vector<1x512xf32>
    %6 = vector.broadcast %5 : vector<1x512xf32> to vector<2x512xf32>
    %7 = arith.addf %4, %6 : vector<2x512xf32>
    %cst = arith.constant 0.000000e+00 : f32
    %8 = vector.broadcast %cst : f32 to vector<2x512xf32>
    %9 = arith.cmpf oge, %7, %8 : vector<2x512xf32>
    %cst_5 = arith.constant 2.000000e-01 : f32
    %10 = vector.broadcast %cst_5 : f32 to vector<2x512xf32>
    %11 = arith.mulf %7, %10 : vector<2x512xf32>
    %12 = arith.select %9, %7, %11 : vector<2x512xi1>, vector<2x512xf32>
    %13 = arith.truncf %12 : vector<2x512xf32> to vector<2x512xbf16>
    %c0_6 = arith.constant 0 : index
    %c0_7 = arith.constant 0 : index
    %14 = vector.load %arg4[%c0_6, %c0_7] : memref<2x512xbf16, #tpu.memory_space<vmem>>, vector<2x512xbf16>
    tpu.vector_store %arg4[%c0_6, %c0_7], %13 {strides = array<i32>} : memref<2x512xbf16, #tpu.memory_space<vmem>>, vector<2x512xbf16>,
    return
  }
  func.func @transform_0(%arg0: i32) -> (i32, i32) {
    %c0_i32 = arith.constant 0 : i32
    %c0_i32_0 = arith.constant 0 : i32
    return %arg0, %c0_i32 : i32, i32
  }
  func.func @transform_1(%arg0: i32) -> (i32, i32) {
    %c0_i32 = arith.constant 0 : i32
    %c0_i32_0 = arith.constant 0 : i32
    %c0_i32_1 = arith.constant 0 : i32
    return %c0_i32, %c0_i32_0 : i32, i32
  }
  func.func @transform_2(%arg0: i32) -> (i32, i32) {
    %c0_i32 = arith.constant 0 : i32
    %c0_i32_0 = arith.constant 0 : i32
    %c0_i32_1 = arith.constant 0 : i32
    return %c0_i32, %c0_i32_0 : i32, i32
  }
  func.func @transform_3(%arg0: i32) -> (i32, i32) {
    %c0_i32 = arith.constant 0 : i32
    %c0_i32_0 = arith.constant 0 : i32
    return %arg0, %c0_i32 : i32, i32
  }
}

module attributes {stable_mosaic.version = 11 : i64} {
  func.func @_conv_stats_kernel(%arg0: i32, %arg1: i32, %arg2: memref<2x1152xbf16, #tpu.memory_space<vmem>>, %arg3: memref<1152x512xbf16, #tpu.memory_space<vmem>>, %arg4: memref<2x512xbf16, #tpu.memory_space<vmem>>, %arg5: memref<1x8x512xf32, #tpu.memory_space<vmem>>, %arg6: memref<1x8x512xf32, #tpu.memory_space<vmem>>, %arg7: memref<2x512xf32, #tpu.memory_space<vmem>>) attributes {dimension_semantics = [#tpu.dimension_semantics<parallel>, #tpu.dimension_semantics<arbitrary>], iteration_bounds = array<i64: 1, 4>, scalar_prefetch = 0 : i64, scratch_operands = 1 : i64, tpu.core_type = #tpu.core_type<tc>, window_params = [{transform_indices = @transform_0, window_bounds = array<i64: 2, 1152>}, {transform_indices = @transform_1, window_bounds = array<i64: 1152, 512>}, {transform_indices = @transform_2, window_bounds = array<i64: 2, 512>}, {transform_indices = @transform_3, window_bounds = array<i64: 1, 8, 512>}, {transform_indices = @transform_4, window_bounds = array<i64: 1, 8, 512>}]} {
    %c0_i32 = arith.constant 0 : i32
    %0 = arith.cmpi eq, %arg1, %c0_i32 : i32
    %1 = arith.extui %0 : i1 to i32
    %c0_i32_0 = arith.constant 0 : i32
    %2 = arith.cmpi ne, %1, %c0_i32_0 : i32
    scf.if %2 {
      %cst_9 = arith.constant 0.000000e+00 : f32
      %12 = vector.broadcast %cst_9 : f32 to vector<2x512xf32>
      %c0_10 = arith.constant 0 : index
      %c0_11 = arith.constant 0 : index
      %13 = vector.load %arg7[%c0_10, %c0_11] : memref<2x512xf32, #tpu.memory_space<vmem>>, vector<2x512xf32>
      tpu.vector_store %arg7[%c0_10, %c0_11], %12 {strides = array<i32>} : memref<2x512xf32, #tpu.memory_space<vmem>>, vector<2x512xf32>,
    } else {
    }
    %c0 = arith.constant 0 : index
    %c0_1 = arith.constant 0 : index
    %3 = vector.load %arg7[%c0, %c0_1] : memref<2x512xf32, #tpu.memory_space<vmem>>, vector<2x512xf32>
    %c0_2 = arith.constant 0 : index
    %c0_3 = arith.constant 0 : index
    %4 = vector.load %arg2[%c0_2, %c0_3] : memref<2x1152xbf16, #tpu.memory_space<vmem>>, vector<2x1152xbf16>
    %c0_4 = arith.constant 0 : index
    %c0_5 = arith.constant 0 : index
    %5 = vector.load %arg3[%c0_4, %c0_5] : memref<1152x512xbf16, #tpu.memory_space<vmem>>, vector<1152x512xbf16>
    %cst = arith.constant dense<0.000000e+00> : vector<2x512xf32>
    %6 = tpu.matmul %4, %5, %cst {dimension_numbers = #tpu.dot_dimension_numbers<[1], [0], [0], [1], [0, 0, 1, 1], [], []>} : vector<2x1152xbf16>, vector<1152x512xbf16>, vector<2x512xf32> -> vector<2x512xf32>
    %7 = arith.addf %3, %6 : vector<2x512xf32>
    %c0_6 = arith.constant 0 : index
    %c0_7 = arith.constant 0 : index
    %8 = vector.load %arg7[%c0_6, %c0_7] : memref<2x512xf32, #tpu.memory_space<vmem>>, vector<2x512xf32>
    tpu.vector_store %arg7[%c0_6, %c0_7], %7 {strides = array<i32>} : memref<2x512xf32, #tpu.memory_space<vmem>>, vector<2x512xf32>,
    %c3_i32 = arith.constant 3 : i32
    %9 = arith.cmpi eq, %arg1, %c3_i32 : i32
    %10 = arith.extui %9 : i1 to i32
    %c0_i32_8 = arith.constant 0 : i32
    %11 = arith.cmpi ne, %10, %c0_i32_8 : i32
    scf.if %11 {
      %c0_9 = arith.constant 0 : index
      %c0_10 = arith.constant 0 : index
      %12 = vector.load %arg7[%c0_9, %c0_10] : memref<2x512xf32, #tpu.memory_space<vmem>>, vector<2x512xf32>
      %13 = arith.truncf %12 : vector<2x512xf32> to vector<2x512xbf16>
      %c0_11 = arith.constant 0 : index
      %c0_12 = arith.constant 0 : index
      %14 = vector.load %arg4[%c0_11, %c0_12] : memref<2x512xbf16, #tpu.memory_space<vmem>>, vector<2x512xbf16>
      tpu.vector_store %arg4[%c0_11, %c0_12], %13 {strides = array<i32>} : memref<2x512xbf16, #tpu.memory_space<vmem>>, vector<2x512xbf16>,
      %cst_13 = arith.constant dense<0.000000e+00> : vector<512xf32>
      %15 = vector.multi_reduction <add>, %12, %cst_13 [0] : vector<2x512xf32> to vector<512xf32>
      %16 = vector.shape_cast %15 : vector<512xf32> to vector<1x512xf32>
      %17 = arith.mulf %12, %12 : vector<2x512xf32>
      %cst_14 = arith.constant dense<0.000000e+00> : vector<512xf32>
      %18 = vector.multi_reduction <add>, %17, %cst_14 [0] : vector<2x512xf32> to vector<512xf32>
      %19 = vector.shape_cast %18 : vector<512xf32> to vector<1x512xf32>
      %20 = vector.shape_cast %16 : vector<1x512xf32> to vector<1x1x512xf32>
      %21 = vector.shape_cast %20 : vector<1x1x512xf32> to vector<1x1x512xf32>
      %22 = vector.broadcast %21 : vector<1x1x512xf32> to vector<1x8x512xf32>
      %c0_15 = arith.constant 0 : index
      %c0_16 = arith.constant 0 : index
      %c0_17 = arith.constant 0 : index
      %23 = vector.load %arg5[%c0_15, %c0_16, %c0_17] : memref<1x8x512xf32, #tpu.memory_space<vmem>>, vector<1x8x512xf32>
      tpu.vector_store %arg5[%c0_15, %c0_16, %c0_17], %22 {strides = array<i32>} : memref<1x8x512xf32, #tpu.memory_space<vmem>>, vector<1x8x512xf32>,
      %24 = vector.shape_cast %19 : vector<1x512xf32> to vector<1x1x512xf32>
      %25 = vector.shape_cast %24 : vector<1x1x512xf32> to vector<1x1x512xf32>
      %26 = vector.broadcast %25 : vector<1x1x512xf32> to vector<1x8x512xf32>
      %c0_18 = arith.constant 0 : index
      %c0_19 = arith.constant 0 : index
      %c0_20 = arith.constant 0 : index
      %27 = vector.load %arg6[%c0_18, %c0_19, %c0_20] : memref<1x8x512xf32, #tpu.memory_space<vmem>>, vector<1x8x512xf32>
      tpu.vector_store %arg6[%c0_18, %c0_19, %c0_20], %26 {strides = array<i32>} : memref<1x8x512xf32, #tpu.memory_space<vmem>>, vector<1x8x512xf32>,
    } else {
    }
    return
  }
  func.func @transform_0(%arg0: i32, %arg1: i32) -> (i32, i32) {
    %c0_i32 = arith.constant 0 : i32
    return %arg0, %arg1 : i32, i32
  }
  func.func @transform_1(%arg0: i32, %arg1: i32) -> (i32, i32) {
    %c0_i32 = arith.constant 0 : i32
    %c0_i32_0 = arith.constant 0 : i32
    return %arg1, %c0_i32 : i32, i32
  }
  func.func @transform_2(%arg0: i32, %arg1: i32) -> (i32, i32) {
    %c0_i32 = arith.constant 0 : i32
    %c0_i32_0 = arith.constant 0 : i32
    return %arg0, %c0_i32 : i32, i32
  }
  func.func @transform_3(%arg0: i32, %arg1: i32) -> (i32, i32, i32) {
    %c0_i32 = arith.constant 0 : i32
    %c0_i32_0 = arith.constant 0 : i32
    %c0_i32_1 = arith.constant 0 : i32
    return %arg0, %c0_i32, %c0_i32_0 : i32, i32, i32
  }
  func.func @transform_4(%arg0: i32, %arg1: i32) -> (i32, i32, i32) {
    %c0_i32 = arith.constant 0 : i32
    %c0_i32_0 = arith.constant 0 : i32
    %c0_i32_1 = arith.constant 0 : i32
    return %arg0, %c0_i32, %c0_i32_0 : i32, i32, i32
  }
}

module attributes {stable_mosaic.version = 11 : i64} {
  func.func @_tail_kernel(%arg0: memref<2x1x512xbf16, #tpu.memory_space<vmem>>, %arg1: memref<512x1024xf32, #tpu.memory_space<vmem>>, %arg2: memref<1x1024xf32, #tpu.memory_space<vmem>>, %arg3: memref<1x1024xf32, #tpu.memory_space<vmem>>, %arg4: memref<1x1xf32, #tpu.memory_space<vmem>>, %arg5: memref<2x1xf32, #tpu.memory_space<vmem>>) attributes {dimension_semantics = [], scalar_prefetch = 0 : i64, scratch_operands = 0 : i64, tpu.core_type = #tpu.core_type<tc>} {
    %c0 = arith.constant 0 : index
    %c0_0 = arith.constant 0 : index
    %c0_1 = arith.constant 0 : index
    %0 = vector.load %arg0[%c0, %c0_0, %c0_1] : memref<2x1x512xbf16, #tpu.memory_space<vmem>>, vector<2x1x512xbf16>
    %1 = arith.extf %0 : vector<2x1x512xbf16> to vector<2x1x512xf32>
    %cst = arith.constant dense<0.000000e+00> : vector<2x512xf32>
    %2 = vector.multi_reduction <add>, %1, %cst [1] : vector<2x1x512xf32> to vector<2x512xf32>
    %cst_2 = arith.constant 1.000000e+00 : f32
    %3 = vector.broadcast %cst_2 : f32 to vector<2x512xf32>
    %4 = arith.divf %2, %3 : vector<2x512xf32>
    %c0_3 = arith.constant 0 : index
    %c0_4 = arith.constant 0 : index
    %5 = vector.load %arg1[%c0_3, %c0_4] : memref<512x1024xf32, #tpu.memory_space<vmem>>, vector<512x1024xf32>
    %cst_5 = arith.constant dense<0.000000e+00> : vector<2x1024xf32>
    %6 = tpu.matmul %4, %5, %cst_5 {dimension_numbers = #tpu.dot_dimension_numbers<[1], [0], [0], [1], [0, 0, 1, 1], [], []>} : vector<2x512xf32>, vector<512x1024xf32>, vector<2x1024xf32> -> vector<2x1024xf32>
    %c0_6 = arith.constant 0 : index
    %c0_7 = arith.constant 0 : index
    %7 = vector.load %arg2[%c0_6, %c0_7] : memref<1x1024xf32, #tpu.memory_space<vmem>>, vector<1x1024xf32>
    %8 = vector.broadcast %7 : vector<1x1024xf32> to vector<2x1024xf32>
    %9 = arith.addf %6, %8 : vector<2x1024xf32>
    %cst_8 = arith.constant 0.000000e+00 : f32
    %10 = vector.broadcast %cst_8 : f32 to vector<2x1024xf32>
    %11 = arith.cmpf oge, %9, %10 : vector<2x1024xf32>
    %cst_9 = arith.constant 2.000000e-01 : f32
    %12 = vector.broadcast %cst_9 : f32 to vector<2x1024xf32>
    %13 = arith.mulf %9, %12 : vector<2x1024xf32>
    %14 = arith.select %11, %9, %13 : vector<2x1024xi1>, vector<2x1024xf32>
    %c0_10 = arith.constant 0 : index
    %c0_11 = arith.constant 0 : index
    %15 = vector.load %arg3[%c0_10, %c0_11] : memref<1x1024xf32, #tpu.memory_space<vmem>>, vector<1x1024xf32>
    %16 = vector.broadcast %15 : vector<1x1024xf32> to vector<2x1024xf32>
    %17 = arith.mulf %14, %16 : vector<2x1024xf32>
    %cst_12 = arith.constant dense<0.000000e+00> : vector<2xf32>
    %18 = vector.multi_reduction <add>, %17, %cst_12 [1] : vector<2x1024xf32> to vector<2xf32>
    %19 = vector.shape_cast %18 : vector<2xf32> to vector<2x1xf32>
    %c0_13 = arith.constant 0 : index
    %c0_14 = arith.constant 0 : index
    %20 = vector.load %arg4[%c0_13, %c0_14] : memref<1x1xf32, #tpu.memory_space<vmem>>, vector<1x1xf32>
    %21 = vector.broadcast %20 : vector<1x1xf32> to vector<2x1xf32>
    %22 = arith.addf %19, %21 : vector<2x1xf32>
    %23 = arith.negf %22 : vector<2x1xf32>
    %24 = math.exp %23 : vector<2x1xf32>
    %cst_15 = arith.constant 1.000000e+00 : f32
    %25 = vector.broadcast %cst_15 : f32 to vector<2x1xf32>
    %26 = arith.addf %25, %24 : vector<2x1xf32>
    %27 = arith.divf %25, %26 : vector<2x1xf32>
    %c0_16 = arith.constant 0 : index
    %c0_17 = arith.constant 0 : index
    %28 = vector.load %arg5[%c0_16, %c0_17] : memref<2x1xf32, #tpu.memory_space<vmem>>, vector<2x1xf32>
    tpu.vector_store %arg5[%c0_16, %c0_17], %27 {strides = array<i32>} : memref<2x1xf32, #tpu.memory_space<vmem>>, vector<2x1xf32>,
    return
  }
}

</mosaic_0001>

<bundles_post_ra>
// kernel: discriminator_forward.16
= control target key start
LH: loop header
LB: loop body
LE: loop exit
PB: predicated region body
PF: predicated region fallthrough
CT: control target
= control target key end

     0   :  { %vm358_vm0 = vcmask 1044480   ;;  %vm359_vm1 = vcmask 1045504   ;;  %v1697_v1 = vmov 65535   ;;  %vm261_vm2 = vcmask 220160   ;;  %s2020_s1 = inlined_call_operand.vmem [shape: bf16[27,128], index: 1, kind: input, shape index: {}]   ;;  %s2021_s0 = inlined_call_operand.vmem [shape: bf16[512,27], index: 0, kind: input, shape index: {}]   ;;  %s2022_s2 = inlined_call_operand.vmem [shape: f32[1,128], index: 2, kind: input, shape index: {}]   ;;  %s2023_s3 = inlined_call_operand.vmem [shape: bf16[512,128], index: 3, kind: output, shape index: {}]  }
   0x1   :  { %v1663_v0 = vld [vmem:[%s2020_s1 + $0x8] sm:$0x3f]   ;;  %v360_v2 = vsel %vm358_vm0, 4294967295, %v1697_v1  ;;  %v1665_v4 = vld [vmem:[%s2021_s0] sm:$0xff]   ;;  %v1669_v10 = vld [vmem:[%s2021_s0 + $0x10] sm:$0xff]  }
   0x2   :  { %v361_v3 = vsel %vm359_vm1, %v360_v2, 0  ;;  %v1664_v6 = vld [vmem:[%s2020_s1] sm:$0xff]   ;;  %1594 = vmatprep.mubr.msk.bf16.mxu0 %vm261_vm2, %v1665_v4  ;;  %v1667_v8 = vld [vmem:[%s2021_s0 + $0x8] sm:$0xff]   ;;  %v1670_v11 = vld [vmem:[%s2021_s0 + $0x90] sm:$0xff]  }
   0x3   :  { %v363_v5 = vand.u32 %v1663_v0, %v361_v3  ;;  %v1666_v7 = vld [vmem:[%s2021_s0 + $0x80] sm:$0xff]   ;;  %v1668_v9 = vld [vmem:[%s2021_s0 + $0x88] sm:$0xff]   ;;  %v1671_v12 = vld [vmem:[%s2021_s0 + $0x18] sm:$0xff]  }
   0x4   :  { %1626 = vmatprep.mubr.msk.bf16.mxu1 %vm261_vm2, %v1666_v7  ;;  %v1672_v13 = vld [vmem:[%s2021_s0 + $0x98] sm:$0xff]   ;;  %v1673_v14 = vld [vmem:[%s2021_s0 + $0x20] sm:$0xff]   ;;  %v1675_v16 = vld [vmem:[%s2021_s0 + $0x28] sm:$0xff]  }
   0x5   :  { %1590 = vmatprep.subr.bf16.mxu0 %v363_v5  ;;  %1658 = vmatprep.subr.bf16.mxu1 %v363_v5  ;;  %v1674_v15 = vld [vmem:[%s2021_s0 + $0xa0] sm:$0xff]   ;;  %v1676_v17 = vld [vmem:[%s2021_s0 + $0xa8] sm:$0xff]   ;;  %v1677_v18 = vld [vmem:[%s2021_s0 + $0x30] sm:$0xff]  }
   0x6   :  { %1591 = vmatpush3.bf16.msra.mxu0 %v363_v5  ;;  %1660 = vmatpush3.bf16.msra.mxu1 %v363_v5  ;;  %v1678_v19 = vld [vmem:[%s2021_s0 + $0xb0] sm:$0xff]   ;;  %v1679_v20 = vld [vmem:[%s2021_s0 + $0x38] sm:$0xff]   ;;  %v1681_v22 = vld [vmem:[%s2021_s0 + $0x40] sm:$0xff]  }
   0x7   :  { %1592 = vmatprep.subr.bf16.mxu0 %v1664_v6  ;;  %1659 = vmatprep.subr.bf16.mxu1 %v1664_v6  ;;  %v1680_v21 = vld [vmem:[%s2021_s0 + $0xb8] sm:$0xff]   ;;  %v1682_v23 = vld [vmem:[%s2021_s0 + $0xc0] sm:$0xff]   ;;  %v1683_v24 = vld [vmem:[%s2021_s0 + $0x48] sm:$0xff]  }
   0x8   :  { %v1684_v25 = vld [vmem:[%s2021_s0 + $0xc8] sm:$0xff]   ;;  %v1685_v26 = vld [vmem:[%s2021_s0 + $0x50] sm:$0xff]   ;;  %v1687_v28 = vld [vmem:[%s2021_s0 + $0x58] sm:$0xff]  }
   0x9   :  { %v1686_v27 = vld [vmem:[%s2021_s0 + $0xd0] sm:$0xff]   ;;  %v1688_v29 = vld [vmem:[%s2021_s0 + $0xd8] sm:$0xff]   ;;  %v1689_v30 = vld [vmem:[%s2021_s0 + $0x60] sm:$0xff]  }
   0xa   :  { %1593 = vmatpush3.bf16.msra.mxu0 %v1664_v6  ;;  %1661 = vmatpush3.bf16.msra.mxu1 %v1664_v6  ;;  %v1690_v31 = vld [vmem:[%s2021_s0 + $0xe0] sm:$0xff]   ;;  %v1691_v32 = vld [vmem:[%s2021_s0 + $0x68] sm:$0xff]   ;;  %v1693_v34 = vld [vmem:[%s2021_s0 + $0x70] sm:$0xff]  }
   0xb   :  { %v1692_v33 = vld [vmem:[%s2021_s0 + $0xe8] sm:$0xff]   ;;  %v1694_v35 = vld [vmem:[%s2021_s0 + $0xf0] sm:$0xff]   ;;  %v1695_v36 = vld [vmem:[%s2021_s0 + $0x78] sm:$0xff]  }
   0xc   :  { %v1696_v37 = vld [vmem:[%s2021_s0 + $0xf8] sm:$0xff]   ;;  %v1855_v38 = vld [vmem:[%s2022_s2] ss:$0 sm:$0xff] }
   0xd   :  { %1595 = vmatmul.mubr.msk.bf16.vlgmr.msra.gmra.mxu0 %vm261_vm2, %v1667_v8  ;;  %1627 = vmatmul.mubr.msk.bf16.vlgmr.msra.gmra.mxu1 %vm261_vm2, %v1668_v9 }
   0xe   :  { %1598 = vmatprep.mubr.msk.bf16.mxu0 %vm261_vm2, %v1669_v10  ;;  %1630 = vmatprep.mubr.msk.bf16.mxu1 %vm261_vm2, %v1670_v11 }
  0x15   :  { %1599 = vmatmul.mubr.msk.bf16.gmra.mxu0 %vm261_vm2, %v1671_v12  ;;  %1631 = vmatmul.mubr.msk.bf16.gmra.mxu1 %vm261_vm2, %v1672_v13 }
  0x16   :  { %1602 = vmatprep.mubr.msk.bf16.mxu0 %vm261_vm2, %v1673_v14  ;;  %1634 = vmatprep.mubr.msk.bf16.mxu1 %vm261_vm2, %v1674_v15 }
  0x1d   :  { %1603 = vmatmul.mubr.msk.bf16.gmra.mxu0 %vm261_vm2, %v1675_v16  ;;  %1635 = vmatmul.mubr.msk.bf16.gmra.mxu1 %vm261_vm2, %v1676_v17 }
  0x1e   :  { %1606 = vmatprep.mubr.msk.bf16.mxu0 %vm261_vm2, %v1677_v18  ;;  %1638 = vmatprep.mubr.msk.bf16.mxu1 %vm261_vm2, %v1678_v19 }
  0x25   :  { %1607 = vmatmul.mubr.msk.bf16.gmra.mxu0 %vm261_vm2, %v1679_v20  ;;  %1639 = vmatmul.mubr.msk.bf16.gmra.mxu1 %vm261_vm2, %v1680_v21 }
  0x26   :  { %1610 = vmatprep.mubr.msk.bf16.mxu0 %vm261_vm2, %v1681_v22  ;;  %1642 = vmatprep.mubr.msk.bf16.mxu1 %vm261_vm2, %v1682_v23 }
  0x2d   :  { %1611 = vmatmul.mubr.msk.bf16.gmra.mxu0 %vm261_vm2, %v1683_v24  ;;  %1643 = vmatmul.mubr.msk.bf16.gmra.mxu1 %vm261_vm2, %v1684_v25 }
  0x2e   :  { %1614 = vmatprep.mubr.msk.bf16.mxu0 %vm261_vm2, %v1685_v26  ;;  %1646 = vmatprep.mubr.msk.bf16.mxu1 %vm261_vm2, %v1686_v27 }
  0x35   :  { %1615 = vmatmul.mubr.msk.bf16.gmra.mxu0 %vm261_vm2, %v1687_v28  ;;  %1647 = vmatmul.mubr.msk.bf16.gmra.mxu1 %vm261_vm2, %v1688_v29 }
  0x36   :  { %1618 = vmatprep.mubr.msk.bf16.mxu0 %vm261_vm2, %v1689_v30  ;;  %1650 = vmatprep.mubr.msk.bf16.mxu1 %vm261_vm2, %v1690_v31 }
  0x3d   :  { %1619 = vmatmul.mubr.msk.bf16.gmra.mxu0 %vm261_vm2, %v1691_v32  ;;  %1651 = vmatmul.mubr.msk.bf16.gmra.mxu1 %vm261_vm2, %v1692_v33 }
  0x3e   :  { %1622 = vmatprep.mubr.msk.bf16.mxu0 %vm261_vm2, %v1693_v34  ;;  %1654 = vmatprep.mubr.msk.bf16.mxu1 %vm261_vm2, %v1694_v35 }
  0x45   :  { %1623 = vmatmul.mubr.msk.bf16.gmra.mxu0 %vm261_vm2, %v1695_v36  ;;  %1655 = vmatmul.mubr.msk.bf16.gmra.mxu1 %vm261_vm2, %v1696_v37 }
  0xcd   :  { %v1596_v39 = vpop.f32.mrf.mxu0  ;;  %v1628_v40 = vpop.f32.mrf.mxu1 }
  0xce   :  { %v408_v41 = vadd.f32 %v1596_v39, %v1855_v38  ;;  %v536_v42 = vadd.f32 %v1628_v40, %v1855_v38 }
  0xcf   :  { %v399_v43 = vpop.f32.mrf.mxu0  ;;  %v527_v44 = vpop.f32.mrf.mxu1 }
  0xd0   :  { %vm656_vm3 = vcmp.ge.f32.partialorder %v408_v41, 0.0  ;;  %v720_v45 = vmul.f32 0.2, %v408_v41  ;;  %vm688_vm4 = vcmp.ge.f32.partialorder %v536_v42, 0.0  ;;  %v752_v46 = vmul.f32 0.2, %v536_v42 }
  0xd1   :  { %v400_v47 = vadd.f32 %v1855_v38, %v399_v43  ;;  %v528_v48 = vadd.f32 %v1855_v38, %v527_v44  ;;  %v1597_v49 = vpop.f32.mrf.mxu0  ;;  %v1629_v50 = vpop.f32.mrf.mxu1 }
  0xd2   :  { %v784_v51 = vsel %vm656_vm3, %v408_v41, %v720_v45  ;;  %v411_v52 = vadd.f32 %v1597_v49, %v1855_v38  ;;  %v539_v53 = vadd.f32 %v1629_v50, %v1855_v38  ;;  %v816_v54 = vsel %vm688_vm4, %v536_v42, %v752_v46 }
  0xd3   :  { %vm654_vm5 = vcmp.ge.f32.partialorder %v400_v47, 0.0  ;;  %v718_v55 = vmul.f32 0.2, %v400_v47  ;;  %vm686_vm6 = vcmp.ge.f32.partialorder %v528_v48, 0.0  ;;  %v402_v56 = vpop.f32.mrf.mxu0  ;;  %v530_v57 = vpop.f32.mrf.mxu1  ;;  %v750_v61 = vmul.f32 0.2, %v528_v48 }
  0xd4   :  { %vm657_vm7 = vcmp.ge.f32.partialorder %v411_v52, 0.0  ;;  %v721_v58 = vmul.f32 0.2, %v411_v52  ;;  %vm689_vm8 = vcmp.ge.f32.partialorder %v539_v53, 0.0  ;;  %v753_v59 = vmul.f32 0.2, %v539_v53 }
  0xd5   :  { %v782_v60 = vsel %vm654_vm5, %v400_v47, %v718_v55  ;;  %v403_v62 = vadd.f32 %v1855_v38, %v402_v56  ;;  %v531_v63 = vadd.f32 %v1855_v38, %v530_v57  ;;  %v1600_v0 = vpop.f32.mrf.mxu0  ;;  %v1632_v1 = vpop.f32.mrf.mxu1  ;;  %v814_v13 = vsel %vm686_vm6, %v528_v48, %v750_v61 }
  0xd6   :  { %v785_v2 = vsel %vm657_vm7, %v411_v52, %v721_v58  ;;  %v817_v3 = vsel %vm689_vm8, %v539_v53, %v753_v59  ;;  %v424_v4 = vadd.f32 %v1600_v0, %v1855_v38  ;;  %v552_v5 = vadd.f32 %v1632_v1, %v1855_v38 }
  0xd7   :  { %v1373_v6 = vpack.c.bf16 %v785_v2, %v784_v51  ;;  %v1453_v7 = vpack.c.bf16 %v817_v3, %v816_v54  ;;  %vm655_vm9 = vcmp.ge.f32.partialorder %v403_v62, 0.0  ;;  %v719_v8 = vmul.f32 0.2, %v403_v62  ;;  %v415_v9 = vpop.f32.mrf.mxu0  ;;  %v543_v10 = vpop.f32.mrf.mxu1 }
  0xd8   :  { %vm687_vm10 = vcmp.ge.f32.partialorder %v531_v63, 0.0  ;;  %v751_v11 = vmul.f32 0.2, %v531_v63  ;;  %vm660_vm11 = vcmp.ge.f32.partialorder %v424_v4, 0.0  ;;  %v724_v12 = vmul.f32 0.2, %v424_v4 }
  0xd9   :  { %1525 = vst [vmem:[%s2023_s3 + $0x8] sm:$0xff] %v1373_v6   ;;  %1541 = vst [vmem:[%s2023_s3 + $0x88] sm:$0xff] %v1453_v7   ;;  %v783_v14 = vsel %vm655_vm9, %v403_v62, %v719_v8  ;;  %v756_v15 = vmul.f32 0.2, %v552_v5  ;;  %v416_v16 = vadd.f32 %v1855_v38, %v415_v9  ;;  %v1601_v17 = vpop.f32.mrf.mxu0  ;;  %v1633_v18 = vpop.f32.mrf.mxu1  ;;  %vm692_vm12 = vcmp.ge.f32.partialorder %v552_v5, 0.0 }
  0xda   :  { %v1368_v19 = vpack.c.bf16 %v783_v14, %v782_v60  ;;  %v815_v20 = vsel %vm687_vm10, %v531_v63, %v751_v11  ;;  %v544_v21 = vadd.f32 %v1855_v38, %v543_v10  ;;  %v788_v23 = vsel %vm660_vm11, %v424_v4, %v724_v12 }
  0xdb   :  { %v1448_v22 = vpack.c.bf16 %v815_v20, %v814_v13  ;;  %vm658_vm13 = vcmp.ge.f32.partialorder %v416_v16, 0.0  ;;  %v722_v24 = vmul.f32 0.2, %v416_v16  ;;  %v418_v25 = vpop.f32.mrf.mxu0  ;;  %v546_v26 = vpop.f32.mrf.mxu1  ;;  %v427_v28 = vadd.f32 %v1601_v17, %v1855_v38 }
  0xdc   :  { %1369 = vst [vmem:[%s2023_s3] sm:$0xff] %v1368_v19   ;;  %vm690_vm14 = vcmp.ge.f32.partialorder %v544_v21, 0.0  ;;  %v754_v27 = vmul.f32 0.2, %v544_v21  ;;  %v555_v29 = vadd.f32 %v1633_v18, %v1855_v38  ;;  %v820_v30 = vsel %vm692_vm12, %v552_v5, %v756_v15 }
  0xdd   :  { %1540 = vst [vmem:[%s2023_s3 + $0x80] sm:$0xff] %v1448_v22   ;;  %v786_v31 = vsel %vm658_vm13, %v416_v16, %v722_v24  ;;  %v419_v32 = vadd.f32 %v1855_v38, %v418_v25  ;;  %v547_v33 = vadd.f32 %v1855_v38, %v546_v26  ;;  %v1604_v34 = vpop.f32.mrf.mxu0  ;;  %v1636_v35 = vpop.f32.mrf.mxu1  ;;  %vm661_vm15 = vcmp.ge.f32.partialorder %v427_v28, 0.0 }
  0xde   :  { %v818_v36 = vsel %vm690_vm14, %v544_v21, %v754_v27  ;;  %v725_v37 = vmul.f32 0.2, %v427_v28  ;;  %vm693_vm0 = vcmp.ge.f32.partialorder %v555_v29, 0.0  ;;  %v757_v39 = vmul.f32 0.2, %v555_v29 }
  0xdf   :  { %vm659_vm1 = vcmp.ge.f32.partialorder %v419_v32, 0.0  ;;  %v723_v40 = vmul.f32 0.2, %v419_v32  ;;  %vm691_vm2 = vcmp.ge.f32.partialorder %v547_v33, 0.0  ;;  %v431_v41 = vpop.f32.mrf.mxu0  ;;  %v559_v42 = vpop.f32.mrf.mxu1  ;;  %v755_v44 = vmul.f32 0.2, %v547_v33 }
  0xe0   :  { %v789_v43 = vsel %vm661_vm15, %v427_v28, %v725_v37  ;;  %v440_v45 = vadd.f32 %v1604_v34, %v1855_v38  ;;  %v568_v46 = vadd.f32 %v1636_v35, %v1855_v38  ;;  %v821_v48 = vsel %vm693_vm0, %v555_v29, %v757_v39 }
  0xe1   :  { %v1383_v47 = vpack.c.bf16 %v789_v43, %v788_v23  ;;  %v787_v49 = vsel %vm659_vm1, %v419_v32, %v723_v40  ;;  %v432_v50 = vadd.f32 %v1855_v38, %v431_v41  ;;  %v1605_v51 = vpop.f32.mrf.mxu0  ;;  %v1637_v52 = vpop.f32.mrf.mxu1  ;;  %v1463_v53 = vpack.c.bf16 %v821_v48, %v820_v30 }
  0xe2   :  { %v1378_v54 = vpack.c.bf16 %v787_v49, %v786_v31  ;;  %v819_v55 = vsel %vm691_vm2, %v547_v33, %v755_v44  ;;  %vm664_vm3 = vcmp.ge.f32.partialorder %v440_v45, 0.0  ;;  %v728_v57 = vmul.f32 0.2, %v440_v45 }
  0xe3   :  { %1527 = vst [vmem:[%s2023_s3 + $0x18] sm:$0xff] %v1383_v47   ;;  %v1458_v56 = vpack.c.bf16 %v819_v55, %v818_v36  ;;  %vm696_vm4 = vcmp.ge.f32.partialorder %v568_v46, 0.0  ;;  %v760_v58 = vmul.f32 0.2, %v568_v46  ;;  %v434_v59 = vpop.f32.mrf.mxu0  ;;  %v562_v60 = vpop.f32.mrf.mxu1  ;;  %1543 = vst [vmem:[%s2023_s3 + $0x98] sm:$0xff] %v1463_v53   ;;  %vm662_vm5 = vcmp.ge.f32.partialorder %v432_v50, 0.0 }
  0xe4   :  { %1526 = vst [vmem:[%s2023_s3 + $0x10] sm:$0xff] %v1378_v54   ;;  %v726_v61 = vmul.f32 0.2, %v432_v50  ;;  %v560_v62 = vadd.f32 %v1855_v38, %v559_v42  ;;  %v443_v63 = vadd.f32 %v1605_v51, %v1855_v38  ;;  %v792_v0 = vsel %vm664_vm3, %v440_v45, %v728_v57 }
  0xe5   :  { %1542 = vst [vmem:[%s2023_s3 + $0x90] sm:$0xff] %v1458_v56   ;;  %v824_v1 = vsel %vm696_vm4, %v568_v46, %v760_v58  ;;  %v571_v2 = vadd.f32 %v1637_v52, %v1855_v38  ;;  %v435_v3 = vadd.f32 %v1855_v38, %v434_v59  ;;  %v1608_v4 = vpop.f32.mrf.mxu0  ;;  %v1640_v5 = vpop.f32.mrf.mxu1  ;;  %v563_v14 = vadd.f32 %v1855_v38, %v562_v60 }
  0xe6   :  { %v790_v6 = vsel %vm662_vm5, %v432_v50, %v726_v61  ;;  %vm694_vm6 = vcmp.ge.f32.partialorder %v560_v62, 0.0  ;;  %v758_v7 = vmul.f32 0.2, %v560_v62  ;;  %vm665_vm7 = vcmp.ge.f32.partialorder %v443_v63, 0.0 }
  0xe7   :  { %v729_v8 = vmul.f32 0.2, %v443_v63  ;;  %vm697_vm8 = vcmp.ge.f32.partialorder %v571_v2, 0.0  ;;  %v761_v9 = vmul.f32 0.2, %v571_v2  ;;  %vm663_vm9 = vcmp.ge.f32.partialorder %v435_v3, 0.0  ;;  %v447_v10 = vpop.f32.mrf.mxu0  ;;  %v575_v11 = vpop.f32.mrf.mxu1 }
  0xe8   :  { %v822_v12 = vsel %vm694_vm6, %v560_v62, %v758_v7  ;;  %v727_v13 = vmul.f32 0.2, %v435_v3  ;;  %v456_v15 = vadd.f32 %v1608_v4, %v1855_v38  ;;  %v584_v18 = vadd.f32 %v1640_v5, %v1855_v38 }
  0xe9   :  { %v793_v16 = vsel %vm665_vm7, %v443_v63, %v729_v8  ;;  %v825_v17 = vsel %vm697_vm8, %v571_v2, %v761_v9  ;;  %v448_v19 = vadd.f32 %v1855_v38, %v447_v10  ;;  %v1609_v20 = vpop.f32.mrf.mxu0  ;;  %v1641_v21 = vpop.f32.mrf.mxu1  ;;  %vm695_vm10 = vcmp.ge.f32.partialorder %v563_v14, 0.0 }
  0xea   :  { %v1393_v22 = vpack.c.bf16 %v793_v16, %v792_v0  ;;  %v1473_v23 = vpack.c.bf16 %v825_v17, %v824_v1  ;;  %v791_v24 = vsel %vm663_vm9, %v435_v3, %v727_v13  ;;  %v759_v26 = vmul.f32 0.2, %v563_v14 }
  0xeb   :  { %v1388_v25 = vpack.c.bf16 %v791_v24, %v790_v6  ;;  %vm668_vm11 = vcmp.ge.f32.partialorder %v456_v15, 0.0  ;;  %v732_v27 = vmul.f32 0.2, %v456_v15  ;;  %v450_v28 = vpop.f32.mrf.mxu0  ;;  %v578_v29 = vpop.f32.mrf.mxu1  ;;  %vm700_vm12 = vcmp.ge.f32.partialorder %v584_v18, 0.0 }
  0xec   :  { %1529 = vst [vmem:[%s2023_s3 + $0x28] sm:$0xff] %v1393_v22   ;;  %1545 = vst [vmem:[%s2023_s3 + $0xa8] sm:$0xff] %v1473_v23   ;;  %v764_v30 = vmul.f32 0.2, %v584_v18  ;;  %vm666_vm13 = vcmp.ge.f32.partialorder %v448_v19, 0.0  ;;  %v823_v32 = vsel %vm695_vm10, %v563_v14, %v759_v26  ;;  %v576_v34 = vadd.f32 %v1855_v38, %v575_v11 }
  0xed   :  { %v730_v31 = vmul.f32 0.2, %v448_v19  ;;  %1528 = vst [vmem:[%s2023_s3 + $0x20] sm:$0xff] %v1388_v25   ;;  %v796_v33 = vsel %vm668_vm11, %v456_v15, %v732_v27  ;;  %v459_v35 = vadd.f32 %v1609_v20, %v1855_v38  ;;  %v1612_v36 = vpop.f32.mrf.mxu0  ;;  %v1644_v37 = vpop.f32.mrf.mxu1  ;;  %v1468_v39 = vpack.c.bf16 %v823_v32, %v822_v12 }
  0xee   :  { %v828_v40 = vsel %vm700_vm12, %v584_v18, %v764_v30  ;;  %v587_v42 = vadd.f32 %v1641_v21, %v1855_v38  ;;  %vm698_vm14 = vcmp.ge.f32.partialorder %v576_v34, 0.0  ;;  %v762_v43 = vmul.f32 0.2, %v576_v34 }
  0xef   :  { %v794_v41 = vsel %vm666_vm13, %v448_v19, %v730_v31  ;;  %vm669_vm15 = vcmp.ge.f32.partialorder %v459_v35, 0.0  ;;  %v733_v44 = vmul.f32 0.2, %v459_v35  ;;  %v463_v45 = vpop.f32.mrf.mxu0  ;;  %v591_v46 = vpop.f32.mrf.mxu1  ;;  %1544 = vst [vmem:[%s2023_s3 + $0xa0] sm:$0xff] %v1468_v39   ;;  %v451_v48 = vadd.f32 %v1855_v38, %v450_v28 }
  0xf0   :  { %vm701_vm0 = vcmp.ge.f32.partialorder %v587_v42, 0.0  ;;  %v765_v47 = vmul.f32 0.2, %v587_v42  ;;  %v579_v49 = vadd.f32 %v1855_v38, %v578_v29  ;;  %v826_v50 = vsel %vm698_vm14, %v576_v34, %v762_v43 }
  0xf1   :  { %v797_v51 = vsel %vm669_vm15, %v459_v35, %v733_v44  ;;  %v472_v52 = vadd.f32 %v1612_v36, %v1855_v38  ;;  %v600_v53 = vadd.f32 %v1644_v37, %v1855_v38  ;;  %v1613_v54 = vpop.f32.mrf.mxu0  ;;  %v1645_v55 = vpop.f32.mrf.mxu1  ;;  %vm667_vm1 = vcmp.ge.f32.partialorder %v451_v48, 0.0 }
  0xf2   :  { %v1403_v56 = vpack.c.bf16 %v797_v51, %v796_v33  ;;  %v829_v57 = vsel %vm701_vm0, %v587_v42, %v765_v47  ;;  %v731_v58 = vmul.f32 0.2, %v451_v48  ;;  %vm699_vm2 = vcmp.ge.f32.partialorder %v579_v49, 0.0 }
  0xf3   :  { %v1483_v59 = vpack.c.bf16 %v829_v57, %v828_v40  ;;  %v763_v60 = vmul.f32 0.2, %v579_v49  ;;  %vm672_vm3 = vcmp.ge.f32.partialorder %v472_v52, 0.0  ;;  %v466_v61 = vpop.f32.mrf.mxu0  ;;  %v594_v62 = vpop.f32.mrf.mxu1  ;;  %v736_v0 = vmul.f32 0.2, %v472_v52 }
  0xf4   :  { %1531 = vst [vmem:[%s2023_s3 + $0x38] sm:$0xff] %v1403_v56   ;;  %v795_v63 = vsel %vm667_vm1, %v451_v48, %v731_v58  ;;  %vm704_vm4 = vcmp.ge.f32.partialorder %v600_v53, 0.0  ;;  %v768_v1 = vmul.f32 0.2, %v600_v53  ;;  %v464_v4 = vadd.f32 %v1855_v38, %v463_v45 }
  0xf5   :  { %1547 = vst [vmem:[%s2023_s3 + $0xb8] sm:$0xff] %v1483_v59   ;;  %v1398_v2 = vpack.c.bf16 %v795_v63, %v794_v41  ;;  %v827_v3 = vsel %vm699_vm2, %v579_v49, %v763_v60  ;;  %v592_v5 = vadd.f32 %v1855_v38, %v591_v46  ;;  %v1616_v6 = vpop.f32.mrf.mxu0  ;;  %v1648_v7 = vpop.f32.mrf.mxu1  ;;  %v800_v9 = vsel %vm672_vm3, %v472_v52, %v736_v0 }
  0xf6   :  { %v1478_v8 = vpack.c.bf16 %v827_v3, %v826_v50  ;;  %v832_v10 = vsel %vm704_vm4, %v600_v53, %v768_v1  ;;  %v475_v11 = vadd.f32 %v1613_v54, %v1855_v38  ;;  %vm670_vm5 = vcmp.ge.f32.partialorder %v464_v4, 0.0 }
  0xf7   :  { %1530 = vst [vmem:[%s2023_s3 + $0x30] sm:$0xff] %v1398_v2   ;;  %v734_v12 = vmul.f32 0.2, %v464_v4  ;;  %vm702_vm6 = vcmp.ge.f32.partialorder %v592_v5, 0.0  ;;  %v766_v13 = vmul.f32 0.2, %v592_v5  ;;  %v479_v14 = vpop.f32.mrf.mxu0  ;;  %v607_v15 = vpop.f32.mrf.mxu1  ;;  %v603_v17 = vadd.f32 %v1645_v55, %v1855_v38 }
  0xf8   :  { %1546 = vst [vmem:[%s2023_s3 + $0xb0] sm:$0xff] %v1478_v8   ;;  %vm673_vm7 = vcmp.ge.f32.partialorder %v475_v11, 0.0  ;;  %v737_v16 = vmul.f32 0.2, %v475_v11  ;;  %v467_v18 = vadd.f32 %v1855_v38, %v466_v61  ;;  %v595_v21 = vadd.f32 %v1855_v38, %v594_v62 }
  0xf9   :  { %v798_v19 = vsel %vm670_vm5, %v464_v4, %v734_v12  ;;  %v830_v20 = vsel %vm702_vm6, %v592_v5, %v766_v13  ;;  %v488_v22 = vadd.f32 %v1616_v6, %v1855_v38  ;;  %v1617_v23 = vpop.f32.mrf.mxu0  ;;  %v1649_v24 = vpop.f32.mrf.mxu1  ;;  %vm705_vm8 = vcmp.ge.f32.partialorder %v603_v17, 0.0 }
  0xfa   :  { %v801_v25 = vsel %vm673_vm7, %v475_v11, %v737_v16  ;;  %v769_v26 = vmul.f32 0.2, %v603_v17  ;;  %vm671_vm9 = vcmp.ge.f32.partialorder %v467_v18, 0.0  ;;  %v735_v28 = vmul.f32 0.2, %v467_v18 }
  0xfb   :  { %v1413_v27 = vpack.c.bf16 %v801_v25, %v800_v9  ;;  %vm703_vm10 = vcmp.ge.f32.partialorder %v595_v21, 0.0  ;;  %v767_v29 = vmul.f32 0.2, %v595_v21  ;;  %v482_v30 = vpop.f32.mrf.mxu0  ;;  %v610_v31 = vpop.f32.mrf.mxu1  ;;  %vm676_vm11 = vcmp.ge.f32.partialorder %v488_v22, 0.0 }
  0xfc   :  { %v833_v32 = vsel %vm705_vm8, %v603_v17, %v769_v26  ;;  %v740_v33 = vmul.f32 0.2, %v488_v22  ;;  %v616_v34 = vadd.f32 %v1648_v7, %v1855_v38  ;;  %v799_v36 = vsel %vm671_vm9, %v467_v18, %v735_v28 }
  0xfd   :  { %1533 = vst [vmem:[%s2023_s3 + $0x48] sm:$0xff] %v1413_v27   ;;  %v1493_v35 = vpack.c.bf16 %v833_v32, %v832_v10  ;;  %v831_v37 = vsel %vm703_vm10, %v595_v21, %v767_v29  ;;  %v480_v39 = vadd.f32 %v1855_v38, %v479_v14  ;;  %v1620_v40 = vpop.f32.mrf.mxu0  ;;  %v1652_v41 = vpop.f32.mrf.mxu1  ;;  %v1408_v42 = vpack.c.bf16 %v799_v36, %v798_v19 }
  0xfe   :  { %v1488_v43 = vpack.c.bf16 %v831_v37, %v830_v20  ;;  %v804_v44 = vsel %vm676_vm11, %v488_v22, %v740_v33  ;;  %vm708_vm12 = vcmp.ge.f32.partialorder %v616_v34, 0.0  ;;  %v772_v45 = vmul.f32 0.2, %v616_v34 }
  0xff   :  { %1549 = vst [vmem:[%s2023_s3 + $0xc8] sm:$0xff] %v1493_v35   ;;  %vm674_vm13 = vcmp.ge.f32.partialorder %v480_v39, 0.0  ;;  %v738_v46 = vmul.f32 0.2, %v480_v39  ;;  %v608_v47 = vadd.f32 %v1855_v38, %v607_v15  ;;  %v495_v48 = vpop.f32.mrf.mxu0  ;;  %v623_v49 = vpop.f32.mrf.mxu1  ;;  %1532 = vst [vmem:[%s2023_s3 + $0x40] sm:$0xff] %v1408_v42   ;;  %v491_v50 = vadd.f32 %v1617_v23, %v1855_v38 }
 0x100   :  { %1548 = vst [vmem:[%s2023_s3 + $0xc0] sm:$0xff] %v1488_v43   ;;  %v619_v51 = vadd.f32 %v1649_v24, %v1855_v38  ;;  %v483_v52 = vadd.f32 %v1855_v38, %v482_v30  ;;  %v611_v53 = vadd.f32 %v1855_v38, %v610_v31  ;;  %v836_v54 = vsel %vm708_vm12, %v616_v34, %v772_v45 }
 0x101   :  { %v802_v55 = vsel %vm674_vm13, %v480_v39, %v738_v46  ;;  %vm706_vm14 = vcmp.ge.f32.partialorder %v608_v47, 0.0  ;;  %v770_v56 = vmul.f32 0.2, %v608_v47  ;;  %v1621_v57 = vpop.f32.mrf.mxu0  ;;  %v1653_v58 = vpop.f32.mrf.mxu1  ;;  %vm677_vm15 = vcmp.ge.f32.partialorder %v491_v50, 0.0 }
 0x102   :  { %v741_v59 = vmul.f32 0.2, %v491_v50  ;;  %vm709_vm0 = vcmp.ge.f32.partialorder %v619_v51, 0.0  ;;  %v773_v60 = vmul.f32 0.2, %v619_v51  ;;  %vm675_vm1 = vcmp.ge.f32.partialorder %v483_v52, 0.0 }
 0x103   :  { %v834_v61 = vsel %vm706_vm14, %v608_v47, %v770_v56  ;;  %v739_v62 = vmul.f32 0.2, %v483_v52  ;;  %vm707_vm2 = vcmp.ge.f32.partialorder %v611_v53, 0.0  ;;  %v498_v63 = vpop.f32.mrf.mxu0  ;;  %v626_v0 = vpop.f32.mrf.mxu1  ;;  %v771_v3 = vmul.f32 0.2, %v611_v53 }
 0x104   :  { %v805_v1 = vsel %vm677_vm15, %v491_v50, %v741_v59  ;;  %v837_v2 = vsel %vm709_vm0, %v619_v51, %v773_v60  ;;  %v504_v4 = vadd.f32 %v1620_v40, %v1855_v38  ;;  %v632_v8 = vadd.f32 %v1652_v41, %v1855_v38 }
 0x105   :  { %v1423_v5 = vpack.c.bf16 %v805_v1, %v804_v44  ;;  %v1503_v6 = vpack.c.bf16 %v837_v2, %v836_v54  ;;  %v803_v7 = vsel %vm675_vm1, %v483_v52, %v739_v62  ;;  %v1624_v9 = vpop.f32.mrf.mxu0  ;;  %v1656_v10 = vpop.f32.mrf.mxu1  ;;  %v835_v12 = vsel %vm707_vm2, %v611_v53, %v771_v3 }
 0x106   :  { %v1418_v11 = vpack.c.bf16 %v803_v7, %v802_v55  ;;  %vm680_vm3 = vcmp.ge.f32.partialorder %v504_v4, 0.0  ;;  %v744_v13 = vmul.f32 0.2, %v504_v4  ;;  %v1498_v14 = vpack.c.bf16 %v835_v12, %v834_v61 }
 0x107   :  { %1535 = vst [vmem:[%s2023_s3 + $0x58] sm:$0xff] %v1423_v5   ;;  %1551 = vst [vmem:[%s2023_s3 + $0xd8] sm:$0xff] %v1503_v6   ;;  %vm712_vm4 = vcmp.ge.f32.partialorder %v632_v8, 0.0  ;;  %v776_v15 = vmul.f32 0.2, %v632_v8  ;;  %v496_v16 = vadd.f32 %v1855_v38, %v495_v48  ;;  %v624_v17 = vadd.f32 %v1855_v38, %v623_v49  ;;  %v511_v23 = vpop.f32.mrf.mxu0  ;;  %v639_v24 = vpop.f32.mrf.mxu1 }
 0x108   :  { %1534 = vst [vmem:[%s2023_s3 + $0x50] sm:$0xff] %v1418_v11   ;;  %v507_v18 = vadd.f32 %v1621_v57, %v1855_v38  ;;  %v635_v19 = vadd.f32 %v1653_v58, %v1855_v38  ;;  %1550 = vst [vmem:[%s2023_s3 + $0xd0] sm:$0xff] %v1498_v14   ;;  %v808_v20 = vsel %vm680_vm3, %v504_v4, %v744_v13 }
 0x109   :  { %vm678_vm5 = vcmp.ge.f32.partialorder %v496_v16, 0.0  ;;  %v742_v21 = vmul.f32 0.2, %v496_v16  ;;  %v499_v22 = vadd.f32 %v1855_v38, %v498_v63  ;;  %v840_v25 = vsel %vm712_vm4, %v632_v8, %v776_v15  ;;  %v1625_v37 = vpop.f32.mrf.mxu0  ;;  %v1657_v39 = vpop.f32.mrf.mxu1 }
 0x10a   :  { %vm710_vm6 = vcmp.ge.f32.partialorder %v624_v17, 0.0  ;;  %vm681_vm7 = vcmp.ge.f32.partialorder %v507_v18, 0.0  ;;  %v745_v26 = vmul.f32 0.2, %v507_v18  ;;  %v774_v27 = vmul.f32 0.2, %v624_v17 }
 0x10b   :  { %vm713_vm8 = vcmp.ge.f32.partialorder %v635_v19, 0.0  ;;  %v777_v28 = vmul.f32 0.2, %v635_v19  ;;  %vm679_vm9 = vcmp.ge.f32.partialorder %v499_v22, 0.0  ;;  %v806_v29 = vsel %vm678_vm5, %v496_v16, %v742_v21  ;;  %v514_v53 = vpop.f32.mrf.mxu0  ;;  %v642_v54 = vpop.f32.mrf.mxu1 }
 0x10c   :  { %v809_v30 = vsel %vm681_vm7, %v507_v18, %v745_v26  ;;  %v743_v31 = vmul.f32 0.2, %v499_v22  ;;  %v627_v32 = vadd.f32 %v1855_v38, %v626_v0  ;;  %v520_v35 = vadd.f32 %v1624_v9, %v1855_v38 }
 0x10d   :  { %v1433_v33 = vpack.c.bf16 %v809_v30, %v808_v20  ;;  %v841_v34 = vsel %vm713_vm8, %v635_v19, %v777_v28  ;;  %v648_v36 = vadd.f32 %v1656_v10, %v1855_v38  ;;  %v838_v43 = vsel %vm710_vm6, %v624_v17, %v774_v27 }
 0x10e   :  { %v1513_v40 = vpack.c.bf16 %v841_v34, %v840_v25  ;;  %v807_v41 = vsel %vm679_vm9, %v499_v22, %v743_v31  ;;  %vm711_vm10 = vcmp.ge.f32.partialorder %v627_v32, 0.0  ;;  %v775_v42 = vmul.f32 0.2, %v627_v32 }
 0x10f   :  { %1537 = vst [vmem:[%s2023_s3 + $0x68] sm:$0xff] %v1433_v33   ;;  %v1428_v44 = vpack.c.bf16 %v807_v41, %v806_v29  ;;  %vm684_vm11 = vcmp.ge.f32.partialorder %v520_v35, 0.0  ;;  %v748_v45 = vmul.f32 0.2, %v520_v35  ;;  %vm716_vm12 = vcmp.ge.f32.partialorder %v648_v36, 0.0 }
 0x110   :  { %1553 = vst [vmem:[%s2023_s3 + $0xe8] sm:$0xff] %v1513_v40   ;;  %v839_v46 = vsel %vm711_vm10, %v627_v32, %v775_v42  ;;  %v780_v47 = vmul.f32 0.2, %v648_v36  ;;  %v512_v48 = vadd.f32 %v1855_v38, %v511_v23  ;;  %v640_v50 = vadd.f32 %v1855_v38, %v639_v24 }
 0x111   :  { %1536 = vst [vmem:[%s2023_s3 + $0x60] sm:$0xff] %v1428_v44   ;;  %v1508_v49 = vpack.c.bf16 %v839_v46, %v838_v43  ;;  %v523_v51 = vadd.f32 %v1625_v37, %v1855_v38  ;;  %v651_v52 = vadd.f32 %v1657_v39, %v1855_v38  ;;  %v812_v55 = vsel %vm684_vm11, %v520_v35, %v748_v45 }
 0x112   :  { %v844_v56 = vsel %vm716_vm12, %v648_v36, %v780_v47  ;;  %v746_v58 = vmul.f32 0.2, %v512_v48  ;;  %v515_v60 = vadd.f32 %v1855_v38, %v514_v53  ;;  %v643_v61 = vadd.f32 %v1855_v38, %v642_v54 }
 0x113   :  { %1552 = vst [vmem:[%s2023_s3 + $0xe0] sm:$0xff] %v1508_v49   ;;  %vm685_vm13 = vcmp.ge.f32.partialorder %v523_v51, 0.0  ;;  %v749_v57 = vmul.f32 0.2, %v523_v51  ;;  %vm717_vm14 = vcmp.ge.f32.partialorder %v651_v52, 0.0  ;;  %vm682_vm15 = vcmp.ge.f32.partialorder %v512_v48, 0.0 }
 0x114   :  { %v781_v59 = vmul.f32 0.2, %v651_v52  ;;  %vm714_vm0 = vcmp.ge.f32.partialorder %v640_v50, 0.0  ;;  %v778_v62 = vmul.f32 0.2, %v640_v50  ;;  %vm683_vm1 = vcmp.ge.f32.partialorder %v515_v60, 0.0 }
 0x115   :  { %v813_v63 = vsel %vm685_vm13, %v523_v51, %v749_v57  ;;  %v747_v2 = vmul.f32 0.2, %v515_v60  ;;  %vm715_vm2 = vcmp.ge.f32.partialorder %v643_v61, 0.0  ;;  %v779_v4 = vmul.f32 0.2, %v643_v61 }
 0x116   :  { %v1443_v0 = vpack.c.bf16 %v813_v63, %v812_v55  ;;  %v845_v1 = vsel %vm717_vm14, %v651_v52, %v781_v59  ;;  %v810_v5 = vsel %vm682_vm15, %v512_v48, %v746_v58  ;;  %v842_v7 = vsel %vm714_vm0, %v640_v50, %v778_v62 }
 0x117   :  { %v1523_v3 = vpack.c.bf16 %v845_v1, %v844_v56  ;;  %v811_v6 = vsel %vm683_vm1, %v515_v60, %v747_v2  ;;  %v843_v8 = vsel %vm715_vm2, %v643_v61, %v779_v4 }
 0x118   :  { %1539 = vst [vmem:[%s2023_s3 + $0x78] sm:$0xff] %v1443_v0   ;;  %v1438_v38 = vpack.c.bf16 %v811_v6, %v810_v5  ;;  %v1518_v9 = vpack.c.bf16 %v843_v8, %v842_v7 }
 0x119   :  { %1555 = vst [vmem:[%s2023_s3 + $0xf8] sm:$0xff] %v1523_v3  }
 0x11a   :  { %1538 = vst [vmem:[%s2023_s3 + $0x70] sm:$0xff] %v1438_v38   ;;  %1554 = vst [vmem:[%s2023_s3 + $0xf0] sm:$0xff] %v1518_v9  }

// kernel: discriminator_forward.18
= control target key start
LH: loop header
LB: loop body
LE: loop exit
PB: predicated region body
PF: predicated region fallthrough
CT: control target
= control target key end

     0   :  { %s455_s0 = inlined_call_operand.vmem [shape: bf16[128,128], index: 0, kind: input, shape index: {}]   ;;  %s456_s1 = inlined_call_operand.vmem [shape: f32[1,128], index: 1, kind: input, shape index: {}]   ;;  %s457_s2 = inlined_call_operand.vmem [shape: f32[1,128], index: 2, kind: input, shape index: {}]   ;;  %s458_s3 = inlined_call_operand.vmem [shape: bf16[128,128], index: 3, kind: output, shape index: {}]  }
   0x1   :  { %v259_v0 = vld [vmem:[%s455_s0] sm:$0xff]   ;;  %v330_v4 = vld [vmem:[%s455_s0 + $0x8] sm:$0xff]   ;;  %v331_v5 = vld [vmem:[%s455_s0 + $0x10] sm:$0xff]  }
   0x2   :  { %v370_v1 = vld [vmem:[%s456_s1] ss:$0 sm:$0xff]  ;;  %v260_v2 = vunpack.c.l.bf16 %v259_v0  ;;  %v261_v3 = vunpack.c.h.bf16 %v259_v0  ;;  %v332_v6 = vld [vmem:[%s455_s0 + $0x18] sm:$0xff]   ;;  %v264_v8 = vunpack.c.l.bf16 %v330_v4  ;;  %v265_v9 = vunpack.c.h.bf16 %v330_v4  ;;  %v334_v35 = vld [vmem:[%s455_s0 + $0x28] sm:$0xff]  }
   0x3   :  { %v384_v7 = vld [vmem:[%s457_s2] ss:$0 sm:$0xff]  ;;  %v268_v10 = vunpack.c.l.bf16 %v331_v5  ;;  %v269_v11 = vunpack.c.h.bf16 %v331_v5  ;;  %v272_v14 = vunpack.c.l.bf16 %v332_v6  ;;  %v273_v15 = vunpack.c.h.bf16 %v332_v6  ;;  %v335_v48 = vld [vmem:[%s455_s0 + $0x30] sm:$0xff]   ;;  %v336_v4 = vld [vmem:[%s455_s0 + $0x38] sm:$0xff]  }
   0x4   :  { %v53_v12 = vmul.f32 %v260_v2, %v370_v1  ;;  %v54_v13 = vmul.f32 %v261_v3, %v370_v1  ;;  %v55_v16 = vmul.f32 %v264_v8, %v370_v1  ;;  %v56_v17 = vmul.f32 %v265_v9, %v370_v1  ;;  %v333_v34 = vld [vmem:[%s455_s0 + $0x20] sm:$0xff]  }
   0x5   :  { %v57_v18 = vmul.f32 %v268_v10, %v370_v1  ;;  %v58_v19 = vmul.f32 %v269_v11, %v370_v1  ;;  %v59_v22 = vmul.f32 %v272_v14, %v370_v1  ;;  %v60_v23 = vmul.f32 %v273_v15, %v370_v1 }
   0x6   :  { %v76_v20 = vadd.f32 %v384_v7, %v53_v12  ;;  %v77_v21 = vadd.f32 %v384_v7, %v54_v13  ;;  %v78_v24 = vadd.f32 %v384_v7, %v55_v16  ;;  %v79_v25 = vadd.f32 %v384_v7, %v56_v17 }
   0x7   :  { %v80_v26 = vadd.f32 %v384_v7, %v57_v18  ;;  %v81_v27 = vadd.f32 %v384_v7, %v58_v19  ;;  %v82_v42 = vadd.f32 %v384_v7, %v59_v22  ;;  %v83_v43 = vadd.f32 %v384_v7, %v60_v23 }
   0x8   :  { %vm92_vm0 = vcmp.ge.f32.partialorder %v76_v20, 0.0  ;;  %vm93_vm1 = vcmp.ge.f32.partialorder %v77_v21, 0.0  ;;  %v108_v28 = vmul.f32 0.2, %v76_v20  ;;  %v109_v29 = vmul.f32 0.2, %v77_v21 }
   0x9   :  { %vm94_vm2 = vcmp.ge.f32.partialorder %v78_v24, 0.0  ;;  %vm95_vm3 = vcmp.ge.f32.partialorder %v79_v25, 0.0  ;;  %v110_v30 = vmul.f32 0.2, %v78_v24  ;;  %v111_v31 = vmul.f32 0.2, %v79_v25 }
   0xa   :  { %v124_v32 = vsel %vm92_vm0, %v76_v20, %v108_v28  ;;  %v125_v33 = vsel %vm93_vm1, %v77_v21, %v109_v29  ;;  %vm96_vm4 = vcmp.ge.f32.partialorder %v80_v26, 0.0  ;;  %vm97_vm5 = vcmp.ge.f32.partialorder %v81_v27, 0.0 }
   0xb   :  { %v293_v36 = vpack.c.bf16 %v125_v33, %v124_v32  ;;  %v126_v37 = vsel %vm94_vm2, %v78_v24, %v110_v30  ;;  %v127_v38 = vsel %vm95_vm3, %v79_v25, %v111_v31  ;;  %v112_v39 = vmul.f32 0.2, %v80_v26 }
   0xc   :  { %v298_v40 = vpack.c.bf16 %v127_v38, %v126_v37  ;;  %v113_v41 = vmul.f32 0.2, %v81_v27  ;;  %v276_v45 = vunpack.c.l.bf16 %v333_v34  ;;  %v277_v46 = vunpack.c.h.bf16 %v333_v34 }
   0xd   :  { %294 = vst [vmem:[%s458_s3] sm:$0xff] %v293_v36   ;;  %v128_v44 = vsel %vm96_vm4, %v80_v26, %v112_v39  ;;  %v280_v47 = vunpack.c.l.bf16 %v334_v35  ;;  %vm98_vm6 = vcmp.ge.f32.partialorder %v82_v42, 0.0  ;;  %vm99_vm7 = vcmp.ge.f32.partialorder %v83_v43, 0.0 }
   0xe   :  { %337 = vst [vmem:[%s458_s3 + $0x8] sm:$0xff] %v298_v40   ;;  %v129_v49 = vsel %vm97_vm5, %v81_v27, %v113_v41  ;;  %v114_v50 = vmul.f32 0.2, %v82_v42  ;;  %v115_v52 = vmul.f32 0.2, %v83_v43  ;;  %v61_v53 = vmul.f32 %v276_v45, %v370_v1 }
   0xf   :  { %v303_v51 = vpack.c.bf16 %v129_v49, %v128_v44  ;;  %v62_v54 = vmul.f32 %v277_v46, %v370_v1  ;;  %v281_v56 = vunpack.c.h.bf16 %v334_v35  ;;  %v63_v57 = vmul.f32 %v280_v47, %v370_v1 }
  0x10   :  { %v130_v55 = vsel %vm98_vm6, %v82_v42, %v114_v50  ;;  %v284_v58 = vunpack.c.l.bf16 %v335_v48  ;;  %v131_v59 = vsel %vm99_vm7, %v83_v43, %v115_v52  ;;  %v84_v60 = vadd.f32 %v384_v7, %v61_v53 }
  0x11   :  { %338 = vst [vmem:[%s458_s3 + $0x10] sm:$0xff] %v303_v51   ;;  %v85_v61 = vadd.f32 %v384_v7, %v62_v54  ;;  %v285_v62 = vunpack.c.h.bf16 %v335_v48  ;;  %v308_v63 = vpack.c.bf16 %v131_v59, %v130_v55  ;;  %v64_v0 = vmul.f32 %v281_v56, %v370_v1 }
  0x12   :  { %v86_v2 = vadd.f32 %v384_v7, %v63_v57  ;;  %v65_v3 = vmul.f32 %v284_v58, %v370_v1  ;;  %vm100_vm8 = vcmp.ge.f32.partialorder %v84_v60, 0.0  ;;  %v116_v5 = vmul.f32 0.2, %v84_v60 }
  0x13   :  { %vm101_vm9 = vcmp.ge.f32.partialorder %v85_v61, 0.0  ;;  %v117_v6 = vmul.f32 0.2, %v85_v61  ;;  %339 = vst [vmem:[%s458_s3 + $0x18] sm:$0xff] %v308_v63   ;;  %v87_v8 = vadd.f32 %v384_v7, %v64_v0  ;;  %v66_v10 = vmul.f32 %v285_v62, %v370_v1 }
  0x14   :  { %vm102_vm10 = vcmp.ge.f32.partialorder %v86_v2, 0.0  ;;  %v118_v9 = vmul.f32 0.2, %v86_v2  ;;  %v132_v11 = vsel %vm100_vm8, %v84_v60, %v116_v5  ;;  %v88_v13 = vadd.f32 %v384_v7, %v65_v3 }
  0x15   :  { %v133_v12 = vsel %vm101_vm9, %v85_v61, %v117_v6  ;;  %v288_v14 = vunpack.c.l.bf16 %v336_v4  ;;  %vm103_vm11 = vcmp.ge.f32.partialorder %v87_v8, 0.0  ;;  %v119_v16 = vmul.f32 0.2, %v87_v8 }
  0x16   :  { %v313_v15 = vpack.c.bf16 %v133_v12, %v132_v11  ;;  %v134_v17 = vsel %vm102_vm10, %v86_v2, %v118_v9  ;;  %v89_v18 = vadd.f32 %v384_v7, %v66_v10  ;;  %vm104_vm12 = vcmp.ge.f32.partialorder %v88_v13, 0.0 }
  0x17   :  { %v120_v19 = vmul.f32 0.2, %v88_v13  ;;  %v289_v20 = vunpack.c.h.bf16 %v336_v4  ;;  %v135_v21 = vsel %vm103_vm11, %v87_v8, %v119_v16  ;;  %v67_v22 = vmul.f32 %v288_v14, %v370_v1 }
  0x18   :  { %340 = vst [vmem:[%s458_s3 + $0x20] sm:$0xff] %v313_v15   ;;  %v318_v23 = vpack.c.bf16 %v135_v21, %v134_v17  ;;  %vm105_vm13 = vcmp.ge.f32.partialorder %v89_v18, 0.0  ;;  %v121_v24 = vmul.f32 0.2, %v89_v18 }
  0x19   :  { %v136_v25 = vsel %vm104_vm12, %v88_v13, %v120_v19  ;;  %v68_v26 = vmul.f32 %v289_v20, %v370_v1  ;;  %v90_v27 = vadd.f32 %v384_v7, %v67_v22 }
  0x1a   :  { %341 = vst [vmem:[%s458_s3 + $0x28] sm:$0xff] %v318_v23   ;;  %v137_v28 = vsel %vm105_vm13, %v89_v18, %v121_v24 }
  0x1b   :  { %v323_v29 = vpack.c.bf16 %v137_v28, %v136_v25  ;;  %v91_v30 = vadd.f32 %v384_v7, %v68_v26  ;;  %vm106_vm14 = vcmp.ge.f32.partialorder %v90_v27, 0.0  ;;  %v122_v31 = vmul.f32 0.2, %v90_v27 }
  0x1d   :  { %342 = vst [vmem:[%s458_s3 + $0x30] sm:$0xff] %v323_v29   ;;  %vm107_vm15 = vcmp.ge.f32.partialorder %v91_v30, 0.0  ;;  %v123_v32 = vmul.f32 0.2, %v91_v30  ;;  %v138_v33 = vsel %vm106_vm14, %v90_v27, %v122_v31 }
  0x1f   :  { %v139_v1 = vsel %vm107_vm15, %v91_v30, %v123_v32 }
  0x20   :  { %v328_v34 = vpack.c.bf16 %v139_v1, %v138_v33 }
  0x22   :  { %343 = vst [vmem:[%s458_s3 + $0x38] sm:$0xff] %v328_v34  }

// kernel: discriminator_forward.17
= control target key start
LH: loop header
LB: loop body
LE: loop exit
PB: predicated region body
PF: predicated region fallthrough
CT: control target
= control target key end

     0   :  { %s2981_s1 = inlined_call_operand.vmem [shape: bf16[1152,128], index: 1, kind: input, shape index: {}]   ;;  %s2982_s0 = inlined_call_operand.vmem [shape: bf16[128,1152], index: 0, kind: input, shape index: {}]   ;;  %s2983_s2 = inlined_call_operand.vmem [shape: bf16[128,128], index: 2, kind: output, shape index: {0}]   ;;  %s2984_s3 = inlined_call_operand.vmem [shape: f32[1,8,128], index: 3, kind: output, shape index: {1}]   ;;  %s2985_s4 = inlined_call_operand.vmem [shape: f32[1,8,128], index: 4, kind: output, shape index: {2}]  }
   0x1   :  { %v2219_v0 = vld [vmem:[%s2981_s1 + $0x78] sm:$0xff]   ;;  %v2223_v4 = vld [vmem:[%s2981_s1 + $0x70] sm:$0xff]   ;;  %v2227_v8 = vld [vmem:[%s2981_s1 + $0x68] sm:$0xff]  }
   0x2   :  { %v2220_v1 = vld [vmem:[%s2981_s1 + $0xf8] sm:$0xff]   ;;  %1899 = vmatprep.subr.bf16.mxu0 %v2219_v0  ;;  %v2224_v5 = vld [vmem:[%s2981_s1 + $0xf0] sm:$0xff]   ;;  %v2228_v9 = vld [vmem:[%s2981_s1 + $0xe8] sm:$0xff]  }
   0x3   :  { %v2221_v2 = vld [vmem:[%s2981_s1 + $0x38] sm:$0xff]   ;;  %1963 = vmatprep.subr.bf16.mxu1 %v2220_v1  ;;  %v2225_v6 = vld [vmem:[%s2981_s1 + $0x30] sm:$0xff]   ;;  %v2229_v10 = vld [vmem:[%s2981_s1 + $0x28] sm:$0xff]  }
   0x4   :  { %v2222_v3 = vld [vmem:[%s2981_s1 + $0xb8] sm:$0xff]   ;;  %1900 = vmatpush3.bf16.msra.mxu0 %v2221_v2  ;;  %v2226_v7 = vld [vmem:[%s2981_s1 + $0xb0] sm:$0xff]   ;;  %v2230_v11 = vld [vmem:[%s2981_s1 + $0xa8] sm:$0xff]  }
   0x5   :  { %1964 = vmatpush3.bf16.msra.mxu1 %v2222_v3  ;;  %1901 = vmatprep.subr.bf16.mxu0 %v2223_v4  ;;  %v2231_v12 = vld [vmem:[%s2981_s1 + $0x60] sm:$0xff]   ;;  %v2235_v16 = vld [vmem:[%s2981_s1 + $0x58] sm:$0xff]   ;;  %v2239_v20 = vld [vmem:[%s2981_s1 + $0x50] sm:$0xff]  }
   0x6   :  { %1965 = vmatprep.subr.bf16.mxu1 %v2224_v5  ;;  %v2232_v13 = vld [vmem:[%s2981_s1 + $0xe0] sm:$0xff]   ;;  %v2236_v17 = vld [vmem:[%s2981_s1 + $0xd8] sm:$0xff]   ;;  %v2240_v21 = vld [vmem:[%s2981_s1 + $0xd0] sm:$0xff]  }
   0x7   :  { %v2233_v14 = vld [vmem:[%s2981_s1 + $0x20] sm:$0xff]   ;;  %v2237_v18 = vld [vmem:[%s2981_s1 + $0x18] sm:$0xff]   ;;  %v2241_v22 = vld [vmem:[%s2981_s1 + $0x10] sm:$0xff]  }
   0x8   :  { %1902 = vmatpush3.bf16.msra.mxu0 %v2225_v6  ;;  %v2234_v15 = vld [vmem:[%s2981_s1 + $0xa0] sm:$0xff]   ;;  %v2238_v19 = vld [vmem:[%s2981_s1 + $0x98] sm:$0xff]   ;;  %v2242_v23 = vld [vmem:[%s2981_s1 + $0x90] sm:$0xff]  }
   0x9   :  { %1966 = vmatpush3.bf16.msra.mxu1 %v2226_v7  ;;  %1903 = vmatprep.subr.bf16.mxu0 %v2227_v8  ;;  %v2243_v24 = vld [vmem:[%s2981_s1 + $0x48] sm:$0xff]   ;;  %v2247_v28 = vld [vmem:[%s2981_s1 + $0x40] sm:$0xff]   ;;  %v2257_v36 = vld [vmem:[%s2981_s1 + $0x178] sm:$0xff]  }
   0xa   :  { %1967 = vmatprep.subr.bf16.mxu1 %v2228_v9  ;;  %v2244_v25 = vld [vmem:[%s2981_s1 + $0xc8] sm:$0xff]   ;;  %v2248_v29 = vld [vmem:[%s2981_s1 + $0xc0] sm:$0xff]   ;;  %v2258_v37 = vld [vmem:[%s2981_s1 + $0x138] sm:$0xff]  }
   0xb   :  { %v2245_v26 = vld [vmem:[%s2981_s1 + $0x8] sm:$0xff]   ;;  %v2249_v30 = vld [vmem:[%s2981_s1] sm:$0xff]   ;;  %v2261_v39 = vld [vmem:[%s2982_s0 + $0x54] ss:$36 sps:$4 sm:$0xff]  }
   0xc   :  { %1904 = vmatpush3.bf16.msra.mxu0 %v2229_v10  ;;  %v2246_v27 = vld [vmem:[%s2981_s1 + $0x88] sm:$0xff]   ;;  %v2250_v31 = vld [vmem:[%s2981_s1 + $0x80] sm:$0xff]   ;;  %v2264_v41 = vld [vmem:[%s2982_s0 + $0x50] ss:$36 sps:$4 sm:$0xff]  }
   0xd   :  { %1968 = vmatpush3.bf16.msra.mxu1 %v2230_v11  ;;  %1905 = vmatprep.subr.bf16.mxu0 %v2231_v12  ;;  %v2251_v32 = vld [vmem:[%s2982_s0] ss:$36 sps:$4 sm:$0xff]   ;;  %v2254_v34 = vld [vmem:[%s2982_s0 + $0x8] ss:$36 sps:$4 sm:$0xff]   ;;  %v2265_v42 = vld [vmem:[%s2981_s1 + $0x170] sm:$0xff]  }
   0xe   :  { %1969 = vmatprep.subr.bf16.mxu1 %v2232_v13  ;;  %v2253_v33 = vld [vmem:[%s2982_s0 + $0x4] ss:$36 sps:$4 sm:$0xff]   ;;  %v2256_v35 = vld [vmem:[%s2982_s0 + $0xc] ss:$36 sps:$4 sm:$0xff]   ;;  %v2267_v44 = vld [vmem:[%s2982_s0 + $0x94] ss:$36 sps:$4 sm:$0xff]  }
   0xf   :  { %1071 = vmatprep.mubr.bf16.mxu0 %v2253_v33  ;;  %1168 = vmatprep.mubr.bf16.mxu1 %v2256_v35  ;;  %v2259_v38 = vld [vmem:[%s2982_s0 + $0x4c] ss:$36 sps:$4 sm:$0xff]   ;;  %v2269_v45 = vld [vmem:[%s2982_s0 + $0x9c] ss:$36 sps:$4 sm:$0xff]   ;;  %v2279_v53 = vld [vmem:[%s2982_s0 + $0xe4] ss:$36 sps:$4 sm:$0xff]  }
  0x10   :  { %1906 = vmatpush3.bf16.msra.mxu0 %v2233_v14  ;;  %v2263_v40 = vld [vmem:[%s2982_s0 + $0x48] ss:$36 sps:$4 sm:$0xff]   ;;  %v2266_v43 = vld [vmem:[%s2981_s1 + $0x130] sm:$0xff]   ;;  %v2274_v47 = vld [vmem:[%s2981_s1 + $0x1f8] sm:$0xff]  }
  0x11   :  { %1970 = vmatpush3.bf16.msra.mxu1 %v2234_v15  ;;  %1907 = vmatprep.subr.bf16.mxu0 %v2235_v16  ;;  %v2273_v46 = vld [vmem:[%s2981_s1 + $0x168] sm:$0xff]   ;;  %v2271_v48 = vld [vmem:[%s2982_s0 + $0x90] ss:$36 sps:$4 sm:$0xff]   ;;  %v2276_v50 = vld [vmem:[%s2981_s1 + $0x1b8] sm:$0xff]  }
  0x12   :  { %1971 = vmatprep.subr.bf16.mxu1 %v2236_v17  ;;  %v2275_v49 = vld [vmem:[%s2981_s1 + $0x128] sm:$0xff]   ;;  %v2272_v51 = vld [vmem:[%s2982_s0 + $0x98] ss:$36 sps:$4 sm:$0xff]   ;;  %v2283_v54 = vld [vmem:[%s2981_s1 + $0x160] sm:$0xff]  }
  0x13   :  { %v2277_v52 = vld [vmem:[%s2982_s0 + $0xdc] ss:$36 sps:$4 sm:$0xff]   ;;  %v2284_v55 = vld [vmem:[%s2981_s1 + $0x1f0] sm:$0xff]   ;;  %v2287_v60 = vld [vmem:[%s2982_s0 + $0x124] ss:$36 sps:$4 sm:$0xff]  }
  0x14   :  { %1908 = vmatpush3.bf16.msra.mxu0 %v2237_v18  ;;  %v2285_v56 = vld [vmem:[%s2981_s1 + $0x120] sm:$0xff]   ;;  %v2286_v57 = vld [vmem:[%s2981_s1 + $0x1b0] sm:$0xff]   ;;  %v2281_v58 = vld [vmem:[%s2982_s0 + $0xd8] ss:$36 sps:$4 sm:$0xff]  }
  0x15   :  { %1972 = vmatpush3.bf16.msra.mxu1 %v2238_v19  ;;  %1909 = vmatprep.subr.bf16.mxu0 %v2239_v20  ;;  %v2282_v59 = vld [vmem:[%s2982_s0 + $0xe0] ss:$36 sps:$4 sm:$0xff]   ;;  %v2289_v61 = vld [vmem:[%s2982_s0 + $0x12c] ss:$36 sps:$4 sm:$0xff]   ;;  %v2293_v62 = vld [vmem:[%s2981_s1 + $0x158] sm:$0xff]  }
  0x16   :  { %1973 = vmatprep.subr.bf16.mxu1 %v2240_v21  ;;  %v2294_v63 = vld [vmem:[%s2981_s1 + $0x1e8] sm:$0xff]   ;;  %v2295_v0 = vld [vmem:[%s2981_s1 + $0x118] sm:$0xff]   ;;  %v2291_v2 = vld [vmem:[%s2982_s0 + $0x120] ss:$36 sps:$4 sm:$0xff]  }
  0x17   :  { %v2296_v1 = vld [vmem:[%s2981_s1 + $0x1a8] sm:$0xff]   ;;  %v2299_v5 = vld [vmem:[%s2982_s0 + $0x174] ss:$36 sps:$4 sm:$0xff]   ;;  %v2304_v7 = vld [vmem:[%s2981_s1 + $0x1e0] sm:$0xff]  }
  0x18   :  { %1910 = vmatpush3.bf16.msra.mxu0 %v2241_v22  ;;  %v2292_v3 = vld [vmem:[%s2982_s0 + $0x128] ss:$36 sps:$4 sm:$0xff]   ;;  %v2303_v6 = vld [vmem:[%s2981_s1 + $0x150] sm:$0xff]   ;;  %v2306_v9 = vld [vmem:[%s2981_s1 + $0x1a0] sm:$0xff]  }
  0x19   :  { %1974 = vmatpush3.bf16.msra.mxu1 %v2242_v23  ;;  %1911 = vmatprep.subr.bf16.mxu0 %v2243_v24  ;;  %v2297_v4 = vld [vmem:[%s2982_s0 + $0x16c] ss:$36 sps:$4 sm:$0xff]   ;;  %v2307_v12 = vld [vmem:[%s2982_s0 + $0x1b4] ss:$36 sps:$4 sm:$0xff]   ;;  %v2309_v14 = vld [vmem:[%s2982_s0 + $0x1bc] ss:$36 sps:$4 sm:$0xff]  }
  0x1a   :  { %1975 = vmatprep.subr.bf16.mxu1 %v2244_v25  ;;  %v2305_v8 = vld [vmem:[%s2981_s1 + $0x110] sm:$0xff]   ;;  %v2301_v10 = vld [vmem:[%s2982_s0 + $0x168] ss:$36 sps:$4 sm:$0xff]   ;;  %v2314_v15 = vld [vmem:[%s2981_s1 + $0x1d8] sm:$0xff]  }
  0x1b   :  { %v2302_v11 = vld [vmem:[%s2982_s0 + $0x170] ss:$36 sps:$4 sm:$0xff]   ;;  %v2313_v13 = vld [vmem:[%s2981_s1 + $0x148] sm:$0xff]   ;;  %v2316_v17 = vld [vmem:[%s2981_s1 + $0x198] sm:$0xff]  }
  0x1c   :  { %1912 = vmatpush3.bf16.msra.mxu0 %v2245_v26  ;;  %v2315_v16 = vld [vmem:[%s2981_s1 + $0x108] sm:$0xff]   ;;  %v2317_v18 = vld [vmem:[%s2981_s1 + $0x1d0] sm:$0xff]   ;;  %v2312_v21 = vld [vmem:[%s2982_s0 + $0x1b8] ss:$36 sps:$4 sm:$0xff]  }
  0x1d   :  { %1976 = vmatpush3.bf16.msra.mxu1 %v2246_v27  ;;  %1913 = vmatprep.subr.bf16.mxu0 %v2247_v28  ;;  %v2318_v19 = vld [vmem:[%s2981_s1 + $0x190] sm:$0xff]   ;;  %v2319_v22 = vld [vmem:[%s2982_s0 + $0x1fc] ss:$36 sps:$4 sm:$0xff]   ;;  %v2321_v23 = vld [vmem:[%s2982_s0 + $0x204] ss:$36 sps:$4 sm:$0xff]  }
  0x1e   :  { %1977 = vmatprep.subr.bf16.mxu1 %v2248_v29  ;;  %v2311_v20 = vld [vmem:[%s2982_s0 + $0x1b0] ss:$36 sps:$4 sm:$0xff]   ;;  %v2325_v24 = vld [vmem:[%s2981_s1 + $0x140] sm:$0xff]   ;;  %v2326_v25 = vld [vmem:[%s2981_s1 + $0x1c8] sm:$0xff]  }
  0x1f   :  { %v2327_v26 = vld [vmem:[%s2981_s1 + $0x100] sm:$0xff]   ;;  %v2328_v27 = vld [vmem:[%s2981_s1 + $0x188] sm:$0xff]   ;;  %v2323_v29 = vld [vmem:[%s2982_s0 + $0x1f8] ss:$36 sps:$4 sm:$0xff]  }
  0x20   :  { %1914 = vmatpush3.bf16.msra.mxu0 %v2249_v30  ;;  %v2329_v28 = vld [vmem:[%s2981_s1 + $0x1c0] sm:$0xff]   ;;  %v2333_v33 = vld [vmem:[%s2982_s0 + $0x14] ss:$36 sps:$4 sm:$0xff]  }
  0x21   :  { %1978 = vmatpush3.bf16.msra.mxu1 %v2250_v31  ;;  %2027 = vmatprep.subr.bf16.mxu0 %v2257_v36  ;;  %v2324_v30 = vld [vmem:[%s2982_s0 + $0x200] ss:$36 sps:$4 sm:$0xff]   ;;  %v2331_v35 = vld [vmem:[%s2982_s0 + $0x10] ss:$36 sps:$4 sm:$0xff]   ;;  %v2334_v36 = vld [vmem:[%s2982_s0 + $0x18] ss:$36 sps:$4 sm:$0xff]  }
  0x22   :  { %2091 = vmatprep.subr.bf16.mxu1 %v2274_v47  ;;  %v2330_v31 = vld [vmem:[%s2981_s1 + $0x180] sm:$0xff]  }
  0x23   :  { %1072 = vmatmul.mubr.bf16.vlgmr.msra.gmra.mxu0 %v2251_v32  ;;  %v2337_v32 = vld [vmem:[%s2981_s1 + $0x238] sm:$0xff]   ;;  %v2349_v47 = vld [vmem:[%s2982_s0 + $0xa0] ss:$36 sps:$4 sm:$0xff]  }
  0x24   :  { %1169 = vmatmul.mubr.bf16.vlgmr.msra.gmra.mxu1 %v2254_v34  ;;  %2028 = vmatpush3.bf16.msra.mxu0 %v2258_v37  ;;  %v2336_v34 = vld [vmem:[%s2982_s0 + $0x1c] ss:$36 sps:$4 sm:$0xff]  }
  0x25   :  { %1079 = vmatprep.mubr.bf16.mxu0 %v2259_v38  ;;  %1176 = vmatprep.mubr.bf16.mxu1 %v2261_v39  ;;  %v2338_v37 = vld [vmem:[%s2982_s0 + $0x5c] ss:$36 sps:$4 sm:$0xff]   ;;  %v2340_v38 = vld [vmem:[%s2982_s0 + $0x64] ss:$36 sps:$4 sm:$0xff]   ;;  %v2344_v39 = vld [vmem:[%s2981_s1 + $0x230] sm:$0xff]  }
  0x26   :  { %2029 = vmatprep.subr.bf16.mxu0 %v2265_v42  ;;  %2092 = vmatpush3.bf16.msra.mxu1 %v2276_v50  ;;  %v2343_v42 = vld [vmem:[%s2982_s0 + $0x60] ss:$36 sps:$4 sm:$0xff]   ;;  %v2354_v50 = vld [vmem:[%s2982_s0 + $0xf4] ss:$36 sps:$4 sm:$0xff]  }
  0x27   :  { %2093 = vmatprep.subr.bf16.mxu1 %v2284_v55  ;;  %v2359_v55 = vld [vmem:[%s2982_s0 + $0x134] ss:$36 sps:$4 sm:$0xff]  }
  0x28   :  { %2030 = vmatpush3.bf16.msra.mxu0 %v2266_v43  ;;  %v2345_v43 = vld [vmem:[%s2982_s0 + $0xa4] ss:$36 sps:$4 sm:$0xff]  }
  0x29   :  { %2031 = vmatprep.subr.bf16.mxu0 %v2273_v46  ;;  %v2365_v46 = vld [vmem:[%s2981_s1 + $0x218] sm:$0xff]  }
  0x2a   :  { %2094 = vmatpush3.bf16.msra.mxu1 %v2286_v57  ;;  %v2386_v57 = vld [vmem:[%s2981_s1 + $0x200] sm:$0xff]  }
  0x2b   :  { %1080 = vmatmul.mubr.bf16.gmra.mxu0 %v2263_v40  ;;  %2095 = vmatprep.subr.bf16.mxu1 %v2294_v63  ;;  %v2351_v40 = vld [vmem:[%s2981_s1 + $0x228] sm:$0xff]   ;;  %v2371_v63 = vld [vmem:[%s2982_s0 + $0x180] ss:$36 sps:$4 sm:$0xff]  }
  0x2c   :  { %1177 = vmatmul.mubr.bf16.gmra.mxu1 %v2264_v41  ;;  %1087 = vmatprep.mubr.bf16.mxu0 %v2267_v44  ;;  %v2342_v41 = vld [vmem:[%s2982_s0 + $0x58] ss:$36 sps:$4 sm:$0xff]   ;;  %v2347_v44 = vld [vmem:[%s2982_s0 + $0xac] ss:$36 sps:$4 sm:$0xff]  }
  0x2d   :  { %1184 = vmatprep.mubr.bf16.mxu1 %v2269_v45  ;;  %2032 = vmatpush3.bf16.msra.mxu0 %v2275_v49  ;;  %v2358_v45 = vld [vmem:[%s2981_s1 + $0x220] sm:$0xff]   ;;  %v2352_v49 = vld [vmem:[%s2982_s0 + $0xec] ss:$36 sps:$4 sm:$0xff]  }
  0x2e   :  { %2033 = vmatprep.subr.bf16.mxu0 %v2283_v54  ;;  %2096 = vmatpush3.bf16.msra.mxu1 %v2296_v1  ;;  %v2357_v54 = vld [vmem:[%s2982_s0 + $0xf0] ss:$36 sps:$4 sm:$0xff]  }
  0x2f   :  { %2097 = vmatprep.subr.bf16.mxu1 %v2304_v7  ;;  %v2375_v1 = vld [vmem:[%s2982_s0 + $0x1cc] ss:$36 sps:$4 sm:$0xff]  }
  0x30   :  { %v2385_v7 = vld [vmem:[%s2982_s0 + $0x210] ss:$36 sps:$4 sm:$0xff]  }
  0x31   :  { %2034 = vmatpush3.bf16.msra.mxu0 %v2285_v56  ;;  %v2361_v56 = vld [vmem:[%s2982_s0 + $0x13c] ss:$36 sps:$4 sm:$0xff]  }
  0x32   :  { %2035 = vmatprep.subr.bf16.mxu0 %v2293_v62  ;;  %2098 = vmatpush3.bf16.msra.mxu1 %v2306_v9  ;;  %v2370_v62 = vld [vmem:[%s2982_s0 + $0x178] ss:$36 sps:$4 sm:$0xff]   ;;  %v2388_v9 = vld [vmem:[%s2982_s0 + $0x140] ss:$36 sps:$4 sm:$0xff]  }
  0x33   :  { %1088 = vmatmul.mubr.bf16.gmra.mxu0 %v2271_v48  ;;  %2099 = vmatprep.subr.bf16.mxu1 %v2314_v15  ;;  %v2350_v48 = vld [vmem:[%s2982_s0 + $0xa8] ss:$36 sps:$4 sm:$0xff]   ;;  %v2394_v15 = vld [vmem:[%s2982_s0 + $0x218] ss:$36 sps:$4 sm:$0xff]  }
  0x34   :  { %1185 = vmatmul.mubr.bf16.gmra.mxu1 %v2272_v51  ;;  %1095 = vmatprep.mubr.bf16.mxu0 %v2277_v52  ;;  %v2372_v51 = vld [vmem:[%s2981_s1 + $0x210] sm:$0xff]   ;;  %v2356_v52 = vld [vmem:[%s2982_s0 + $0xe8] ss:$36 sps:$4 sm:$0xff]  }
  0x35   :  { %1192 = vmatprep.mubr.bf16.mxu1 %v2279_v53  ;;  %2036 = vmatpush3.bf16.msra.mxu0 %v2295_v0  ;;  %v2379_v53 = vld [vmem:[%s2981_s1 + $0x208] sm:$0xff]  }
  0x36   :  { %2037 = vmatprep.subr.bf16.mxu0 %v2303_v6  ;;  %2100 = vmatpush3.bf16.msra.mxu1 %v2316_v17  ;;  %v2373_v0 = vld [vmem:[%s2982_s0 + $0x1c4] ss:$36 sps:$4 sm:$0xff]  }
  0x37   :  { %2101 = vmatprep.subr.bf16.mxu1 %v2317_v18  ;;  %v2384_v6 = vld [vmem:[%s2982_s0 + $0x208] ss:$36 sps:$4 sm:$0xff]  }
  0x39   :  { %2038 = vmatpush3.bf16.msra.mxu0 %v2305_v8  ;;  %v2387_v8 = vld [vmem:[%s2982_s0 + $0x20] ss:$36 sps:$4 sm:$0xff]  }
  0x3a   :  { %2039 = vmatprep.subr.bf16.mxu0 %v2313_v13  ;;  %2102 = vmatpush3.bf16.msra.mxu1 %v2318_v19  ;;  %v2392_v13 = vld [vmem:[%s2982_s0 + $0x1d0] ss:$36 sps:$4 sm:$0xff]  }
  0x3b   :  { %1096 = vmatmul.mubr.bf16.gmra.mxu0 %v2281_v58  ;;  %2103 = vmatprep.subr.bf16.mxu1 %v2326_v25  ;;  %v2363_v58 = vld [vmem:[%s2982_s0 + $0x130] ss:$36 sps:$4 sm:$0xff]  }
  0x3c   :  { %1193 = vmatmul.mubr.bf16.gmra.mxu1 %v2282_v59  ;;  %1103 = vmatprep.mubr.bf16.mxu0 %v2287_v60  ;;  %v2364_v59 = vld [vmem:[%s2982_s0 + $0x138] ss:$36 sps:$4 sm:$0xff]  }
  0x3d   :  { %1200 = vmatprep.mubr.bf16.mxu1 %v2289_v61  ;;  %2040 = vmatpush3.bf16.msra.mxu0 %v2315_v16  ;;  %v2366_v60 = vld [vmem:[%s2982_s0 + $0x17c] ss:$36 sps:$4 sm:$0xff]   ;;  %v2368_v61 = vld [vmem:[%s2982_s0 + $0x184] ss:$36 sps:$4 sm:$0xff]  }
  0x3e   :  { %2041 = vmatprep.subr.bf16.mxu0 %v2325_v24  ;;  %2104 = vmatpush3.bf16.msra.mxu1 %v2328_v27 }
  0x3f   :  { %2105 = vmatprep.subr.bf16.mxu1 %v2329_v28 }
  0x41   :  { %2042 = vmatpush3.bf16.msra.mxu0 %v2327_v26 }
  0x42   :  { %2171 = vmatprep.subr.bf16.mxu0 %v2337_v32  ;;  %2106 = vmatpush3.bf16.msra.mxu1 %v2330_v31 }
  0x43   :  { %1104 = vmatmul.mubr.bf16.gmra.mxu0 %v2291_v2  ;;  %2203 = vmatprep.subr.bf16.mxu1 %v2337_v32  ;;  %v2377_v2 = vld [vmem:[%s2982_s0 + $0x1c0] ss:$36 sps:$4 sm:$0xff]  }
  0x44   :  { %1201 = vmatmul.mubr.bf16.gmra.mxu1 %v2292_v3  ;;  %1111 = vmatprep.mubr.bf16.mxu0 %v2297_v4  ;;  %v2378_v3 = vld [vmem:[%s2982_s0 + $0x1c8] ss:$36 sps:$4 sm:$0xff]  }
  0x45   :  { %1208 = vmatprep.mubr.bf16.mxu1 %v2299_v5  ;;  %v2380_v4 = vld [vmem:[%s2982_s0 + $0x20c] ss:$36 sps:$4 sm:$0xff]   ;;  %v2382_v5 = vld [vmem:[%s2982_s0 + $0x214] ss:$36 sps:$4 sm:$0xff]  }
  0x4b   :  { %1112 = vmatmul.mubr.bf16.gmra.mxu0 %v2301_v10  ;;  %v2389_v10 = vld [vmem:[%s2982_s0 + $0x68] ss:$36 sps:$4 sm:$0xff]  }
  0x4c   :  { %1209 = vmatmul.mubr.bf16.gmra.mxu1 %v2302_v11  ;;  %1119 = vmatprep.mubr.bf16.mxu0 %v2307_v12  ;;  %v2390_v11 = vld [vmem:[%s2982_s0 + $0x188] ss:$36 sps:$4 sm:$0xff]   ;;  %v2391_v12 = vld [vmem:[%s2982_s0 + $0xb0] ss:$36 sps:$4 sm:$0xff]  }
  0x4d   :  { %1216 = vmatprep.mubr.bf16.mxu1 %v2309_v14  ;;  %v2393_v14 = vld [vmem:[%s2982_s0 + $0xf8] ss:$36 sps:$4 sm:$0xff]  }
  0x53   :  { %1120 = vmatmul.mubr.bf16.gmra.mxu0 %v2311_v20 }
  0x54   :  { %1217 = vmatmul.mubr.bf16.gmra.mxu1 %v2312_v21  ;;  %1127 = vmatprep.mubr.bf16.mxu0 %v2319_v22 }
  0x55   :  { %1224 = vmatprep.mubr.bf16.mxu1 %v2321_v23 }
  0x5b   :  { %1128 = vmatmul.mubr.bf16.gmra.mxu0 %v2323_v29 }
  0x5c   :  { %1225 = vmatmul.mubr.bf16.gmra.mxu1 %v2324_v30  ;;  %1265 = vmatprep.mubr.bf16.mxu0 %v2333_v33 }
  0x5d   :  { %1362 = vmatprep.mubr.bf16.mxu1 %v2336_v34 }
  0x63   :  { %1266 = vmatmul.mubr.bf16.vlgmr.msra.gmra.mxu0 %v2331_v35 }
  0x64   :  { %1363 = vmatmul.mubr.bf16.vlgmr.msra.gmra.mxu1 %v2334_v36  ;;  %2172 = vmatpush3.bf16.msra.mxu0 %v2337_v32 }
  0x65   :  { %1273 = vmatprep.mubr.bf16.mxu0 %v2338_v37  ;;  %1370 = vmatprep.mubr.bf16.mxu1 %v2340_v38 }
  0x66   :  { %2173 = vmatprep.subr.bf16.mxu0 %v2344_v39  ;;  %2211 = vmatpush3.bf16.msra.mxu1 %v2337_v32 }
  0x67   :  { %2204 = vmatprep.subr.bf16.mxu1 %v2344_v39 }
  0x68   :  { %2174 = vmatpush3.bf16.msra.mxu0 %v2344_v39 }
  0x69   :  { %2175 = vmatprep.subr.bf16.mxu0 %v2351_v40 }
  0x6a   :  { %2212 = vmatpush3.bf16.msra.mxu1 %v2344_v39 }
  0x6b   :  { %1274 = vmatmul.mubr.bf16.gmra.mxu0 %v2342_v41  ;;  %2205 = vmatprep.subr.bf16.mxu1 %v2351_v40 }
  0x6c   :  { %1371 = vmatmul.mubr.bf16.gmra.mxu1 %v2343_v42  ;;  %1281 = vmatprep.mubr.bf16.mxu0 %v2345_v43 }
  0x6d   :  { %1378 = vmatprep.mubr.bf16.mxu1 %v2347_v44  ;;  %2176 = vmatpush3.bf16.msra.mxu0 %v2351_v40 }
  0x6e   :  { %2177 = vmatprep.subr.bf16.mxu0 %v2358_v45  ;;  %2213 = vmatpush3.bf16.msra.mxu1 %v2351_v40 }
  0x6f   :  { %2206 = vmatprep.subr.bf16.mxu1 %v2358_v45 }
  0x71   :  { %2178 = vmatpush3.bf16.msra.mxu0 %v2358_v45 }
  0x72   :  { %2179 = vmatprep.subr.bf16.mxu0 %v2365_v46  ;;  %2214 = vmatpush3.bf16.msra.mxu1 %v2358_v45 }
  0x73   :  { %1282 = vmatmul.mubr.bf16.gmra.mxu0 %v2349_v47  ;;  %2207 = vmatprep.subr.bf16.mxu1 %v2365_v46 }
  0x74   :  { %1379 = vmatmul.mubr.bf16.gmra.mxu1 %v2350_v48  ;;  %1289 = vmatprep.mubr.bf16.mxu0 %v2352_v49 }
  0x75   :  { %1386 = vmatprep.mubr.bf16.mxu1 %v2354_v50  ;;  %2180 = vmatpush3.bf16.msra.mxu0 %v2365_v46 }
  0x76   :  { %2181 = vmatprep.subr.bf16.mxu0 %v2372_v51  ;;  %2215 = vmatpush3.bf16.msra.mxu1 %v2365_v46 }
  0x77   :  { %2208 = vmatprep.subr.bf16.mxu1 %v2372_v51 }
  0x79   :  { %2182 = vmatpush3.bf16.msra.mxu0 %v2372_v51 }
  0x7a   :  { %2183 = vmatprep.subr.bf16.mxu0 %v2379_v53  ;;  %2216 = vmatpush3.bf16.msra.mxu1 %v2372_v51 }
  0x7b   :  { %1290 = vmatmul.mubr.bf16.gmra.mxu0 %v2356_v52  ;;  %2209 = vmatprep.subr.bf16.mxu1 %v2379_v53 }
  0x7c   :  { %1387 = vmatmul.mubr.bf16.gmra.mxu1 %v2357_v54  ;;  %1297 = vmatprep.mubr.bf16.mxu0 %v2359_v55 }
  0x7d   :  { %1394 = vmatprep.mubr.bf16.mxu1 %v2361_v56  ;;  %2184 = vmatpush3.bf16.msra.mxu0 %v2379_v53 }
  0x7e   :  { %2185 = vmatprep.subr.bf16.mxu0 %v2386_v57  ;;  %2217 = vmatpush3.bf16.msra.mxu1 %v2379_v53 }
  0x7f   :  { %2210 = vmatprep.subr.bf16.mxu1 %v2386_v57 }
  0x81   :  { %2186 = vmatpush3.bf16.msra.mxu0 %v2386_v57 }
  0x82   :  { %2218 = vmatpush3.bf16.msra.mxu1 %v2386_v57 }
  0x83   :  { %1298 = vmatmul.mubr.bf16.gmra.mxu0 %v2363_v58 }
  0x84   :  { %1395 = vmatmul.mubr.bf16.gmra.mxu1 %v2364_v59  ;;  %1305 = vmatprep.mubr.bf16.mxu0 %v2366_v60 }
  0x85   :  { %1402 = vmatprep.mubr.bf16.mxu1 %v2368_v61 }
  0x8b   :  { %1306 = vmatmul.mubr.bf16.gmra.mxu0 %v2370_v62 }
  0x8c   :  { %1403 = vmatmul.mubr.bf16.gmra.mxu1 %v2371_v63  ;;  %1313 = vmatprep.mubr.bf16.mxu0 %v2373_v0 }
  0x8d   :  { %1410 = vmatprep.mubr.bf16.mxu1 %v2375_v1 }
  0x93   :  { %1314 = vmatmul.mubr.bf16.gmra.mxu0 %v2377_v2 }
  0x94   :  { %1411 = vmatmul.mubr.bf16.gmra.mxu1 %v2378_v3  ;;  %1321 = vmatprep.mubr.bf16.mxu0 %v2380_v4 }
  0x95   :  { %1418 = vmatprep.mubr.bf16.mxu1 %v2382_v5 }
  0x9b   :  { %1322 = vmatmul.mubr.bf16.gmra.mxu0 %v2384_v6 }
  0x9c   :  { %1419 = vmatmul.mubr.bf16.gmra.mxu1 %v2385_v7  ;;  %2187 = vmatprep.mubr.bf16.mxu0 %v2387_v8 }
  0x9d   :  { %2195 = vmatprep.mubr.bf16.mxu1 %v2388_v9 }
  0xa3   :  { %2188 = vmatmul.mubr.bf16.vlgmr.msra.gmra.mxu0 %v2389_v10 }
  0xa4   :  { %2196 = vmatmul.mubr.bf16.vlgmr.msra.gmra.mxu1 %v2390_v11  ;;  %2191 = vmatprep.mubr.bf16.mxu0 %v2391_v12 }
  0xa5   :  { %2199 = vmatprep.mubr.bf16.mxu1 %v2392_v13 }
  0xab   :  { %2192 = vmatmul.mubr.bf16.gmra.mxu0 %v2393_v14 }
  0xac   :  { %2200 = vmatmul.mubr.bf16.gmra.mxu1 %v2394_v15 }
  0xe3   :  { %v1915_v16 = vpop.f32.mrf.mxu0 }
  0xe4   :  { %v1979_v17 = vpop.f32.mrf.mxu1 }
  0xe5   :  { %v1916_v18 = vpop.f32.mrf.mxu0 }
  0xe6   :  { %v1917_v19 = vadd.f32 %v1916_v18, %v1915_v16  ;;  %v1980_v20 = vpop.f32.mrf.mxu1 }
  0xe7   :  { %v1981_v21 = vadd.f32 %v1980_v20, %v1979_v17  ;;  %v1918_v22 = vpop.f32.mrf.mxu0 }
  0xe8   :  { %v1982_v23 = vpop.f32.mrf.mxu1 }
  0xe9   :  { %v2852_v24 = vadd.f32 %v1981_v21, %v1917_v19  ;;  %v1919_v25 = vpop.f32.mrf.mxu0 }
  0xea   :  { %v1920_v26 = vadd.f32 %v1919_v25, %v1918_v22  ;;  %v1983_v27 = vpop.f32.mrf.mxu1 }
  0xeb   :  { %v1984_v28 = vadd.f32 %v1983_v27, %v1982_v23  ;;  %v1921_v29 = vpop.f32.mrf.mxu0 }
  0xec   :  { %v1985_v30 = vpop.f32.mrf.mxu1 }
  0xed   :  { %v2854_v31 = vadd.f32 %v1984_v28, %v1920_v26  ;;  %v1922_v32 = vpop.f32.mrf.mxu0 }
  0xee   :  { %v1923_v33 = vadd.f32 %v1922_v32, %v1921_v29  ;;  %v1986_v34 = vpop.f32.mrf.mxu1 }
  0xef   :  { %v1987_v35 = vadd.f32 %v1986_v34, %v1985_v30  ;;  %v1924_v36 = vpop.f32.mrf.mxu0 }
  0xf0   :  { %v1988_v37 = vpop.f32.mrf.mxu1 }
  0xf1   :  { %v2856_v38 = vadd.f32 %v1987_v35, %v1923_v33  ;;  %v1925_v39 = vpop.f32.mrf.mxu0 }
  0xf2   :  { %v1926_v40 = vadd.f32 %v1925_v39, %v1924_v36  ;;  %v1989_v41 = vpop.f32.mrf.mxu1 }
  0xf3   :  { %v1990_v42 = vadd.f32 %v1989_v41, %v1988_v37  ;;  %v1927_v43 = vpop.f32.mrf.mxu0 }
  0xf4   :  { %v1991_v44 = vpop.f32.mrf.mxu1 }
  0xf5   :  { %v2858_v45 = vadd.f32 %v1990_v42, %v1926_v40  ;;  %v1928_v46 = vpop.f32.mrf.mxu0 }
  0xf6   :  { %v1929_v47 = vadd.f32 %v1928_v46, %v1927_v43  ;;  %v1992_v48 = vpop.f32.mrf.mxu1 }
  0xf7   :  { %v1993_v49 = vadd.f32 %v1992_v48, %v1991_v44  ;;  %v1930_v50 = vpop.f32.mrf.mxu0 }
  0xf8   :  { %v1994_v51 = vpop.f32.mrf.mxu1 }
  0xf9   :  { %v2860_v52 = vadd.f32 %v1993_v49, %v1929_v47  ;;  %v1931_v53 = vpop.f32.mrf.mxu0 }
  0xfa   :  { %v1932_v54 = vadd.f32 %v1931_v53, %v1930_v50  ;;  %v1995_v55 = vpop.f32.mrf.mxu1 }
  0xfb   :  { %2986 = vst [vmem:[#allocation2_spill] sm:$0xff] %v2860_v52  ;;  %v1996_v56 = vadd.f32 %v1995_v55, %v1994_v51  ;;  %v1933_v57 = vpop.f32.mrf.mxu0 }
  0xfc   :  { %v1997_v58 = vpop.f32.mrf.mxu1 }
  0xfd   :  { %v2862_v59 = vadd.f32 %v1996_v56, %v1932_v54  ;;  %v1934_v60 = vpop.f32.mrf.mxu0 }
  0xfe   :  { %v1935_v61 = vadd.f32 %v1934_v60, %v1933_v57  ;;  %v1998_v62 = vpop.f32.mrf.mxu1 }
  0xff   :  { %2987 = vst [vmem:[#allocation3_spill] sm:$0xff] %v2862_v59  ;;  %v1999_v63 = vadd.f32 %v1998_v62, %v1997_v58  ;;  %v1936_v0 = vpop.f32.mrf.mxu0 }
 0x100   :  { %v2000_v1 = vpop.f32.mrf.mxu1 }
 0x101   :  { %v2864_v2 = vadd.f32 %v1999_v63, %v1935_v61  ;;  %v1937_v3 = vpop.f32.mrf.mxu0 }
 0x102   :  { %v1938_v4 = vadd.f32 %v1937_v3, %v1936_v0  ;;  %v2001_v5 = vpop.f32.mrf.mxu1 }
 0x103   :  { %2988 = vst [vmem:[#allocation4_spill] sm:$0xff] %v2864_v2  ;;  %v2002_v6 = vadd.f32 %v2001_v5, %v2000_v1  ;;  %v1939_v7 = vpop.f32.mrf.mxu0 }
 0x104   :  { %v2003_v8 = vpop.f32.mrf.mxu1 }
 0x105   :  { %v2866_v9 = vadd.f32 %v2002_v6, %v1938_v4  ;;  %v1940_v10 = vpop.f32.mrf.mxu0 }
 0x106   :  { %v1941_v11 = vadd.f32 %v1940_v10, %v1939_v7  ;;  %v2004_v12 = vpop.f32.mrf.mxu1 }
 0x107   :  { %2989 = vst [vmem:[#allocation5_spill] sm:$0xff] %v2866_v9  ;;  %v2005_v13 = vadd.f32 %v2004_v12, %v2003_v8  ;;  %v1942_v14 = vpop.f32.mrf.mxu0 }
 0x108   :  { %v2006_v15 = vpop.f32.mrf.mxu1 }
 0x109   :  { %v2868_v16 = vadd.f32 %v2005_v13, %v1941_v11  ;;  %v1943_v17 = vpop.f32.mrf.mxu0 }
 0x10a   :  { %v1944_v18 = vadd.f32 %v1943_v17, %v1942_v14  ;;  %v2007_v19 = vpop.f32.mrf.mxu1 }
 0x10b   :  { %2990 = vst [vmem:[#allocation6_spill] sm:$0xff] %v2868_v16  ;;  %v2008_v20 = vadd.f32 %v2007_v19, %v2006_v15  ;;  %v1945_v21 = vpop.f32.mrf.mxu0 }
 0x10c   :  { %v2009_v22 = vpop.f32.mrf.mxu1 }
 0x10d   :  { %v2870_v23 = vadd.f32 %v2008_v20, %v1944_v18  ;;  %v1946_v25 = vpop.f32.mrf.mxu0 }
 0x10e   :  { %v1947_v26 = vadd.f32 %v1946_v25, %v1945_v21  ;;  %v2010_v27 = vpop.f32.mrf.mxu1 }
 0x10f   :  { %2991 = vst [vmem:[#allocation7_spill] sm:$0xff] %v2870_v23  ;;  %v2011_v28 = vadd.f32 %v2010_v27, %v2009_v22  ;;  %v1948_v29 = vpop.f32.mrf.mxu0 }
 0x110   :  { %v2012_v30 = vpop.f32.mrf.mxu1 }
 0x111   :  { %v2872_v32 = vadd.f32 %v2011_v28, %v1947_v26  ;;  %v1949_v33 = vpop.f32.mrf.mxu0 }
 0x112   :  { %v1950_v34 = vadd.f32 %v1949_v33, %v1948_v29  ;;  %v2013_v35 = vpop.f32.mrf.mxu1 }
 0x113   :  { %2992 = vst [vmem:[#allocation8_spill] sm:$0xff] %v2872_v32  ;;  %v2014_v36 = vadd.f32 %v2013_v35, %v2012_v30  ;;  %v1951_v37 = vpop.f32.mrf.mxu0 }
 0x114   :  { %v2015_v39 = vpop.f32.mrf.mxu1 }
 0x115   :  { %v2874_v40 = vadd.f32 %v2014_v36, %v1950_v34  ;;  %v1952_v41 = vpop.f32.mrf.mxu0 }
 0x116   :  { %v1953_v42 = vadd.f32 %v1952_v41, %v1951_v37  ;;  %v2016_v43 = vpop.f32.mrf.mxu1 }
 0x117   :  { %2993 = vst [vmem:[#allocation9_spill] sm:$0xff] %v2874_v40  ;;  %v2017_v44 = vadd.f32 %v2016_v43, %v2015_v39  ;;  %v1954_v46 = vpop.f32.mrf.mxu0 }
 0x118   :  { %v2018_v47 = vpop.f32.mrf.mxu1 }
 0x119   :  { %v2876_v48 = vadd.f32 %v2017_v44, %v1953_v42  ;;  %v1955_v49 = vpop.f32.mrf.mxu0 }
 0x11a   :  { %v1956_v50 = vadd.f32 %v1955_v49, %v1954_v46  ;;  %v2019_v51 = vpop.f32.mrf.mxu1 }
 0x11b   :  { %2994 = vst [vmem:[#allocation10_spill] sm:$0xff] %v2876_v48  ;;  %v2020_v53 = vadd.f32 %v2019_v51, %v2018_v47  ;;  %v1957_v54 = vpop.f32.mrf.mxu0 }
 0x11c   :  { %v2021_v55 = vpop.f32.mrf.mxu1 }
 0x11d   :  { %v2878_v56 = vadd.f32 %v2020_v53, %v1956_v50  ;;  %v1958_v57 = vpop.f32.mrf.mxu0 }
 0x11e   :  { %v1959_v58 = vadd.f32 %v1958_v57, %v1957_v54  ;;  %v2022_v60 = vpop.f32.mrf.mxu1 }
 0x11f   :  { %2995 = vst [vmem:[#allocation11_spill] sm:$0xff] %v2878_v56  ;;  %v2023_v61 = vadd.f32 %v2022_v60, %v2021_v55  ;;  %v1960_v62 = vpop.f32.mrf.mxu0 }
 0x120   :  { %v2024_v63 = vpop.f32.mrf.mxu1 }
 0x121   :  { %v2880_v0 = vadd.f32 %v2023_v61, %v1959_v58  ;;  %v1961_v1 = vpop.f32.mrf.mxu0 }
 0x122   :  { %v1962_v3 = vadd.f32 %v1961_v1, %v1960_v62  ;;  %v2025_v4 = vpop.f32.mrf.mxu1 }
 0x123   :  { %2996 = vst [vmem:[#allocation12_spill] sm:$0xff] %v2880_v0  ;;  %v2026_v5 = vadd.f32 %v2025_v4, %v2024_v63  ;;  %v2043_v6 = vpop.f32.mrf.mxu0 }
 0x124   :  { %v2107_v7 = vpop.f32.mrf.mxu1 }
 0x125   :  { %v2882_v8 = vadd.f32 %v2026_v5, %v1962_v3  ;;  %v2044_v10 = vpop.f32.mrf.mxu0 }
 0x126   :  { %v2045_v11 = vadd.f32 %v2044_v10, %v2043_v6  ;;  %v2108_v12 = vpop.f32.mrf.mxu1 }
 0x127   :  { %2997 = vst [vmem:[#allocation13_spill] sm:$0xff] %v2882_v8  ;;  %v2109_v13 = vadd.f32 %v2108_v12, %v2107_v7  ;;  %v2046_v14 = vpop.f32.mrf.mxu0 }
 0x128   :  { %v1268_v15 = vadd.f32 %v2045_v11, %v2852_v24  ;;  %v2110_v17 = vpop.f32.mrf.mxu1 }
 0x129   :  { %v2047_v18 = vpop.f32.mrf.mxu0 }
 0x12a   :  { %v2111_v19 = vpop.f32.mrf.mxu1  ;;  %v2885_v20 = vadd.f32 %v2109_v13, %v1268_v15  ;;  %v2048_v0 = vadd.f32 %v2047_v18, %v2046_v14 }
 0x12b   :  { %v2049_v21 = vpop.f32.mrf.mxu0  ;;  %v2112_v23 = vadd.f32 %v2111_v19, %v2110_v17 }
 0x12c   :  { %2998 = vst [vmem:[#allocation14_spill] sm:$0xff] %v2885_v20  ;;  %v2113_v22 = vpop.f32.mrf.mxu1 }
 0x12d   :  { %v2050_v25 = vpop.f32.mrf.mxu0 }
 0x12e   :  { %v2114_v26 = vpop.f32.mrf.mxu1 }
 0x12f   :  { %v2052_v27 = vpop.f32.mrf.mxu0  ;;  %v2115_v2 = vadd.f32 %v2114_v26, %v2113_v22 }
 0x130   :  { %v2116_v28 = vpop.f32.mrf.mxu1 }
 0x131   :  { %v2053_v29 = vpop.f32.mrf.mxu0 }
 0x132   :  { %v2117_v30 = vpop.f32.mrf.mxu1  ;;  %v2054_v59 = vadd.f32 %v2053_v29, %v2052_v27  ;;  %v3007_v27 = vld [vmem:[#allocation2_spill] sm:$0xff] }
 0x133   :  { %v2055_v33 = vpop.f32.mrf.mxu0  ;;  %v2118_v14 = vadd.f32 %v2117_v30, %v2116_v28  ;;  %v3011_v30 = vld [vmem:[#allocation7_spill] sm:$0xff] }
 0x134   :  { %v2119_v34 = vpop.f32.mrf.mxu1 }
 0x135   :  { %v2056_v35 = vpop.f32.mrf.mxu0 }
 0x136   :  { %v2120_v36 = vpop.f32.mrf.mxu1  ;;  %v2057_v40 = vadd.f32 %v2056_v35, %v2055_v33  ;;  %v3008_v35 = vld [vmem:[#allocation4_spill] sm:$0xff] }
 0x137   :  { %v2058_v37 = vpop.f32.mrf.mxu0  ;;  %v2121_v17 = vadd.f32 %v2120_v36, %v2119_v34  ;;  %v3013_v34 = vld [vmem:[#allocation9_spill] sm:$0xff] }
 0x138   :  { %v2887_v39 = vpop.f32.mrf.mxu1  ;;  %v1284_v29 = vadd.f32 %v2057_v40, %v3007_v27 }
 0x139   :  { %2999 = vst [vmem:[#allocation15_spill] sm:$0xff] %v2887_v39  ;;  %v2059_v24 = vpop.f32.mrf.mxu0 }
 0x13a   :  { %v2889_v41 = vpop.f32.mrf.mxu1  ;;  %v2060_v19 = vadd.f32 %v2059_v24, %v2058_v37 }
 0x13b   :  { %3000 = vst [vmem:[#allocation16_spill] sm:$0xff] %v2889_v41  ;;  %v2061_v42 = vpop.f32.mrf.mxu0  ;;  %v2051_v41 = vadd.f32 %v2050_v25, %v2049_v21  ;;  %v1279_v25 = vadd.f32 %v2054_v59, %v2858_v45  ;;  %v3012_v45 = vld [vmem:[#allocation8_spill] sm:$0xff] }
 0x13c   :  { %v2125_v43 = vpop.f32.mrf.mxu1 }
 0x13d   :  { %v2062_v44 = vpop.f32.mrf.mxu0 }
 0x13e   :  { %v2126_v46 = vpop.f32.mrf.mxu1  ;;  %v2063_v16 = vadd.f32 %v2062_v44, %v2061_v42 }
 0x13f   :  { %v2064_v47 = vpop.f32.mrf.mxu0 }
 0x140   :  { %v2128_v49 = vpop.f32.mrf.mxu1  ;;  %v1292_v42 = vadd.f32 %v2063_v16, %v3008_v35 }
 0x141   :  { %v2065_v50 = vpop.f32.mrf.mxu0 }
 0x142   :  { %v2129_v51 = vpop.f32.mrf.mxu1 }
 0x143   :  { %v2067_v53 = vpop.f32.mrf.mxu0  ;;  %v2130_v26 = vadd.f32 %v2129_v51, %v2128_v49  ;;  %v3014_v49 = vld [vmem:[#allocation3_spill] sm:$0xff] }
 0x144   :  { %v2131_v54 = vpop.f32.mrf.mxu1  ;;  %v1287_v51 = vadd.f32 %v2060_v19, %v3014_v49 }
 0x145   :  { %v2068_v55 = vpop.f32.mrf.mxu0 }
 0x146   :  { %v2132_v57 = vpop.f32.mrf.mxu1 }
 0x147   :  { %v2070_v58 = vpop.f32.mrf.mxu0  ;;  %v2133_v28 = vadd.f32 %v2132_v57, %v2131_v54 }
 0x148   :  { %v2134_v60 = vpop.f32.mrf.mxu1 }
 0x149   :  { %v2071_v61 = vpop.f32.mrf.mxu0 }
 0x14a   :  { %v2135_v62 = vpop.f32.mrf.mxu1  ;;  %v2072_v52 = vadd.f32 %v2071_v61, %v2070_v58  ;;  %v3015_v58 = vld [vmem:[#allocation15_spill] sm:$0xff] }
 0x14b   :  { %v2073_v63 = vpop.f32.mrf.mxu0 }
 0x14c   :  { %v2137_v1 = vpop.f32.mrf.mxu1 }
 0x14d   :  { %v2074_v3 = vpop.f32.mrf.mxu0 }
 0x14e   :  { %v2138_v4 = vpop.f32.mrf.mxu1  ;;  %v2075_v18 = vadd.f32 %v2074_v3, %v2073_v63 }
 0x14f   :  { %v2076_v5 = vpop.f32.mrf.mxu0  ;;  %v2139_v40 = vadd.f32 %v2138_v4, %v2137_v1 }
 0x150   :  { %v2140_v6 = vpop.f32.mrf.mxu1  ;;  %v1308_v59 = vadd.f32 %v2075_v18, %v3012_v45 }
 0x151   :  { %v2077_v7 = vpop.f32.mrf.mxu0 }
 0x152   :  { %v2141_v10 = vpop.f32.mrf.mxu1 }
 0x153   :  { %v2079_v11 = vpop.f32.mrf.mxu0  ;;  %v2142_v37 = vadd.f32 %v2141_v10, %v2140_v6 }
 0x154   :  { %v2891_v12 = vpop.f32.mrf.mxu1 }
 0x155   :  { %3001 = vst [vmem:[#allocation17_spill] sm:$0xff] %v2891_v12  ;;  %v2080_v13 = vpop.f32.mrf.mxu0  ;;  %v2066_v12 = vadd.f32 %v2065_v50, %v2064_v47  ;;  %v3010_v47 = vld [vmem:[#allocation6_spill] sm:$0xff]  ;;  %v2136_v50 = vadd.f32 %v2135_v62, %v2134_v60  ;;  %v1381_v60 = vadd.f32 %v2121_v17, %v1284_v29 }
 0x156   :  { %v2893_v15 = vpop.f32.mrf.mxu1 }
 0x157   :  { %3002 = vst [vmem:[#allocation18_spill] sm:$0xff] %v2893_v15  ;;  %v2895_v56 = vpop.f32.mrf.mxu0  ;;  %v1271_v15 = vadd.f32 %v2048_v0, %v2854_v31  ;;  %v2127_v31 = vadd.f32 %v2126_v46, %v2125_v43  ;;  %v3009_v0 = vld [vmem:[#allocation5_spill] sm:$0xff]  ;;  %v1376_v46 = vadd.f32 %v2118_v14, %v1279_v25 }
 0x158   :  { %3003 = vst [vmem:[#allocation19_spill] sm:$0xff] %v2895_v56  ;;  %v2897_v48 = vpop.f32.mrf.mxu1  ;;  %v2069_v56 = vadd.f32 %v2068_v55, %v2067_v53  ;;  %v1295_v22 = vadd.f32 %v2066_v12, %v3009_v0  ;;  %v3019_v12 = vld [vmem:[#allocation14_spill] sm:$0xff]  ;;  %v3023_v0 = vld [vmem:[#allocation13_spill] sm:$0xff] }
 0x159   :  { %3004 = vst [vmem:[#allocation20_spill] sm:$0xff] %v2897_v48  ;;  %v2899_v8 = vpop.f32.mrf.mxu0  ;;  %v1368_v55 = vadd.f32 %v2112_v23, %v1271_v15 }
 0x15a   :  { %3005 = vst [vmem:[#allocation21_spill] sm:$0xff] %v2899_v8  ;;  %v2901_v20 = vpop.f32.mrf.mxu1  ;;  %v1276_v8 = vadd.f32 %v2051_v41, %v2856_v38  ;;  %v1300_v38 = vadd.f32 %v2069_v56, %v3010_v47  ;;  %v1303_v41 = vadd.f32 %v2072_v52, %v3011_v30  ;;  %v3016_v56 = vld [vmem:[#allocation16_spill] sm:$0xff]  ;;  %v1389_v52 = vadd.f32 %v2127_v31, %v1292_v42 }
 0x15b   :  { %3006 = vst [vmem:[#allocation22_spill] sm:$0xff] %v2901_v20  ;;  %v2085_v39 = vpop.f32.mrf.mxu0  ;;  %v2078_v20 = vadd.f32 %v2077_v7, %v2076_v5  ;;  %v2124_v54 = vadd.f32 %v3016_v56, %v3015_v58  ;;  %v1392_v3 = vadd.f32 %v2130_v26, %v1295_v22  ;;  %v1405_v5 = vadd.f32 %v2139_v40, %v1308_v59 }
 0x15c   :  { %v2149_v32 = vpop.f32.mrf.mxu1  ;;  %v1373_v16 = vadd.f32 %v2115_v2, %v1276_v8  ;;  %v1397_v62 = vadd.f32 %v2133_v28, %v1300_v38  ;;  %v1400_v1 = vadd.f32 %v2136_v50, %v1303_v41  ;;  %v3017_v6 = vld [vmem:[#allocation17_spill] sm:$0xff]  ;;  %v3024_v41 = vld [vmem:[#allocation10_spill] sm:$0xff] }
 0x15d   :  { %v2086_v9 = vpop.f32.mrf.mxu0  ;;  %v1311_v36 = vadd.f32 %v2078_v20, %v3013_v34  ;;  %v2081_v20 = vadd.f32 %v2080_v13, %v2079_v11  ;;  %v3022_v13 = vld [vmem:[#allocation12_spill] sm:$0xff] }
 0x15e   :  { %v2150_v48 = vpop.f32.mrf.mxu1  ;;  %v2087_v61 = vadd.f32 %v2086_v9, %v2085_v39  ;;  %v3018_v23 = vld [vmem:[#allocation18_spill] sm:$0xff] }
 0x15f   :  { %v2088_v21 = vpop.f32.mrf.mxu0  ;;  %v1408_v8 = vadd.f32 %v2142_v37, %v1311_v36  ;;  %v2145_v7 = vadd.f32 %v3018_v23, %v3017_v6  ;;  %v3020_v25 = vld [vmem:[#allocation19_spill] sm:$0xff]  ;;  %v2151_v39 = vadd.f32 %v2150_v48, %v2149_v32  ;;  %v1316_v50 = vadd.f32 %v2081_v20, %v3024_v41 }
 0x160   :  { %v2152_v33 = vpop.f32.mrf.mxu1  ;;  %v3026_v59 = vld [vmem:[#allocation20_spill] sm:$0xff] }
 0x161   :  { %v2089_v44 = vpop.f32.mrf.mxu0  ;;  %v3021_v27 = vld [vmem:[#allocation21_spill] sm:$0xff] }
 0x162   :  { %v2153_v53 = vpop.f32.mrf.mxu1  ;;  %v2090_v4 = vadd.f32 %v2089_v44, %v2088_v21  ;;  %v2084_v9 = vadd.f32 %v3021_v27, %v3020_v25  ;;  %v1324_v21 = vadd.f32 %v2087_v61, %v3022_v13  ;;  %v3027_v40 = vld [vmem:[#allocation22_spill] sm:$0xff]  ;;  %v1384_v61 = vadd.f32 %v2124_v54, %v1287_v51 }
 0x163   :  { %v2189_v24 = vpop.f32.mrf.mxu0  ;;  %v2154_v19 = vadd.f32 %v2153_v53, %v2152_v33  ;;  %v3025_v53 = vld [vmem:[#allocation11_spill] sm:$0xff]  ;;  %v2148_v34 = vadd.f32 %v3027_v40, %v3026_v59 }
 0x164   :  { %v2197_v43 = vpop.f32.mrf.mxu1  ;;  %v1470_v10 = vadd.f32 %v2189_v24, %v1373_v16  ;;  %v1327_v22 = vadd.f32 %v2090_v4, %v3023_v0  ;;  %v1319_v45 = vadd.f32 %v2084_v9, %v3025_v53  ;;  %v1421_v58 = vadd.f32 %v2151_v39, %v1324_v21 }
 0x165   :  { %v1461_v57 = vpop.f32.mrf.mxu0  ;;  %v2921_v29 = vadd.f32 %v2197_v43, %v1405_v5 }
 0x166   :  { %v1493_v63 = vpop.f32.mrf.mxu1  ;;  %v1462_v15 = vadd.f32 %v1461_v57, %v3019_v12  ;;  %v1627_v24 = vmul.f32 %v1470_v10, %v1470_v10  ;;  %v1424_v57 = vadd.f32 %v2154_v19, %v1327_v22 }
 0x167   :  { %v2190_v2 = vpop.f32.mrf.mxu0  ;;  %v2927_v26 = vadd.f32 %v1493_v63, %v1397_v62 }
 0x168   :  { %v1473_v14 = vadd.f32 %v2190_v2, %v1376_v46  ;;  %v2198_v18 = vpop.f32.mrf.mxu1  ;;  %v1625_v48 = vmul.f32 %v1462_v15, %v1462_v15  ;;  %v1413_v2 = vadd.f32 %v2145_v7, %v1316_v50 }
 0x169   :  { %v2923_v17 = vadd.f32 %v2198_v18, %v1408_v8  ;;  %v1464_v11 = vpop.f32.mrf.mxu0 }
 0x16a   :  { %v1860_v35 = vpack.c.bf16 %v1473_v14, %v1470_v10  ;;  %v1465_v42 = vadd.f32 %v1464_v11, %v1368_v55  ;;  %v1496_v31 = vpop.f32.mrf.mxu1  ;;  %v1628_v49 = vmul.f32 %v1473_v14, %v1473_v14 }
 0x16b   :  { %v1880_v44 = vpack.c.bf16 %v2923_v17, %v2921_v29  ;;  %v2931_v47 = vadd.f32 %v1496_v31, %v1400_v1  ;;  %v2193_v32 = vpop.f32.mrf.mxu0 }
 0x16c   :  { %1892 = vst [vmem:[%s2983_s2 + $0x8] sm:$0xff] %v1860_v35   ;;  %v1855_v38 = vpack.c.bf16 %v1465_v42, %v1462_v15  ;;  %v1604_v33 = vadd.f32 %v1465_v42, %v1462_v15  ;;  %v1626_v28 = vmul.f32 %v1465_v42, %v1465_v42  ;;  %v2201_v30 = vpop.f32.mrf.mxu1  ;;  %v1486_v63 = vadd.f32 %v2193_v32, %v1389_v52 }
 0x16d   :  { %1896 = vst [vmem:[%s2983_s2 + $0x28] sm:$0xff] %v1880_v44   ;;  %v1875_v36 = vpack.c.bf16 %v2931_v47, %v2927_v26  ;;  %v1477_v37 = vpop.f32.mrf.mxu0  ;;  %v1518_v5 = vadd.f32 %v2201_v30, %v1421_v58  ;;  %v1633_v42 = vmul.f32 %v2927_v26, %v2927_v26  ;;  %v1634_v22 = vmul.f32 %v2931_v47, %v2931_v47 }
 0x16e   :  { %1856 = vst [vmem:[%s2983_s2] sm:$0xff] %v1855_v38   ;;  %v1605_v16 = vadd.f32 %v1604_v33, %v1470_v10  ;;  %v1641_v43 = vadd.f32 %v1626_v28, %v1625_v48  ;;  %v1478_v46 = vadd.f32 %v1477_v37, %v1381_v60  ;;  %v1509_v55 = vpop.f32.mrf.mxu1  ;;  %v1416_v60 = vadd.f32 %v2148_v34, %v1319_v45 }
 0x16f   :  { %1895 = vst [vmem:[%s2983_s2 + $0x20] sm:$0xff] %v1875_v36   ;;  %v2194_v56 = vpop.f32.mrf.mxu0  ;;  %v1510_v25 = vadd.f32 %v1509_v55, %v1413_v2  ;;  %v1635_v48 = vmul.f32 %v2921_v29, %v2921_v29  ;;  %v1636_v28 = vmul.f32 %v2923_v17, %v2923_v17  ;;  %v1639_v34 = vmul.f32 %v1518_v5, %v1518_v5 }
 0x170   :  { %v1642_v62 = vadd.f32 %v1641_v43, %v1627_v24  ;;  %v1606_v1 = vadd.f32 %v1605_v16, %v1473_v14  ;;  %v1489_v20 = vadd.f32 %v2194_v56, %v1392_v3  ;;  %v2202_v4 = vpop.f32.mrf.mxu1  ;;  %v1629_v10 = vmul.f32 %v1478_v46, %v1478_v46 }
 0x171   :  { %v1521_v8 = vadd.f32 %v2202_v4, %v1424_v57  ;;  %v1480_v6 = vpop.f32.mrf.mxu0  ;;  %v1631_v14 = vmul.f32 %v1486_v63, %v1486_v63 }
 0x172   :  { %v1607_v23 = vadd.f32 %v1606_v1, %v1478_v46  ;;  %v1643_v12 = vadd.f32 %v1642_v62, %v1628_v49  ;;  %v1870_v15 = vpack.c.bf16 %v1489_v20, %v1486_v63  ;;  %v1512_v18 = vpop.f32.mrf.mxu1  ;;  %v1481_v9 = vadd.f32 %v1480_v6, %v1384_v61 }
 0x173   :  { %v1890_v27 = vpack.c.bf16 %v1521_v8, %v1518_v5  ;;  %v1513_v39 = vadd.f32 %v1512_v18, %v1416_v60  ;;  %v1632_v21 = vmul.f32 %v1489_v20, %v1489_v20  ;;  %v1640_v37 = vmul.f32 %v1521_v8, %v1521_v8 }
 0x174   :  { %v1644_v51 = vadd.f32 %v1643_v12, %v1629_v10  ;;  %1894 = vst [vmem:[%s2983_s2 + $0x18] sm:$0xff] %v1870_v15   ;;  %v1865_v54 = vpack.c.bf16 %v1481_v9, %v1478_v46  ;;  %v1608_v52 = vadd.f32 %v1607_v23, %v1481_v9  ;;  %v1630_v3 = vmul.f32 %v1481_v9, %v1481_v9 }
 0x175   :  { %1898 = vst [vmem:[%s2983_s2 + $0x38] sm:$0xff] %v1890_v27   ;;  %v1885_v7 = vpack.c.bf16 %v1513_v39, %v1510_v25  ;;  %v1638_v59 = vmul.f32 %v1513_v39, %v1513_v39 }
 0x176   :  { %1893 = vst [vmem:[%s2983_s2 + $0x10] sm:$0xff] %v1865_v54   ;;  %v1609_v11 = vadd.f32 %v1608_v52, %v1486_v63  ;;  %v1645_v13 = vadd.f32 %v1644_v51, %v1630_v3 }
 0x177   :  { %1897 = vst [vmem:[%s2983_s2 + $0x30] sm:$0xff] %v1885_v7  }
 0x178   :  { %v1610_v19 = vadd.f32 %v1609_v11, %v1489_v20  ;;  %v1646_v35 = vadd.f32 %v1645_v13, %v1631_v14 }
 0x17a   :  { %v1611_v31 = vadd.f32 %v1610_v19, %v2927_v26  ;;  %v1647_v0 = vadd.f32 %v1646_v35, %v1632_v21  ;;  %v1637_v26 = vmul.f32 %v1510_v25, %v1510_v25 }
 0x17c   :  { %v1648_v44 = vadd.f32 %v1647_v0, %v1633_v42  ;;  %v1612_v32 = vadd.f32 %v1611_v31, %v2931_v47 }
 0x17e   :  { %v1613_v38 = vadd.f32 %v1612_v32, %v2921_v29  ;;  %v1649_v33 = vadd.f32 %v1648_v44, %v1634_v22 }
 0x180   :  { %v1614_v30 = vadd.f32 %v1613_v38, %v2923_v17  ;;  %v1650_v41 = vadd.f32 %v1649_v33, %v1635_v48 }
 0x182   :  { %v1615_v50 = vadd.f32 %v1614_v30, %v1510_v25  ;;  %v1651_v53 = vadd.f32 %v1650_v41, %v1636_v28 }
 0x184   :  { %v1616_v45 = vadd.f32 %v1615_v50, %v1513_v39  ;;  %v1652_v40 = vadd.f32 %v1651_v53, %v1637_v26 }
 0x186   :  { %v1617_v47 = vadd.f32 %v1616_v45, %v1518_v5  ;;  %v1653_v36 = vadd.f32 %v1652_v40, %v1638_v59 }
 0x188   :  { %v1618_v24 = vadd.f32 %v1617_v47, %v1521_v8  ;;  %v1654_v16 = vadd.f32 %v1653_v36, %v1639_v34 }
 0x18a   :  { %v1619_v29 = vrot.slane %v1618_v24, 4  ;;  %v1655_v43 = vadd.f32 %v1654_v16, %v1640_v37 }
 0x18c   :  { %v1620_v46 = vadd.f32 %v1619_v29, %v1618_v24  ;;  %v1656_v55 = vrot.slane %v1655_v43, 4 }
 0x18e   :  { %v1621_v49 = vrot.slane %v1620_v46, 2  ;;  %v1657_v58 = vadd.f32 %v1656_v55, %v1655_v43 }
 0x190   :  { %v1622_v17 = vadd.f32 %v1621_v49, %v1620_v46  ;;  %v1658_v56 = vrot.slane %v1657_v58, 2 }
 0x192   :  { %v1623_v57 = vrot.slane %v1622_v17, 1  ;;  %v1659_v61 = vadd.f32 %v1658_v56, %v1657_v58 }
 0x194   :  { %v1624_v62 = vadd.f32 %v1623_v57, %v1622_v17  ;;  %v1660_v63 = vrot.slane %v1659_v61, 1 }
 0x196   :  { %v1661_v1 = vadd.f32 %v1660_v63, %v1659_v61  ;;  %1662 = vst [vmem:[%s2984_s3] sm:$0xff] %v1624_v62 }
 0x198   :  { %1663 = vst [vmem:[%s2985_s4] sm:$0xff] %v1661_v1 }

// kernel: discriminator_forward.22
= control target key start
LH: loop header
LB: loop body
LE: loop exit
PB: predicated region body
PF: predicated region fallthrough
CT: control target
= control target key end

     0   :  { %s148_s0 = inlined_call_operand.vmem [shape: bf16[32,128], index: 0, kind: input, shape index: {}]   ;;  %s149_s1 = inlined_call_operand.vmem [shape: f32[1,128], index: 1, kind: input, shape index: {}]   ;;  %s150_s2 = inlined_call_operand.vmem [shape: f32[1,128], index: 2, kind: input, shape index: {}]   ;;  %s151_s3 = inlined_call_operand.vmem [shape: bf16[32,128], index: 3, kind: output, shape index: {}]  }
   0x1   :  { %v91_v0 = vld [vmem:[%s148_s0] sm:$0xff]   ;;  %v108_v4 = vld [vmem:[%s148_s0 + $0x8] sm:$0xff]  }
   0x2   :  { %v80_v1 = vld [vmem:[%s149_s1] ss:$0 sm:$0xff]  ;;  %v92_v2 = vunpack.c.l.bf16 %v91_v0  ;;  %v93_v3 = vunpack.c.h.bf16 %v91_v0  ;;  %v96_v6 = vunpack.c.l.bf16 %v108_v4  ;;  %v97_v7 = vunpack.c.h.bf16 %v108_v4 }
   0x3   :  { %v81_v5 = vld [vmem:[%s150_s2] ss:$0 sm:$0xff] }
   0x4   :  { %v29_v8 = vmul.f32 %v92_v2, %v80_v1  ;;  %v30_v9 = vmul.f32 %v93_v3, %v80_v1  ;;  %v31_v10 = vmul.f32 %v96_v6, %v80_v1  ;;  %v32_v11 = vmul.f32 %v97_v7, %v80_v1 }
   0x6   :  { %v40_v12 = vadd.f32 %v81_v5, %v29_v8  ;;  %v41_v13 = vadd.f32 %v81_v5, %v30_v9  ;;  %v42_v14 = vadd.f32 %v81_v5, %v31_v10  ;;  %v43_v15 = vadd.f32 %v81_v5, %v32_v11 }
   0x8   :  { %vm44_vm0 = vcmp.ge.f32.partialorder %v40_v12, 0.0  ;;  %vm45_vm1 = vcmp.ge.f32.partialorder %v41_v13, 0.0  ;;  %v48_v16 = vmul.f32 0.2, %v40_v12  ;;  %v49_v17 = vmul.f32 0.2, %v41_v13 }
   0x9   :  { %vm46_vm2 = vcmp.ge.f32.partialorder %v42_v14, 0.0  ;;  %vm47_vm3 = vcmp.ge.f32.partialorder %v43_v15, 0.0  ;;  %v50_v18 = vmul.f32 0.2, %v42_v14  ;;  %v51_v19 = vmul.f32 0.2, %v43_v15 }
   0xa   :  { %v52_v20 = vsel %vm44_vm0, %v40_v12, %v48_v16  ;;  %v53_v21 = vsel %vm45_vm1, %v41_v13, %v49_v17 }
   0xb   :  { %v101_v22 = vpack.c.bf16 %v53_v21, %v52_v20  ;;  %v54_v23 = vsel %vm46_vm2, %v42_v14, %v50_v18  ;;  %v55_v24 = vsel %vm47_vm3, %v43_v15, %v51_v19 }
   0xc   :  { %v106_v25 = vpack.c.bf16 %v55_v24, %v54_v23 }
   0xd   :  { %102 = vst [vmem:[%s151_s3] sm:$0xff] %v101_v22  }
   0xe   :  { %109 = vst [vmem:[%s151_s3 + $0x8] sm:$0xff] %v106_v25  }

// kernel: discriminator_forward.24
= control target key start
LH: loop header
LB: loop body
LE: loop exit
PB: predicated region body
PF: predicated region fallthrough
CT: control target
= control target key end

     0   :  { %v28_v0 = vlaneseq  ;;  %s180_s0 = inlined_call_operand.vmem [shape: bf16[32,256], index: 0, kind: input, shape index: {}]   ;;  %s181_s1 = inlined_call_operand.vmem [shape: f32[1,256], index: 1, kind: input, shape index: {}]   ;;  %s182_s2 = inlined_call_operand.vmem [shape: f32[1,256], index: 2, kind: input, shape index: {}]   ;;  %s183_s3 = inlined_call_operand.vmem [shape: bf16[32,256], index: 3, kind: output, shape index: {}]  }
   0x1   :  { %v14_v1 = vld [vmem:[%s180_s0] sm:$0xff]  ;;  %v15_v3 = vld [vmem:[%s180_s0 + $0x8] sm:$0xff]  ;;  %v16_v4 = vld [vmem:[%s180_s0 + $0x10] sm:$0xff] }
   0x2   :  { %v29_v2 = vshrl.u32 %v28_v0, 7  ;;  %v17_v5 = vld [vmem:[%s180_s0 + $0x18] sm:$0xff]  ;;  %v18_v6 = vunpack.c.l.bf16 %v14_v1  ;;  %v19_v7 = vunpack.c.h.bf16 %v14_v1  ;;  %v26_v8 = vld [vmem:[%s181_s1] sm:$0x3]  ;;  %v20_v12 = vunpack.c.l.bf16 %v15_v3 }
   0x3   :  { %v46_v9 = vld [vmem:[%s182_s2] sm:$0x3]  ;;  %v21_v13 = vunpack.c.h.bf16 %v15_v3  ;;  %v22_v14 = vunpack.c.l.bf16 %v16_v4  ;;  %v23_v15 = vunpack.c.h.bf16 %v16_v4  ;;  %v24_v16 = vunpack.c.l.bf16 %v17_v5 }
   0x4   :  { %v30_v10 = vsub.s32 0, %v29_v2  ;;  %v34_v11 = vsub.s32 1, %v29_v2  ;;  %v25_v17 = vunpack.c.h.bf16 %v17_v5 }
   0x6   :  { %v31_v18 = vrot.slane %v26_v8, %v30_v10  ;;  %v35_v19 = vrot.slane %v26_v8, %v34_v11  ;;  %v51_v20 = vrot.slane %v46_v9, %v30_v10  ;;  %v55_v21 = vrot.slane %v46_v9, %v34_v11 }
   0x8   :  { %v38_v22 = vmul.f32 %v31_v18, %v18_v6  ;;  %v39_v23 = vmul.f32 %v35_v19, %v19_v7  ;;  %v40_v24 = vmul.f32 %v31_v18, %v20_v12  ;;  %v41_v25 = vmul.f32 %v35_v19, %v21_v13 }
   0x9   :  { %v42_v26 = vmul.f32 %v31_v18, %v22_v14  ;;  %v43_v27 = vmul.f32 %v35_v19, %v23_v15  ;;  %v44_v28 = vmul.f32 %v31_v18, %v24_v16  ;;  %v45_v29 = vmul.f32 %v35_v19, %v25_v17 }
   0xa   :  { %v58_v30 = vadd.f32 %v51_v20, %v38_v22  ;;  %v59_v31 = vadd.f32 %v55_v21, %v39_v23  ;;  %v60_v32 = vadd.f32 %v51_v20, %v40_v24  ;;  %v61_v33 = vadd.f32 %v55_v21, %v41_v25 }
   0xb   :  { %v62_v34 = vadd.f32 %v51_v20, %v42_v26  ;;  %v63_v35 = vadd.f32 %v55_v21, %v43_v27  ;;  %v64_v36 = vadd.f32 %v51_v20, %v44_v28  ;;  %v65_v37 = vadd.f32 %v55_v21, %v45_v29 }
   0xc   :  { %vm66_vm0 = vcmp.ge.f32.partialorder %v58_v30, 0.0  ;;  %vm67_vm1 = vcmp.ge.f32.partialorder %v59_v31, 0.0  ;;  %v74_v38 = vmul.f32 0.2, %v58_v30  ;;  %v75_v39 = vmul.f32 0.2, %v59_v31 }
   0xd   :  { %vm68_vm2 = vcmp.ge.f32.partialorder %v60_v32, 0.0  ;;  %vm69_vm3 = vcmp.ge.f32.partialorder %v61_v33, 0.0  ;;  %v76_v40 = vmul.f32 0.2, %v60_v32  ;;  %v77_v41 = vmul.f32 0.2, %v61_v33 }
   0xe   :  { %v82_v42 = vsel %vm66_vm0, %v58_v30, %v74_v38  ;;  %v83_v43 = vsel %vm67_vm1, %v59_v31, %v75_v39  ;;  %vm70_vm4 = vcmp.ge.f32.partialorder %v62_v34, 0.0  ;;  %vm71_vm5 = vcmp.ge.f32.partialorder %v63_v35, 0.0 }
   0xf   :  { %v126_v44 = vpack.c.bf16 %v83_v43, %v82_v42  ;;  %v84_v45 = vsel %vm68_vm2, %v60_v32, %v76_v40  ;;  %v85_v46 = vsel %vm69_vm3, %v61_v33, %v77_v41  ;;  %v78_v47 = vmul.f32 0.2, %v62_v34 }
  0x10   :  { %v127_v48 = vpack.c.bf16 %v85_v46, %v84_v45  ;;  %v79_v49 = vmul.f32 0.2, %v63_v35  ;;  %vm72_vm6 = vcmp.ge.f32.partialorder %v64_v36, 0.0  ;;  %vm73_vm7 = vcmp.ge.f32.partialorder %v65_v37, 0.0 }
  0x11   :  { %114 = vst [vmem:[%s183_s3] sm:$0xff] %v126_v44  ;;  %v86_v50 = vsel %vm70_vm4, %v62_v34, %v78_v47  ;;  %v80_v51 = vmul.f32 0.2, %v64_v36  ;;  %v81_v52 = vmul.f32 0.2, %v65_v37 }
  0x12   :  { %115 = vst [vmem:[%s183_s3 + $0x8] sm:$0xff] %v127_v48  ;;  %v87_v53 = vsel %vm71_vm5, %v63_v35, %v79_v49 }
  0x13   :  { %v128_v54 = vpack.c.bf16 %v87_v53, %v86_v50  ;;  %v88_v55 = vsel %vm72_vm6, %v64_v36, %v80_v51  ;;  %v89_v56 = vsel %vm73_vm7, %v65_v37, %v81_v52 }
  0x14   :  { %v129_v57 = vpack.c.bf16 %v89_v56, %v88_v55 }
  0x15   :  { %116 = vst [vmem:[%s183_s3 + $0x10] sm:$0xff] %v128_v54 }
  0x16   :  { %117 = vst [vmem:[%s183_s3 + $0x18] sm:$0xff] %v129_v57 }

// kernel: discriminator_forward.21
= control target key start
LH: loop header
LB: loop body
LE: loop exit
PB: predicated region body
PF: predicated region fallthrough
CT: control target
= control target key end

     0   :  { %s1660_s1 = inlined_call_operand.vmem [shape: bf16[1152,128], index: 1, kind: input, shape index: {}]   ;;  %s1661_s0 = inlined_call_operand.vmem [shape: bf16[32,1152], index: 0, kind: input, shape index: {}]   ;;  %s1662_s2 = inlined_call_operand.vmem [shape: bf16[32,128], index: 2, kind: output, shape index: {0}]   ;;  %s1663_s3 = inlined_call_operand.vmem [shape: f32[1,8,128], index: 3, kind: output, shape index: {1}]   ;;  %s1664_s4 = inlined_call_operand.vmem [shape: f32[1,8,128], index: 4, kind: output, shape index: {2}]  }
   0x1   :  { %v1255_v0 = vld [vmem:[%s1660_s1 + $0x78] sm:$0xff]   ;;  %v1259_v4 = vld [vmem:[%s1660_s1 + $0x70] sm:$0xff]   ;;  %v1263_v8 = vld [vmem:[%s1660_s1 + $0x68] sm:$0xff]  }
   0x2   :  { %v1256_v1 = vld [vmem:[%s1660_s1 + $0xf8] sm:$0xff]   ;;  %1113 = vmatprep.subr.bf16.mxu0 %v1255_v0  ;;  %v1260_v5 = vld [vmem:[%s1660_s1 + $0xf0] sm:$0xff]   ;;  %v1264_v9 = vld [vmem:[%s1660_s1 + $0xe8] sm:$0xff]  }
   0x3   :  { %v1257_v2 = vld [vmem:[%s1660_s1 + $0x38] sm:$0xff]   ;;  %1141 = vmatprep.subr.bf16.mxu1 %v1256_v1  ;;  %v1261_v6 = vld [vmem:[%s1660_s1 + $0x30] sm:$0xff]   ;;  %v1265_v10 = vld [vmem:[%s1660_s1 + $0x28] sm:$0xff]  }
   0x4   :  { %v1258_v3 = vld [vmem:[%s1660_s1 + $0xb8] sm:$0xff]   ;;  %1114 = vmatpush3.bf16.msra.mxu0 %v1257_v2  ;;  %v1262_v7 = vld [vmem:[%s1660_s1 + $0xb0] sm:$0xff]   ;;  %v1266_v11 = vld [vmem:[%s1660_s1 + $0xa8] sm:$0xff]  }
   0x5   :  { %1142 = vmatpush3.bf16.msra.mxu1 %v1258_v3  ;;  %1115 = vmatprep.subr.bf16.mxu0 %v1259_v4  ;;  %v1267_v12 = vld [vmem:[%s1660_s1 + $0x60] sm:$0xff]   ;;  %v1271_v16 = vld [vmem:[%s1660_s1 + $0x58] sm:$0xff]   ;;  %v1275_v20 = vld [vmem:[%s1660_s1 + $0x50] sm:$0xff]  }
   0x6   :  { %1143 = vmatprep.subr.bf16.mxu1 %v1260_v5  ;;  %v1268_v13 = vld [vmem:[%s1660_s1 + $0xe0] sm:$0xff]   ;;  %v1272_v17 = vld [vmem:[%s1660_s1 + $0xd8] sm:$0xff]   ;;  %v1276_v21 = vld [vmem:[%s1660_s1 + $0xd0] sm:$0xff]  }
   0x7   :  { %v1269_v14 = vld [vmem:[%s1660_s1 + $0x20] sm:$0xff]   ;;  %v1273_v18 = vld [vmem:[%s1660_s1 + $0x18] sm:$0xff]   ;;  %v1277_v22 = vld [vmem:[%s1660_s1 + $0x10] sm:$0xff]  }
   0x8   :  { %1116 = vmatpush3.bf16.msra.mxu0 %v1261_v6  ;;  %v1270_v15 = vld [vmem:[%s1660_s1 + $0xa0] sm:$0xff]   ;;  %v1274_v19 = vld [vmem:[%s1660_s1 + $0x98] sm:$0xff]   ;;  %v1278_v23 = vld [vmem:[%s1660_s1 + $0x90] sm:$0xff]  }
   0x9   :  { %1144 = vmatpush3.bf16.msra.mxu1 %v1262_v7  ;;  %1117 = vmatprep.subr.bf16.mxu0 %v1263_v8  ;;  %v1279_v24 = vld [vmem:[%s1660_s1 + $0x48] sm:$0xff]   ;;  %v1283_v28 = vld [vmem:[%s1660_s1 + $0x40] sm:$0xff]   ;;  %v1293_v36 = vld [vmem:[%s1660_s1 + $0x178] sm:$0xff]  }
   0xa   :  { %1145 = vmatprep.subr.bf16.mxu1 %v1264_v9  ;;  %v1280_v25 = vld [vmem:[%s1660_s1 + $0xc8] sm:$0xff]   ;;  %v1284_v29 = vld [vmem:[%s1660_s1 + $0xc0] sm:$0xff]   ;;  %v1294_v37 = vld [vmem:[%s1660_s1 + $0x138] sm:$0xff]  }
   0xb   :  { %v1281_v26 = vld [vmem:[%s1660_s1 + $0x8] sm:$0xff]   ;;  %v1285_v30 = vld [vmem:[%s1660_s1] sm:$0xff]   ;;  %v1295_v38 = vld [vmem:[%s1660_s1 + $0x1f8] sm:$0xff]  }
   0xc   :  { %1118 = vmatpush3.bf16.msra.mxu0 %v1265_v10  ;;  %v1282_v27 = vld [vmem:[%s1660_s1 + $0x88] sm:$0xff]   ;;  %v1286_v31 = vld [vmem:[%s1660_s1 + $0x80] sm:$0xff]   ;;  %v1296_v39 = vld [vmem:[%s1660_s1 + $0x1b8] sm:$0xff]  }
   0xd   :  { %1146 = vmatpush3.bf16.msra.mxu1 %v1266_v11  ;;  %1119 = vmatprep.subr.bf16.mxu0 %v1267_v12  ;;  %v1287_v32 = vld [vmem:[%s1661_s0] ss:$36 sps:$4 sm:$0xff]   ;;  %v1290_v34 = vld [vmem:[%s1661_s0 + $0x8] ss:$36 sps:$4 sm:$0xff]   ;;  %v1297_v40 = vld [vmem:[%s1660_s1 + $0x170] sm:$0xff]  }
   0xe   :  { %1147 = vmatprep.subr.bf16.mxu1 %v1268_v13  ;;  %v1289_v33 = vld [vmem:[%s1661_s0 + $0x4] ss:$36 sps:$4 sm:$0xff]   ;;  %v1292_v35 = vld [vmem:[%s1661_s0 + $0xc] ss:$36 sps:$4 sm:$0xff]   ;;  %v1309_v52 = vld [vmem:[%s1660_s1 + $0x158] sm:$0xff]  }
   0xf   :  { %735 = vmatprep.mubr.bf16.mxu0 %v1289_v33  ;;  %784 = vmatprep.mubr.bf16.mxu1 %v1292_v35  ;;  %v1298_v41 = vld [vmem:[%s1660_s1 + $0x130] sm:$0xff]   ;;  %v1301_v44 = vld [vmem:[%s1660_s1 + $0x168] sm:$0xff]   ;;  %v1305_v48 = vld [vmem:[%s1660_s1 + $0x160] sm:$0xff]  }
  0x10   :  { %1120 = vmatpush3.bf16.msra.mxu0 %v1269_v14  ;;  %v1299_v42 = vld [vmem:[%s1660_s1 + $0x1f0] sm:$0xff]   ;;  %v1302_v45 = vld [vmem:[%s1660_s1 + $0x128] sm:$0xff]   ;;  %v1306_v49 = vld [vmem:[%s1660_s1 + $0x120] sm:$0xff]  }
  0x11   :  { %1148 = vmatpush3.bf16.msra.mxu1 %v1270_v15  ;;  %1121 = vmatprep.subr.bf16.mxu0 %v1271_v16  ;;  %v1300_v43 = vld [vmem:[%s1660_s1 + $0x1b0] sm:$0xff]   ;;  %v1303_v46 = vld [vmem:[%s1660_s1 + $0x1e8] sm:$0xff]   ;;  %v1307_v50 = vld [vmem:[%s1660_s1 + $0x1e0] sm:$0xff]  }
  0x12   :  { %1149 = vmatprep.subr.bf16.mxu1 %v1272_v17  ;;  %v1304_v47 = vld [vmem:[%s1660_s1 + $0x1a8] sm:$0xff]   ;;  %v1308_v51 = vld [vmem:[%s1660_s1 + $0x1a0] sm:$0xff]   ;;  %v1310_v53 = vld [vmem:[%s1660_s1 + $0x118] sm:$0xff]  }
  0x13   :  { %v1311_v54 = vld [vmem:[%s1661_s0 + $0x4c] ss:$36 sps:$4 sm:$0xff]   ;;  %v1313_v55 = vld [vmem:[%s1661_s0 + $0x54] ss:$36 sps:$4 sm:$0xff]   ;;  %v1327_v4 = vld [vmem:[%s1660_s1 + $0x140] sm:$0xff]  }
  0x14   :  { %1122 = vmatpush3.bf16.msra.mxu0 %v1273_v18  ;;  %v1315_v56 = vld [vmem:[%s1660_s1 + $0x1d8] sm:$0xff]   ;;  %v1316_v57 = vld [vmem:[%s1661_s0 + $0x48] ss:$36 sps:$4 sm:$0xff]   ;;  %v1317_v58 = vld [vmem:[%s1661_s0 + $0x50] ss:$36 sps:$4 sm:$0xff]  }
  0x15   :  { %1150 = vmatpush3.bf16.msra.mxu1 %v1274_v19  ;;  %1123 = vmatprep.subr.bf16.mxu0 %v1275_v20  ;;  %v1318_v59 = vld [vmem:[%s1660_s1 + $0x198] sm:$0xff]   ;;  %v1319_v60 = vld [vmem:[%s1660_s1 + $0x150] sm:$0xff]   ;;  %v1323_v0 = vld [vmem:[%s1660_s1 + $0x148] sm:$0xff]  }
  0x16   :  { %1151 = vmatprep.subr.bf16.mxu1 %v1276_v21  ;;  %v1320_v61 = vld [vmem:[%s1660_s1 + $0x110] sm:$0xff]   ;;  %v1324_v1 = vld [vmem:[%s1660_s1 + $0x108] sm:$0xff]   ;;  %v1328_v5 = vld [vmem:[%s1660_s1 + $0x100] sm:$0xff]  }
  0x17   :  { %v1321_v62 = vld [vmem:[%s1660_s1 + $0x1d0] sm:$0xff]   ;;  %v1325_v2 = vld [vmem:[%s1660_s1 + $0x1c8] sm:$0xff]   ;;  %v1329_v6 = vld [vmem:[%s1660_s1 + $0x1c0] sm:$0xff]  }
  0x18   :  { %1124 = vmatpush3.bf16.msra.mxu0 %v1277_v22  ;;  %v1322_v63 = vld [vmem:[%s1660_s1 + $0x190] sm:$0xff]   ;;  %v1326_v3 = vld [vmem:[%s1660_s1 + $0x188] sm:$0xff]   ;;  %v1333_v9 = vld [vmem:[%s1660_s1 + $0x180] sm:$0xff]  }
  0x19   :  { %1152 = vmatpush3.bf16.msra.mxu1 %v1278_v23  ;;  %1125 = vmatprep.subr.bf16.mxu0 %v1279_v24  ;;  %v1330_v7 = vld [vmem:[%s1661_s0 + $0x10] ss:$36 sps:$4 sm:$0xff]   ;;  %v1334_v10 = vld [vmem:[%s1660_s1 + $0x238] sm:$0xff]   ;;  %v1342_v16 = vld [vmem:[%s1660_s1 + $0x228] sm:$0xff]  }
  0x1a   :  { %1153 = vmatprep.subr.bf16.mxu1 %v1280_v25  ;;  %v1332_v8 = vld [vmem:[%s1661_s0 + $0x14] ss:$36 sps:$4 sm:$0xff]   ;;  %v1337_v12 = vld [vmem:[%s1661_s0 + $0x1c] ss:$36 sps:$4 sm:$0xff]   ;;  %v1343_v17 = vld [vmem:[%s1661_s0 + $0x64] ss:$36 sps:$4 sm:$0xff]  }
  0x1b   :  { %v1335_v11 = vld [vmem:[%s1661_s0 + $0x18] ss:$36 sps:$4 sm:$0xff]   ;;  %v1338_v13 = vld [vmem:[%s1660_s1 + $0x230] sm:$0xff]   ;;  %v1345_v18 = vld [vmem:[%s1661_s0 + $0x60] ss:$36 sps:$4 sm:$0xff]  }
  0x1c   :  { %1126 = vmatpush3.bf16.msra.mxu0 %v1281_v26  ;;  %v1339_v14 = vld [vmem:[%s1661_s0 + $0x5c] ss:$36 sps:$4 sm:$0xff]   ;;  %v1348_v22 = vld [vmem:[%s1660_s1 + $0x210] sm:$0xff]   ;;  %v1349_v23 = vld [vmem:[%s1660_s1 + $0x208] sm:$0xff]  }
  0x1d   :  { %1154 = vmatpush3.bf16.msra.mxu1 %v1282_v27  ;;  %1127 = vmatprep.subr.bf16.mxu0 %v1283_v28  ;;  %v1341_v15 = vld [vmem:[%s1661_s0 + $0x58] ss:$36 sps:$4 sm:$0xff]   ;;  %v1346_v19 = vld [vmem:[%s1660_s1 + $0x220] sm:$0xff]   ;;  %v1352_v25 = vld [vmem:[%s1661_s0 + $0x68] ss:$36 sps:$4 sm:$0xff]  }
  0x1e   :  { %1155 = vmatprep.subr.bf16.mxu1 %v1284_v29  ;;  %v1347_v20 = vld [vmem:[%s1660_s1 + $0x218] sm:$0xff]   ;;  %v1351_v21 = vld [vmem:[%s1661_s0 + $0x20] ss:$36 sps:$4 sm:$0xff]  }
  0x1f   :  { %v1350_v24 = vld [vmem:[%s1660_s1 + $0x200] sm:$0xff]  }
  0x20   :  { %1128 = vmatpush3.bf16.msra.mxu0 %v1285_v30 }
  0x21   :  { %1156 = vmatpush3.bf16.msra.mxu1 %v1286_v31  ;;  %1169 = vmatprep.subr.bf16.mxu0 %v1293_v36 }
  0x22   :  { %1197 = vmatprep.subr.bf16.mxu1 %v1295_v38 }
  0x23   :  { %736 = vmatmul.mubr.bf16.vlgmr.msra.gmra.mxu0 %v1287_v32 }
  0x24   :  { %785 = vmatmul.mubr.bf16.vlgmr.msra.gmra.mxu1 %v1290_v34  ;;  %1170 = vmatpush3.bf16.msra.mxu0 %v1294_v37 }
  0x25   :  { %1198 = vmatpush3.bf16.msra.mxu1 %v1296_v39  ;;  %1171 = vmatprep.subr.bf16.mxu0 %v1297_v40 }
  0x26   :  { %1199 = vmatprep.subr.bf16.mxu1 %v1299_v42  ;;  %743 = vmatprep.mubr.bf16.mxu0 %v1311_v54 }
  0x27   :  { %792 = vmatprep.mubr.bf16.mxu1 %v1313_v55 }
  0x28   :  { %1172 = vmatpush3.bf16.msra.mxu0 %v1298_v41 }
  0x29   :  { %1200 = vmatpush3.bf16.msra.mxu1 %v1300_v43  ;;  %1173 = vmatprep.subr.bf16.mxu0 %v1301_v44 }
  0x2a   :  { %1201 = vmatprep.subr.bf16.mxu1 %v1303_v46 }
  0x2b   :  { %744 = vmatmul.mubr.bf16.gmra.mxu0 %v1316_v57 }
  0x2c   :  { %1174 = vmatpush3.bf16.msra.mxu0 %v1302_v45  ;;  %793 = vmatmul.mubr.bf16.gmra.mxu1 %v1317_v58 }
  0x2d   :  { %1202 = vmatpush3.bf16.msra.mxu1 %v1304_v47  ;;  %1175 = vmatprep.subr.bf16.mxu0 %v1305_v48 }
  0x2e   :  { %1203 = vmatprep.subr.bf16.mxu1 %v1307_v50  ;;  %833 = vmatprep.mubr.bf16.mxu0 %v1332_v8 }
  0x2f   :  { %882 = vmatprep.mubr.bf16.mxu1 %v1337_v12 }
  0x30   :  { %1176 = vmatpush3.bf16.msra.mxu0 %v1306_v49 }
  0x31   :  { %1204 = vmatpush3.bf16.msra.mxu1 %v1308_v51  ;;  %1177 = vmatprep.subr.bf16.mxu0 %v1309_v52 }
  0x32   :  { %1205 = vmatprep.subr.bf16.mxu1 %v1315_v56 }
  0x34   :  { %1178 = vmatpush3.bf16.msra.mxu0 %v1310_v53 }
  0x35   :  { %1206 = vmatpush3.bf16.msra.mxu1 %v1318_v59  ;;  %1179 = vmatprep.subr.bf16.mxu0 %v1319_v60 }
  0x36   :  { %1207 = vmatprep.subr.bf16.mxu1 %v1321_v62 }
  0x38   :  { %1180 = vmatpush3.bf16.msra.mxu0 %v1320_v61 }
  0x39   :  { %1208 = vmatpush3.bf16.msra.mxu1 %v1322_v63  ;;  %1181 = vmatprep.subr.bf16.mxu0 %v1323_v0 }
  0x3a   :  { %1209 = vmatprep.subr.bf16.mxu1 %v1325_v2 }
  0x3c   :  { %1182 = vmatpush3.bf16.msra.mxu0 %v1324_v1 }
  0x3d   :  { %1210 = vmatpush3.bf16.msra.mxu1 %v1326_v3  ;;  %1183 = vmatprep.subr.bf16.mxu0 %v1327_v4 }
  0x3e   :  { %1211 = vmatprep.subr.bf16.mxu1 %v1329_v6 }
  0x40   :  { %1184 = vmatpush3.bf16.msra.mxu0 %v1328_v5 }
  0x41   :  { %1212 = vmatpush3.bf16.msra.mxu1 %v1333_v9  ;;  %1235 = vmatprep.subr.bf16.mxu0 %v1334_v10 }
  0x43   :  { %834 = vmatmul.mubr.bf16.vlgmr.msra.gmra.mxu0 %v1330_v7 }
  0x44   :  { %1236 = vmatpush3.bf16.msra.mxu0 %v1334_v10  ;;  %883 = vmatmul.mubr.bf16.vlgmr.msra.gmra.mxu1 %v1335_v11 }
  0x45   :  { %1237 = vmatprep.subr.bf16.mxu0 %v1338_v13  ;;  %841 = vmatprep.mubr.bf16.mxu0 %v1339_v14 }
  0x46   :  { %890 = vmatprep.mubr.bf16.mxu1 %v1343_v17 }
  0x48   :  { %1238 = vmatpush3.bf16.msra.mxu0 %v1338_v13 }
  0x49   :  { %1239 = vmatprep.subr.bf16.mxu0 %v1342_v16 }
  0x4b   :  { %842 = vmatmul.mubr.bf16.gmra.mxu0 %v1341_v15 }
  0x4c   :  { %1240 = vmatpush3.bf16.msra.mxu0 %v1342_v16  ;;  %891 = vmatmul.mubr.bf16.gmra.mxu1 %v1345_v18 }
  0x4d   :  { %1241 = vmatprep.subr.bf16.mxu0 %v1346_v19  ;;  %1251 = vmatprep.mubr.bf16.mxu0 %v1351_v21 }
  0x50   :  { %1242 = vmatpush3.bf16.msra.mxu0 %v1346_v19 }
  0x51   :  { %1243 = vmatprep.subr.bf16.mxu0 %v1347_v20 }
  0x54   :  { %1244 = vmatpush3.bf16.msra.mxu0 %v1347_v20 }
  0x55   :  { %1245 = vmatprep.subr.bf16.mxu0 %v1348_v22 }
  0x58   :  { %1246 = vmatpush3.bf16.msra.mxu0 %v1348_v22 }
  0x59   :  { %1247 = vmatprep.subr.bf16.mxu0 %v1349_v23 }
  0x5c   :  { %1248 = vmatpush3.bf16.msra.mxu0 %v1349_v23 }
  0x5d   :  { %1249 = vmatprep.subr.bf16.mxu0 %v1350_v24 }
  0x60   :  { %1250 = vmatpush3.bf16.msra.mxu0 %v1350_v24 }
  0x63   :  { %1252 = vmatmul.mubr.bf16.vlgmr.msra.gmra.mxu0 %v1352_v25 }
  0xe3   :  { %v1129_v26 = vpop.f32.mrf.mxu0 }
  0xe4   :  { %v1157_v27 = vpop.f32.mrf.mxu1 }
  0xe5   :  { %v1130_v28 = vpop.f32.mrf.mxu0 }
  0xe6   :  { %v1158_v29 = vpop.f32.mrf.mxu1  ;;  %v1131_v55 = vadd.f32 %v1130_v28, %v1129_v26 }
  0xe7   :  { %v1132_v30 = vpop.f32.mrf.mxu0  ;;  %v1159_v56 = vadd.f32 %v1158_v29, %v1157_v27 }
  0xe8   :  { %v1160_v31 = vpop.f32.mrf.mxu1 }
  0xe9   :  { %v1133_v32 = vpop.f32.mrf.mxu0  ;;  %v787_v4 = vadd.f32 %v1159_v56, %v1131_v55 }
  0xea   :  { %v1161_v34 = vpop.f32.mrf.mxu1  ;;  %v1134_v63 = vadd.f32 %v1133_v32, %v1132_v30 }
  0xeb   :  { %v1135_v33 = vpop.f32.mrf.mxu0  ;;  %v1162_v0 = vadd.f32 %v1161_v34, %v1160_v31 }
  0xec   :  { %v1163_v35 = vpop.f32.mrf.mxu1 }
  0xed   :  { %v1136_v36 = vpop.f32.mrf.mxu0  ;;  %v790_v9 = vadd.f32 %v1162_v0, %v1134_v63 }
  0xee   :  { %v1164_v37 = vpop.f32.mrf.mxu1  ;;  %v1137_v59 = vadd.f32 %v1136_v36, %v1135_v33 }
  0xef   :  { %v1138_v38 = vpop.f32.mrf.mxu0  ;;  %v1165_v60 = vadd.f32 %v1164_v37, %v1163_v35 }
  0xf0   :  { %v1166_v39 = vpop.f32.mrf.mxu1 }
  0xf1   :  { %v1139_v40 = vpop.f32.mrf.mxu0  ;;  %v795_v6 = vadd.f32 %v1165_v60, %v1137_v59 }
  0xf2   :  { %v1167_v42 = vpop.f32.mrf.mxu1  ;;  %v1140_v61 = vadd.f32 %v1139_v40, %v1138_v38 }
  0xf3   :  { %v1168_v62 = vadd.f32 %v1167_v42, %v1166_v39 }
  0xf5   :  { %v798_v7 = vadd.f32 %v1168_v62, %v1140_v61 }
 0x103   :  { %v1185_v41 = vpop.f32.mrf.mxu0 }
 0x104   :  { %v1213_v44 = vpop.f32.mrf.mxu1 }
 0x105   :  { %v1186_v43 = vpop.f32.mrf.mxu0 }
 0x106   :  { %v1214_v46 = vpop.f32.mrf.mxu1  ;;  %v1187_v1 = vadd.f32 %v1186_v43, %v1185_v41 }
 0x107   :  { %v1188_v45 = vpop.f32.mrf.mxu0  ;;  %v1215_v11 = vadd.f32 %v1214_v46, %v1213_v44 }
 0x108   :  { %v1216_v48 = vpop.f32.mrf.mxu1  ;;  %v836_v10 = vadd.f32 %v1187_v1, %v787_v4 }
 0x109   :  { %v1189_v47 = vpop.f32.mrf.mxu0 }
 0x10a   :  { %v1217_v50 = vpop.f32.mrf.mxu1  ;;  %v1190_v8 = vadd.f32 %v1189_v47, %v1188_v45  ;;  %v885_v21 = vadd.f32 %v1215_v11, %v836_v10 }
 0x10b   :  { %v1191_v49 = vpop.f32.mrf.mxu0  ;;  %v1218_v18 = vadd.f32 %v1217_v50, %v1216_v48 }
 0x10c   :  { %v1219_v52 = vpop.f32.mrf.mxu1  ;;  %v839_v17 = vadd.f32 %v1190_v8, %v790_v9 }
 0x10d   :  { %v1192_v51 = vpop.f32.mrf.mxu0 }
 0x10e   :  { %v1220_v54 = vpop.f32.mrf.mxu1  ;;  %v1193_v2 = vadd.f32 %v1192_v51, %v1191_v49  ;;  %v888_v27 = vadd.f32 %v1218_v18, %v839_v17 }
 0x10f   :  { %v1194_v53 = vpop.f32.mrf.mxu0  ;;  %v1221_v13 = vadd.f32 %v1220_v54, %v1219_v52 }
 0x110   :  { %v1222_v58 = vpop.f32.mrf.mxu1  ;;  %v844_v12 = vadd.f32 %v1193_v2, %v795_v6 }
 0x111   :  { %v1195_v57 = vpop.f32.mrf.mxu0 }
 0x112   :  { %v1196_v3 = vadd.f32 %v1195_v57, %v1194_v53  ;;  %v1223_v5 = vpop.f32.mrf.mxu1  ;;  %v893_v20 = vadd.f32 %v1221_v13, %v844_v12 }
 0x113   :  { %v1224_v15 = vadd.f32 %v1223_v5, %v1222_v58 }
 0x114   :  { %v847_v14 = vadd.f32 %v1196_v3, %v798_v7 }
 0x116   :  { %v896_v22 = vadd.f32 %v1224_v15, %v847_v14 }
 0x123   :  { %v1253_v16 = vpop.f32.mrf.mxu0 }
 0x124   :  { %v942_v24 = vadd.f32 %v1253_v16, %v893_v20 }
 0x125   :  { %v933_v19 = vpop.f32.mrf.mxu0 }
 0x126   :  { %v934_v25 = vadd.f32 %v933_v19, %v885_v21  ;;  %v979_v35 = vmul.f32 %v942_v24, %v942_v24 }
 0x127   :  { %v1254_v23 = vpop.f32.mrf.mxu0 }
 0x128   :  { %v945_v26 = vadd.f32 %v1254_v23, %v896_v22  ;;  %v977_v31 = vmul.f32 %v934_v25, %v934_v25 }
 0x129   :  { %v936_v28 = vpop.f32.mrf.mxu0 }
 0x12a   :  { %v1110_v29 = vpack.c.bf16 %v945_v26, %v942_v24  ;;  %v937_v30 = vadd.f32 %v936_v28, %v888_v27  ;;  %v980_v38 = vmul.f32 %v945_v26, %v945_v26 }
 0x12c   :  { %1112 = vst [vmem:[%s1662_s2 + $0x8] sm:$0xff] %v1110_v29   ;;  %v1105_v32 = vpack.c.bf16 %v937_v30, %v934_v25  ;;  %v968_v33 = vadd.f32 %v937_v30, %v934_v25  ;;  %v978_v34 = vmul.f32 %v937_v30, %v937_v30 }
 0x12e   :  { %1106 = vst [vmem:[%s1662_s2] sm:$0xff] %v1105_v32   ;;  %v969_v36 = vadd.f32 %v968_v33, %v942_v24  ;;  %v981_v37 = vadd.f32 %v978_v34, %v977_v31 }
 0x130   :  { %v970_v39 = vadd.f32 %v969_v36, %v945_v26  ;;  %v982_v40 = vadd.f32 %v981_v37, %v979_v35 }
 0x132   :  { %v971_v41 = vrot.slane %v970_v39, 4  ;;  %v983_v42 = vadd.f32 %v982_v40, %v980_v38 }
 0x134   :  { %v972_v43 = vadd.f32 %v971_v41, %v970_v39  ;;  %v984_v44 = vrot.slane %v983_v42, 4 }
 0x136   :  { %v973_v45 = vrot.slane %v972_v43, 2  ;;  %v985_v46 = vadd.f32 %v984_v44, %v983_v42 }
 0x138   :  { %v974_v47 = vadd.f32 %v973_v45, %v972_v43  ;;  %v986_v48 = vrot.slane %v985_v46, 2 }
 0x13a   :  { %v975_v49 = vrot.slane %v974_v47, 1  ;;  %v987_v50 = vadd.f32 %v986_v48, %v985_v46 }
 0x13c   :  { %v976_v51 = vadd.f32 %v975_v49, %v974_v47  ;;  %v988_v52 = vrot.slane %v987_v50, 1 }
 0x13e   :  { %v989_v53 = vadd.f32 %v988_v52, %v987_v50  ;;  %990 = vst [vmem:[%s1663_s3] sm:$0xff] %v976_v51 }
 0x140   :  { %991 = vst [vmem:[%s1664_s4] sm:$0xff] %v989_v53 }

// kernel: discriminator_forward.23
= control target key start
LH: loop header
LB: loop body
LE: loop exit
PB: predicated region body
PF: predicated region fallthrough
CT: control target
= control target key end

     0   :  { %s2309_s1 = inlined_call_operand.vmem [shape: bf16[1152,256], index: 1, kind: input, shape index: {}]   ;;  %s2310_s0 = inlined_call_operand.vmem [shape: bf16[32,1152], index: 0, kind: input, shape index: {}]   ;;  %s2311_s2 = inlined_call_operand.vmem [shape: bf16[32,256], index: 2, kind: output, shape index: {0}]   ;;  %s2312_s3 = inlined_call_operand.vmem [shape: f32[1,8,256], index: 3, kind: output, shape index: {1}]   ;;  %s2313_s4 = inlined_call_operand.vmem [shape: f32[1,8,256], index: 4, kind: output, shape index: {2}]  }
   0x1   :  { %v1531_v0 = vld [vmem:[%s2309_s1 + $0x74] ss:$8 sps:$4 sm:$0xff]   ;;  %v1535_v2 = vld [vmem:[%s2309_s1 + $0x70] ss:$8 sps:$4 sm:$0xff]   ;;  %v1537_v4 = vld [vmem:[%s2309_s1 + $0x64] ss:$8 sps:$4 sm:$0xff]  }
   0x2   :  { %v1533_v1 = vld [vmem:[%s2309_s1 + $0x174] ss:$8 sps:$4 sm:$0xff]   ;;  %991 = vmatprep.subr.bf16.mxu0 %v1531_v0  ;;  %v1536_v3 = vld [vmem:[%s2309_s1 + $0x170] ss:$8 sps:$4 sm:$0xff]   ;;  %v1539_v5 = vld [vmem:[%s2309_s1 + $0x164] ss:$8 sps:$4 sm:$0xff]  }
   0x3   :  { %1044 = vmatprep.subr.bf16.mxu1 %v1533_v1  ;;  %992 = vmatpush1.bf16.msra.mxu0 %v1535_v2  ;;  %v1541_v6 = vld [vmem:[%s2309_s1 + $0x60] ss:$8 sps:$4 sm:$0xff]   ;;  %v1543_v8 = vld [vmem:[%s2309_s1 + $0x54] ss:$8 sps:$4 sm:$0xff]   ;;  %v1547_v10 = vld [vmem:[%s2309_s1 + $0x50] ss:$8 sps:$4 sm:$0xff]  }
   0x4   :  { %1045 = vmatpush1.bf16.msra.mxu1 %v1536_v3  ;;  %993 = vmatprep.subr.bf16.mxu0 %v1537_v4  ;;  %v1542_v7 = vld [vmem:[%s2309_s1 + $0x160] ss:$8 sps:$4 sm:$0xff]   ;;  %v1545_v9 = vld [vmem:[%s2309_s1 + $0x154] ss:$8 sps:$4 sm:$0xff]   ;;  %v1548_v11 = vld [vmem:[%s2309_s1 + $0x150] ss:$8 sps:$4 sm:$0xff]  }
   0x5   :  { %1046 = vmatprep.subr.bf16.mxu1 %v1539_v5  ;;  %v1549_v12 = vld [vmem:[%s2309_s1 + $0x44] ss:$8 sps:$4 sm:$0xff]   ;;  %v1553_v14 = vld [vmem:[%s2309_s1 + $0x40] ss:$8 sps:$4 sm:$0xff]   ;;  %v1555_v16 = vld [vmem:[%s2309_s1 + $0x34] ss:$8 sps:$4 sm:$0xff]  }
   0x6   :  { %v1551_v13 = vld [vmem:[%s2309_s1 + $0x144] ss:$8 sps:$4 sm:$0xff]   ;;  %v1554_v15 = vld [vmem:[%s2309_s1 + $0x140] ss:$8 sps:$4 sm:$0xff]   ;;  %v1557_v17 = vld [vmem:[%s2309_s1 + $0x134] ss:$8 sps:$4 sm:$0xff]  }
   0x7   :  { %994 = vmatpush1.bf16.msra.mxu0 %v1541_v6  ;;  %v1559_v18 = vld [vmem:[%s2309_s1 + $0x30] ss:$8 sps:$4 sm:$0xff]   ;;  %v1561_v20 = vld [vmem:[%s2309_s1 + $0x24] ss:$8 sps:$4 sm:$0xff]   ;;  %v1565_v22 = vld [vmem:[%s2309_s1 + $0x20] ss:$8 sps:$4 sm:$0xff]  }
   0x8   :  { %1047 = vmatpush1.bf16.msra.mxu1 %v1542_v7  ;;  %995 = vmatprep.subr.bf16.mxu0 %v1543_v8  ;;  %v1560_v19 = vld [vmem:[%s2309_s1 + $0x130] ss:$8 sps:$4 sm:$0xff]   ;;  %v1563_v21 = vld [vmem:[%s2309_s1 + $0x124] ss:$8 sps:$4 sm:$0xff]   ;;  %v1566_v23 = vld [vmem:[%s2309_s1 + $0x120] ss:$8 sps:$4 sm:$0xff]  }
   0x9   :  { %1048 = vmatprep.subr.bf16.mxu1 %v1545_v9  ;;  %v1567_v24 = vld [vmem:[%s2309_s1 + $0x14] ss:$8 sps:$4 sm:$0xff]   ;;  %v1571_v26 = vld [vmem:[%s2309_s1 + $0x10] ss:$8 sps:$4 sm:$0xff]   ;;  %v1573_v28 = vld [vmem:[%s2309_s1 + $0x4] ss:$8 sps:$4 sm:$0xff]  }
   0xa   :  { %v1569_v25 = vld [vmem:[%s2309_s1 + $0x114] ss:$8 sps:$4 sm:$0xff]   ;;  %v1572_v27 = vld [vmem:[%s2309_s1 + $0x110] ss:$8 sps:$4 sm:$0xff]   ;;  %v1575_v29 = vld [vmem:[%s2309_s1 + $0x104] ss:$8 sps:$4 sm:$0xff]  }
   0xb   :  { %996 = vmatpush1.bf16.msra.mxu0 %v1547_v10  ;;  %v1577_v30 = vld [vmem:[%s2309_s1] ss:$8 sps:$4 sm:$0xff]   ;;  %v1579_v32 = vld [vmem:[%s2309_s1 + $0xf4] ss:$8 sps:$4 sm:$0xff]   ;;  %v1583_v34 = vld [vmem:[%s2309_s1 + $0xf0] ss:$8 sps:$4 sm:$0xff]  }
   0xc   :  { %1049 = vmatpush1.bf16.msra.mxu1 %v1548_v11  ;;  %997 = vmatprep.subr.bf16.mxu0 %v1549_v12  ;;  %v1578_v31 = vld [vmem:[%s2309_s1 + $0x100] ss:$8 sps:$4 sm:$0xff]   ;;  %v1581_v33 = vld [vmem:[%s2309_s1 + $0x1f4] ss:$8 sps:$4 sm:$0xff]   ;;  %v1584_v35 = vld [vmem:[%s2309_s1 + $0x1f0] ss:$8 sps:$4 sm:$0xff]  }
   0xd   :  { %1050 = vmatprep.subr.bf16.mxu1 %v1551_v13  ;;  %v1585_v36 = vld [vmem:[%s2309_s1 + $0xe4] ss:$8 sps:$4 sm:$0xff]   ;;  %v1589_v38 = vld [vmem:[%s2309_s1 + $0xe0] ss:$8 sps:$4 sm:$0xff]   ;;  %v1591_v40 = vld [vmem:[%s2309_s1 + $0xd4] ss:$8 sps:$4 sm:$0xff]  }
   0xe   :  { %v1587_v37 = vld [vmem:[%s2309_s1 + $0x1e4] ss:$8 sps:$4 sm:$0xff]   ;;  %v1590_v39 = vld [vmem:[%s2309_s1 + $0x1e0] ss:$8 sps:$4 sm:$0xff]   ;;  %v1593_v41 = vld [vmem:[%s2309_s1 + $0x1d4] ss:$8 sps:$4 sm:$0xff]  }
   0xf   :  { %998 = vmatpush1.bf16.msra.mxu0 %v1553_v14  ;;  %v1595_v42 = vld [vmem:[%s2309_s1 + $0xd0] ss:$8 sps:$4 sm:$0xff]   ;;  %v1597_v44 = vld [vmem:[%s2309_s1 + $0xc4] ss:$8 sps:$4 sm:$0xff]   ;;  %v1601_v46 = vld [vmem:[%s2309_s1 + $0xc0] ss:$8 sps:$4 sm:$0xff]  }
  0x10   :  { %1051 = vmatpush1.bf16.msra.mxu1 %v1554_v15  ;;  %999 = vmatprep.subr.bf16.mxu0 %v1555_v16  ;;  %v1596_v43 = vld [vmem:[%s2309_s1 + $0x1d0] ss:$8 sps:$4 sm:$0xff]   ;;  %v1599_v45 = vld [vmem:[%s2309_s1 + $0x1c4] ss:$8 sps:$4 sm:$0xff]   ;;  %v1602_v47 = vld [vmem:[%s2309_s1 + $0x1c0] ss:$8 sps:$4 sm:$0xff]  }
  0x11   :  { %1052 = vmatprep.subr.bf16.mxu1 %v1557_v17  ;;  %v1603_v48 = vld [vmem:[%s2309_s1 + $0xb4] ss:$8 sps:$4 sm:$0xff]   ;;  %v1629_v49 = vld [vmem:[%s2310_s0 + $0x4] ss:$36 sps:$4 sm:$0xff]   ;;  %v1632_v51 = vld [vmem:[%s2310_s0 + $0xc] ss:$36 sps:$4 sm:$0xff]  }
  0x12   :  { %v1605_v50 = vld [vmem:[%s2309_s1 + $0x1b4] ss:$8 sps:$4 sm:$0xff]   ;;  %1023 = vmatprep.mubr.bf16.mxu0 %v1629_v49  ;;  %v1607_v52 = vld [vmem:[%s2309_s1 + $0xb0] ss:$8 sps:$4 sm:$0xff]   ;;  %1076 = vmatprep.mubr.bf16.mxu1 %v1632_v51  ;;  %v1609_v54 = vld [vmem:[%s2309_s1 + $0xa4] ss:$8 sps:$4 sm:$0xff]  }
  0x13   :  { %1000 = vmatpush1.bf16.msra.mxu0 %v1559_v18  ;;  %v1608_v53 = vld [vmem:[%s2309_s1 + $0x1b0] ss:$8 sps:$4 sm:$0xff]   ;;  %v1611_v55 = vld [vmem:[%s2309_s1 + $0x1a4] ss:$8 sps:$4 sm:$0xff]   ;;  %v1613_v56 = vld [vmem:[%s2309_s1 + $0xa0] ss:$8 sps:$4 sm:$0xff]  }
  0x14   :  { %1053 = vmatpush1.bf16.msra.mxu1 %v1560_v19  ;;  %1001 = vmatprep.subr.bf16.mxu0 %v1561_v20  ;;  %v1614_v57 = vld [vmem:[%s2309_s1 + $0x1a0] ss:$8 sps:$4 sm:$0xff]   ;;  %v1615_v58 = vld [vmem:[%s2309_s1 + $0x94] ss:$8 sps:$4 sm:$0xff]   ;;  %v1619_v60 = vld [vmem:[%s2309_s1 + $0x90] ss:$8 sps:$4 sm:$0xff]  }
  0x15   :  { %1054 = vmatprep.subr.bf16.mxu1 %v1563_v21  ;;  %v1617_v59 = vld [vmem:[%s2309_s1 + $0x194] ss:$8 sps:$4 sm:$0xff]   ;;  %v1620_v61 = vld [vmem:[%s2309_s1 + $0x190] ss:$8 sps:$4 sm:$0xff]   ;;  %v1621_v62 = vld [vmem:[%s2309_s1 + $0x84] ss:$8 sps:$4 sm:$0xff]  }
  0x16   :  { %v1623_v63 = vld [vmem:[%s2309_s1 + $0x184] ss:$8 sps:$4 sm:$0xff]   ;;  %v1625_v0 = vld [vmem:[%s2309_s1 + $0x80] ss:$8 sps:$4 sm:$0xff]   ;;  %v1635_v2 = vld [vmem:[%s2309_s1 + $0x274] ss:$8 sps:$4 sm:$0xff]  }
  0x17   :  { %1002 = vmatpush1.bf16.msra.mxu0 %v1565_v22  ;;  %v1626_v1 = vld [vmem:[%s2309_s1 + $0x180] ss:$8 sps:$4 sm:$0xff]   ;;  %v1638_v3 = vld [vmem:[%s2309_s1 + $0x374] ss:$8 sps:$4 sm:$0xff]   ;;  %v1633_v6 = vld [vmem:[%s2309_s1 + $0x270] ss:$8 sps:$4 sm:$0xff]  }
  0x18   :  { %1055 = vmatpush1.bf16.msra.mxu1 %v1566_v23  ;;  %1003 = vmatprep.subr.bf16.mxu0 %v1567_v24  ;;  %v1627_v4 = vld [vmem:[%s2310_s0] ss:$36 sps:$4 sm:$0xff]   ;;  %v1630_v5 = vld [vmem:[%s2310_s0 + $0x8] ss:$36 sps:$4 sm:$0xff]   ;;  %v1636_v7 = vld [vmem:[%s2309_s1 + $0x370] ss:$8 sps:$4 sm:$0xff]  }
  0x19   :  { %1056 = vmatprep.subr.bf16.mxu1 %v1569_v25  ;;  %v1641_v8 = vld [vmem:[%s2309_s1 + $0x264] ss:$8 sps:$4 sm:$0xff]   ;;  %v1639_v10 = vld [vmem:[%s2309_s1 + $0x260] ss:$8 sps:$4 sm:$0xff]   ;;  %v1647_v12 = vld [vmem:[%s2309_s1 + $0x254] ss:$8 sps:$4 sm:$0xff]  }
  0x1a   :  { %v1644_v9 = vld [vmem:[%s2309_s1 + $0x364] ss:$8 sps:$4 sm:$0xff]   ;;  %v1642_v11 = vld [vmem:[%s2309_s1 + $0x360] ss:$8 sps:$4 sm:$0xff]   ;;  %v1650_v13 = vld [vmem:[%s2309_s1 + $0x354] ss:$8 sps:$4 sm:$0xff]  }
  0x1b   :  { %1004 = vmatpush1.bf16.msra.mxu0 %v1571_v26  ;;  %v1645_v14 = vld [vmem:[%s2309_s1 + $0x250] ss:$8 sps:$4 sm:$0xff]   ;;  %v1653_v16 = vld [vmem:[%s2309_s1 + $0x244] ss:$8 sps:$4 sm:$0xff]   ;;  %v1651_v18 = vld [vmem:[%s2309_s1 + $0x240] ss:$8 sps:$4 sm:$0xff]  }
  0x1c   :  { %1057 = vmatpush1.bf16.msra.mxu1 %v1572_v27  ;;  %1005 = vmatprep.subr.bf16.mxu0 %v1573_v28  ;;  %v1648_v15 = vld [vmem:[%s2309_s1 + $0x350] ss:$8 sps:$4 sm:$0xff]   ;;  %v1656_v17 = vld [vmem:[%s2309_s1 + $0x344] ss:$8 sps:$4 sm:$0xff]   ;;  %v1654_v19 = vld [vmem:[%s2309_s1 + $0x340] ss:$8 sps:$4 sm:$0xff]  }
  0x1d   :  { %1058 = vmatprep.subr.bf16.mxu1 %v1575_v29  ;;  %v1659_v20 = vld [vmem:[%s2309_s1 + $0x234] ss:$8 sps:$4 sm:$0xff]   ;;  %v1657_v22 = vld [vmem:[%s2309_s1 + $0x230] ss:$8 sps:$4 sm:$0xff]   ;;  %v1665_v24 = vld [vmem:[%s2309_s1 + $0x224] ss:$8 sps:$4 sm:$0xff]  }
  0x1e   :  { %v1662_v21 = vld [vmem:[%s2309_s1 + $0x334] ss:$8 sps:$4 sm:$0xff]   ;;  %v1660_v23 = vld [vmem:[%s2309_s1 + $0x330] ss:$8 sps:$4 sm:$0xff]   ;;  %v1668_v25 = vld [vmem:[%s2309_s1 + $0x324] ss:$8 sps:$4 sm:$0xff]  }
  0x1f   :  { %1006 = vmatpush1.bf16.msra.mxu0 %v1577_v30  ;;  %v1711_v26 = vld [vmem:[%s2310_s0 + $0x4c] ss:$36 sps:$4 sm:$0xff]   ;;  %v1713_v27 = vld [vmem:[%s2310_s0 + $0x54] ss:$36 sps:$4 sm:$0xff]   ;;  %v1663_v30 = vld [vmem:[%s2309_s1 + $0x220] ss:$8 sps:$4 sm:$0xff]  }
  0x20   :  { %1059 = vmatpush1.bf16.msra.mxu1 %v1578_v31  ;;  %1007 = vmatprep.subr.bf16.mxu0 %v1579_v32  ;;  %v1715_v28 = vld [vmem:[%s2310_s0 + $0x48] ss:$36 sps:$4 sm:$0xff]   ;;  %v1716_v29 = vld [vmem:[%s2310_s0 + $0x50] ss:$36 sps:$4 sm:$0xff]  }
  0x21   :  { %1060 = vmatprep.subr.bf16.mxu1 %v1581_v33  ;;  %v1666_v31 = vld [vmem:[%s2309_s1 + $0x320] ss:$8 sps:$4 sm:$0xff]   ;;  %v1671_v32 = vld [vmem:[%s2309_s1 + $0x214] ss:$8 sps:$4 sm:$0xff]  }
  0x22   :  { %v1674_v33 = vld [vmem:[%s2309_s1 + $0x314] ss:$8 sps:$4 sm:$0xff]   ;;  %v1690_v49 = vld [vmem:[%s2309_s1 + $0x3e0] ss:$8 sps:$4 sm:$0xff]  }
  0x23   :  { %1008 = vmatpush2.bf16.msra.mxu0 %v1583_v34  ;;  %v1669_v34 = vld [vmem:[%s2309_s1 + $0x210] ss:$8 sps:$4 sm:$0xff]   ;;  %v1698_v51 = vld [vmem:[%s2309_s1 + $0x3d4] ss:$8 sps:$4 sm:$0xff]  }
  0x24   :  { %1061 = vmatpush2.bf16.msra.mxu1 %v1584_v35  ;;  %1009 = vmatprep.subr.bf16.mxu0 %v1585_v36  ;;  %v1672_v35 = vld [vmem:[%s2309_s1 + $0x310] ss:$8 sps:$4 sm:$0xff]   ;;  %v1677_v36 = vld [vmem:[%s2309_s1 + $0x204] ss:$8 sps:$4 sm:$0xff]  }
  0x25   :  { %1062 = vmatprep.subr.bf16.mxu1 %v1587_v37  ;;  %v1680_v37 = vld [vmem:[%s2309_s1 + $0x304] ss:$8 sps:$4 sm:$0xff]  }
  0x27   :  { %1010 = vmatpush2.bf16.msra.mxu0 %v1589_v38  ;;  %v1675_v38 = vld [vmem:[%s2309_s1 + $0x200] ss:$8 sps:$4 sm:$0xff]  }
  0x28   :  { %1063 = vmatpush2.bf16.msra.mxu1 %v1590_v39  ;;  %1011 = vmatprep.subr.bf16.mxu0 %v1591_v40  ;;  %v1678_v39 = vld [vmem:[%s2309_s1 + $0x300] ss:$8 sps:$4 sm:$0xff]   ;;  %v1683_v40 = vld [vmem:[%s2309_s1 + $0x2f4] ss:$8 sps:$4 sm:$0xff]  }
  0x29   :  { %1064 = vmatprep.subr.bf16.mxu1 %v1593_v41  ;;  %v1737_v41 = vld [vmem:[%s2310_s0 + $0x14] ss:$36 sps:$4 sm:$0xff]  }
  0x2b   :  { %1012 = vmatpush2.bf16.msra.mxu0 %v1595_v42  ;;  %v1686_v42 = vld [vmem:[%s2309_s1 + $0x3f4] ss:$8 sps:$4 sm:$0xff]  }
  0x2c   :  { %1065 = vmatpush2.bf16.msra.mxu1 %v1596_v43  ;;  %1013 = vmatprep.subr.bf16.mxu0 %v1597_v44  ;;  %v1740_v43 = vld [vmem:[%s2310_s0 + $0x1c] ss:$36 sps:$4 sm:$0xff]   ;;  %v1681_v44 = vld [vmem:[%s2309_s1 + $0x2f0] ss:$8 sps:$4 sm:$0xff]  }
  0x2d   :  { %1066 = vmatprep.subr.bf16.mxu1 %v1599_v45  ;;  %v1684_v45 = vld [vmem:[%s2309_s1 + $0x3f0] ss:$8 sps:$4 sm:$0xff]  }
  0x2f   :  { %1014 = vmatpush2.bf16.msra.mxu0 %v1601_v46  ;;  %v1689_v46 = vld [vmem:[%s2309_s1 + $0x2e4] ss:$8 sps:$4 sm:$0xff]  }
  0x30   :  { %1067 = vmatpush2.bf16.msra.mxu1 %v1602_v47  ;;  %1015 = vmatprep.subr.bf16.mxu0 %v1603_v48  ;;  %v1692_v47 = vld [vmem:[%s2309_s1 + $0x3e4] ss:$8 sps:$4 sm:$0xff]   ;;  %v1687_v48 = vld [vmem:[%s2309_s1 + $0x2e0] ss:$8 sps:$4 sm:$0xff]  }
  0x31   :  { %1068 = vmatprep.subr.bf16.mxu1 %v1605_v50  ;;  %v1695_v50 = vld [vmem:[%s2309_s1 + $0x2d4] ss:$8 sps:$4 sm:$0xff]  }
  0x33   :  { %1016 = vmatpush2.bf16.msra.mxu0 %v1607_v52  ;;  %v1693_v52 = vld [vmem:[%s2309_s1 + $0x2d0] ss:$8 sps:$4 sm:$0xff]  }
  0x34   :  { %1069 = vmatpush2.bf16.msra.mxu1 %v1608_v53  ;;  %1017 = vmatprep.subr.bf16.mxu0 %v1609_v54  ;;  %v1696_v53 = vld [vmem:[%s2309_s1 + $0x3d0] ss:$8 sps:$4 sm:$0xff]   ;;  %v1701_v54 = vld [vmem:[%s2309_s1 + $0x2c4] ss:$8 sps:$4 sm:$0xff]  }
  0x35   :  { %1070 = vmatprep.subr.bf16.mxu1 %v1611_v55  ;;  %v1704_v55 = vld [vmem:[%s2309_s1 + $0x3c4] ss:$8 sps:$4 sm:$0xff]  }
  0x37   :  { %1018 = vmatpush2.bf16.msra.mxu0 %v1613_v56  ;;  %v1699_v56 = vld [vmem:[%s2309_s1 + $0x2c0] ss:$8 sps:$4 sm:$0xff]  }
  0x38   :  { %1071 = vmatpush2.bf16.msra.mxu1 %v1614_v57  ;;  %1019 = vmatprep.subr.bf16.mxu0 %v1615_v58  ;;  %v1702_v57 = vld [vmem:[%s2309_s1 + $0x3c0] ss:$8 sps:$4 sm:$0xff]   ;;  %v1707_v58 = vld [vmem:[%s2309_s1 + $0x2b4] ss:$8 sps:$4 sm:$0xff]  }
  0x39   :  { %1072 = vmatprep.subr.bf16.mxu1 %v1617_v59  ;;  %v1710_v59 = vld [vmem:[%s2309_s1 + $0x3b4] ss:$8 sps:$4 sm:$0xff]  }
  0x3b   :  { %1020 = vmatpush2.bf16.msra.mxu0 %v1619_v60  ;;  %v1705_v60 = vld [vmem:[%s2309_s1 + $0x2b0] ss:$8 sps:$4 sm:$0xff]  }
  0x3c   :  { %1073 = vmatpush2.bf16.msra.mxu1 %v1620_v61  ;;  %1021 = vmatprep.subr.bf16.mxu0 %v1621_v62  ;;  %v1708_v61 = vld [vmem:[%s2309_s1 + $0x3b0] ss:$8 sps:$4 sm:$0xff]   ;;  %v1719_v62 = vld [vmem:[%s2309_s1 + $0x2a4] ss:$8 sps:$4 sm:$0xff]  }
  0x3d   :  { %1074 = vmatprep.subr.bf16.mxu1 %v1623_v63  ;;  %v1722_v63 = vld [vmem:[%s2309_s1 + $0x3a4] ss:$8 sps:$4 sm:$0xff]  }
  0x3f   :  { %1022 = vmatpush2.bf16.msra.mxu0 %v1625_v0  ;;  %v1717_v0 = vld [vmem:[%s2309_s1 + $0x2a0] ss:$8 sps:$4 sm:$0xff]  }
  0x40   :  { %1075 = vmatpush2.bf16.msra.mxu1 %v1626_v1  ;;  %1097 = vmatprep.subr.bf16.mxu0 %v1635_v2  ;;  %v1720_v1 = vld [vmem:[%s2309_s1 + $0x3a0] ss:$8 sps:$4 sm:$0xff]   ;;  %v1725_v2 = vld [vmem:[%s2309_s1 + $0x294] ss:$8 sps:$4 sm:$0xff]  }
  0x41   :  { %1150 = vmatprep.subr.bf16.mxu1 %v1638_v3  ;;  %v1728_v3 = vld [vmem:[%s2309_s1 + $0x394] ss:$8 sps:$4 sm:$0xff]  }
  0x42   :  { %1024 = vmatmul.mubr.bf16.vlgmr.msra.gmra.mxu0 %v1627_v4  ;;  %v1723_v4 = vld [vmem:[%s2309_s1 + $0x290] ss:$8 sps:$4 sm:$0xff]  }
  0x43   :  { %1077 = vmatmul.mubr.bf16.vlgmr.msra.gmra.mxu1 %v1630_v5  ;;  %1098 = vmatpush1.bf16.msra.mxu0 %v1633_v6  ;;  %v1726_v5 = vld [vmem:[%s2309_s1 + $0x390] ss:$8 sps:$4 sm:$0xff]   ;;  %v1731_v6 = vld [vmem:[%s2309_s1 + $0x284] ss:$8 sps:$4 sm:$0xff]  }
  0x44   :  { %1151 = vmatpush1.bf16.msra.mxu1 %v1636_v7  ;;  %1099 = vmatprep.subr.bf16.mxu0 %v1641_v8  ;;  %v1734_v7 = vld [vmem:[%s2309_s1 + $0x384] ss:$8 sps:$4 sm:$0xff]   ;;  %v1729_v8 = vld [vmem:[%s2309_s1 + $0x280] ss:$8 sps:$4 sm:$0xff]  }
  0x45   :  { %1152 = vmatprep.subr.bf16.mxu1 %v1644_v9  ;;  %1033 = vmatprep.mubr.bf16.mxu0 %v1711_v26  ;;  %v1732_v9 = vld [vmem:[%s2309_s1 + $0x380] ss:$8 sps:$4 sm:$0xff]   ;;  %v1759_v26 = vld [vmem:[%s2309_s1 + $0x430] ss:$8 sps:$4 sm:$0xff]  }
  0x46   :  { %1086 = vmatprep.mubr.bf16.mxu1 %v1713_v27  ;;  %v1764_v27 = vld [vmem:[%s2309_s1 + $0x424] ss:$8 sps:$4 sm:$0xff]  }
  0x47   :  { %1100 = vmatpush1.bf16.msra.mxu0 %v1639_v10  ;;  %v1743_v10 = vld [vmem:[%s2309_s1 + $0x474] ss:$8 sps:$4 sm:$0xff]  }
  0x48   :  { %1153 = vmatpush1.bf16.msra.mxu1 %v1642_v11  ;;  %1101 = vmatprep.subr.bf16.mxu0 %v1647_v12  ;;  %v1735_v11 = vld [vmem:[%s2310_s0 + $0x10] ss:$36 sps:$4 sm:$0xff]   ;;  %v1738_v12 = vld [vmem:[%s2310_s0 + $0x18] ss:$36 sps:$4 sm:$0xff]  }
  0x49   :  { %1154 = vmatprep.subr.bf16.mxu1 %v1650_v13  ;;  %v1741_v13 = vld [vmem:[%s2309_s1 + $0x470] ss:$8 sps:$4 sm:$0xff]  }
  0x4a   :  { %1034 = vmatmul.mubr.bf16.gmra.mxu0 %v1715_v28  ;;  %v1762_v28 = vld [vmem:[%s2309_s1 + $0x420] ss:$8 sps:$4 sm:$0xff]  }
  0x4b   :  { %1102 = vmatpush1.bf16.msra.mxu0 %v1645_v14  ;;  %1087 = vmatmul.mubr.bf16.gmra.mxu1 %v1716_v29  ;;  %v1746_v14 = vld [vmem:[%s2309_s1 + $0x464] ss:$8 sps:$4 sm:$0xff]   ;;  %v1767_v29 = vld [vmem:[%s2309_s1 + $0x414] ss:$8 sps:$4 sm:$0xff]  }
  0x4c   :  { %1155 = vmatpush1.bf16.msra.mxu1 %v1648_v15  ;;  %1103 = vmatprep.subr.bf16.mxu0 %v1653_v16  ;;  %v1747_v15 = vld [vmem:[%s2310_s0 + $0x5c] ss:$36 sps:$4 sm:$0xff]   ;;  %v1753_v16 = vld [vmem:[%s2310_s0 + $0x64] ss:$36 sps:$4 sm:$0xff]  }
  0x4d   :  { %1156 = vmatprep.subr.bf16.mxu1 %v1656_v17  ;;  %1129 = vmatprep.mubr.bf16.mxu0 %v1737_v41  ;;  %v1744_v17 = vld [vmem:[%s2309_s1 + $0x460] ss:$8 sps:$4 sm:$0xff]  }
  0x4e   :  { %1182 = vmatprep.mubr.bf16.mxu1 %v1740_v43 }
  0x4f   :  { %1104 = vmatpush1.bf16.msra.mxu0 %v1651_v18  ;;  %v1752_v18 = vld [vmem:[%s2309_s1 + $0x454] ss:$8 sps:$4 sm:$0xff]  }
  0x50   :  { %1157 = vmatpush1.bf16.msra.mxu1 %v1654_v19  ;;  %1105 = vmatprep.subr.bf16.mxu0 %v1659_v20  ;;  %v1749_v19 = vld [vmem:[%s2310_s0 + $0x58] ss:$36 sps:$4 sm:$0xff]   ;;  %v1755_v20 = vld [vmem:[%s2310_s0 + $0x60] ss:$36 sps:$4 sm:$0xff]  }
  0x51   :  { %1158 = vmatprep.subr.bf16.mxu1 %v1662_v21  ;;  %v1750_v21 = vld [vmem:[%s2309_s1 + $0x450] ss:$8 sps:$4 sm:$0xff]  }
  0x53   :  { %1106 = vmatpush1.bf16.msra.mxu0 %v1657_v22  ;;  %v1758_v22 = vld [vmem:[%s2309_s1 + $0x444] ss:$8 sps:$4 sm:$0xff]  }
  0x54   :  { %1159 = vmatpush1.bf16.msra.mxu1 %v1660_v23  ;;  %1107 = vmatprep.subr.bf16.mxu0 %v1665_v24  ;;  %v1756_v23 = vld [vmem:[%s2309_s1 + $0x440] ss:$8 sps:$4 sm:$0xff]   ;;  %v1761_v24 = vld [vmem:[%s2309_s1 + $0x434] ss:$8 sps:$4 sm:$0xff]  }
  0x55   :  { %1160 = vmatprep.subr.bf16.mxu1 %v1668_v25  ;;  %v1773_v25 = vmov 0  }
  0x57   :  { %1108 = vmatpush1.bf16.msra.mxu0 %v1663_v30  ;;  %v1765_v30 = vld [vmem:[%s2309_s1 + $0x410] ss:$8 sps:$4 sm:$0xff]  }
  0x58   :  { %1161 = vmatpush1.bf16.msra.mxu1 %v1666_v31  ;;  %1109 = vmatprep.subr.bf16.mxu0 %v1671_v32  ;;  %v1770_v31 = vld [vmem:[%s2309_s1 + $0x404] ss:$8 sps:$4 sm:$0xff]   ;;  %v1768_v32 = vld [vmem:[%s2309_s1 + $0x400] ss:$8 sps:$4 sm:$0xff]  }
  0x59   :  { %1162 = vmatprep.subr.bf16.mxu1 %v1674_v33  ;;  %v1771_v33 = vld [vmem:[%s2310_s0 + $0x20] ss:$36 sps:$4 sm:$0xff]  }
  0x5b   :  { %1110 = vmatpush1.bf16.msra.mxu0 %v1669_v34  ;;  %v1772_v34 = vld [vmem:[%s2310_s0 + $0x68] ss:$36 sps:$4 sm:$0xff]  }
  0x5c   :  { %1163 = vmatpush1.bf16.msra.mxu1 %v1672_v35  ;;  %1111 = vmatprep.subr.bf16.mxu0 %v1677_v36 }
  0x5d   :  { %1164 = vmatprep.subr.bf16.mxu1 %v1680_v37 }
  0x5f   :  { %1112 = vmatpush1.bf16.msra.mxu0 %v1675_v38 }
  0x60   :  { %1165 = vmatpush1.bf16.msra.mxu1 %v1678_v39  ;;  %1113 = vmatprep.subr.bf16.mxu0 %v1683_v40 }
  0x61   :  { %1166 = vmatprep.subr.bf16.mxu1 %v1686_v42 }
  0x63   :  { %1114 = vmatpush2.bf16.msra.mxu0 %v1681_v44 }
  0x64   :  { %1167 = vmatpush2.bf16.msra.mxu1 %v1684_v45  ;;  %1115 = vmatprep.subr.bf16.mxu0 %v1689_v46 }
  0x65   :  { %1168 = vmatprep.subr.bf16.mxu1 %v1692_v47 }
  0x67   :  { %1116 = vmatpush2.bf16.msra.mxu0 %v1687_v48 }
  0x68   :  { %1169 = vmatpush2.bf16.msra.mxu1 %v1690_v49  ;;  %1117 = vmatprep.subr.bf16.mxu0 %v1695_v50 }
  0x69   :  { %1170 = vmatprep.subr.bf16.mxu1 %v1698_v51 }
  0x6b   :  { %1118 = vmatpush2.bf16.msra.mxu0 %v1693_v52 }
  0x6c   :  { %1171 = vmatpush2.bf16.msra.mxu1 %v1696_v53  ;;  %1119 = vmatprep.subr.bf16.mxu0 %v1701_v54 }
  0x6d   :  { %1172 = vmatprep.subr.bf16.mxu1 %v1704_v55 }
  0x6f   :  { %1120 = vmatpush2.bf16.msra.mxu0 %v1699_v56 }
  0x70   :  { %1173 = vmatpush2.bf16.msra.mxu1 %v1702_v57  ;;  %1121 = vmatprep.subr.bf16.mxu0 %v1707_v58 }
  0x71   :  { %1174 = vmatprep.subr.bf16.mxu1 %v1710_v59 }
  0x73   :  { %1122 = vmatpush2.bf16.msra.mxu0 %v1705_v60 }
  0x74   :  { %1175 = vmatpush2.bf16.msra.mxu1 %v1708_v61  ;;  %1123 = vmatprep.subr.bf16.mxu0 %v1719_v62 }
  0x75   :  { %1176 = vmatprep.subr.bf16.mxu1 %v1722_v63 }
  0x77   :  { %1124 = vmatpush2.bf16.msra.mxu0 %v1717_v0 }
  0x78   :  { %1177 = vmatpush2.bf16.msra.mxu1 %v1720_v1  ;;  %1125 = vmatprep.subr.bf16.mxu0 %v1725_v2 }
  0x79   :  { %1178 = vmatprep.subr.bf16.mxu1 %v1728_v3 }
  0x7b   :  { %1126 = vmatpush2.bf16.msra.mxu0 %v1723_v4 }
  0x7c   :  { %1179 = vmatpush2.bf16.msra.mxu1 %v1726_v5  ;;  %1127 = vmatprep.subr.bf16.mxu0 %v1731_v6 }
  0x7d   :  { %1180 = vmatprep.subr.bf16.mxu1 %v1734_v7 }
  0x7f   :  { %1128 = vmatpush2.bf16.msra.mxu0 %v1729_v8 }
  0x80   :  { %1181 = vmatpush2.bf16.msra.mxu1 %v1732_v9  ;;  %1203 = vmatprep.subr.bf16.mxu0 %v1743_v10 }
  0x81   :  { %1514 = vmatprep.subr.bf16.mxu1 %v1743_v10 }
  0x82   :  { %1130 = vmatmul.mubr.bf16.vlgmr.msra.gmra.mxu0 %v1735_v11 }
  0x83   :  { %1183 = vmatmul.mubr.bf16.vlgmr.msra.gmra.mxu1 %v1738_v12  ;;  %1204 = vmatpush1.bf16.msra.mxu0 %v1741_v13 }
  0x84   :  { %1522 = vmatpush1.bf16.msra.mxu1 %v1741_v13  ;;  %1205 = vmatprep.subr.bf16.mxu0 %v1746_v14 }
  0x85   :  { %1515 = vmatprep.subr.bf16.mxu1 %v1746_v14  ;;  %1139 = vmatprep.mubr.bf16.mxu0 %v1747_v15 }
  0x86   :  { %1192 = vmatprep.mubr.bf16.mxu1 %v1753_v16 }
  0x87   :  { %1206 = vmatpush1.bf16.msra.mxu0 %v1744_v17 }
  0x88   :  { %1523 = vmatpush1.bf16.msra.mxu1 %v1744_v17  ;;  %1207 = vmatprep.subr.bf16.mxu0 %v1752_v18 }
  0x89   :  { %1516 = vmatprep.subr.bf16.mxu1 %v1752_v18 }
  0x8a   :  { %1140 = vmatmul.mubr.bf16.gmra.mxu0 %v1749_v19 }
  0x8b   :  { %1193 = vmatmul.mubr.bf16.gmra.mxu1 %v1755_v20  ;;  %1208 = vmatpush1.bf16.msra.mxu0 %v1750_v21 }
  0x8c   :  { %1524 = vmatpush1.bf16.msra.mxu1 %v1750_v21  ;;  %1209 = vmatprep.subr.bf16.mxu0 %v1758_v22 }
  0x8d   :  { %1517 = vmatprep.subr.bf16.mxu1 %v1758_v22  ;;  %1235 = vmatprep.mubr.bf16.mxu0 %v1773_v25 }
  0x8e   :  { %1245 = vmatprep.mubr.bf16.mxu1 %v1773_v25 }
  0x8f   :  { %1210 = vmatpush1.bf16.msra.mxu0 %v1756_v23 }
  0x90   :  { %1525 = vmatpush1.bf16.msra.mxu1 %v1756_v23  ;;  %1211 = vmatprep.subr.bf16.mxu0 %v1761_v24 }
  0x91   :  { %1518 = vmatprep.subr.bf16.mxu1 %v1761_v24 }
  0x93   :  { %1212 = vmatpush1.bf16.msra.mxu0 %v1759_v26 }
  0x94   :  { %1526 = vmatpush1.bf16.msra.mxu1 %v1759_v26  ;;  %1213 = vmatprep.subr.bf16.mxu0 %v1764_v27 }
  0x95   :  { %1519 = vmatprep.subr.bf16.mxu1 %v1764_v27 }
  0x97   :  { %1214 = vmatpush1.bf16.msra.mxu0 %v1762_v28 }
  0x98   :  { %1527 = vmatpush1.bf16.msra.mxu1 %v1762_v28  ;;  %1215 = vmatprep.subr.bf16.mxu0 %v1767_v29 }
  0x99   :  { %1520 = vmatprep.subr.bf16.mxu1 %v1767_v29 }
  0x9b   :  { %1216 = vmatpush1.bf16.msra.mxu0 %v1765_v30 }
  0x9c   :  { %1528 = vmatpush1.bf16.msra.mxu1 %v1765_v30  ;;  %1217 = vmatprep.subr.bf16.mxu0 %v1770_v31 }
  0x9d   :  { %1521 = vmatprep.subr.bf16.mxu1 %v1770_v31 }
  0x9f   :  { %1218 = vmatpush1.bf16.msra.mxu0 %v1768_v32 }
  0xa0   :  { %1529 = vmatpush1.bf16.msra.mxu1 %v1768_v32 }
  0xa2   :  { %1236 = vmatmul.mubr.bf16.vlgmr.msra.gmra.mxu0 %v1771_v33 }
  0xa3   :  { %1246 = vmatmul.mubr.bf16.vlgmr.msra.gmra.mxu1 %v1772_v34 }
 0x102   :  { %v1025_v35 = vpop.f32.mrf.mxu0 }
 0x103   :  { %v1078_v36 = vpop.f32.mrf.mxu1 }
 0x104   :  { %v1027_v37 = vpop.f32.mrf.mxu0  ;;  %v1079_v63 = vadd.f32 %v1078_v36, %v1025_v35 }
 0x105   :  { %v1080_v38 = vpop.f32.mrf.mxu1 }
 0x106   :  { %v1029_v39 = vpop.f32.mrf.mxu0  ;;  %v1081_v0 = vadd.f32 %v1080_v38, %v1027_v37 }
 0x107   :  { %v1082_v40 = vpop.f32.mrf.mxu1 }
 0x108   :  { %v1031_v41 = vpop.f32.mrf.mxu0  ;;  %v1083_v9 = vadd.f32 %v1082_v40, %v1029_v39 }
 0x109   :  { %v1084_v42 = vpop.f32.mrf.mxu1 }
 0x10a   :  { %v1035_v43 = vpop.f32.mrf.mxu0  ;;  %v1085_v10 = vadd.f32 %v1084_v42, %v1031_v41 }
 0x10b   :  { %v1088_v44 = vpop.f32.mrf.mxu1 }
 0x10c   :  { %v1037_v45 = vpop.f32.mrf.mxu0  ;;  %v1089_v3 = vadd.f32 %v1088_v44, %v1035_v43 }
 0x10d   :  { %v1090_v46 = vpop.f32.mrf.mxu1 }
 0x10e   :  { %v1039_v47 = vpop.f32.mrf.mxu0  ;;  %v1091_v4 = vadd.f32 %v1090_v46, %v1037_v45 }
 0x10f   :  { %v1092_v48 = vpop.f32.mrf.mxu1 }
 0x110   :  { %v1041_v49 = vpop.f32.mrf.mxu0  ;;  %v1093_v13 = vadd.f32 %v1092_v48, %v1039_v47 }
 0x111   :  { %v1094_v50 = vpop.f32.mrf.mxu1 }
 0x112   :  { %v1095_v14 = vadd.f32 %v1094_v50, %v1041_v49 }
 0x142   :  { %v1131_v51 = vpop.f32.mrf.mxu0 }
 0x143   :  { %v1184_v52 = vpop.f32.mrf.mxu1  ;;  %v1132_v5 = vadd.f32 %v1131_v51, %v1079_v63 }
 0x144   :  { %v1133_v53 = vpop.f32.mrf.mxu0 }
 0x145   :  { %v1186_v54 = vpop.f32.mrf.mxu1  ;;  %v1134_v6 = vadd.f32 %v1133_v53, %v1081_v0  ;;  %v1185_v15 = vadd.f32 %v1184_v52, %v1132_v5 }
 0x146   :  { %v1135_v55 = vpop.f32.mrf.mxu0 }
 0x147   :  { %v1188_v56 = vpop.f32.mrf.mxu1  ;;  %v1187_v16 = vadd.f32 %v1186_v54, %v1134_v6  ;;  %v1136_v17 = vadd.f32 %v1135_v55, %v1083_v9 }
 0x148   :  { %v1137_v57 = vpop.f32.mrf.mxu0 }
 0x149   :  { %v1190_v58 = vpop.f32.mrf.mxu1  ;;  %v1138_v18 = vadd.f32 %v1137_v57, %v1085_v10  ;;  %v1189_v31 = vadd.f32 %v1188_v56, %v1136_v17 }
 0x14a   :  { %v1141_v59 = vpop.f32.mrf.mxu0 }
 0x14b   :  { %v1194_v60 = vpop.f32.mrf.mxu1  ;;  %v1142_v7 = vadd.f32 %v1141_v59, %v1089_v3  ;;  %v1191_v32 = vadd.f32 %v1190_v58, %v1138_v18 }
 0x14c   :  { %v1143_v61 = vpop.f32.mrf.mxu0 }
 0x14d   :  { %v1196_v62 = vpop.f32.mrf.mxu1  ;;  %v1144_v8 = vadd.f32 %v1143_v61, %v1091_v4  ;;  %v1195_v21 = vadd.f32 %v1194_v60, %v1142_v7 }
 0x14e   :  { %v1145_v1 = vpop.f32.mrf.mxu0 }
 0x14f   :  { %v1198_v2 = vpop.f32.mrf.mxu1  ;;  %v1146_v22 = vadd.f32 %v1145_v1, %v1093_v13  ;;  %v1197_v23 = vadd.f32 %v1196_v62, %v1144_v8 }
 0x150   :  { %v1147_v11 = vpop.f32.mrf.mxu0 }
 0x151   :  { %v1200_v12 = vpop.f32.mrf.mxu1  ;;  %v1148_v24 = vadd.f32 %v1147_v11, %v1095_v14  ;;  %v1199_v35 = vadd.f32 %v1198_v2, %v1146_v22 }
 0x153   :  { %v1201_v36 = vadd.f32 %v1200_v12, %v1148_v24 }
 0x162   :  { %v1237_v19 = vpop.f32.mrf.mxu0 }
 0x163   :  { %v1247_v20 = vpop.f32.mrf.mxu1  ;;  %v1238_v27 = vadd.f32 %v1237_v19, %v1185_v15 }
 0x164   :  { %v1239_v25 = vpop.f32.mrf.mxu0  ;;  %v1248_v28 = vadd.f32 %v1247_v20, %v1195_v21 }
 0x165   :  { %v1249_v26 = vpop.f32.mrf.mxu1  ;;  %v1240_v29 = vadd.f32 %v1239_v25, %v1187_v16  ;;  %v1302_v45 = vmul.f32 %v1238_v27, %v1238_v27 }
 0x166   :  { %v1250_v30 = vadd.f32 %v1249_v26, %v1197_v23  ;;  %v1241_v33 = vpop.f32.mrf.mxu0  ;;  %v1306_v53 = vmul.f32 %v1248_v28, %v1248_v28 }
 0x167   :  { %v1251_v34 = vpop.f32.mrf.mxu1  ;;  %v1510_v37 = vpack.c.bf16 %v1240_v29, %v1238_v27  ;;  %v1242_v39 = vadd.f32 %v1241_v33, %v1189_v31  ;;  %v1303_v46 = vmul.f32 %v1240_v29, %v1240_v29 }
 0x168   :  { %v1512_v38 = vpack.c.bf16 %v1250_v30, %v1248_v28  ;;  %v1243_v40 = vpop.f32.mrf.mxu0  ;;  %v1252_v42 = vadd.f32 %v1251_v34, %v1199_v35  ;;  %v1307_v56 = vmul.f32 %v1250_v30, %v1250_v30 }
 0x169   :  { %v1253_v41 = vpop.f32.mrf.mxu1  ;;  %1280 = vst [vmem:[%s2311_s2] sm:$0xff] %v1510_v37  ;;  %v1244_v43 = vadd.f32 %v1243_v40, %v1191_v32  ;;  %v1284_v47 = vadd.f32 %v1242_v39, %v1238_v27  ;;  %v1304_v48 = vmul.f32 %v1242_v39, %v1242_v39 }
 0x16a   :  { %1282 = vst [vmem:[%s2311_s2 + $0x10] sm:$0xff] %v1512_v38  ;;  %v1254_v44 = vadd.f32 %v1253_v41, %v1201_v36  ;;  %v1308_v60 = vmul.f32 %v1252_v42, %v1252_v42 }
 0x16b   :  { %v1511_v49 = vpack.c.bf16 %v1244_v43, %v1242_v39  ;;  %v1293_v50 = vadd.f32 %v1244_v43, %v1240_v29  ;;  %v1305_v51 = vmul.f32 %v1244_v43, %v1244_v43  ;;  %v1310_v54 = vadd.f32 %v1304_v48, %v1302_v45 }
 0x16c   :  { %v1513_v52 = vpack.c.bf16 %v1254_v44, %v1252_v42  ;;  %v1285_v55 = vadd.f32 %v1284_v47, %v1248_v28  ;;  %v1309_v63 = vmul.f32 %v1254_v44, %v1254_v44 }
 0x16d   :  { %1281 = vst [vmem:[%s2311_s2 + $0x8] sm:$0xff] %v1511_v49  ;;  %v1319_v57 = vadd.f32 %v1305_v51, %v1303_v46  ;;  %v1294_v58 = vadd.f32 %v1293_v50, %v1250_v30  ;;  %v1311_v61 = vadd.f32 %v1310_v54, %v1306_v53 }
 0x16e   :  { %1283 = vst [vmem:[%s2311_s2 + $0x18] sm:$0xff] %v1513_v52  ;;  %v1286_v59 = vadd.f32 %v1285_v55, %v1252_v42 }
 0x16f   :  { %v1295_v62 = vadd.f32 %v1294_v58, %v1254_v44  ;;  %v1320_v0 = vadd.f32 %v1319_v57, %v1307_v56  ;;  %v1312_v2 = vadd.f32 %v1311_v61, %v1308_v60 }
 0x170   :  { %v1287_v1 = vrot.slane %v1286_v59, 4 }
 0x171   :  { %v1296_v3 = vrot.slane %v1295_v62, 4  ;;  %v1321_v4 = vadd.f32 %v1320_v0, %v1309_v63  ;;  %v1313_v6 = vrot.slane %v1312_v2, 4 }
 0x172   :  { %v1288_v5 = vadd.f32 %v1287_v1, %v1286_v59 }
 0x173   :  { %v1297_v7 = vadd.f32 %v1296_v3, %v1295_v62  ;;  %v1322_v8 = vrot.slane %v1321_v4, 4  ;;  %v1314_v10 = vadd.f32 %v1313_v6, %v1312_v2 }
 0x174   :  { %v1289_v9 = vrot.slane %v1288_v5, 2 }
 0x175   :  { %v1298_v11 = vrot.slane %v1297_v7, 2  ;;  %v1323_v12 = vadd.f32 %v1322_v8, %v1321_v4  ;;  %v1315_v14 = vrot.slane %v1314_v10, 2 }
 0x176   :  { %v1290_v13 = vadd.f32 %v1289_v9, %v1288_v5 }
 0x177   :  { %v1299_v15 = vadd.f32 %v1298_v11, %v1297_v7  ;;  %v1324_v16 = vrot.slane %v1323_v12, 2  ;;  %v1316_v18 = vadd.f32 %v1315_v14, %v1314_v10 }
 0x178   :  { %v1291_v17 = vrot.slane %v1290_v13, 1 }
 0x179   :  { %v1300_v19 = vrot.slane %v1299_v15, 1  ;;  %v1325_v20 = vadd.f32 %v1324_v16, %v1323_v12  ;;  %v1317_v22 = vrot.slane %v1316_v18, 1 }
 0x17a   :  { %v1292_v21 = vadd.f32 %v1291_v17, %v1290_v13 }
 0x17b   :  { %v1301_v23 = vadd.f32 %v1300_v19, %v1299_v15  ;;  %v1326_v24 = vrot.slane %v1325_v20, 1  ;;  %v1318_v25 = vadd.f32 %v1317_v22, %v1316_v18 }
 0x17c   :  { %1328 = vst [vmem:[%s2312_s3] sm:$0xff] %v1292_v21 }
 0x17d   :  { %v1327_v26 = vadd.f32 %v1326_v24, %v1325_v20  ;;  %1329 = vst [vmem:[%s2312_s3 + $0x8] sm:$0xff] %v1301_v23  ;;  %1330 = vst [vmem:[%s2313_s4] sm:$0xff] %v1318_v25 }
 0x17f   :  { %1331 = vst [vmem:[%s2313_s4 + $0x8] sm:$0xff] %v1327_v26 }

// kernel: discriminator_forward.26
= control target key start
LH: loop header
LB: loop body
LE: loop exit
PB: predicated region body
PF: predicated region fallthrough
CT: control target
= control target key end

     0   :  { %v19_v0 = vlaneseq  ;;  %s98_s0 = inlined_call_operand.vmem [shape: bf16[8,256], index: 0, kind: input, shape index: {}]   ;;  %s99_s1 = inlined_call_operand.vmem [shape: f32[1,256], index: 1, kind: input, shape index: {}]   ;;  %s100_s2 = inlined_call_operand.vmem [shape: f32[1,256], index: 2, kind: input, shape index: {}]   ;;  %s101_s3 = inlined_call_operand.vmem [shape: bf16[8,256], index: 3, kind: output, shape index: {}]  }
   0x1   :  { %v14_v1 = vld [vmem:[%s98_s0] sm:$0xff] }
   0x2   :  { %v20_v2 = vshrl.u32 %v19_v0, 7  ;;  %v17_v3 = vld [vmem:[%s99_s1] sm:$0x3]  ;;  %v15_v5 = vunpack.c.l.bf16 %v14_v1  ;;  %v16_v6 = vunpack.c.h.bf16 %v14_v1 }
   0x3   :  { %v31_v4 = vld [vmem:[%s100_s2] sm:$0x3] }
   0x4   :  { %v21_v7 = vsub.s32 0, %v20_v2  ;;  %v25_v8 = vsub.s32 1, %v20_v2 }
   0x6   :  { %v22_v9 = vrot.slane %v17_v3, %v21_v7  ;;  %v26_v10 = vrot.slane %v17_v3, %v25_v8  ;;  %v36_v11 = vrot.slane %v31_v4, %v21_v7  ;;  %v40_v12 = vrot.slane %v31_v4, %v25_v8 }
   0x8   :  { %v29_v13 = vmul.f32 %v22_v9, %v15_v5  ;;  %v30_v14 = vmul.f32 %v26_v10, %v16_v6 }
   0xa   :  { %v43_v15 = vadd.f32 %v36_v11, %v29_v13  ;;  %v44_v16 = vadd.f32 %v40_v12, %v30_v14 }
   0xc   :  { %vm45_vm0 = vcmp.ge.f32.partialorder %v43_v15, 0.0  ;;  %vm46_vm1 = vcmp.ge.f32.partialorder %v44_v16, 0.0  ;;  %v47_v17 = vmul.f32 0.2, %v43_v15  ;;  %v48_v18 = vmul.f32 0.2, %v44_v16 }
   0xe   :  { %v49_v19 = vsel %vm45_vm0, %v43_v15, %v47_v17  ;;  %v50_v20 = vsel %vm46_vm1, %v44_v16, %v48_v18 }
   0xf   :  { %v65_v21 = vpack.c.bf16 %v50_v20, %v49_v19 }
  0x11   :  { %59 = vst [vmem:[%s101_s3] sm:$0xff] %v65_v21 }

// kernel: discriminator_forward.25
= control target key start
LH: loop header
LB: loop body
LE: loop exit
PB: predicated region body
PF: predicated region fallthrough
CT: control target
= control target key end

     0   :  { %s2051_s15 = smov 0   ;;  %s2053_s16 = smov 0   ;;  %s2270_s0 = inlined_call_operand.vmem [shape: bf16[8,2304], index: 0, kind: input, shape index: {}]   ;;  %s2271_s1 = inlined_call_operand.vmem [shape: bf16[2304,256], index: 1, kind: input, shape index: {}]   ;;  %s2272_s2 = inlined_call_operand.vmem [shape: bf16[8,256], index: 2, kind: output, shape index: {0}]   ;;  %s2273_s3 = inlined_call_operand.vmem [shape: f32[1,8,256], index: 3, kind: output, shape index: {1}]   ;;  %s2274_s4 = inlined_call_operand.vmem [shape: f32[1,8,256], index: 4, kind: output, shape index: {2}]  }
   0x1   :  { %s2055_s17 = smov 0  }
   0x2 LB: > { %s24_s18 = sadd.s32 1, %s2018_s16  ;;  %p1582_p0 = scmp.ge.s32.totalorder %s2022_s17, 1  ;;  %s2022_s17 = sphi %s2055_s17, %s15_s17   ;;  %s2018_s16 = sphi %s2053_s16, %s2276_s16   ;;  %s2014_s15 = sphi %s2051_s15, %s2275_s15  }
   0x3   : > { %p25_p1 = scmp.ge.s32.totalorder %s24_s18, 2  ;;  %p198_p2 = scmp.lt.s32.totalorder %s2022_s17, 3 }
   0x5   : > { %s2278_s18 = smov (%p25_p1, %s24_s18), 0  ;;  %p199_p3 = pnand %p1582_p0, %p198_p2 }
   0x6   : > { %s244_s19 = smul.u32 (!%p199_p3), 9, %s2014_s15  ;;  %p1586_p6 = scmp.ne.s32.totalorder (!%p199_p3), %s2014_s15, 0 }
   0x7   : > { %202 = sbr.rel (%p199_p3) target bundleno = 405 (0x195), region = 28 }
   0x8   : > { %s254_s20 = smul.u32 (!%p199_p3), 144, %s2014_s15  ;;  %p247_p4 = scmp.lt.s32.totalorder (!%p199_p3), %s244_s19, 17 }
   0xa   : > { %p255_p5 = scmp.lt.s32.totalorder (!%p199_p3), %s254_s20, 287 }
   0xc   : > { %s2280_s19 = smov (!%p247_p4, %s244_s19), 17  ;;  %s2282_s20 = smov (!%p255_p5, %s254_s20), 287 }
   0xd   : > { %s1583_s21 = sshll.u32 %s2280_s19, 2  ;;  %s1747_s25 = sshll.u32 %s2282_s20, 3 }
   0xe   : > { %s2076_s24 = scalar_lea.vmem %s2270_s0, %s1583_s21  ;;  %s2081_s28 = scalar_lea.vmem %s2271_s1, %s1747_s25 }
   0xf   : > { %280 = sbr.rel (%p1586_p6) target bundleno = 22 (0x16), region = 32 }
  0x14   : > { %v2024_v0 = vmov 0.0  }
  0x15   : > { %281 = vst [vmem:[#allocation2] sm:$0xff] %v2024_v0  ;;  %282 = vst [vmem:[#allocation2 + $0x8] sm:$0xff] %v2024_v0 }
  0x16 PF: > { %v1775_v1 = vld [vmem:[%s2081_s28 + $0x74] ss:$8 sps:$4 sm:$0xff]   ;;  %v1779_v3 = vld [vmem:[%s2081_s28 + $0x70] ss:$8 sps:$4 sm:$0xff]   ;;  %v1781_v5 = vld [vmem:[%s2081_s28 + $0x64] ss:$8 sps:$4 sm:$0xff]  }
  0x17   : > { %v1777_v2 = vld [vmem:[%s2081_s28 + $0x174] ss:$8 sps:$4 sm:$0xff]   ;;  %1186 = vmatprep.subr.bf16.mxu0 %v1775_v1  ;;  %v1780_v4 = vld [vmem:[%s2081_s28 + $0x170] ss:$8 sps:$4 sm:$0xff]   ;;  %v1783_v6 = vld [vmem:[%s2081_s28 + $0x164] ss:$8 sps:$4 sm:$0xff]  }
  0x18   : > { %1227 = vmatprep.subr.bf16.mxu1 %v1777_v2  ;;  %1187 = vmatpush1.bf16.msra.mxu0 %v1779_v3  ;;  %v1785_v7 = vld [vmem:[%s2081_s28 + $0x60] ss:$8 sps:$4 sm:$0xff]   ;;  %v1787_v9 = vld [vmem:[%s2081_s28 + $0x54] ss:$8 sps:$4 sm:$0xff]   ;;  %v1791_v11 = vld [vmem:[%s2081_s28 + $0x50] ss:$8 sps:$4 sm:$0xff]  }
  0x19   : > { %1228 = vmatpush1.bf16.msra.mxu1 %v1780_v4  ;;  %1188 = vmatprep.subr.bf16.mxu0 %v1781_v5  ;;  %v1786_v8 = vld [vmem:[%s2081_s28 + $0x160] ss:$8 sps:$4 sm:$0xff]   ;;  %v1789_v10 = vld [vmem:[%s2081_s28 + $0x154] ss:$8 sps:$4 sm:$0xff]   ;;  %v1792_v12 = vld [vmem:[%s2081_s28 + $0x150] ss:$8 sps:$4 sm:$0xff]  }
  0x1a   : > { %1229 = vmatprep.subr.bf16.mxu1 %v1783_v6  ;;  %v1793_v13 = vld [vmem:[%s2081_s28 + $0x44] ss:$8 sps:$4 sm:$0xff]   ;;  %v1797_v15 = vld [vmem:[%s2081_s28 + $0x40] ss:$8 sps:$4 sm:$0xff]   ;;  %v1799_v17 = vld [vmem:[%s2081_s28 + $0x34] ss:$8 sps:$4 sm:$0xff]  }
  0x1b   : > { %v1795_v14 = vld [vmem:[%s2081_s28 + $0x144] ss:$8 sps:$4 sm:$0xff]   ;;  %v1798_v16 = vld [vmem:[%s2081_s28 + $0x140] ss:$8 sps:$4 sm:$0xff]   ;;  %v1801_v18 = vld [vmem:[%s2081_s28 + $0x134] ss:$8 sps:$4 sm:$0xff]  }
  0x1c   : > { %1189 = vmatpush1.bf16.msra.mxu0 %v1785_v7  ;;  %v1803_v19 = vld [vmem:[%s2081_s28 + $0x30] ss:$8 sps:$4 sm:$0xff]   ;;  %v1805_v21 = vld [vmem:[%s2081_s28 + $0x24] ss:$8 sps:$4 sm:$0xff]   ;;  %v1809_v23 = vld [vmem:[%s2081_s28 + $0x20] ss:$8 sps:$4 sm:$0xff]  }
  0x1d   : > { %1230 = vmatpush1.bf16.msra.mxu1 %v1786_v8  ;;  %1190 = vmatprep.subr.bf16.mxu0 %v1787_v9  ;;  %v1804_v20 = vld [vmem:[%s2081_s28 + $0x130] ss:$8 sps:$4 sm:$0xff]   ;;  %v1807_v22 = vld [vmem:[%s2081_s28 + $0x124] ss:$8 sps:$4 sm:$0xff]   ;;  %v1810_v24 = vld [vmem:[%s2081_s28 + $0x120] ss:$8 sps:$4 sm:$0xff]  }
  0x1e   : > { %1231 = vmatprep.subr.bf16.mxu1 %v1789_v10  ;;  %v1811_v25 = vld [vmem:[%s2081_s28 + $0x14] ss:$8 sps:$4 sm:$0xff]   ;;  %v1815_v27 = vld [vmem:[%s2081_s28 + $0x10] ss:$8 sps:$4 sm:$0xff]   ;;  %v1817_v29 = vld [vmem:[%s2081_s28 + $0x4] ss:$8 sps:$4 sm:$0xff]  }
  0x1f   : > { %v1813_v26 = vld [vmem:[%s2081_s28 + $0x114] ss:$8 sps:$4 sm:$0xff]   ;;  %v1816_v28 = vld [vmem:[%s2081_s28 + $0x110] ss:$8 sps:$4 sm:$0xff]   ;;  %v1819_v30 = vld [vmem:[%s2081_s28 + $0x104] ss:$8 sps:$4 sm:$0xff]  }
  0x20   : > { %1191 = vmatpush1.bf16.msra.mxu0 %v1791_v11  ;;  %v1821_v31 = vld [vmem:[%s2081_s28] ss:$8 sps:$4 sm:$0xff]   ;;  %v1823_v33 = vld [vmem:[%s2081_s28 + $0xf4] ss:$8 sps:$4 sm:$0xff]   ;;  %v1827_v35 = vld [vmem:[%s2081_s28 + $0xf0] ss:$8 sps:$4 sm:$0xff]  }
  0x21   : > { %1232 = vmatpush1.bf16.msra.mxu1 %v1792_v12  ;;  %1192 = vmatprep.subr.bf16.mxu0 %v1793_v13  ;;  %v1822_v32 = vld [vmem:[%s2081_s28 + $0x100] ss:$8 sps:$4 sm:$0xff]   ;;  %v1825_v34 = vld [vmem:[%s2081_s28 + $0x1f4] ss:$8 sps:$4 sm:$0xff]   ;;  %v1828_v36 = vld [vmem:[%s2081_s28 + $0x1f0] ss:$8 sps:$4 sm:$0xff]  }
  0x22   : > { %1233 = vmatprep.subr.bf16.mxu1 %v1795_v14  ;;  %v1829_v37 = vld [vmem:[%s2081_s28 + $0xe4] ss:$8 sps:$4 sm:$0xff]   ;;  %v1833_v39 = vld [vmem:[%s2081_s28 + $0xe0] ss:$8 sps:$4 sm:$0xff]   ;;  %v1835_v41 = vld [vmem:[%s2081_s28 + $0xd4] ss:$8 sps:$4 sm:$0xff]  }
  0x23   : > { %v1831_v38 = vld [vmem:[%s2081_s28 + $0x1e4] ss:$8 sps:$4 sm:$0xff]   ;;  %v1834_v40 = vld [vmem:[%s2081_s28 + $0x1e0] ss:$8 sps:$4 sm:$0xff]   ;;  %v1837_v42 = vld [vmem:[%s2081_s28 + $0x1d4] ss:$8 sps:$4 sm:$0xff]  }
  0x24   : > { %1193 = vmatpush1.bf16.msra.mxu0 %v1797_v15  ;;  %v1839_v43 = vld [vmem:[%s2081_s28 + $0xd0] ss:$8 sps:$4 sm:$0xff]   ;;  %v1841_v45 = vld [vmem:[%s2081_s28 + $0xc4] ss:$8 sps:$4 sm:$0xff]   ;;  %v1845_v50 = vld [vmem:[%s2081_s28 + $0xc0] ss:$8 sps:$4 sm:$0xff]  }
  0x25   : > { %1234 = vmatpush1.bf16.msra.mxu1 %v1798_v16  ;;  %1194 = vmatprep.subr.bf16.mxu0 %v1799_v17  ;;  %v1840_v44 = vld [vmem:[%s2081_s28 + $0x1d0] ss:$8 sps:$4 sm:$0xff]   ;;  %v1843_v46 = vld [vmem:[%s2081_s28 + $0x1c4] ss:$8 sps:$4 sm:$0xff]   ;;  %v1846_v51 = vld [vmem:[%s2081_s28 + $0x1c0] ss:$8 sps:$4 sm:$0xff]  }
  0x26   : > { %1235 = vmatprep.subr.bf16.mxu1 %v1801_v18  ;;  %v285_v47 = vld [vmem:[%s2076_s24] sm:$0xff]  ;;  %v286_v49 = vld [vmem:[%s2076_s24 + $0x8] sm:$0xff]  ;;  %v1847_v53 = vld [vmem:[%s2081_s28 + $0xb4] ss:$8 sps:$4 sm:$0xff]   ;;  %p1740_p7 = scmp.ne.s32.totalorder %s2014_s15, 1 }
  0x27   : > { %v1588_v48 = vcombine.high %v285_v47, %v285_v47  ;;  %v1590_v52 = vcombine.high %v286_v49, %v286_v49  ;;  %v1849_v54 = vld [vmem:[%s2081_s28 + $0x1b4] ss:$8 sps:$4 sm:$0xff]   ;;  %v1851_v55 = vld [vmem:[%s2081_s28 + $0xb0] ss:$8 sps:$4 sm:$0xff]   ;;  %v1853_v57 = vld [vmem:[%s2081_s28 + $0xa4] ss:$8 sps:$4 sm:$0xff]   ;;  %v1587_v7 = vcombine.low %v285_v47, %v285_v47  ;;  %v1589_v8 = vcombine.low %v286_v49, %v286_v49 }
  0x28   : > { %1195 = vmatpush1.bf16.msra.mxu0 %v1803_v19  ;;  %v1852_v56 = vld [vmem:[%s2081_s28 + $0x1b0] ss:$8 sps:$4 sm:$0xff]   ;;  %v1855_v58 = vld [vmem:[%s2081_s28 + $0x1a4] ss:$8 sps:$4 sm:$0xff]   ;;  %v1857_v59 = vld [vmem:[%s2081_s28 + $0xa0] ss:$8 sps:$4 sm:$0xff]  }
  0x29   : > { %1236 = vmatpush1.bf16.msra.mxu1 %v1804_v20  ;;  %1196 = vmatprep.subr.bf16.mxu0 %v1805_v21  ;;  %v1858_v60 = vld [vmem:[%s2081_s28 + $0x1a0] ss:$8 sps:$4 sm:$0xff]   ;;  %v1859_v61 = vld [vmem:[%s2081_s28 + $0x94] ss:$8 sps:$4 sm:$0xff]   ;;  %v1863_v63 = vld [vmem:[%s2081_s28 + $0x90] ss:$8 sps:$4 sm:$0xff]  }
  0x2a   : > { %1237 = vmatprep.subr.bf16.mxu1 %v1807_v22  ;;  %1218 = vmatprep.mubr.bf16.mxu0 %v1588_v48  ;;  %v1861_v62 = vld [vmem:[%s2081_s28 + $0x194] ss:$8 sps:$4 sm:$0xff]   ;;  %v1864_v0 = vld [vmem:[%s2081_s28 + $0x190] ss:$8 sps:$4 sm:$0xff]   ;;  %v1865_v1 = vld [vmem:[%s2081_s28 + $0x84] ss:$8 sps:$4 sm:$0xff]  }
  0x2b   : > { %1259 = vmatprep.mubr.bf16.mxu1 %v1590_v52  ;;  %v1867_v2 = vld [vmem:[%s2081_s28 + $0x184] ss:$8 sps:$4 sm:$0xff]   ;;  %v1869_v3 = vld [vmem:[%s2081_s28 + $0x80] ss:$8 sps:$4 sm:$0xff]   ;;  %v1877_v5 = vld [vmem:[%s2081_s28 + $0x274] ss:$8 sps:$4 sm:$0xff]  }
  0x2c   : > { %1197 = vmatpush1.bf16.msra.mxu0 %v1809_v23  ;;  %v1870_v4 = vld [vmem:[%s2081_s28 + $0x180] ss:$8 sps:$4 sm:$0xff]   ;;  %v1880_v6 = vld [vmem:[%s2081_s28 + $0x374] ss:$8 sps:$4 sm:$0xff]   ;;  %v1875_v9 = vld [vmem:[%s2081_s28 + $0x270] ss:$8 sps:$4 sm:$0xff]  }
  0x2d   : > { %1238 = vmatpush1.bf16.msra.mxu1 %v1810_v24  ;;  %1198 = vmatprep.subr.bf16.mxu0 %v1811_v25  ;;  %v1878_v10 = vld [vmem:[%s2081_s28 + $0x370] ss:$8 sps:$4 sm:$0xff]   ;;  %v1883_v11 = vld [vmem:[%s2081_s28 + $0x264] ss:$8 sps:$4 sm:$0xff]   ;;  %v1881_v13 = vld [vmem:[%s2081_s28 + $0x260] ss:$8 sps:$4 sm:$0xff]  }
  0x2e   : > { %1239 = vmatprep.subr.bf16.mxu1 %v1813_v26  ;;  %v1886_v12 = vld [vmem:[%s2081_s28 + $0x364] ss:$8 sps:$4 sm:$0xff]   ;;  %v1884_v14 = vld [vmem:[%s2081_s28 + $0x360] ss:$8 sps:$4 sm:$0xff]   ;;  %v1889_v15 = vld [vmem:[%s2081_s28 + $0x254] ss:$8 sps:$4 sm:$0xff]  }
  0x2f   : > { %v1892_v16 = vld [vmem:[%s2081_s28 + $0x354] ss:$8 sps:$4 sm:$0xff]   ;;  %v1887_v17 = vld [vmem:[%s2081_s28 + $0x250] ss:$8 sps:$4 sm:$0xff]   ;;  %v1895_v19 = vld [vmem:[%s2081_s28 + $0x244] ss:$8 sps:$4 sm:$0xff]  }
  0x30   : > { %1199 = vmatpush1.bf16.msra.mxu0 %v1815_v27  ;;  %v1890_v18 = vld [vmem:[%s2081_s28 + $0x350] ss:$8 sps:$4 sm:$0xff]   ;;  %v1898_v20 = vld [vmem:[%s2081_s28 + $0x344] ss:$8 sps:$4 sm:$0xff]   ;;  %v1893_v21 = vld [vmem:[%s2081_s28 + $0x240] ss:$8 sps:$4 sm:$0xff]  }
  0x31   : > { %1240 = vmatpush1.bf16.msra.mxu1 %v1816_v28  ;;  %1200 = vmatprep.subr.bf16.mxu0 %v1817_v29  ;;  %v1896_v22 = vld [vmem:[%s2081_s28 + $0x340] ss:$8 sps:$4 sm:$0xff]   ;;  %v1901_v23 = vld [vmem:[%s2081_s28 + $0x234] ss:$8 sps:$4 sm:$0xff]   ;;  %v1899_v25 = vld [vmem:[%s2081_s28 + $0x230] ss:$8 sps:$4 sm:$0xff]  }
  0x32   : > { %1241 = vmatprep.subr.bf16.mxu1 %v1819_v30  ;;  %v1904_v24 = vld [vmem:[%s2081_s28 + $0x334] ss:$8 sps:$4 sm:$0xff]   ;;  %v1902_v26 = vld [vmem:[%s2081_s28 + $0x330] ss:$8 sps:$4 sm:$0xff]   ;;  %v1907_v27 = vld [vmem:[%s2081_s28 + $0x224] ss:$8 sps:$4 sm:$0xff]  }
  0x33   : > { %v1910_v28 = vld [vmem:[%s2081_s28 + $0x324] ss:$8 sps:$4 sm:$0xff]   ;;  %v1905_v29 = vld [vmem:[%s2081_s28 + $0x220] ss:$8 sps:$4 sm:$0xff]   ;;  %v1940_v52 = vld [vmem:[%s2081_s28 + $0x3d4] ss:$8 sps:$4 sm:$0xff]  }
  0x34   : > { %1201 = vmatpush1.bf16.msra.mxu0 %v1821_v31  ;;  %v1908_v30 = vld [vmem:[%s2081_s28 + $0x320] ss:$8 sps:$4 sm:$0xff]   ;;  %v1913_v31 = vld [vmem:[%s2081_s28 + $0x214] ss:$8 sps:$4 sm:$0xff]   ;;  %v1931_v47 = vld [vmem:[%s2081_s28 + $0x2e4] ss:$8 sps:$4 sm:$0xff]  }
  0x35   : > { %1242 = vmatpush1.bf16.msra.mxu1 %v1822_v32  ;;  %1202 = vmatprep.subr.bf16.mxu0 %v1823_v33  ;;  %v1916_v32 = vld [vmem:[%s2081_s28 + $0x314] ss:$8 sps:$4 sm:$0xff]   ;;  %v1934_v48 = vld [vmem:[%s2081_s28 + $0x3e4] ss:$8 sps:$4 sm:$0xff]   ;;  %v1929_v49 = vld [vmem:[%s2081_s28 + $0x2e0] ss:$8 sps:$4 sm:$0xff]  }
  0x36   : > { %1243 = vmatprep.subr.bf16.mxu1 %v1825_v34  ;;  %v2177_v33 = vld [vmem:[%s2076_s24 + $0x10] sm:$0xff] }
  0x37   : > { %v1911_v34 = vld [vmem:[%s2081_s28 + $0x210] ss:$8 sps:$4 sm:$0xff]  }
  0x38   : > { %1203 = vmatpush2.bf16.msra.mxu0 %v1827_v35  ;;  %v1914_v35 = vld [vmem:[%s2081_s28 + $0x310] ss:$8 sps:$4 sm:$0xff]  }
  0x39   : > { %1244 = vmatpush2.bf16.msra.mxu1 %v1828_v36  ;;  %1204 = vmatprep.subr.bf16.mxu0 %v1829_v37  ;;  %v1592_v36 = vcombine.high %v2177_v33, %v2177_v33  ;;  %v2184_v37 = vld [vmem:[%s2076_s24 + $0x18] sm:$0xff] }
  0x3a   : > { %1245 = vmatprep.subr.bf16.mxu1 %v1831_v38  ;;  %v1919_v38 = vld [vmem:[%s2081_s28 + $0x204] ss:$8 sps:$4 sm:$0xff]  }
  0x3c   : > { %1205 = vmatpush2.bf16.msra.mxu0 %v1833_v39  ;;  %v1594_v39 = vcombine.high %v2184_v37, %v2184_v37 }
  0x3d   : > { %1246 = vmatpush2.bf16.msra.mxu1 %v1834_v40  ;;  %1206 = vmatprep.subr.bf16.mxu0 %v1835_v41  ;;  %v1922_v40 = vld [vmem:[%s2081_s28 + $0x304] ss:$8 sps:$4 sm:$0xff]   ;;  %v1917_v41 = vld [vmem:[%s2081_s28 + $0x200] ss:$8 sps:$4 sm:$0xff]  }
  0x3e   : > { %1247 = vmatprep.subr.bf16.mxu1 %v1837_v42  ;;  %v1920_v42 = vld [vmem:[%s2081_s28 + $0x300] ss:$8 sps:$4 sm:$0xff]  }
  0x40   : > { %1207 = vmatpush2.bf16.msra.mxu0 %v1839_v43  ;;  %v1925_v43 = vld [vmem:[%s2081_s28 + $0x2f4] ss:$8 sps:$4 sm:$0xff]  }
  0x41   : > { %1248 = vmatpush2.bf16.msra.mxu1 %v1840_v44  ;;  %1208 = vmatprep.subr.bf16.mxu0 %v1841_v45  ;;  %v1928_v44 = vld [vmem:[%s2081_s28 + $0x3f4] ss:$8 sps:$4 sm:$0xff]   ;;  %v1923_v45 = vld [vmem:[%s2081_s28 + $0x2f0] ss:$8 sps:$4 sm:$0xff]  }
  0x42   : > { %1249 = vmatprep.subr.bf16.mxu1 %v1843_v46  ;;  %v1926_v46 = vld [vmem:[%s2081_s28 + $0x3f0] ss:$8 sps:$4 sm:$0xff]  }
  0x44   : > { %1209 = vmatpush2.bf16.msra.mxu0 %v1845_v50  ;;  %v1932_v50 = vld [vmem:[%s2081_s28 + $0x3e0] ss:$8 sps:$4 sm:$0xff]  }
  0x45   : > { %1250 = vmatpush2.bf16.msra.mxu1 %v1846_v51  ;;  %1210 = vmatprep.subr.bf16.mxu0 %v1847_v53  ;;  %v1937_v51 = vld [vmem:[%s2081_s28 + $0x2d4] ss:$8 sps:$4 sm:$0xff]   ;;  %v1935_v53 = vld [vmem:[%s2081_s28 + $0x2d0] ss:$8 sps:$4 sm:$0xff]  }
  0x46   : > { %1251 = vmatprep.subr.bf16.mxu1 %v1849_v54  ;;  %v1938_v54 = vld [vmem:[%s2081_s28 + $0x3d0] ss:$8 sps:$4 sm:$0xff]  }
  0x48   : > { %1211 = vmatpush2.bf16.msra.mxu0 %v1851_v55  ;;  %v1943_v55 = vld [vmem:[%s2081_s28 + $0x2c4] ss:$8 sps:$4 sm:$0xff]  }
  0x49   : > { %1252 = vmatpush2.bf16.msra.mxu1 %v1852_v56  ;;  %1212 = vmatprep.subr.bf16.mxu0 %v1853_v57  ;;  %v1946_v56 = vld [vmem:[%s2081_s28 + $0x3c4] ss:$8 sps:$4 sm:$0xff]   ;;  %v1941_v57 = vld [vmem:[%s2081_s28 + $0x2c0] ss:$8 sps:$4 sm:$0xff]  }
  0x4a   : > { %1253 = vmatprep.subr.bf16.mxu1 %v1855_v58  ;;  %v1944_v58 = vld [vmem:[%s2081_s28 + $0x3c0] ss:$8 sps:$4 sm:$0xff]  }
  0x4c   : > { %1213 = vmatpush2.bf16.msra.mxu0 %v1857_v59  ;;  %v1949_v59 = vld [vmem:[%s2081_s28 + $0x2b4] ss:$8 sps:$4 sm:$0xff]  }
  0x4d   : > { %1254 = vmatpush2.bf16.msra.mxu1 %v1858_v60  ;;  %1214 = vmatprep.subr.bf16.mxu0 %v1859_v61  ;;  %v1952_v60 = vld [vmem:[%s2081_s28 + $0x3b4] ss:$8 sps:$4 sm:$0xff]   ;;  %v1947_v61 = vld [vmem:[%s2081_s28 + $0x2b0] ss:$8 sps:$4 sm:$0xff]  }
  0x4e   : > { %1255 = vmatprep.subr.bf16.mxu1 %v1861_v62  ;;  %v1950_v62 = vld [vmem:[%s2081_s28 + $0x3b0] ss:$8 sps:$4 sm:$0xff]  }
  0x50   : > { %1215 = vmatpush2.bf16.msra.mxu0 %v1863_v63  ;;  %v1955_v63 = vld [vmem:[%s2081_s28 + $0x2a4] ss:$8 sps:$4 sm:$0xff]  }
  0x51   : > { %1256 = vmatpush2.bf16.msra.mxu1 %v1864_v0  ;;  %1216 = vmatprep.subr.bf16.mxu0 %v1865_v1  ;;  %v1958_v0 = vld [vmem:[%s2081_s28 + $0x3a4] ss:$8 sps:$4 sm:$0xff]   ;;  %v1953_v1 = vld [vmem:[%s2081_s28 + $0x2a0] ss:$8 sps:$4 sm:$0xff]  }
  0x52   : > { %1257 = vmatprep.subr.bf16.mxu1 %v1867_v2  ;;  %v1956_v2 = vld [vmem:[%s2081_s28 + $0x3a0] ss:$8 sps:$4 sm:$0xff]  }
  0x54   : > { %1217 = vmatpush2.bf16.msra.mxu0 %v1869_v3  ;;  %v1961_v3 = vld [vmem:[%s2081_s28 + $0x294] ss:$8 sps:$4 sm:$0xff]  }
  0x55   : > { %1258 = vmatpush2.bf16.msra.mxu1 %v1870_v4  ;;  %1268 = vmatprep.subr.bf16.mxu0 %v1877_v5  ;;  %v1964_v4 = vld [vmem:[%s2081_s28 + $0x394] ss:$8 sps:$4 sm:$0xff]   ;;  %v1959_v5 = vld [vmem:[%s2081_s28 + $0x290] ss:$8 sps:$4 sm:$0xff]  }
  0x56   : > { %1309 = vmatprep.subr.bf16.mxu1 %v1880_v6  ;;  %v1962_v6 = vld [vmem:[%s2081_s28 + $0x390] ss:$8 sps:$4 sm:$0xff]  }
  0x57   : > { %1219 = vmatmul.mubr.bf16.vlgmr.msra.gmra.mxu0 %v1587_v7  ;;  %v1967_v7 = vld [vmem:[%s2081_s28 + $0x284] ss:$8 sps:$4 sm:$0xff]  }
  0x58   : > { %1260 = vmatmul.mubr.bf16.vlgmr.msra.gmra.mxu1 %v1589_v8  ;;  %1269 = vmatpush1.bf16.msra.mxu0 %v1875_v9  ;;  %v1970_v8 = vld [vmem:[%s2081_s28 + $0x384] ss:$8 sps:$4 sm:$0xff]   ;;  %v1965_v9 = vld [vmem:[%s2081_s28 + $0x280] ss:$8 sps:$4 sm:$0xff]  }
  0x59   : > { %1310 = vmatpush1.bf16.msra.mxu1 %v1878_v10  ;;  %1270 = vmatprep.subr.bf16.mxu0 %v1883_v11  ;;  %v1968_v10 = vld [vmem:[%s2081_s28 + $0x380] ss:$8 sps:$4 sm:$0xff]   ;;  %v1975_v11 = vld [vmem:[%s2081_s28 + $0x474] ss:$8 sps:$4 sm:$0xff]  }
  0x5a   : > { %1311 = vmatprep.subr.bf16.mxu1 %v1886_v12  ;;  %1300 = vmatprep.mubr.bf16.mxu0 %v1592_v36  ;;  %v1591_v12 = vcombine.low %v2177_v33, %v2177_v33 }
  0x5b   : > { %1341 = vmatprep.mubr.bf16.mxu1 %v1594_v39 }
  0x5c   : > { %1271 = vmatpush1.bf16.msra.mxu0 %v1881_v13  ;;  %v1593_v13 = vcombine.low %v2184_v37, %v2184_v37 }
  0x5d   : > { %1312 = vmatpush1.bf16.msra.mxu1 %v1884_v14  ;;  %1272 = vmatprep.subr.bf16.mxu0 %v1889_v15  ;;  %v1973_v14 = vld [vmem:[%s2081_s28 + $0x470] ss:$8 sps:$4 sm:$0xff]   ;;  %v1980_v15 = vld [vmem:[%s2081_s28 + $0x464] ss:$8 sps:$4 sm:$0xff]  }
  0x5e   : > { %1313 = vmatprep.subr.bf16.mxu1 %v1892_v16  ;;  %v1978_v16 = vld [vmem:[%s2081_s28 + $0x460] ss:$8 sps:$4 sm:$0xff]  }
  0x60   : > { %1273 = vmatpush1.bf16.msra.mxu0 %v1887_v17  ;;  %v2025_v17 = vmov 0  }
  0x61   : > { %1314 = vmatpush1.bf16.msra.mxu1 %v1890_v18  ;;  %1274 = vmatprep.subr.bf16.mxu0 %v1895_v19  ;;  %v1983_v18 = vld [vmem:[%s2081_s28 + $0x454] ss:$8 sps:$4 sm:$0xff]   ;;  %v1981_v19 = vld [vmem:[%s2081_s28 + $0x450] ss:$8 sps:$4 sm:$0xff]  }
  0x62   : > { %1315 = vmatprep.subr.bf16.mxu1 %v1898_v20  ;;  %v1986_v20 = vld [vmem:[%s2081_s28 + $0x444] ss:$8 sps:$4 sm:$0xff]  }
  0x64   : > { %1275 = vmatpush1.bf16.msra.mxu0 %v1893_v21  ;;  %v1984_v21 = vld [vmem:[%s2081_s28 + $0x440] ss:$8 sps:$4 sm:$0xff]  }
  0x65   : > { %1316 = vmatpush1.bf16.msra.mxu1 %v1896_v22  ;;  %1276 = vmatprep.subr.bf16.mxu0 %v1901_v23  ;;  %v1989_v22 = vld [vmem:[%s2081_s28 + $0x434] ss:$8 sps:$4 sm:$0xff]   ;;  %v1987_v23 = vld [vmem:[%s2081_s28 + $0x430] ss:$8 sps:$4 sm:$0xff]  }
  0x66   : > { %1317 = vmatprep.subr.bf16.mxu1 %v1904_v24  ;;  %v1992_v24 = vld [vmem:[%s2081_s28 + $0x424] ss:$8 sps:$4 sm:$0xff]  }
  0x68   : > { %1277 = vmatpush1.bf16.msra.mxu0 %v1899_v25  ;;  %v1990_v25 = vld [vmem:[%s2081_s28 + $0x420] ss:$8 sps:$4 sm:$0xff]  }
  0x69   : > { %1318 = vmatpush1.bf16.msra.mxu1 %v1902_v26  ;;  %1278 = vmatprep.subr.bf16.mxu0 %v1907_v27  ;;  %v1995_v26 = vld [vmem:[%s2081_s28 + $0x414] ss:$8 sps:$4 sm:$0xff]   ;;  %v1993_v27 = vld [vmem:[%s2081_s28 + $0x410] ss:$8 sps:$4 sm:$0xff]  }
  0x6a   : > { %1319 = vmatprep.subr.bf16.mxu1 %v1910_v28  ;;  %v1998_v28 = vld [vmem:[%s2081_s28 + $0x404] ss:$8 sps:$4 sm:$0xff]  }
  0x6c   : > { %1279 = vmatpush1.bf16.msra.mxu0 %v1905_v29  ;;  %v1996_v29 = vld [vmem:[%s2081_s28 + $0x400] ss:$8 sps:$4 sm:$0xff]  }
  0x6d   : > { %1320 = vmatpush1.bf16.msra.mxu1 %v1908_v30  ;;  %1280 = vmatprep.subr.bf16.mxu0 %v1913_v31  ;;  %v1999_v30 = vld [vmem:[%s2076_s24 + $0x20] ss:$0 sps:$4 sm:$0xff]  }
  0x6e   : > { %1321 = vmatprep.subr.bf16.mxu1 %v1916_v32 }
  0x70   : > { %1281 = vmatpush1.bf16.msra.mxu0 %v1911_v34 }
  0x71   : > { %1322 = vmatpush1.bf16.msra.mxu1 %v1914_v35  ;;  %1282 = vmatprep.subr.bf16.mxu0 %v1919_v38 }
  0x72   : > { %1323 = vmatprep.subr.bf16.mxu1 %v1922_v40 }
  0x74   : > { %1283 = vmatpush1.bf16.msra.mxu0 %v1917_v41 }
  0x75   : > { %1324 = vmatpush1.bf16.msra.mxu1 %v1920_v42  ;;  %1284 = vmatprep.subr.bf16.mxu0 %v1925_v43 }
  0x76   : > { %1325 = vmatprep.subr.bf16.mxu1 %v1928_v44 }
  0x78   : > { %1285 = vmatpush2.bf16.msra.mxu0 %v1923_v45 }
  0x79   : > { %1326 = vmatpush2.bf16.msra.mxu1 %v1926_v46  ;;  %1286 = vmatprep.subr.bf16.mxu0 %v1931_v47 }
  0x7a   : > { %1327 = vmatprep.subr.bf16.mxu1 %v1934_v48 }
  0x7c   : > { %1287 = vmatpush2.bf16.msra.mxu0 %v1929_v49 }
  0x7d   : > { %1328 = vmatpush2.bf16.msra.mxu1 %v1932_v50  ;;  %1288 = vmatprep.subr.bf16.mxu0 %v1937_v51 }
  0x7e   : > { %1329 = vmatprep.subr.bf16.mxu1 %v1940_v52  ;;  %v283_v52 = vld [vmem:[#allocation2] sm:$0xff] }
  0x80   : > { %1289 = vmatpush2.bf16.msra.mxu0 %v1935_v53 }
  0x81   : > { %1330 = vmatpush2.bf16.msra.mxu1 %v1938_v54  ;;  %1290 = vmatprep.subr.bf16.mxu0 %v1943_v55 }
  0x82   : > { %1331 = vmatprep.subr.bf16.mxu1 %v1946_v56  ;;  %v284_v56 = vld [vmem:[#allocation2 + $0x8] sm:$0xff] }
  0x84   : > { %1291 = vmatpush2.bf16.msra.mxu0 %v1941_v57 }
  0x85   : > { %1332 = vmatpush2.bf16.msra.mxu1 %v1944_v58  ;;  %1292 = vmatprep.subr.bf16.mxu0 %v1949_v59 }
  0x86   : > { %1333 = vmatprep.subr.bf16.mxu1 %v1952_v60 }
  0x88   : > { %1293 = vmatpush2.bf16.msra.mxu0 %v1947_v61 }
  0x89   : > { %1334 = vmatpush2.bf16.msra.mxu1 %v1950_v62  ;;  %1294 = vmatprep.subr.bf16.mxu0 %v1955_v63 }
  0x8a   : > { %1335 = vmatprep.subr.bf16.mxu1 %v1958_v0 }
  0x8c   : > { %1295 = vmatpush2.bf16.msra.mxu0 %v1953_v1 }
  0x8d   : > { %1336 = vmatpush2.bf16.msra.mxu1 %v1956_v2  ;;  %1296 = vmatprep.subr.bf16.mxu0 %v1961_v3 }
  0x8e   : > { %1337 = vmatprep.subr.bf16.mxu1 %v1964_v4 }
  0x90   : > { %1297 = vmatpush2.bf16.msra.mxu0 %v1959_v5 }
  0x91   : > { %1338 = vmatpush2.bf16.msra.mxu1 %v1962_v6  ;;  %1298 = vmatprep.subr.bf16.mxu0 %v1967_v7 }
  0x92   : > { %1339 = vmatprep.subr.bf16.mxu1 %v1970_v8 }
  0x94   : > { %1299 = vmatpush2.bf16.msra.mxu0 %v1965_v9 }
  0x95   : > { %1340 = vmatpush2.bf16.msra.mxu1 %v1968_v10  ;;  %1350 = vmatprep.subr.bf16.mxu0 %v1975_v11 }
  0x97   : > { %1301 = vmatmul.mubr.bf16.vlgmr.msra.gmra.mxu0 %v1591_v12 }
  0x98   : > { %1342 = vmatmul.mubr.bf16.vlgmr.msra.gmra.mxu1 %v1593_v13  ;;  %1351 = vmatpush1.bf16.msra.mxu0 %v1973_v14 }
  0x99   : > { %1382 = vmatprep.mubr.bf16.mxu0 %v2025_v17  ;;  %1352 = vmatprep.subr.bf16.mxu0 %v1980_v15 }
  0x9c   : > { %1353 = vmatpush1.bf16.msra.mxu0 %v1978_v16 }
  0x9d   : > { %1354 = vmatprep.subr.bf16.mxu0 %v1983_v18 }
  0xa0   : > { %1355 = vmatpush1.bf16.msra.mxu0 %v1981_v19 }
  0xa1   : > { %1356 = vmatprep.subr.bf16.mxu0 %v1986_v20 }
  0xa4   : > { %1357 = vmatpush1.bf16.msra.mxu0 %v1984_v21 }
  0xa5   : > { %1358 = vmatprep.subr.bf16.mxu0 %v1989_v22 }
  0xa8   : > { %1359 = vmatpush1.bf16.msra.mxu0 %v1987_v23 }
  0xa9   : > { %1360 = vmatprep.subr.bf16.mxu0 %v1992_v24 }
  0xac   : > { %1361 = vmatpush1.bf16.msra.mxu0 %v1990_v25 }
  0xad   : > { %1362 = vmatprep.subr.bf16.mxu0 %v1995_v26 }
  0xb0   : > { %1363 = vmatpush1.bf16.msra.mxu0 %v1993_v27 }
  0xb1   : > { %1364 = vmatprep.subr.bf16.mxu0 %v1998_v28 }
  0xb4   : > { %1365 = vmatpush1.bf16.msra.mxu0 %v1996_v29 }
  0xb7   : > { %1383 = vmatmul.mubr.bf16.vlgmr.msra.gmra.mxu0 %v1999_v30 }
 0x117   : > { %v1220_v31 = vpop.f32.mrf.mxu0 }
 0x118   : > { %v1261_v32 = vpop.f32.mrf.mxu1 }
 0x119   : > { %v1262_v33 = vadd.f32 %v1261_v32, %v1220_v31  ;;  %v1222_v34 = vpop.f32.mrf.mxu0 }
 0x11a   : > { %v1263_v35 = vpop.f32.mrf.mxu1 }
 0x11b   : > { %v1264_v36 = vadd.f32 %v1263_v35, %v1222_v34  ;;  %v1224_v37 = vpop.f32.mrf.mxu0 }
 0x11c   : > { %v1265_v38 = vpop.f32.mrf.mxu1 }
 0x11d   : > { %v1225_v39 = vpop.f32.mrf.mxu0 }
 0x11e   : > { %v1266_v40 = vpop.f32.mrf.mxu1 }
 0x157   : > { %v1302_v41 = vpop.f32.mrf.mxu0 }
 0x158   : > { %v1343_v42 = vpop.f32.mrf.mxu1  ;;  %v1303_v49 = vadd.f32 %v1302_v41, %v1262_v33 }
 0x159   : > { %v1304_v43 = vpop.f32.mrf.mxu0 }
 0x15a   : > { %v1345_v44 = vpop.f32.mrf.mxu1  ;;  %v1305_v50 = vadd.f32 %v1304_v43, %v1264_v36  ;;  %v1344_v51 = vadd.f32 %v1343_v42, %v1303_v49 }
 0x15b   : > { %v1306_v45 = vpop.f32.mrf.mxu0 }
 0x15c   : > { %v1347_v46 = vpop.f32.mrf.mxu1  ;;  %v1346_v54 = vadd.f32 %v1345_v44, %v1305_v50 }
 0x15d   : > { %v1307_v47 = vpop.f32.mrf.mxu0 }
 0x15e   : > { %v1348_v48 = vpop.f32.mrf.mxu1 }
 0x177   : > { %v1384_v53 = vpop.f32.mrf.mxu0 }
 0x178   : > { %v1385_v55 = vadd.f32 %v1384_v53, %v1344_v51 }
 0x179   : > { %v1386_v57 = vpop.f32.mrf.mxu0 }
 0x17a   : > { %v1391_v58 = vadd.f32 %v1385_v55, %v283_v52  ;;  %v1387_v59 = vadd.f32 %v1386_v57, %v1346_v54  ;;  %1398 = sbr.rel (%p1740_p7) target bundleno = 405 (0x195), region = 36 }
 0x17b   : > { %v1388_v60 = vpop.f32.mrf.mxu0 }
 0x17c   : > { %1393 = vst [vmem:[#allocation2] sm:$0xff] %v1391_v58  ;;  %v1392_v61 = vadd.f32 %v1387_v59, %v284_v56 }
 0x17d   : > { %v1389_v62 = vpop.f32.mrf.mxu0 }
 0x17e   : > { %1394 = vst [vmem:[#allocation2 + $0x8] sm:$0xff] %v1392_v61 }
 0x183   : > { %v1399_v63 = vld [vmem:[#allocation2] sm:$0xff] }
 0x184   : > { %v1410_v2 = vrot.slane %v1399_v63, 4  ;;  %v1422_v4 = vmul.f32 %v1399_v63, %v1399_v63 }
 0x185   : > { %v1400_v0 = vld [vmem:[#allocation2 + $0x8] sm:$0xff] }
 0x186   : > { %v1748_v1 = vpack.c.bf16 %v1400_v0, %v1399_v63  ;;  %v1416_v3 = vrot.slane %v1400_v0, 4  ;;  %v1423_v5 = vmul.f32 %v1400_v0, %v1400_v0  ;;  %v1411_v6 = vadd.f32 %v1410_v2, %v1399_v63 }
 0x187   : > { %v1424_v8 = vrot.slane %v1422_v4, 4 }
 0x188   : > { %1409 = vst [vmem:[%s2272_s2] sm:$0xff] %v1748_v1  ;;  %v1417_v7 = vadd.f32 %v1416_v3, %v1400_v0  ;;  %v1430_v9 = vrot.slane %v1423_v5, 4  ;;  %v1412_v10 = vrot.slane %v1411_v6, 2 }
 0x189   : > { %v1425_v12 = vadd.f32 %v1424_v8, %v1422_v4 }
 0x18a   : > { %v1418_v11 = vrot.slane %v1417_v7, 2  ;;  %v1431_v13 = vadd.f32 %v1430_v9, %v1423_v5  ;;  %v1413_v14 = vadd.f32 %v1412_v10, %v1411_v6 }
 0x18b   : > { %v1426_v16 = vrot.slane %v1425_v12, 2 }
 0x18c   : > { %v1419_v15 = vadd.f32 %v1418_v11, %v1417_v7  ;;  %v1432_v17 = vrot.slane %v1431_v13, 2  ;;  %v1414_v18 = vrot.slane %v1413_v14, 1 }
 0x18d   : > { %v1427_v20 = vadd.f32 %v1426_v16, %v1425_v12 }
 0x18e   : > { %v1420_v19 = vrot.slane %v1419_v15, 1  ;;  %v1433_v21 = vadd.f32 %v1432_v17, %v1431_v13  ;;  %v1415_v22 = vadd.f32 %v1414_v18, %v1413_v14 }
 0x18f   : > { %v1428_v24 = vrot.slane %v1427_v20, 1 }
 0x190   : > { %v1421_v23 = vadd.f32 %v1420_v19, %v1419_v15  ;;  %v1434_v25 = vrot.slane %v1433_v21, 1  ;;  %1436 = vst [vmem:[%s2273_s3] sm:$0xff] %v1415_v22 }
 0x191   : > { %v1429_v26 = vadd.f32 %v1428_v24, %v1427_v20 }
 0x192   : > { %1437 = vst [vmem:[%s2273_s3 + $0x8] sm:$0xff] %v1421_v23  ;;  %v1435_v27 = vadd.f32 %v1434_v25, %v1433_v21 }
 0x193   : > { %1438 = vst [vmem:[%s2274_s4] sm:$0xff] %v1429_v26 }
 0x194   : > { %1439 = vst [vmem:[%s2274_s4 + $0x8] sm:$0xff] %v1435_v27 }
 0x195 PF: > { %s15_s17 = sadd.s32 1, %s2022_s17   ;;  %s2275_s15 = smov %s2018_s16 }
 0x196   : > { %p12_p8 = scmp.ge.s32.totalorder %s15_s17, 4   ;;  %s2276_s16 = smov %s2278_s18 }
 0x198   :  { %14 = sbr.rel (!%p12_p8) target bundleno = 2 (0x2), region = 93 }

// kernel: discriminator_forward.28
= control target key start
LH: loop header
LB: loop body
LE: loop exit
PB: predicated region body
PF: predicated region fallthrough
CT: control target
= control target key end

     0   :  { %v22_v0 = vlaneseq  ;;  %s148_s0 = inlined_call_operand.vmem [shape: bf16[8,512], index: 0, kind: input, shape index: {}]   ;;  %s149_s1 = inlined_call_operand.vmem [shape: f32[1,512], index: 1, kind: input, shape index: {}]   ;;  %s150_s2 = inlined_call_operand.vmem [shape: f32[1,512], index: 2, kind: input, shape index: {}]   ;;  %s151_s3 = inlined_call_operand.vmem [shape: bf16[8,512], index: 3, kind: output, shape index: {}]  }
   0x1   :  { %v14_v1 = vld [vmem:[%s148_s0] sm:$0xff]  ;;  %v15_v3 = vld [vmem:[%s148_s0 + $0x8] sm:$0xff] }
   0x2   :  { %v23_v2 = vshrl.u32 %v22_v0, 7  ;;  %v16_v4 = vunpack.c.l.bf16 %v14_v1  ;;  %v17_v5 = vunpack.c.h.bf16 %v14_v1  ;;  %v20_v6 = vld [vmem:[%s149_s1] sm:$0xf]  ;;  %v18_v12 = vunpack.c.l.bf16 %v15_v3 }
   0x3   :  { %v46_v7 = vld [vmem:[%s150_s2] sm:$0xf]  ;;  %v19_v13 = vunpack.c.h.bf16 %v15_v3 }
   0x4   :  { %v24_v8 = vsub.s32 0, %v23_v2  ;;  %v28_v9 = vsub.s32 1, %v23_v2  ;;  %v32_v10 = vsub.s32 2, %v23_v2  ;;  %v36_v11 = vsub.s32 3, %v23_v2 }
   0x6   :  { %v25_v14 = vrot.slane %v20_v6, %v24_v8  ;;  %v29_v15 = vrot.slane %v20_v6, %v28_v9  ;;  %v51_v16 = vrot.slane %v46_v7, %v24_v8  ;;  %v55_v17 = vrot.slane %v46_v7, %v28_v9 }
   0x7   :  { %v33_v18 = vrot.slane %v20_v6, %v32_v10  ;;  %v37_v19 = vrot.slane %v20_v6, %v36_v11  ;;  %v59_v20 = vrot.slane %v46_v7, %v32_v10  ;;  %v63_v21 = vrot.slane %v46_v7, %v36_v11 }
   0x8   :  { %v42_v22 = vmul.f32 %v25_v14, %v16_v4  ;;  %v43_v23 = vmul.f32 %v29_v15, %v17_v5 }
   0x9   :  { %v44_v24 = vmul.f32 %v33_v18, %v18_v12  ;;  %v45_v25 = vmul.f32 %v37_v19, %v19_v13 }
   0xa   :  { %v68_v26 = vadd.f32 %v51_v16, %v42_v22  ;;  %v69_v27 = vadd.f32 %v55_v17, %v43_v23 }
   0xb   :  { %v70_v28 = vadd.f32 %v59_v20, %v44_v24  ;;  %v71_v29 = vadd.f32 %v63_v21, %v45_v25 }
   0xc   :  { %vm72_vm0 = vcmp.ge.f32.partialorder %v68_v26, 0.0  ;;  %vm73_vm1 = vcmp.ge.f32.partialorder %v69_v27, 0.0  ;;  %v76_v30 = vmul.f32 0.2, %v68_v26  ;;  %v77_v31 = vmul.f32 0.2, %v69_v27 }
   0xd   :  { %vm74_vm2 = vcmp.ge.f32.partialorder %v70_v28, 0.0  ;;  %vm75_vm3 = vcmp.ge.f32.partialorder %v71_v29, 0.0  ;;  %v78_v32 = vmul.f32 0.2, %v70_v28  ;;  %v79_v33 = vmul.f32 0.2, %v71_v29 }
   0xe   :  { %v80_v34 = vsel %vm72_vm0, %v68_v26, %v76_v30  ;;  %v81_v35 = vsel %vm73_vm1, %v69_v27, %v77_v31 }
   0xf   :  { %v108_v36 = vpack.c.bf16 %v81_v35, %v80_v34  ;;  %v82_v37 = vsel %vm74_vm2, %v70_v28, %v78_v32  ;;  %v83_v38 = vsel %vm75_vm3, %v71_v29, %v79_v33 }
  0x10   :  { %v109_v39 = vpack.c.bf16 %v83_v38, %v82_v37 }
  0x11   :  { %100 = vst [vmem:[%s151_s3] sm:$0xff] %v108_v36 }
  0x12   :  { %101 = vst [vmem:[%s151_s3 + $0x8] sm:$0xff] %v109_v39 }

// kernel: discriminator_forward.30
= control target key start
LH: loop header
LB: loop body
LE: loop exit
PB: predicated region body
PF: predicated region fallthrough
CT: control target
= control target key end

     0   :  { %v18_v0 = vlaneseq  ;;  %v158_v1 = vmov 1983009808   ;;  %v159_v33 = vmov 1966171168   ;;  %s192_s1 = inlined_call_operand.vmem [shape: f32[1,512], index: 1, kind: input, shape index: {}]   ;;  %s193_s2 = inlined_call_operand.vmem [shape: f32[1,512], index: 2, kind: input, shape index: {}]   ;;  %s194_s0 = inlined_call_operand.vmem [shape: bf16[2,512], index: 0, kind: input, shape index: {}]   ;;  %s195_s3 = inlined_call_operand.vmem [shape: bf16[2,512], index: 3, kind: output, shape index: {}]  }
   0x1   :  { %v37_v2 = vunpack.c.l.s4 %v158_v1  ;;  %v16_v4 = vld [vmem:[%s192_s1] sm:$0xf]  ;;  %v126_v34 = vunpack.c.l.s4 %v159_v33 }
   0x2   :  { %v19_v3 = vshrl.u32 %v18_v0, 7  ;;  %v53_v10 = vld [vmem:[%s193_s2] sm:$0xf] }
   0x3   :  { %v38_v5 = vunpack.c.0.s8 %v37_v2  ;;  %v14_v16 = vld [vmem:[%s194_s0] sm:$0xf]  ;;  %v127_v37 = vunpack.c.0.s8 %v126_v34 }
   0x4   :  { %v20_v6 = vsub.s32 0, %v19_v3  ;;  %v24_v7 = vsub.s32 1, %v19_v3  ;;  %v28_v8 = vsub.s32 2, %v19_v3  ;;  %v32_v9 = vsub.s32 3, %v19_v3 }
   0x5   :  { %v41_v11 = vsub.s32 %v38_v5, %v19_v3  ;;  %v15_v25 = vunpack.c.l.bf16 %v14_v16  ;;  %v130_v43 = vsub.s32 %v127_v37, %v19_v3 }
   0x6   :  { %v21_v12 = vrot.slane %v16_v4, %v20_v6  ;;  %v25_v13 = vrot.slane %v16_v4, %v24_v7  ;;  %v29_v14 = vrot.slane %v16_v4, %v28_v8  ;;  %v33_v15 = vrot.slane %v16_v4, %v32_v9 }
   0x7   :  { %v58_v17 = vrot.slane %v53_v10, %v20_v6  ;;  %v62_v18 = vrot.slane %v53_v10, %v24_v7  ;;  %v66_v19 = vrot.slane %v53_v10, %v28_v8  ;;  %v70_v20 = vrot.slane %v53_v10, %v32_v9 }
   0x8   :  { %v34_v21 = vcombine.low %v21_v12, %v25_v13  ;;  %v35_v22 = vcombine.low %v29_v14, %v33_v15 }
   0x9   :  { %v71_v23 = vcombine.low %v58_v17, %v62_v18  ;;  %v72_v24 = vcombine.low %v66_v19, %v70_v20 }
   0xa   :  { %v42_v26 = vrot.slane %v34_v21, %v41_v11  ;;  %v49_v27 = vrot.slane %v35_v22, %v41_v11 }
   0xb   :  { %v79_v28 = vrot.slane %v71_v23, %v41_v11  ;;  %v86_v29 = vrot.slane %v72_v24, %v41_v11 }
   0xc   :  { %v50_v30 = vcombine.low %v42_v26, %v49_v27 }
   0xd   :  { %v87_v31 = vcombine.low %v79_v28, %v86_v29 }
   0xe   :  { %v52_v32 = vmul.f32 %v50_v30, %v15_v25 }
  0x10   :  { %v89_v35 = vadd.f32 %v87_v31, %v52_v32 }
  0x12   :  { %vm90_vm0 = vcmp.ge.f32.partialorder %v89_v35, 0.0  ;;  %v91_v36 = vmul.f32 0.2, %v89_v35 }
  0x14   :  { %v92_v38 = vsel %vm90_vm0, %v89_v35, %v91_v36 }
  0x15   :  { %v94_v39 = vcombine.high %v92_v38, %v92_v38  ;;  %v101_v40 = vrot.slane %v92_v38, %v41_v11 }
  0x17   :  { %v108_v41 = vrot.slane %v94_v39, %v41_v11  ;;  %v109_v42 = vcombine.high %v101_v40, %v101_v40 }
  0x19   :  { %v110_v44 = vcombine.high %v108_v41, %v108_v41  ;;  %v153_v45 = vpack.c.bf16 %v109_v42, %v101_v40 }
  0x1b   :  { %v154_v46 = vpack.c.bf16 %v110_v44, %v108_v41  ;;  %v131_v47 = vrot.slane %v153_v45, %v130_v43 }
  0x1d   :  { %v138_v48 = vrot.slane %v154_v46, %v130_v43 }
  0x1f   :  { %v139_v49 = vcombine.low %v131_v47, %v138_v48 }
  0x21   :  { %155 = vst.sshfl [vmem:[%s195_s3] sm:$0x55 pattern:$0x73625140] %v139_v49 }

// kernel: discriminator_forward.27
= control target key start
LH: loop header
LB: loop body
LE: loop exit
PB: predicated region body
PF: predicated region fallthrough
CT: control target
= control target key end

     0   :  { %s3531_s15 = smov 0   ;;  %s3533_s16 = smov 0   ;;  %s3953_s0 = inlined_call_operand.vmem [shape: bf16[8,2304], index: 0, kind: input, shape index: {}]   ;;  %s3954_s1 = inlined_call_operand.vmem [shape: bf16[2304,512], index: 1, kind: input, shape index: {}]   ;;  %s3955_s2 = inlined_call_operand.vmem [shape: bf16[8,512], index: 2, kind: output, shape index: {0}]   ;;  %s3956_s3 = inlined_call_operand.vmem [shape: f32[1,8,512], index: 3, kind: output, shape index: {1}]   ;;  %s3957_s4 = inlined_call_operand.vmem [shape: f32[1,8,512], index: 4, kind: output, shape index: {2}]  }
   0x1   :  { %s3535_s17 = smov 0  }
   0x2 LB: > { %s24_s18 = sadd.s32 1, %s3498_s16  ;;  %p2700_p0 = scmp.ge.s32.totalorder %s3502_s17, 1  ;;  %s3502_s17 = sphi %s3535_s17, %s15_s17   ;;  %s3498_s16 = sphi %s3533_s16, %s3959_s16   ;;  %s3494_s15 = sphi %s3531_s15, %s3958_s15  }
   0x3   : > { %p25_p1 = scmp.ge.s32.totalorder %s24_s18, 2  ;;  %p198_p2 = scmp.lt.s32.totalorder %s3502_s17, 3 }
   0x5   : > { %s3961_s18 = smov (%p25_p1, %s24_s18), 0  ;;  %p199_p3 = pnand %p2700_p0, %p198_p2 }
   0x6   : > { %s244_s19 = smul.u32 (!%p199_p3), 9, %s3494_s15  ;;  %p2704_p6 = scmp.ne.s32.totalorder (!%p199_p3), %s3494_s15, 0 }
   0x7   : > { %202 = sbr.rel (%p199_p3) target bundleno = 536 (0x218), region = 28 }
   0x8   : > { %s254_s20 = smul.u32 (!%p199_p3), 144, %s3494_s15  ;;  %p247_p4 = scmp.lt.s32.totalorder (!%p199_p3), %s244_s19, 17 }
   0xa   : > { %p255_p5 = scmp.lt.s32.totalorder (!%p199_p3), %s254_s20, 287 }
   0xc   : > { %s3963_s19 = smov (!%p247_p4, %s244_s19), 17  ;;  %s3965_s20 = smov (!%p255_p5, %s254_s20), 287 }
   0xd   : > { %s2701_s21 = sshll.u32 %s3963_s19, 2  ;;  %s3010_s25 = sshll.u32 %s3965_s20, 4 }
   0xe   : > { %s3556_s24 = scalar_lea.vmem %s3953_s0, %s2701_s21  ;;  %s3561_s28 = scalar_lea.vmem %s3954_s1, %s3010_s25 }
   0xf   : > { %280 = sbr.rel (%p2704_p6) target bundleno = 23 (0x17), region = 32 }
  0x14   : > { %v3504_v0 = vmov 0.0  }
  0x15   : > { %281 = vst [vmem:[#allocation2 + $0x10] sm:$0xff] %v3504_v0  ;;  %282 = vst [vmem:[#allocation2] sm:$0xff] %v3504_v0 }
  0x16   : > { %283 = vst [vmem:[#allocation2 + $0x18] sm:$0xff] %v3504_v0  ;;  %284 = vst [vmem:[#allocation2 + $0x8] sm:$0xff] %v3504_v0 }
  0x17 PF: > { %v3039_v1 = vld [vmem:[%s3561_s28 + $0xe4] ss:$16 sps:$4 sm:$0xff]   ;;  %v3043_v3 = vld [vmem:[%s3561_s28 + $0xe0] ss:$16 sps:$4 sm:$0xff]   ;;  %v290_v49 = vld [vmem:[%s3556_s24 + $0x8] sm:$0xff]  ;;  %p3002_p7 = scmp.ne.s32.totalorder %s3494_s15, 1 }
  0x18   : > { %v3041_v2 = vld [vmem:[%s3561_s28 + $0x2e4] ss:$16 sps:$4 sm:$0xff]   ;;  %2054 = vmatprep.subr.bf16.mxu0 %v3039_v1  ;;  %v3044_v4 = vld [vmem:[%s3561_s28 + $0x2e0] ss:$16 sps:$4 sm:$0xff]   ;;  %v3616_v52 = vcombine.high %v290_v49, %v290_v49 }
  0x19   : > { %2095 = vmatprep.subr.bf16.mxu1 %v3041_v2  ;;  %v3045_v5 = vld [vmem:[%s3561_s28 + $0xc4] ss:$16 sps:$4 sm:$0xff]   ;;  %2055 = vmatpush1.bf16.msra.mxu0 %v3043_v3  ;;  %v3049_v7 = vld [vmem:[%s3561_s28 + $0xc0] ss:$16 sps:$4 sm:$0xff]  }
  0x1a   : > { %2096 = vmatpush1.bf16.msra.mxu1 %v3044_v4  ;;  %v3047_v6 = vld [vmem:[%s3561_s28 + $0x2c4] ss:$16 sps:$4 sm:$0xff]   ;;  %2056 = vmatprep.subr.bf16.mxu0 %v3045_v5  ;;  %v3050_v8 = vld [vmem:[%s3561_s28 + $0x2c0] ss:$16 sps:$4 sm:$0xff]  }
  0x1b   : > { %2097 = vmatprep.subr.bf16.mxu1 %v3047_v6  ;;  %v3051_v9 = vld [vmem:[%s3561_s28 + $0xa4] ss:$16 sps:$4 sm:$0xff]   ;;  %v3055_v11 = vld [vmem:[%s3561_s28 + $0xa0] ss:$16 sps:$4 sm:$0xff]   ;;  %2127 = vmatprep.mubr.bf16.mxu1 %v3616_v52 }
  0x1c   : > { %v3053_v10 = vld [vmem:[%s3561_s28 + $0x2a4] ss:$16 sps:$4 sm:$0xff]   ;;  %v3056_v12 = vld [vmem:[%s3561_s28 + $0x2a0] ss:$16 sps:$4 sm:$0xff]  }
  0x1d   : > { %2057 = vmatpush1.bf16.msra.mxu0 %v3049_v7  ;;  %v3057_v13 = vld [vmem:[%s3561_s28 + $0x84] ss:$16 sps:$4 sm:$0xff]   ;;  %v3061_v15 = vld [vmem:[%s3561_s28 + $0x80] ss:$16 sps:$4 sm:$0xff]  }
  0x1e   : > { %2098 = vmatpush1.bf16.msra.mxu1 %v3050_v8  ;;  %2058 = vmatprep.subr.bf16.mxu0 %v3051_v9  ;;  %v3059_v14 = vld [vmem:[%s3561_s28 + $0x284] ss:$16 sps:$4 sm:$0xff]   ;;  %v3062_v16 = vld [vmem:[%s3561_s28 + $0x280] ss:$16 sps:$4 sm:$0xff]   ;;  %v3640_v8 = vcombine.low %v290_v49, %v290_v49 }
  0x1f   : > { %2099 = vmatprep.subr.bf16.mxu1 %v3053_v10  ;;  %v3063_v17 = vld [vmem:[%s3561_s28 + $0x64] ss:$16 sps:$4 sm:$0xff]   ;;  %v3067_v19 = vld [vmem:[%s3561_s28 + $0x60] ss:$16 sps:$4 sm:$0xff]  }
  0x20   : > { %v3065_v18 = vld [vmem:[%s3561_s28 + $0x264] ss:$16 sps:$4 sm:$0xff]   ;;  %v3068_v20 = vld [vmem:[%s3561_s28 + $0x260] ss:$16 sps:$4 sm:$0xff]  }
  0x21   : > { %2059 = vmatpush1.bf16.msra.mxu0 %v3055_v11  ;;  %v3069_v21 = vld [vmem:[%s3561_s28 + $0x44] ss:$16 sps:$4 sm:$0xff]   ;;  %v3073_v23 = vld [vmem:[%s3561_s28 + $0x40] ss:$16 sps:$4 sm:$0xff]  }
  0x22   : > { %2100 = vmatpush1.bf16.msra.mxu1 %v3056_v12  ;;  %2060 = vmatprep.subr.bf16.mxu0 %v3057_v13  ;;  %v3071_v22 = vld [vmem:[%s3561_s28 + $0x244] ss:$16 sps:$4 sm:$0xff]   ;;  %v3074_v24 = vld [vmem:[%s3561_s28 + $0x240] ss:$16 sps:$4 sm:$0xff]  }
  0x23   : > { %2101 = vmatprep.subr.bf16.mxu1 %v3059_v14  ;;  %v3075_v25 = vld [vmem:[%s3561_s28 + $0x24] ss:$16 sps:$4 sm:$0xff]   ;;  %v3079_v27 = vld [vmem:[%s3561_s28 + $0x20] ss:$16 sps:$4 sm:$0xff]  }
  0x24   : > { %v3077_v26 = vld [vmem:[%s3561_s28 + $0x224] ss:$16 sps:$4 sm:$0xff]   ;;  %v3080_v28 = vld [vmem:[%s3561_s28 + $0x220] ss:$16 sps:$4 sm:$0xff]  }
  0x25   : > { %2061 = vmatpush1.bf16.msra.mxu0 %v3061_v15  ;;  %v3081_v29 = vld [vmem:[%s3561_s28 + $0x4] ss:$16 sps:$4 sm:$0xff]   ;;  %v3085_v31 = vld [vmem:[%s3561_s28] ss:$16 sps:$4 sm:$0xff]  }
  0x26   : > { %2102 = vmatpush1.bf16.msra.mxu1 %v3062_v16  ;;  %2062 = vmatprep.subr.bf16.mxu0 %v3063_v17  ;;  %v3083_v30 = vld [vmem:[%s3561_s28 + $0x204] ss:$16 sps:$4 sm:$0xff]   ;;  %v3086_v32 = vld [vmem:[%s3561_s28 + $0x200] ss:$16 sps:$4 sm:$0xff]  }
  0x27   : > { %2103 = vmatprep.subr.bf16.mxu1 %v3065_v18  ;;  %v3087_v33 = vld [vmem:[%s3561_s28 + $0x1e4] ss:$16 sps:$4 sm:$0xff]   ;;  %v3091_v35 = vld [vmem:[%s3561_s28 + $0x1e0] ss:$16 sps:$4 sm:$0xff]  }
  0x28   : > { %v3089_v34 = vld [vmem:[%s3561_s28 + $0x3e4] ss:$16 sps:$4 sm:$0xff]   ;;  %v3092_v36 = vld [vmem:[%s3561_s28 + $0x3e0] ss:$16 sps:$4 sm:$0xff]  }
  0x29   : > { %2063 = vmatpush1.bf16.msra.mxu0 %v3067_v19  ;;  %v3093_v37 = vld [vmem:[%s3561_s28 + $0x1c4] ss:$16 sps:$4 sm:$0xff]   ;;  %v3097_v39 = vld [vmem:[%s3561_s28 + $0x1c0] ss:$16 sps:$4 sm:$0xff]  }
  0x2a   : > { %2104 = vmatpush1.bf16.msra.mxu1 %v3068_v20  ;;  %2064 = vmatprep.subr.bf16.mxu0 %v3069_v21  ;;  %v3095_v38 = vld [vmem:[%s3561_s28 + $0x3c4] ss:$16 sps:$4 sm:$0xff]   ;;  %v3098_v40 = vld [vmem:[%s3561_s28 + $0x3c0] ss:$16 sps:$4 sm:$0xff]  }
  0x2b   : > { %2105 = vmatprep.subr.bf16.mxu1 %v3071_v22  ;;  %v3099_v41 = vld [vmem:[%s3561_s28 + $0x1a4] ss:$16 sps:$4 sm:$0xff]   ;;  %v3103_v43 = vld [vmem:[%s3561_s28 + $0x1a0] ss:$16 sps:$4 sm:$0xff]  }
  0x2c   : > { %v3101_v42 = vld [vmem:[%s3561_s28 + $0x3a4] ss:$16 sps:$4 sm:$0xff]   ;;  %v3104_v44 = vld [vmem:[%s3561_s28 + $0x3a0] ss:$16 sps:$4 sm:$0xff]  }
  0x2d   : > { %2065 = vmatpush1.bf16.msra.mxu0 %v3073_v23  ;;  %v3105_v45 = vld [vmem:[%s3561_s28 + $0x184] ss:$16 sps:$4 sm:$0xff]   ;;  %v3109_v50 = vld [vmem:[%s3561_s28 + $0x180] ss:$16 sps:$4 sm:$0xff]  }
  0x2e   : > { %2106 = vmatpush1.bf16.msra.mxu1 %v3074_v24  ;;  %2066 = vmatprep.subr.bf16.mxu0 %v3075_v25  ;;  %v3107_v46 = vld [vmem:[%s3561_s28 + $0x384] ss:$16 sps:$4 sm:$0xff]   ;;  %v3110_v51 = vld [vmem:[%s3561_s28 + $0x380] ss:$16 sps:$4 sm:$0xff]  }
  0x2f   : > { %2107 = vmatprep.subr.bf16.mxu1 %v3077_v26  ;;  %v289_v47 = vld [vmem:[%s3556_s24] sm:$0xff] }
  0x30   : > { %v3611_v48 = vcombine.high %v289_v47, %v289_v47  ;;  %v3111_v53 = vld [vmem:[%s3561_s28 + $0x164] ss:$16 sps:$4 sm:$0xff]   ;;  %v3115_v55 = vld [vmem:[%s3561_s28 + $0x160] ss:$16 sps:$4 sm:$0xff]   ;;  %v3638_v7 = vcombine.low %v289_v47, %v289_v47 }
  0x31   : > { %2067 = vmatpush1.bf16.msra.mxu0 %v3079_v27  ;;  %v3113_v54 = vld [vmem:[%s3561_s28 + $0x364] ss:$16 sps:$4 sm:$0xff]   ;;  %v3116_v56 = vld [vmem:[%s3561_s28 + $0x360] ss:$16 sps:$4 sm:$0xff]  }
  0x32   : > { %2108 = vmatpush1.bf16.msra.mxu1 %v3080_v28  ;;  %2068 = vmatprep.subr.bf16.mxu0 %v3081_v29  ;;  %v3117_v57 = vld [vmem:[%s3561_s28 + $0x144] ss:$16 sps:$4 sm:$0xff]   ;;  %v3121_v59 = vld [vmem:[%s3561_s28 + $0x140] ss:$16 sps:$4 sm:$0xff]  }
  0x33   : > { %2109 = vmatprep.subr.bf16.mxu1 %v3083_v30  ;;  %2086 = vmatprep.mubr.bf16.mxu0 %v3611_v48  ;;  %v3119_v58 = vld [vmem:[%s3561_s28 + $0x344] ss:$16 sps:$4 sm:$0xff]   ;;  %v3122_v60 = vld [vmem:[%s3561_s28 + $0x340] ss:$16 sps:$4 sm:$0xff]  }
  0x34   : > { %v3123_v61 = vld [vmem:[%s3561_s28 + $0x124] ss:$16 sps:$4 sm:$0xff]   ;;  %v3127_v63 = vld [vmem:[%s3561_s28 + $0x120] ss:$16 sps:$4 sm:$0xff]  }
  0x35   : > { %2069 = vmatpush1.bf16.msra.mxu0 %v3085_v31  ;;  %v3125_v62 = vld [vmem:[%s3561_s28 + $0x324] ss:$16 sps:$4 sm:$0xff]   ;;  %v3128_v0 = vld [vmem:[%s3561_s28 + $0x320] ss:$16 sps:$4 sm:$0xff]  }
  0x36   : > { %2110 = vmatpush1.bf16.msra.mxu1 %v3086_v32  ;;  %2070 = vmatprep.subr.bf16.mxu0 %v3087_v33  ;;  %v3129_v1 = vld [vmem:[%s3561_s28 + $0x104] ss:$16 sps:$4 sm:$0xff]   ;;  %v3133_v3 = vld [vmem:[%s3561_s28 + $0x100] ss:$16 sps:$4 sm:$0xff]  }
  0x37   : > { %2111 = vmatprep.subr.bf16.mxu1 %v3089_v34  ;;  %v3131_v2 = vld [vmem:[%s3561_s28 + $0x304] ss:$16 sps:$4 sm:$0xff]   ;;  %v3134_v4 = vld [vmem:[%s3561_s28 + $0x300] ss:$16 sps:$4 sm:$0xff]   ;;  %v3672_v34 = vld [vmem:[%s3556_s24 + $0x18] sm:$0xff] }
  0x38   : > { %v3141_v5 = vld [vmem:[%s3561_s28 + $0x4e4] ss:$16 sps:$4 sm:$0xff]   ;;  %v3139_v9 = vld [vmem:[%s3561_s28 + $0x4e0] ss:$16 sps:$4 sm:$0xff]  }
  0x39   : > { %2071 = vmatpush2.bf16.msra.mxu0 %v3091_v35  ;;  %v3144_v6 = vld [vmem:[%s3561_s28 + $0x6e4] ss:$16 sps:$4 sm:$0xff]   ;;  %v3142_v10 = vld [vmem:[%s3561_s28 + $0x6e0] ss:$16 sps:$4 sm:$0xff]  }
  0x3a   : > { %2112 = vmatpush2.bf16.msra.mxu1 %v3092_v36  ;;  %2072 = vmatprep.subr.bf16.mxu0 %v3093_v37  ;;  %v3147_v11 = vld [vmem:[%s3561_s28 + $0x4c4] ss:$16 sps:$4 sm:$0xff]   ;;  %v3145_v13 = vld [vmem:[%s3561_s28 + $0x4c0] ss:$16 sps:$4 sm:$0xff]  }
  0x3b   : > { %2113 = vmatprep.subr.bf16.mxu1 %v3095_v38  ;;  %v3150_v12 = vld [vmem:[%s3561_s28 + $0x6c4] ss:$16 sps:$4 sm:$0xff]   ;;  %v3148_v14 = vld [vmem:[%s3561_s28 + $0x6c0] ss:$16 sps:$4 sm:$0xff]   ;;  %v3682_v38 = vcombine.high %v3672_v34, %v3672_v34 }
  0x3c   : > { %v3153_v15 = vld [vmem:[%s3561_s28 + $0x4a4] ss:$16 sps:$4 sm:$0xff]   ;;  %v3151_v17 = vld [vmem:[%s3561_s28 + $0x4a0] ss:$16 sps:$4 sm:$0xff]  }
  0x3d   : > { %2073 = vmatpush2.bf16.msra.mxu0 %v3097_v39  ;;  %v3156_v16 = vld [vmem:[%s3561_s28 + $0x6a4] ss:$16 sps:$4 sm:$0xff]   ;;  %v3154_v18 = vld [vmem:[%s3561_s28 + $0x6a0] ss:$16 sps:$4 sm:$0xff]  }
  0x3e   : > { %2114 = vmatpush2.bf16.msra.mxu1 %v3098_v40  ;;  %2074 = vmatprep.subr.bf16.mxu0 %v3099_v41  ;;  %v3159_v19 = vld [vmem:[%s3561_s28 + $0x484] ss:$16 sps:$4 sm:$0xff]   ;;  %v3157_v21 = vld [vmem:[%s3561_s28 + $0x480] ss:$16 sps:$4 sm:$0xff]  }
  0x3f   : > { %2115 = vmatprep.subr.bf16.mxu1 %v3101_v42  ;;  %v3162_v20 = vld [vmem:[%s3561_s28 + $0x684] ss:$16 sps:$4 sm:$0xff]   ;;  %v3160_v22 = vld [vmem:[%s3561_s28 + $0x680] ss:$16 sps:$4 sm:$0xff]  }
  0x40   : > { %v3165_v23 = vld [vmem:[%s3561_s28 + $0x464] ss:$16 sps:$4 sm:$0xff]   ;;  %v3163_v25 = vld [vmem:[%s3561_s28 + $0x460] ss:$16 sps:$4 sm:$0xff]  }
  0x41   : > { %2075 = vmatpush2.bf16.msra.mxu0 %v3103_v43  ;;  %v3168_v24 = vld [vmem:[%s3561_s28 + $0x664] ss:$16 sps:$4 sm:$0xff]   ;;  %v3166_v26 = vld [vmem:[%s3561_s28 + $0x660] ss:$16 sps:$4 sm:$0xff]  }
  0x42   : > { %2116 = vmatpush2.bf16.msra.mxu1 %v3104_v44  ;;  %2076 = vmatprep.subr.bf16.mxu0 %v3105_v45  ;;  %v3171_v27 = vld [vmem:[%s3561_s28 + $0x444] ss:$16 sps:$4 sm:$0xff]   ;;  %v3169_v29 = vld [vmem:[%s3561_s28 + $0x440] ss:$16 sps:$4 sm:$0xff]  }
  0x43   : > { %2117 = vmatprep.subr.bf16.mxu1 %v3107_v46  ;;  %v3174_v28 = vld [vmem:[%s3561_s28 + $0x644] ss:$16 sps:$4 sm:$0xff]   ;;  %v3172_v30 = vld [vmem:[%s3561_s28 + $0x640] ss:$16 sps:$4 sm:$0xff]  }
  0x44   : > { %v3177_v31 = vld [vmem:[%s3561_s28 + $0x424] ss:$16 sps:$4 sm:$0xff]   ;;  %v3175_v35 = vld [vmem:[%s3561_s28 + $0x420] ss:$16 sps:$4 sm:$0xff]  }
  0x45   : > { %2077 = vmatpush2.bf16.msra.mxu0 %v3109_v50  ;;  %v3180_v32 = vld [vmem:[%s3561_s28 + $0x624] ss:$16 sps:$4 sm:$0xff]   ;;  %v3178_v36 = vld [vmem:[%s3561_s28 + $0x620] ss:$16 sps:$4 sm:$0xff]  }
  0x46   : > { %2118 = vmatpush2.bf16.msra.mxu1 %v3110_v51  ;;  %2078 = vmatprep.subr.bf16.mxu0 %v3111_v53  ;;  %v3669_v33 = vld [vmem:[%s3556_s24 + $0x10] sm:$0xff] }
  0x47   : > { %2119 = vmatprep.subr.bf16.mxu1 %v3113_v54  ;;  %v3678_v37 = vcombine.high %v3669_v33, %v3669_v33  ;;  %v3183_v39 = vld [vmem:[%s3561_s28 + $0x404] ss:$16 sps:$4 sm:$0xff]   ;;  %v3181_v41 = vld [vmem:[%s3561_s28 + $0x400] ss:$16 sps:$4 sm:$0xff]  }
  0x48   : > { %v3186_v40 = vld [vmem:[%s3561_s28 + $0x604] ss:$16 sps:$4 sm:$0xff]   ;;  %v3184_v42 = vld [vmem:[%s3561_s28 + $0x600] ss:$16 sps:$4 sm:$0xff]  }
  0x49   : > { %2079 = vmatpush2.bf16.msra.mxu0 %v3115_v55  ;;  %v3189_v43 = vld [vmem:[%s3561_s28 + $0x5e4] ss:$16 sps:$4 sm:$0xff]   ;;  %v3187_v45 = vld [vmem:[%s3561_s28 + $0x5e0] ss:$16 sps:$4 sm:$0xff]  }
  0x4a   : > { %2120 = vmatpush2.bf16.msra.mxu1 %v3116_v56  ;;  %2080 = vmatprep.subr.bf16.mxu0 %v3117_v57  ;;  %v3192_v44 = vld [vmem:[%s3561_s28 + $0x7e4] ss:$16 sps:$4 sm:$0xff]   ;;  %v3190_v46 = vld [vmem:[%s3561_s28 + $0x7e0] ss:$16 sps:$4 sm:$0xff]  }
  0x4b   : > { %2121 = vmatprep.subr.bf16.mxu1 %v3119_v58  ;;  %v3195_v47 = vld [vmem:[%s3561_s28 + $0x5c4] ss:$16 sps:$4 sm:$0xff]   ;;  %v3193_v50 = vld [vmem:[%s3561_s28 + $0x5c0] ss:$16 sps:$4 sm:$0xff]  }
  0x4c   : > { %v3198_v49 = vld [vmem:[%s3561_s28 + $0x7c4] ss:$16 sps:$4 sm:$0xff]   ;;  %v3196_v51 = vld [vmem:[%s3561_s28 + $0x7c0] ss:$16 sps:$4 sm:$0xff]  }
  0x4d   : > { %2081 = vmatpush2.bf16.msra.mxu0 %v3121_v59  ;;  %v3201_v53 = vld [vmem:[%s3561_s28 + $0x5a4] ss:$16 sps:$4 sm:$0xff]   ;;  %v3199_v55 = vld [vmem:[%s3561_s28 + $0x5a0] ss:$16 sps:$4 sm:$0xff]  }
  0x4e   : > { %2122 = vmatpush2.bf16.msra.mxu1 %v3122_v60  ;;  %2082 = vmatprep.subr.bf16.mxu0 %v3123_v61  ;;  %v3204_v54 = vld [vmem:[%s3561_s28 + $0x7a4] ss:$16 sps:$4 sm:$0xff]   ;;  %v3202_v56 = vld [vmem:[%s3561_s28 + $0x7a0] ss:$16 sps:$4 sm:$0xff]  }
  0x4f   : > { %2123 = vmatprep.subr.bf16.mxu1 %v3125_v62  ;;  %v3207_v57 = vld [vmem:[%s3561_s28 + $0x584] ss:$16 sps:$4 sm:$0xff]   ;;  %v3205_v59 = vld [vmem:[%s3561_s28 + $0x580] ss:$16 sps:$4 sm:$0xff]  }
  0x50   : > { %v3210_v58 = vld [vmem:[%s3561_s28 + $0x784] ss:$16 sps:$4 sm:$0xff]   ;;  %v3208_v60 = vld [vmem:[%s3561_s28 + $0x780] ss:$16 sps:$4 sm:$0xff]  }
  0x51   : > { %2083 = vmatpush2.bf16.msra.mxu0 %v3127_v63  ;;  %v3213_v61 = vld [vmem:[%s3561_s28 + $0x564] ss:$16 sps:$4 sm:$0xff]   ;;  %v3211_v63 = vld [vmem:[%s3561_s28 + $0x560] ss:$16 sps:$4 sm:$0xff]  }
  0x52   : > { %2124 = vmatpush2.bf16.msra.mxu1 %v3128_v0  ;;  %2084 = vmatprep.subr.bf16.mxu0 %v3129_v1  ;;  %v3216_v62 = vld [vmem:[%s3561_s28 + $0x764] ss:$16 sps:$4 sm:$0xff]   ;;  %v3214_v0 = vld [vmem:[%s3561_s28 + $0x760] ss:$16 sps:$4 sm:$0xff]  }
  0x53   : > { %2125 = vmatprep.subr.bf16.mxu1 %v3131_v2  ;;  %v3219_v1 = vld [vmem:[%s3561_s28 + $0x544] ss:$16 sps:$4 sm:$0xff]  }
  0x54   : > { %v3222_v2 = vld [vmem:[%s3561_s28 + $0x744] ss:$16 sps:$4 sm:$0xff]  }
  0x55   : > { %2085 = vmatpush2.bf16.msra.mxu0 %v3133_v3  ;;  %v3217_v3 = vld [vmem:[%s3561_s28 + $0x540] ss:$16 sps:$4 sm:$0xff]  }
  0x56   : > { %2126 = vmatpush2.bf16.msra.mxu1 %v3134_v4  ;;  %2136 = vmatprep.subr.bf16.mxu0 %v3141_v5  ;;  %v3220_v4 = vld [vmem:[%s3561_s28 + $0x740] ss:$16 sps:$4 sm:$0xff]   ;;  %v3225_v5 = vld [vmem:[%s3561_s28 + $0x524] ss:$16 sps:$4 sm:$0xff]  }
  0x57   : > { %2177 = vmatprep.subr.bf16.mxu1 %v3144_v6  ;;  %v3228_v6 = vld [vmem:[%s3561_s28 + $0x724] ss:$16 sps:$4 sm:$0xff]  }
  0x58   : > { %2087 = vmatmul.mubr.bf16.vlgmr.msra.gmra.mxu0 %v3638_v7 }
  0x59   : > { %2128 = vmatmul.mubr.bf16.vlgmr.msra.gmra.mxu1 %v3640_v8  ;;  %2137 = vmatpush1.bf16.msra.mxu0 %v3139_v9  ;;  %v3223_v9 = vld [vmem:[%s3561_s28 + $0x520] ss:$16 sps:$4 sm:$0xff]  }
  0x5a   : > { %2178 = vmatpush1.bf16.msra.mxu1 %v3142_v10  ;;  %2138 = vmatprep.subr.bf16.mxu0 %v3147_v11  ;;  %v3226_v10 = vld [vmem:[%s3561_s28 + $0x720] ss:$16 sps:$4 sm:$0xff]   ;;  %v3231_v11 = vld [vmem:[%s3561_s28 + $0x504] ss:$16 sps:$4 sm:$0xff]  }
  0x5b   : > { %2179 = vmatprep.subr.bf16.mxu1 %v3150_v12  ;;  %2168 = vmatprep.mubr.bf16.mxu0 %v3678_v37  ;;  %v3234_v12 = vld [vmem:[%s3561_s28 + $0x704] ss:$16 sps:$4 sm:$0xff]  }
  0x5c   : > { %2209 = vmatprep.mubr.bf16.mxu1 %v3682_v38 }
  0x5d   : > { %2139 = vmatpush1.bf16.msra.mxu0 %v3145_v13  ;;  %v3229_v13 = vld [vmem:[%s3561_s28 + $0x500] ss:$16 sps:$4 sm:$0xff]  }
  0x5e   : > { %2180 = vmatpush1.bf16.msra.mxu1 %v3148_v14  ;;  %2140 = vmatprep.subr.bf16.mxu0 %v3153_v15  ;;  %v3232_v14 = vld [vmem:[%s3561_s28 + $0x700] ss:$16 sps:$4 sm:$0xff]   ;;  %v3241_v15 = vld [vmem:[%s3561_s28 + $0x8e4] ss:$16 sps:$4 sm:$0xff]  }
  0x5f   : > { %2181 = vmatprep.subr.bf16.mxu1 %v3156_v16  ;;  %v3244_v16 = vld [vmem:[%s3561_s28 + $0xec] ss:$16 sps:$4 sm:$0xff]  }
  0x61   : > { %2141 = vmatpush1.bf16.msra.mxu0 %v3151_v17  ;;  %v3726_v17 = vcombine.low %v3669_v33, %v3669_v33  ;;  %v3260_v33 = vld [vmem:[%s3561_s28 + $0x88] ss:$16 sps:$4 sm:$0xff]  }
  0x62   : > { %2182 = vmatpush1.bf16.msra.mxu1 %v3154_v18  ;;  %2142 = vmatprep.subr.bf16.mxu0 %v3159_v19  ;;  %v3730_v18 = vcombine.low %v3672_v34, %v3672_v34  ;;  %v3239_v19 = vld [vmem:[%s3561_s28 + $0x8e0] ss:$16 sps:$4 sm:$0xff]   ;;  %v3268_v34 = vld [vmem:[%s3561_s28 + $0x6c] ss:$16 sps:$4 sm:$0xff]  }
  0x63   : > { %2183 = vmatprep.subr.bf16.mxu1 %v3162_v20  ;;  %v3242_v20 = vld [vmem:[%s3561_s28 + $0xe8] ss:$16 sps:$4 sm:$0xff]  }
  0x65   : > { %2143 = vmatpush1.bf16.msra.mxu0 %v3157_v21  ;;  %v3247_v21 = vld [vmem:[%s3561_s28 + $0x8c4] ss:$16 sps:$4 sm:$0xff]  }
  0x66   : > { %2184 = vmatpush1.bf16.msra.mxu1 %v3160_v22  ;;  %2144 = vmatprep.subr.bf16.mxu0 %v3165_v23  ;;  %v3250_v22 = vld [vmem:[%s3561_s28 + $0xcc] ss:$16 sps:$4 sm:$0xff]   ;;  %v3245_v23 = vld [vmem:[%s3561_s28 + $0x8c0] ss:$16 sps:$4 sm:$0xff]  }
  0x67   : > { %2185 = vmatprep.subr.bf16.mxu1 %v3168_v24  ;;  %v3248_v24 = vld [vmem:[%s3561_s28 + $0xc8] ss:$16 sps:$4 sm:$0xff]  }
  0x69   : > { %2145 = vmatpush1.bf16.msra.mxu0 %v3163_v25  ;;  %v3253_v25 = vld [vmem:[%s3561_s28 + $0x8a4] ss:$16 sps:$4 sm:$0xff]  }
  0x6a   : > { %2186 = vmatpush1.bf16.msra.mxu1 %v3166_v26  ;;  %2146 = vmatprep.subr.bf16.mxu0 %v3171_v27  ;;  %v3256_v26 = vld [vmem:[%s3561_s28 + $0xac] ss:$16 sps:$4 sm:$0xff]   ;;  %v3505_v27 = vmov 0  }
  0x6b   : > { %2187 = vmatprep.subr.bf16.mxu1 %v3174_v28  ;;  %v3251_v28 = vld [vmem:[%s3561_s28 + $0x8a0] ss:$16 sps:$4 sm:$0xff]  }
  0x6d   : > { %2147 = vmatpush1.bf16.msra.mxu0 %v3169_v29  ;;  %v3254_v29 = vld [vmem:[%s3561_s28 + $0xa8] ss:$16 sps:$4 sm:$0xff]  }
  0x6e   : > { %2188 = vmatpush1.bf16.msra.mxu1 %v3172_v30  ;;  %2148 = vmatprep.subr.bf16.mxu0 %v3177_v31  ;;  %v3259_v30 = vld [vmem:[%s3561_s28 + $0x884] ss:$16 sps:$4 sm:$0xff]   ;;  %v3262_v31 = vld [vmem:[%s3561_s28 + $0x8c] ss:$16 sps:$4 sm:$0xff]  }
  0x6f   : > { %2189 = vmatprep.subr.bf16.mxu1 %v3180_v32  ;;  %v3257_v32 = vld [vmem:[%s3561_s28 + $0x880] ss:$16 sps:$4 sm:$0xff]  }
  0x71   : > { %2149 = vmatpush1.bf16.msra.mxu0 %v3175_v35  ;;  %v3263_v35 = vld [vmem:[%s3561_s28 + $0x860] ss:$16 sps:$4 sm:$0xff]  }
  0x72   : > { %2190 = vmatpush1.bf16.msra.mxu1 %v3178_v36  ;;  %2150 = vmatprep.subr.bf16.mxu0 %v3183_v39  ;;  %v3266_v36 = vld [vmem:[%s3561_s28 + $0x68] ss:$16 sps:$4 sm:$0xff]   ;;  %v3271_v39 = vld [vmem:[%s3561_s28 + $0x844] ss:$16 sps:$4 sm:$0xff]  }
  0x73   : > { %2191 = vmatprep.subr.bf16.mxu1 %v3186_v40  ;;  %v3274_v40 = vld [vmem:[%s3561_s28 + $0x4c] ss:$16 sps:$4 sm:$0xff]  }
  0x75   : > { %2151 = vmatpush1.bf16.msra.mxu0 %v3181_v41  ;;  %v3269_v41 = vld [vmem:[%s3561_s28 + $0x840] ss:$16 sps:$4 sm:$0xff]  }
  0x76   : > { %2192 = vmatpush1.bf16.msra.mxu1 %v3184_v42  ;;  %2152 = vmatprep.subr.bf16.mxu0 %v3189_v43  ;;  %v3272_v42 = vld [vmem:[%s3561_s28 + $0x48] ss:$16 sps:$4 sm:$0xff]   ;;  %v3277_v43 = vld [vmem:[%s3561_s28 + $0x824] ss:$16 sps:$4 sm:$0xff]  }
  0x77   : > { %2193 = vmatprep.subr.bf16.mxu1 %v3192_v44  ;;  %v3280_v44 = vld [vmem:[%s3561_s28 + $0x2c] ss:$16 sps:$4 sm:$0xff]  }
  0x79   : > { %2153 = vmatpush2.bf16.msra.mxu0 %v3187_v45  ;;  %v3275_v45 = vld [vmem:[%s3561_s28 + $0x820] ss:$16 sps:$4 sm:$0xff]  }
  0x7a   : > { %2194 = vmatpush2.bf16.msra.mxu1 %v3190_v46  ;;  %2154 = vmatprep.subr.bf16.mxu0 %v3195_v47  ;;  %v3278_v46 = vld [vmem:[%s3561_s28 + $0x28] ss:$16 sps:$4 sm:$0xff]   ;;  %v3283_v47 = vld [vmem:[%s3561_s28 + $0x804] ss:$16 sps:$4 sm:$0xff]  }
  0x7b   : > { %2195 = vmatprep.subr.bf16.mxu1 %v3198_v49  ;;  %v3286_v49 = vld [vmem:[%s3561_s28 + $0xc] ss:$16 sps:$4 sm:$0xff]  }
  0x7d   : > { %2155 = vmatpush2.bf16.msra.mxu0 %v3193_v50  ;;  %v3281_v50 = vld [vmem:[%s3561_s28 + $0x800] ss:$16 sps:$4 sm:$0xff]  }
  0x7e   : > { %2196 = vmatpush2.bf16.msra.mxu1 %v3196_v51  ;;  %2156 = vmatprep.subr.bf16.mxu0 %v3201_v53  ;;  %v3284_v51 = vld [vmem:[%s3561_s28 + $0x8] ss:$16 sps:$4 sm:$0xff]   ;;  %v3290_v53 = vld [vmem:[%s3561_s28 + $0x1ec] ss:$16 sps:$4 sm:$0xff]  }
  0x7f   : > { %2197 = vmatprep.subr.bf16.mxu1 %v3204_v54  ;;  %v3293_v54 = vld [vmem:[%s3561_s28 + $0x2ec] ss:$16 sps:$4 sm:$0xff]  }
  0x81   : > { %2157 = vmatpush2.bf16.msra.mxu0 %v3199_v55  ;;  %v3769_v55 = vld [vmem:[%s3556_s24 + $0x20] ss:$0 sps:$4 sm:$0xff]  }
  0x82   : > { %2198 = vmatpush2.bf16.msra.mxu1 %v3202_v56  ;;  %2158 = vmatprep.subr.bf16.mxu0 %v3207_v57  ;;  %v3288_v56 = vld [vmem:[%s3561_s28 + $0x1e8] ss:$16 sps:$4 sm:$0xff]  }
  0x83   : > { %2199 = vmatprep.subr.bf16.mxu1 %v3210_v58  ;;  %v3291_v57 = vld [vmem:[%s3561_s28 + $0x2e8] ss:$16 sps:$4 sm:$0xff]   ;;  %v3296_v58 = vld [vmem:[%s3561_s28 + $0x1cc] ss:$16 sps:$4 sm:$0xff]  }
  0x85   : > { %2159 = vmatpush2.bf16.msra.mxu0 %v3205_v59  ;;  %v3299_v59 = vld [vmem:[%s3561_s28 + $0x2cc] ss:$16 sps:$4 sm:$0xff]  }
  0x86   : > { %2200 = vmatpush2.bf16.msra.mxu1 %v3208_v60  ;;  %2160 = vmatprep.subr.bf16.mxu0 %v3213_v61  ;;  %v3294_v60 = vld [vmem:[%s3561_s28 + $0x1c8] ss:$16 sps:$4 sm:$0xff]  }
  0x87   : > { %2201 = vmatprep.subr.bf16.mxu1 %v3216_v62  ;;  %v3297_v61 = vld [vmem:[%s3561_s28 + $0x2c8] ss:$16 sps:$4 sm:$0xff]   ;;  %v3302_v62 = vld [vmem:[%s3561_s28 + $0x1ac] ss:$16 sps:$4 sm:$0xff]  }
  0x89   : > { %2161 = vmatpush2.bf16.msra.mxu0 %v3211_v63  ;;  %v3305_v63 = vld [vmem:[%s3561_s28 + $0x2ac] ss:$16 sps:$4 sm:$0xff]  }
  0x8a   : > { %2202 = vmatpush2.bf16.msra.mxu1 %v3214_v0  ;;  %2162 = vmatprep.subr.bf16.mxu0 %v3219_v1  ;;  %v3300_v0 = vld [vmem:[%s3561_s28 + $0x1a8] ss:$16 sps:$4 sm:$0xff]  }
  0x8b   : > { %2203 = vmatprep.subr.bf16.mxu1 %v3222_v2  ;;  %v3303_v1 = vld [vmem:[%s3561_s28 + $0x2a8] ss:$16 sps:$4 sm:$0xff]   ;;  %v3308_v2 = vld [vmem:[%s3561_s28 + $0x18c] ss:$16 sps:$4 sm:$0xff]  }
  0x8d   : > { %2163 = vmatpush2.bf16.msra.mxu0 %v3217_v3  ;;  %v3311_v3 = vld [vmem:[%s3561_s28 + $0x28c] ss:$16 sps:$4 sm:$0xff]  }
  0x8e   : > { %2204 = vmatpush2.bf16.msra.mxu1 %v3220_v4  ;;  %2164 = vmatprep.subr.bf16.mxu0 %v3225_v5  ;;  %v3306_v4 = vld [vmem:[%s3561_s28 + $0x188] ss:$16 sps:$4 sm:$0xff]  }
  0x8f   : > { %2205 = vmatprep.subr.bf16.mxu1 %v3228_v6  ;;  %v3309_v5 = vld [vmem:[%s3561_s28 + $0x288] ss:$16 sps:$4 sm:$0xff]   ;;  %v3317_v6 = vld [vmem:[%s3561_s28 + $0x26c] ss:$16 sps:$4 sm:$0xff]  }
  0x91   : > { %2165 = vmatpush2.bf16.msra.mxu0 %v3223_v9  ;;  %v3312_v9 = vld [vmem:[%s3561_s28 + $0x168] ss:$16 sps:$4 sm:$0xff]  }
  0x92   : > { %2206 = vmatpush2.bf16.msra.mxu1 %v3226_v10  ;;  %2166 = vmatprep.subr.bf16.mxu0 %v3231_v11  ;;  %v3315_v10 = vld [vmem:[%s3561_s28 + $0x268] ss:$16 sps:$4 sm:$0xff]   ;;  %v3320_v11 = vld [vmem:[%s3561_s28 + $0x14c] ss:$16 sps:$4 sm:$0xff]  }
  0x93   : > { %2207 = vmatprep.subr.bf16.mxu1 %v3234_v12  ;;  %v3323_v12 = vld [vmem:[%s3561_s28 + $0x24c] ss:$16 sps:$4 sm:$0xff]  }
  0x95   : > { %2167 = vmatpush2.bf16.msra.mxu0 %v3229_v13  ;;  %v3318_v13 = vld [vmem:[%s3561_s28 + $0x148] ss:$16 sps:$4 sm:$0xff]  }
  0x96   : > { %2208 = vmatpush2.bf16.msra.mxu1 %v3232_v14  ;;  %2218 = vmatprep.subr.bf16.mxu0 %v3241_v15  ;;  %v3321_v14 = vld [vmem:[%s3561_s28 + $0x248] ss:$16 sps:$4 sm:$0xff]   ;;  %v3326_v15 = vld [vmem:[%s3561_s28 + $0x12c] ss:$16 sps:$4 sm:$0xff]  }
  0x97   : > { %2259 = vmatprep.subr.bf16.mxu1 %v3244_v16  ;;  %v3329_v16 = vld [vmem:[%s3561_s28 + $0x22c] ss:$16 sps:$4 sm:$0xff]  }
  0x98   : > { %2169 = vmatmul.mubr.bf16.vlgmr.msra.gmra.mxu0 %v3726_v17 }
  0x99   : > { %2210 = vmatmul.mubr.bf16.vlgmr.msra.gmra.mxu1 %v3730_v18  ;;  %2219 = vmatpush1.bf16.msra.mxu0 %v3239_v19  ;;  %v3324_v19 = vld [vmem:[%s3561_s28 + $0x128] ss:$16 sps:$4 sm:$0xff]  }
  0x9a   : > { %2260 = vmatpush1.bf16.msra.mxu1 %v3242_v20  ;;  %2220 = vmatprep.subr.bf16.mxu0 %v3247_v21  ;;  %v3327_v20 = vld [vmem:[%s3561_s28 + $0x228] ss:$16 sps:$4 sm:$0xff]   ;;  %v3332_v21 = vld [vmem:[%s3561_s28 + $0x10c] ss:$16 sps:$4 sm:$0xff]  }
  0x9b   : > { %2261 = vmatprep.subr.bf16.mxu1 %v3250_v22  ;;  %2250 = vmatprep.mubr.bf16.mxu0 %v3505_v27  ;;  %v3335_v22 = vld [vmem:[%s3561_s28 + $0x20c] ss:$16 sps:$4 sm:$0xff]  }
  0x9c   : > { %2291 = vmatprep.mubr.bf16.mxu1 %v3611_v48  ;;  %v3265_v48 = vld [vmem:[%s3561_s28 + $0x864] ss:$16 sps:$4 sm:$0xff]  }
  0x9d   : > { %2221 = vmatpush1.bf16.msra.mxu0 %v3245_v23  ;;  %v3330_v23 = vld [vmem:[%s3561_s28 + $0x108] ss:$16 sps:$4 sm:$0xff]  }
  0x9e   : > { %2262 = vmatpush1.bf16.msra.mxu1 %v3248_v24  ;;  %2222 = vmatprep.subr.bf16.mxu0 %v3253_v25  ;;  %v3333_v24 = vld [vmem:[%s3561_s28 + $0x208] ss:$16 sps:$4 sm:$0xff]   ;;  %v3338_v25 = vld [vmem:[%s3561_s28 + $0x3ec] ss:$16 sps:$4 sm:$0xff]  }
  0x9f   : > { %2263 = vmatprep.subr.bf16.mxu1 %v3256_v26  ;;  %v3341_v26 = vld [vmem:[%s3561_s28 + $0x4ec] ss:$16 sps:$4 sm:$0xff]  }
  0xa1   : > { %2223 = vmatpush1.bf16.msra.mxu0 %v3251_v28  ;;  %v3336_v28 = vld [vmem:[%s3561_s28 + $0x3e8] ss:$16 sps:$4 sm:$0xff]  }
  0xa2   : > { %2264 = vmatpush1.bf16.msra.mxu1 %v3254_v29  ;;  %2224 = vmatprep.subr.bf16.mxu0 %v3259_v30  ;;  %v3339_v29 = vld [vmem:[%s3561_s28 + $0x4e8] ss:$16 sps:$4 sm:$0xff]   ;;  %v3344_v30 = vld [vmem:[%s3561_s28 + $0x3cc] ss:$16 sps:$4 sm:$0xff]  }
  0xa3   : > { %2265 = vmatprep.subr.bf16.mxu1 %v3262_v31  ;;  %v3347_v31 = vld [vmem:[%s3561_s28 + $0x4cc] ss:$16 sps:$4 sm:$0xff]  }
  0xa5   : > { %2225 = vmatpush1.bf16.msra.mxu0 %v3257_v32  ;;  %v3342_v32 = vld [vmem:[%s3561_s28 + $0x3c8] ss:$16 sps:$4 sm:$0xff]  }
  0xa6   : > { %2266 = vmatpush1.bf16.msra.mxu1 %v3260_v33  ;;  %2226 = vmatprep.subr.bf16.mxu0 %v3265_v48  ;;  %v3345_v33 = vld [vmem:[%s3561_s28 + $0x4c8] ss:$16 sps:$4 sm:$0xff]   ;;  %v3350_v48 = vld [vmem:[%s3561_s28 + $0x3ac] ss:$16 sps:$4 sm:$0xff]  }
  0xa7   : > { %2267 = vmatprep.subr.bf16.mxu1 %v3268_v34  ;;  %v3353_v34 = vld [vmem:[%s3561_s28 + $0x4ac] ss:$16 sps:$4 sm:$0xff]  }
  0xa9   : > { %2227 = vmatpush1.bf16.msra.mxu0 %v3263_v35  ;;  %v3348_v35 = vld [vmem:[%s3561_s28 + $0x3a8] ss:$16 sps:$4 sm:$0xff]  }
  0xaa   : > { %2268 = vmatpush1.bf16.msra.mxu1 %v3266_v36  ;;  %2228 = vmatprep.subr.bf16.mxu0 %v3271_v39  ;;  %v3356_v36 = vld [vmem:[%s3561_s28 + $0x38c] ss:$16 sps:$4 sm:$0xff]  }
  0xab   : > { %2269 = vmatprep.subr.bf16.mxu1 %v3274_v40  ;;  %v3359_v39 = vld [vmem:[%s3561_s28 + $0x48c] ss:$16 sps:$4 sm:$0xff]   ;;  %v3354_v40 = vld [vmem:[%s3561_s28 + $0x388] ss:$16 sps:$4 sm:$0xff]  }
  0xad   : > { %2229 = vmatpush1.bf16.msra.mxu0 %v3269_v41  ;;  %v3357_v41 = vld [vmem:[%s3561_s28 + $0x488] ss:$16 sps:$4 sm:$0xff]  }
  0xae   : > { %2270 = vmatpush1.bf16.msra.mxu1 %v3272_v42  ;;  %2230 = vmatprep.subr.bf16.mxu0 %v3277_v43  ;;  %v3365_v42 = vld [vmem:[%s3561_s28 + $0x46c] ss:$16 sps:$4 sm:$0xff]   ;;  %v3360_v43 = vld [vmem:[%s3561_s28 + $0x368] ss:$16 sps:$4 sm:$0xff]  }
  0xaf   : > { %2271 = vmatprep.subr.bf16.mxu1 %v3280_v44  ;;  %v3363_v44 = vld [vmem:[%s3561_s28 + $0x468] ss:$16 sps:$4 sm:$0xff]  }
  0xb1   : > { %2231 = vmatpush1.bf16.msra.mxu0 %v3275_v45  ;;  %v3368_v45 = vld [vmem:[%s3561_s28 + $0x34c] ss:$16 sps:$4 sm:$0xff]  }
  0xb2   : > { %2272 = vmatpush1.bf16.msra.mxu1 %v3278_v46  ;;  %2232 = vmatprep.subr.bf16.mxu0 %v3283_v47  ;;  %v3371_v46 = vld [vmem:[%s3561_s28 + $0x44c] ss:$16 sps:$4 sm:$0xff]   ;;  %v3366_v47 = vld [vmem:[%s3561_s28 + $0x348] ss:$16 sps:$4 sm:$0xff]  }
  0xb3   : > { %2273 = vmatprep.subr.bf16.mxu1 %v3286_v49  ;;  %v3369_v49 = vld [vmem:[%s3561_s28 + $0x448] ss:$16 sps:$4 sm:$0xff]  }
  0xb5   : > { %2233 = vmatpush1.bf16.msra.mxu0 %v3281_v50  ;;  %v3374_v50 = vld [vmem:[%s3561_s28 + $0x32c] ss:$16 sps:$4 sm:$0xff]  }
  0xb6   : > { %2274 = vmatpush1.bf16.msra.mxu1 %v3284_v51  ;;  %2300 = vmatprep.subr.bf16.mxu0 %v3293_v54  ;;  %v3377_v51 = vld [vmem:[%s3561_s28 + $0x42c] ss:$16 sps:$4 sm:$0xff]   ;;  %v3375_v54 = vld [vmem:[%s3561_s28 + $0x428] ss:$16 sps:$4 sm:$0xff]  }
  0xb7   : > { %2275 = vmatprep.subr.bf16.mxu1 %v3290_v53  ;;  %v3372_v53 = vld [vmem:[%s3561_s28 + $0x328] ss:$16 sps:$4 sm:$0xff]  }
  0xb8   : > { %2251 = vmatmul.mubr.bf16.vlgmr.msra.gmra.mxu0 %v3769_v55 }
  0xb9   : > { %2301 = vmatpush1.bf16.msra.mxu0 %v3291_v57  ;;  %2332 = vmatprep.mubr.bf16.mxu0 %v3616_v52  ;;  %v3314_v52 = vld [vmem:[%s3561_s28 + $0x16c] ss:$16 sps:$4 sm:$0xff]  }
  0xba   : > { %2276 = vmatpush2.bf16.msra.mxu1 %v3288_v56  ;;  %2302 = vmatprep.subr.bf16.mxu0 %v3299_v59  ;;  %v3380_v56 = vld [vmem:[%s3561_s28 + $0x30c] ss:$16 sps:$4 sm:$0xff]   ;;  %v3381_v59 = vld [vmem:[%s3561_s28 + $0x408] ss:$16 sps:$4 sm:$0xff]  }
  0xbb   : > { %2277 = vmatprep.subr.bf16.mxu1 %v3296_v58  ;;  %v3383_v57 = vld [vmem:[%s3561_s28 + $0x40c] ss:$16 sps:$4 sm:$0xff]   ;;  %v3378_v58 = vld [vmem:[%s3561_s28 + $0x308] ss:$16 sps:$4 sm:$0xff]  }
  0xbd   : > { %2303 = vmatpush1.bf16.msra.mxu0 %v3297_v61  ;;  %v3389_v61 = vld [vmem:[%s3561_s28 + $0x6ec] ss:$16 sps:$4 sm:$0xff]  }
  0xbe   : > { %2278 = vmatpush2.bf16.msra.mxu1 %v3294_v60  ;;  %2304 = vmatprep.subr.bf16.mxu0 %v3305_v63  ;;  %v3386_v60 = vld [vmem:[%s3561_s28 + $0x5ec] ss:$16 sps:$4 sm:$0xff]   ;;  %v3387_v63 = vld [vmem:[%s3561_s28 + $0x6e8] ss:$16 sps:$4 sm:$0xff]  }
  0xbf   : > { %2279 = vmatprep.subr.bf16.mxu1 %v3302_v62  ;;  %v3384_v62 = vld [vmem:[%s3561_s28 + $0x5e8] ss:$16 sps:$4 sm:$0xff]  }
  0xc1   : > { %2305 = vmatpush1.bf16.msra.mxu0 %v3303_v1  ;;  %v3395_v1 = vld [vmem:[%s3561_s28 + $0x6cc] ss:$16 sps:$4 sm:$0xff]  }
  0xc2   : > { %2280 = vmatpush2.bf16.msra.mxu1 %v3300_v0  ;;  %2306 = vmatprep.subr.bf16.mxu0 %v3311_v3  ;;  %v3392_v0 = vld [vmem:[%s3561_s28 + $0x5cc] ss:$16 sps:$4 sm:$0xff]   ;;  %v3393_v3 = vld [vmem:[%s3561_s28 + $0x6c8] ss:$16 sps:$4 sm:$0xff]  }
  0xc3   : > { %2281 = vmatprep.subr.bf16.mxu1 %v3308_v2  ;;  %v3390_v2 = vld [vmem:[%s3561_s28 + $0x5c8] ss:$16 sps:$4 sm:$0xff]  }
  0xc5   : > { %2307 = vmatpush1.bf16.msra.mxu0 %v3309_v5  ;;  %v3401_v5 = vld [vmem:[%s3561_s28 + $0x6ac] ss:$16 sps:$4 sm:$0xff]  }
  0xc6   : > { %2282 = vmatpush2.bf16.msra.mxu1 %v3306_v4  ;;  %2308 = vmatprep.subr.bf16.mxu0 %v3317_v6  ;;  %v3398_v4 = vld [vmem:[%s3561_s28 + $0x5ac] ss:$16 sps:$4 sm:$0xff]  }
  0xc7   : > { %2283 = vmatprep.subr.bf16.mxu1 %v3314_v52  ;;  %v3396_v52 = vld [vmem:[%s3561_s28 + $0x5a8] ss:$16 sps:$4 sm:$0xff]   ;;  %v3404_v6 = vld [vmem:[%s3561_s28 + $0x58c] ss:$16 sps:$4 sm:$0xff]  }
  0xc9   : > { %2309 = vmatpush1.bf16.msra.mxu0 %v3315_v10  ;;  %v3402_v10 = vld [vmem:[%s3561_s28 + $0x588] ss:$16 sps:$4 sm:$0xff]  }
  0xca   : > { %2284 = vmatpush2.bf16.msra.mxu1 %v3312_v9  ;;  %2310 = vmatprep.subr.bf16.mxu0 %v3323_v12  ;;  %v3407_v9 = vld [vmem:[%s3561_s28 + $0x68c] ss:$16 sps:$4 sm:$0xff]  }
  0xcb   : > { %2285 = vmatprep.subr.bf16.mxu1 %v3320_v11  ;;  %v3405_v11 = vld [vmem:[%s3561_s28 + $0x688] ss:$16 sps:$4 sm:$0xff]   ;;  %v3413_v12 = vld [vmem:[%s3561_s28 + $0x66c] ss:$16 sps:$4 sm:$0xff]  }
  0xcd   : > { %2311 = vmatpush1.bf16.msra.mxu0 %v3321_v14  ;;  %v3411_v14 = vld [vmem:[%s3561_s28 + $0x668] ss:$16 sps:$4 sm:$0xff]  }
  0xce   : > { %2286 = vmatpush2.bf16.msra.mxu1 %v3318_v13  ;;  %2312 = vmatprep.subr.bf16.mxu0 %v3329_v16  ;;  %v3408_v13 = vld [vmem:[%s3561_s28 + $0x568] ss:$16 sps:$4 sm:$0xff]   ;;  %v3419_v16 = vld [vmem:[%s3561_s28 + $0x64c] ss:$16 sps:$4 sm:$0xff]  }
  0xcf   : > { %2287 = vmatprep.subr.bf16.mxu1 %v3326_v15  ;;  %v3416_v15 = vld [vmem:[%s3561_s28 + $0x54c] ss:$16 sps:$4 sm:$0xff]  }
  0xd1   : > { %2313 = vmatpush1.bf16.msra.mxu0 %v3327_v20  ;;  %v3417_v20 = vld [vmem:[%s3561_s28 + $0x648] ss:$16 sps:$4 sm:$0xff]  }
  0xd2   : > { %2288 = vmatpush2.bf16.msra.mxu1 %v3324_v19  ;;  %2314 = vmatprep.subr.bf16.mxu0 %v3335_v22  ;;  %v3414_v19 = vld [vmem:[%s3561_s28 + $0x548] ss:$16 sps:$4 sm:$0xff]   ;;  %v3425_v22 = vld [vmem:[%s3561_s28 + $0x62c] ss:$16 sps:$4 sm:$0xff]  }
  0xd3   : > { %2289 = vmatprep.subr.bf16.mxu1 %v3332_v21  ;;  %v3422_v21 = vld [vmem:[%s3561_s28 + $0x52c] ss:$16 sps:$4 sm:$0xff]  }
  0xd5   : > { %2315 = vmatpush1.bf16.msra.mxu0 %v3333_v24  ;;  %v3423_v24 = vld [vmem:[%s3561_s28 + $0x628] ss:$16 sps:$4 sm:$0xff]  }
  0xd6   : > { %2290 = vmatpush2.bf16.msra.mxu1 %v3330_v23  ;;  %2316 = vmatprep.subr.bf16.mxu0 %v3338_v25  ;;  %v3420_v23 = vld [vmem:[%s3561_s28 + $0x528] ss:$16 sps:$4 sm:$0xff]   ;;  %v3428_v25 = vld [vmem:[%s3561_s28 + $0x50c] ss:$16 sps:$4 sm:$0xff]  }
  0xd7   : > { %2341 = vmatprep.subr.bf16.mxu1 %v3341_v26  ;;  %v3431_v26 = vld [vmem:[%s3561_s28 + $0x60c] ss:$16 sps:$4 sm:$0xff]  }
  0xd9   : > { %2292 = vmatmul.mubr.bf16.vlgmr.msra.gmra.mxu1 %v3638_v7  ;;  %2317 = vmatpush2.bf16.msra.mxu0 %v3336_v28  ;;  %v3351_v7 = vld [vmem:[%s3561_s28 + $0x4a8] ss:$16 sps:$4 sm:$0xff]  }
  0xda   : > { %2342 = vmatpush1.bf16.msra.mxu1 %v3339_v29  ;;  %2318 = vmatprep.subr.bf16.mxu0 %v3344_v30  ;;  %v3426_v28 = vld [vmem:[%s3561_s28 + $0x508] ss:$16 sps:$4 sm:$0xff]   ;;  %v3434_v30 = vld [vmem:[%s3561_s28 + $0x7ec] ss:$16 sps:$4 sm:$0xff]  }
  0xdb   : > { %2343 = vmatprep.subr.bf16.mxu1 %v3347_v31  ;;  %2373 = vmatprep.mubr.bf16.mxu1 %v3678_v37  ;;  %v3362_v37 = vld [vmem:[%s3561_s28 + $0x36c] ss:$16 sps:$4 sm:$0xff]   ;;  %v3429_v29 = vld [vmem:[%s3561_s28 + $0x608] ss:$16 sps:$4 sm:$0xff]  }
  0xdc   : > { %v3437_v31 = vld [vmem:[%s3561_s28 + $0x8ec] ss:$16 sps:$4 sm:$0xff]  }
  0xdd   : > { %2319 = vmatpush2.bf16.msra.mxu0 %v3342_v32  ;;  %v3432_v32 = vld [vmem:[%s3561_s28 + $0x7e8] ss:$16 sps:$4 sm:$0xff]  }
  0xde   : > { %2344 = vmatpush1.bf16.msra.mxu1 %v3345_v33  ;;  %2320 = vmatprep.subr.bf16.mxu0 %v3350_v48  ;;  %v3435_v33 = vld [vmem:[%s3561_s28 + $0x8e8] ss:$16 sps:$4 sm:$0xff]   ;;  %v3440_v48 = vld [vmem:[%s3561_s28 + $0x7cc] ss:$16 sps:$4 sm:$0xff]  }
  0xdf   : > { %2345 = vmatprep.subr.bf16.mxu1 %v3353_v34  ;;  %v3443_v34 = vld [vmem:[%s3561_s28 + $0x8cc] ss:$16 sps:$4 sm:$0xff]  }
  0xe1   : > { %2321 = vmatpush2.bf16.msra.mxu0 %v3348_v35 }
  0xe2   : > { %2346 = vmatpush1.bf16.msra.mxu1 %v3351_v7  ;;  %2322 = vmatprep.subr.bf16.mxu0 %v3356_v36 }
  0xe3   : > { %2347 = vmatprep.subr.bf16.mxu1 %v3359_v39  ;;  %v3438_v39 = vld [vmem:[%s3561_s28 + $0x7c8] ss:$16 sps:$4 sm:$0xff]  }
  0xe5   : > { %2323 = vmatpush2.bf16.msra.mxu0 %v3354_v40  ;;  %v3441_v40 = vld [vmem:[%s3561_s28 + $0x8c8] ss:$16 sps:$4 sm:$0xff]  }
  0xe6   : > { %2348 = vmatpush1.bf16.msra.mxu1 %v3357_v41  ;;  %2324 = vmatprep.subr.bf16.mxu0 %v3362_v37 }
  0xe7   : > { %2349 = vmatprep.subr.bf16.mxu1 %v3365_v42  ;;  %v3446_v42 = vld [vmem:[%s3561_s28 + $0x7ac] ss:$16 sps:$4 sm:$0xff]  }
  0xe9   : > { %2325 = vmatpush2.bf16.msra.mxu0 %v3360_v43  ;;  %v3449_v43 = vld [vmem:[%s3561_s28 + $0x8ac] ss:$16 sps:$4 sm:$0xff]  }
  0xea   : > { %2350 = vmatpush1.bf16.msra.mxu1 %v3363_v44  ;;  %2326 = vmatprep.subr.bf16.mxu0 %v3368_v45 }
  0xeb   : > { %2351 = vmatprep.subr.bf16.mxu1 %v3371_v46  ;;  %v3444_v46 = vld [vmem:[%s3561_s28 + $0x7a8] ss:$16 sps:$4 sm:$0xff]  }
  0xed   : > { %2327 = vmatpush2.bf16.msra.mxu0 %v3366_v47  ;;  %v3447_v47 = vld [vmem:[%s3561_s28 + $0x8a8] ss:$16 sps:$4 sm:$0xff]  }
  0xee   : > { %2352 = vmatpush1.bf16.msra.mxu1 %v3369_v49  ;;  %2328 = vmatprep.subr.bf16.mxu0 %v3374_v50 }
  0xef   : > { %2353 = vmatprep.subr.bf16.mxu1 %v3377_v51  ;;  %v3452_v51 = vld [vmem:[%s3561_s28 + $0x78c] ss:$16 sps:$4 sm:$0xff]  }
  0xf1   : > { %2329 = vmatpush2.bf16.msra.mxu0 %v3372_v53  ;;  %v3455_v53 = vld [vmem:[%s3561_s28 + $0x88c] ss:$16 sps:$4 sm:$0xff]  }
  0xf2   : > { %2354 = vmatpush1.bf16.msra.mxu1 %v3375_v54  ;;  %2330 = vmatprep.subr.bf16.mxu0 %v3380_v56  ;;  %v3453_v54 = vld [vmem:[%s3561_s28 + $0x888] ss:$16 sps:$4 sm:$0xff]   ;;  %v3458_v56 = vld [vmem:[%s3561_s28 + $0x76c] ss:$16 sps:$4 sm:$0xff]  }
  0xf3   : > { %2355 = vmatprep.subr.bf16.mxu1 %v3383_v57  ;;  %v3461_v57 = vld [vmem:[%s3561_s28 + $0x86c] ss:$16 sps:$4 sm:$0xff]  }
  0xf5   : > { %2331 = vmatpush2.bf16.msra.mxu0 %v3378_v58  ;;  %v3456_v58 = vld [vmem:[%s3561_s28 + $0x768] ss:$16 sps:$4 sm:$0xff]  }
  0xf6   : > { %2356 = vmatpush1.bf16.msra.mxu1 %v3381_v59  ;;  %2382 = vmatprep.subr.bf16.mxu0 %v3389_v61  ;;  %v3459_v59 = vld [vmem:[%s3561_s28 + $0x868] ss:$16 sps:$4 sm:$0xff]   ;;  %v3467_v61 = vld [vmem:[%s3561_s28 + $0x84c] ss:$16 sps:$4 sm:$0xff]  }
  0xf7   : > { %2357 = vmatprep.subr.bf16.mxu1 %v3386_v60  ;;  %v3464_v60 = vld [vmem:[%s3561_s28 + $0x74c] ss:$16 sps:$4 sm:$0xff]  }
  0xf8   : > { %2333 = vmatmul.mubr.bf16.vlgmr.msra.gmra.mxu0 %v3640_v8  ;;  %v3399_v8 = vld [vmem:[%s3561_s28 + $0x6a8] ss:$16 sps:$4 sm:$0xff]  }
  0xf9   : > { %2383 = vmatpush1.bf16.msra.mxu0 %v3387_v63  ;;  %2414 = vmatprep.mubr.bf16.mxu0 %v3682_v38  ;;  %v3410_v38 = vld [vmem:[%s3561_s28 + $0x56c] ss:$16 sps:$4 sm:$0xff]   ;;  %v3465_v63 = vld [vmem:[%s3561_s28 + $0x848] ss:$16 sps:$4 sm:$0xff]  }
  0xfa   : > { %2358 = vmatpush2.bf16.msra.mxu1 %v3384_v62  ;;  %2384 = vmatprep.subr.bf16.mxu0 %v3395_v1  ;;  %v3462_v62 = vld [vmem:[%s3561_s28 + $0x748] ss:$16 sps:$4 sm:$0xff]   ;;  %v3473_v1 = vld [vmem:[%s3561_s28 + $0x82c] ss:$16 sps:$4 sm:$0xff]  }
  0xfb   : > { %2359 = vmatprep.subr.bf16.mxu1 %v3392_v0  ;;  %v3470_v0 = vld [vmem:[%s3561_s28 + $0x72c] ss:$16 sps:$4 sm:$0xff]  }
  0xfd   : > { %2385 = vmatpush1.bf16.msra.mxu0 %v3393_v3  ;;  %v3471_v3 = vld [vmem:[%s3561_s28 + $0x828] ss:$16 sps:$4 sm:$0xff]  }
  0xfe   : > { %2360 = vmatpush2.bf16.msra.mxu1 %v3390_v2  ;;  %2386 = vmatprep.subr.bf16.mxu0 %v3401_v5  ;;  %v3468_v2 = vld [vmem:[%s3561_s28 + $0x728] ss:$16 sps:$4 sm:$0xff]   ;;  %v3479_v5 = vld [vmem:[%s3561_s28 + $0x80c] ss:$16 sps:$4 sm:$0xff]  }
  0xff   : > { %2361 = vmatprep.subr.bf16.mxu1 %v3398_v4  ;;  %v3476_v4 = vld [vmem:[%s3561_s28 + $0x70c] ss:$16 sps:$4 sm:$0xff]  }
 0x101   : > { %2387 = vmatpush1.bf16.msra.mxu0 %v3399_v8  ;;  %v3477_v8 = vld [vmem:[%s3561_s28 + $0x808] ss:$16 sps:$4 sm:$0xff]  }
 0x102   : > { %2362 = vmatpush2.bf16.msra.mxu1 %v3396_v52  ;;  %2388 = vmatprep.subr.bf16.mxu0 %v3407_v9  ;;  %v3474_v52 = vld [vmem:[%s3561_s28 + $0x708] ss:$16 sps:$4 sm:$0xff]  }
 0x103   : > { %2363 = vmatprep.subr.bf16.mxu1 %v3404_v6 }
 0x105   : > { %2389 = vmatpush1.bf16.msra.mxu0 %v3405_v11 }
 0x106   : > { %2364 = vmatpush2.bf16.msra.mxu1 %v3402_v10  ;;  %2390 = vmatprep.subr.bf16.mxu0 %v3413_v12 }
 0x107   : > { %2365 = vmatprep.subr.bf16.mxu1 %v3410_v38 }
 0x109   : > { %2391 = vmatpush1.bf16.msra.mxu0 %v3411_v14 }
 0x10a   : > { %2366 = vmatpush2.bf16.msra.mxu1 %v3408_v13  ;;  %2392 = vmatprep.subr.bf16.mxu0 %v3419_v16 }
 0x10b   : > { %2367 = vmatprep.subr.bf16.mxu1 %v3416_v15 }
 0x10d   : > { %2393 = vmatpush1.bf16.msra.mxu0 %v3417_v20  ;;  %v285_v20 = vld [vmem:[#allocation2 + $0x10] sm:$0xff] }
 0x10e   : > { %2368 = vmatpush2.bf16.msra.mxu1 %v3414_v19  ;;  %2394 = vmatprep.subr.bf16.mxu0 %v3425_v22 }
 0x10f   : > { %2369 = vmatprep.subr.bf16.mxu1 %v3422_v21 }
 0x111   : > { %2395 = vmatpush1.bf16.msra.mxu0 %v3423_v24 }
 0x112   : > { %2370 = vmatpush2.bf16.msra.mxu1 %v3420_v23  ;;  %2396 = vmatprep.subr.bf16.mxu0 %v3431_v26 }
 0x113   : > { %2371 = vmatprep.subr.bf16.mxu1 %v3428_v25 }
 0x115   : > { %2397 = vmatpush1.bf16.msra.mxu0 %v3429_v29 }
 0x116   : > { %2372 = vmatpush2.bf16.msra.mxu1 %v3426_v28  ;;  %2398 = vmatprep.subr.bf16.mxu0 %v3434_v30 }
 0x117   : > { %2423 = vmatprep.subr.bf16.mxu1 %v3437_v31 }
 0x118   : > { %v2088_v35 = vpop.f32.mrf.mxu0 }
 0x119   : > { %v2129_v7 = vpop.f32.mrf.mxu1  ;;  %2374 = vmatmul.mubr.bf16.vlgmr.msra.gmra.mxu1 %v3726_v17  ;;  %2399 = vmatpush2.bf16.msra.mxu0 %v3432_v32 }
 0x11a   : > { %v3878_v36 = vadd.f32 %v2129_v7, %v2088_v35  ;;  %2424 = vmatpush1.bf16.msra.mxu1 %v3435_v33  ;;  %v2090_v41 = vpop.f32.mrf.mxu0  ;;  %2400 = vmatprep.subr.bf16.mxu0 %v3440_v48 }
 0x11b   : > { %v2131_v37 = vpop.f32.mrf.mxu1  ;;  %2425 = vmatprep.subr.bf16.mxu1 %v3443_v34  ;;  %2455 = vmatprep.mubr.bf16.mxu1 %v3505_v27  ;;  %v3450_v27 = vld [vmem:[%s3561_s28 + $0x788] ss:$16 sps:$4 sm:$0xff]  }
 0x11c   : > { %v3884_v44 = vadd.f32 %v2131_v37, %v2090_v41  ;;  %v2092_v17 = vpop.f32.mrf.mxu0 }
 0x11d   : > { %v2133_v45 = vpop.f32.mrf.mxu1  ;;  %2401 = vmatpush2.bf16.msra.mxu0 %v3438_v39 }
 0x11e   : > { %2426 = vmatpush1.bf16.msra.mxu1 %v3441_v40  ;;  %v2093_v49 = vpop.f32.mrf.mxu0  ;;  %2402 = vmatprep.subr.bf16.mxu0 %v3446_v42 }
 0x11f   : > { %v2134_v50 = vpop.f32.mrf.mxu1  ;;  %2427 = vmatprep.subr.bf16.mxu1 %v3449_v43 }
 0x121   : > { %2403 = vmatpush2.bf16.msra.mxu0 %v3444_v46 }
 0x122   : > { %2428 = vmatpush1.bf16.msra.mxu1 %v3447_v47  ;;  %2404 = vmatprep.subr.bf16.mxu0 %v3452_v51  ;;  %v287_v47 = vld [vmem:[#allocation2 + $0x18] sm:$0xff] }
 0x123   : > { %2429 = vmatprep.subr.bf16.mxu1 %v3455_v53 }
 0x125   : > { %2405 = vmatpush2.bf16.msra.mxu0 %v3450_v27  ;;  %v288_v27 = vld [vmem:[#allocation2 + $0x8] sm:$0xff] }
 0x126   : > { %2430 = vmatpush1.bf16.msra.mxu1 %v3453_v54  ;;  %2406 = vmatprep.subr.bf16.mxu0 %v3458_v56 }
 0x127   : > { %2431 = vmatprep.subr.bf16.mxu1 %v3461_v57 }
 0x129   : > { %2407 = vmatpush2.bf16.msra.mxu0 %v3456_v58 }
 0x12a   : > { %2432 = vmatpush1.bf16.msra.mxu1 %v3459_v59  ;;  %2408 = vmatprep.subr.bf16.mxu0 %v3464_v60 }
 0x12b   : > { %2433 = vmatprep.subr.bf16.mxu1 %v3467_v61 }
 0x12d   : > { %2409 = vmatpush2.bf16.msra.mxu0 %v3462_v62 }
 0x12e   : > { %2434 = vmatpush1.bf16.msra.mxu1 %v3465_v63  ;;  %2410 = vmatprep.subr.bf16.mxu0 %v3470_v0 }
 0x12f   : > { %2435 = vmatprep.subr.bf16.mxu1 %v3473_v1 }
 0x131   : > { %2411 = vmatpush2.bf16.msra.mxu0 %v3468_v2 }
 0x132   : > { %2436 = vmatpush1.bf16.msra.mxu1 %v3471_v3  ;;  %2412 = vmatprep.subr.bf16.mxu0 %v3476_v4 }
 0x133   : > { %2437 = vmatprep.subr.bf16.mxu1 %v3479_v5 }
 0x135   : > { %2413 = vmatpush2.bf16.msra.mxu0 %v3474_v52 }
 0x136   : > { %2438 = vmatpush1.bf16.msra.mxu1 %v3477_v8 }
 0x138   : > { %2415 = vmatmul.mubr.bf16.vlgmr.msra.gmra.mxu0 %v3730_v18  ;;  %v286_v18 = vld [vmem:[#allocation2] sm:$0xff] }
 0x139   : > { %2456 = vmatmul.mubr.bf16.vlgmr.msra.gmra.mxu1 %v3769_v55 }
 0x158   : > { %v2170_v6 = vpop.f32.mrf.mxu0 }
 0x159   : > { %v2211_v9 = vpop.f32.mrf.mxu1  ;;  %v2171_v15 = vadd.f32 %v2170_v6, %v3878_v36 }
 0x15a   : > { %v2172_v10 = vpop.f32.mrf.mxu0 }
 0x15b   : > { %v2213_v11 = vpop.f32.mrf.mxu1  ;;  %v2173_v16 = vadd.f32 %v2172_v10, %v3884_v44  ;;  %v2212_v19 = vadd.f32 %v2211_v9, %v2171_v15 }
 0x15c   : > { %v2174_v38 = vpop.f32.mrf.mxu0 }
 0x15d   : > { %v2215_v12 = vpop.f32.mrf.mxu1  ;;  %v2214_v22 = vadd.f32 %v2213_v11, %v2173_v16 }
 0x15e   : > { %v2175_v13 = vpop.f32.mrf.mxu0 }
 0x15f   : > { %v2216_v14 = vpop.f32.mrf.mxu1 }
 0x178   : > { %v2252_v21 = vpop.f32.mrf.mxu0 }
 0x179   : > { %v2253_v23 = vadd.f32 %v2252_v21, %v2212_v19 }
 0x17a   : > { %v2254_v24 = vpop.f32.mrf.mxu0 }
 0x17b   : > { %v2464_v55 = vadd.f32 %v2253_v23, %v285_v20  ;;  %v2255_v25 = vadd.f32 %v2254_v24, %v2214_v22 }
 0x17c   : > { %v2256_v26 = vpop.f32.mrf.mxu0 }
 0x17d   : > { %2468 = vst [vmem:[#allocation2 + $0x10] sm:$0xff] %v2464_v55  ;;  %v2465_v28 = vadd.f32 %v2255_v25, %v286_v18 }
 0x17e   : > { %v2257_v29 = vpop.f32.mrf.mxu0 }
 0x17f   : > { %2469 = vst [vmem:[#allocation2] sm:$0xff] %v2465_v28 }
 0x199   : > { %v2293_v30 = vpop.f32.mrf.mxu1 }
 0x19b   : > { %v2295_v31 = vpop.f32.mrf.mxu1 }
 0x19d   : > { %v2297_v32 = vpop.f32.mrf.mxu1 }
 0x19f   : > { %v2298_v33 = vpop.f32.mrf.mxu1 }
 0x1b8   : > { %v2334_v48 = vpop.f32.mrf.mxu0 }
 0x1b9   : > { %v2335_v37 = vadd.f32 %v2334_v48, %v2293_v30 }
 0x1ba   : > { %v2336_v34 = vpop.f32.mrf.mxu0 }
 0x1bb   : > { %v2337_v42 = vadd.f32 %v2336_v34, %v2295_v31 }
 0x1bc   : > { %v2338_v35 = vpop.f32.mrf.mxu0 }
 0x1be   : > { %v2339_v7 = vpop.f32.mrf.mxu0 }
 0x1d9   : > { %v2375_v36 = vpop.f32.mrf.mxu1 }
 0x1da   : > { %v2376_v43 = vadd.f32 %v2375_v36, %v2335_v37 }
 0x1db   : > { %v2377_v39 = vpop.f32.mrf.mxu1 }
 0x1dc   : > { %v2378_v45 = vadd.f32 %v2377_v39, %v2337_v42 }
 0x1dd   : > { %v2379_v40 = vpop.f32.mrf.mxu1 }
 0x1df   : > { %v2380_v41 = vpop.f32.mrf.mxu1 }
 0x1f8   : > { %v2416_v44 = vpop.f32.mrf.mxu0 }
 0x1f9   : > { %v2457_v17 = vpop.f32.mrf.mxu1  ;;  %v2417_v46 = vadd.f32 %v2416_v44, %v2376_v43 }
 0x1fa   : > { %v2418_v49 = vpop.f32.mrf.mxu0 }
 0x1fb   : > { %v2459_v50 = vpop.f32.mrf.mxu1  ;;  %v2458_v51 = vadd.f32 %v2457_v17, %v2417_v46  ;;  %v2419_v53 = vadd.f32 %v2418_v49, %v2378_v45 }
 0x1fc   : > { %v2420_v54 = vpop.f32.mrf.mxu0 }
 0x1fd   : > { %v2461_v56 = vpop.f32.mrf.mxu1  ;;  %v2466_v57 = vadd.f32 %v2458_v51, %v287_v47  ;;  %v2460_v58 = vadd.f32 %v2459_v50, %v2419_v53  ;;  %2475 = sbr.rel (%p3002_p7) target bundleno = 536 (0x218), region = 36 }
 0x1fe   : > { %v2421_v59 = vpop.f32.mrf.mxu0 }
 0x1ff   : > { %v2462_v60 = vpop.f32.mrf.mxu1  ;;  %2470 = vst [vmem:[#allocation2 + $0x18] sm:$0xff] %v2466_v57  ;;  %v2467_v61 = vadd.f32 %v2460_v58, %v288_v27 }
 0x201   : > { %2471 = vst [vmem:[#allocation2 + $0x8] sm:$0xff] %v2467_v61 }
 0x202   : > { %v2476_v62 = vld [vmem:[#allocation2 + $0x10] sm:$0xff]  ;;  %v2477_v63 = vld [vmem:[#allocation2] sm:$0xff] }
 0x203   : > { %v3011_v1 = vpack.c.bf16 %v2477_v63, %v2476_v62  ;;  %v2498_v3 = vrot.slane %v2476_v62, 4  ;;  %v2504_v4 = vrot.slane %v2477_v63, 4  ;;  %v2522_v6 = vmul.f32 %v2476_v62, %v2476_v62 }
 0x204   : > { %v2523_v9 = vmul.f32 %v2477_v63, %v2477_v63 }
 0x205   : > { %2496 = vst [vmem:[%s3955_s2] sm:$0xff] %v3011_v1  ;;  %v2499_v10 = vadd.f32 %v2498_v3, %v2476_v62  ;;  %v2505_v11 = vadd.f32 %v2504_v4, %v2477_v63  ;;  %v2526_v14 = vrot.slane %v2522_v6, 4 }
 0x206   : > { %v2478_v0 = vld [vmem:[#allocation2 + $0x18] sm:$0xff]  ;;  %v2532_v15 = vrot.slane %v2523_v9, 4 }
 0x207   : > { %v2510_v5 = vrot.slane %v2478_v0, 4  ;;  %v2524_v12 = vmul.f32 %v2478_v0, %v2478_v0  ;;  %v2500_v19 = vrot.slane %v2499_v10, 2  ;;  %v2506_v20 = vrot.slane %v2505_v11, 2 }
 0x208   : > { %v2479_v2 = vld [vmem:[#allocation2 + $0x8] sm:$0xff]  ;;  %v2527_v18 = vadd.f32 %v2526_v14, %v2522_v6  ;;  %v2533_v24 = vadd.f32 %v2532_v15, %v2523_v9 }
 0x209   : > { %v3012_v52 = vpack.c.bf16 %v2479_v2, %v2478_v0  ;;  %v2516_v8 = vrot.slane %v2479_v2, 4  ;;  %v2511_v38 = vadd.f32 %v2510_v5, %v2478_v0  ;;  %v2525_v16 = vmul.f32 %v2479_v2, %v2479_v2 }
 0x20a   : > { %v2538_v22 = vrot.slane %v2524_v12, 4  ;;  %v2501_v25 = vadd.f32 %v2500_v19, %v2499_v10  ;;  %v2507_v26 = vadd.f32 %v2506_v20, %v2505_v11  ;;  %v2528_v31 = vrot.slane %v2527_v18, 2 }
 0x20b   : > { %2497 = vst [vmem:[%s3955_s2 + $0x8] sm:$0xff] %v3012_v52  ;;  %v2517_v13 = vadd.f32 %v2516_v8, %v2479_v2  ;;  %v2512_v21 = vrot.slane %v2511_v38, 2  ;;  %v2544_v55 = vrot.slane %v2525_v16, 4  ;;  %v2534_v32 = vrot.slane %v2533_v24, 2 }
 0x20c   : > { %v2539_v29 = vadd.f32 %v2538_v22, %v2524_v12  ;;  %v2502_v48 = vrot.slane %v2501_v25, 1  ;;  %v2508_v34 = vrot.slane %v2507_v26, 1  ;;  %v2529_v39 = vadd.f32 %v2528_v31, %v2527_v18 }
 0x20d   : > { %v2518_v23 = vrot.slane %v2517_v13, 2  ;;  %v2513_v28 = vadd.f32 %v2512_v21, %v2511_v38  ;;  %v2545_v33 = vadd.f32 %v2544_v55, %v2525_v16  ;;  %v2535_v40 = vadd.f32 %v2534_v32, %v2533_v24 }
 0x20e   : > { %v2540_v7 = vrot.slane %v2539_v29, 2  ;;  %v2503_v37 = vadd.f32 %v2502_v48, %v2501_v25  ;;  %v2509_v42 = vadd.f32 %v2508_v34, %v2507_v26  ;;  %v2530_v45 = vrot.slane %v2529_v39, 1 }
 0x20f   : > { %v2519_v30 = vadd.f32 %v2518_v23, %v2517_v13  ;;  %v2514_v35 = vrot.slane %v2513_v28, 1  ;;  %v2546_v41 = vrot.slane %v2545_v33, 2  ;;  %v2536_v46 = vrot.slane %v2535_v40, 1 }
 0x210   : > { %v2541_v44 = vadd.f32 %v2540_v7, %v2539_v29  ;;  %2550 = vst [vmem:[%s3956_s3] sm:$0xff] %v2503_v37  ;;  %2551 = vst [vmem:[%s3956_s3 + $0x8] sm:$0xff] %v2509_v42  ;;  %v2531_v50 = vadd.f32 %v2530_v45, %v2529_v39 }
 0x211   : > { %v2520_v36 = vrot.slane %v2519_v30, 1  ;;  %v2515_v43 = vadd.f32 %v2514_v35, %v2513_v28  ;;  %v2547_v47 = vadd.f32 %v2546_v41, %v2545_v33  ;;  %v2537_v51 = vadd.f32 %v2536_v46, %v2535_v40 }
 0x212   : > { %v2542_v49 = vrot.slane %v2541_v44, 1  ;;  %2554 = vst [vmem:[%s3957_s4] sm:$0xff] %v2531_v50 }
 0x213   : > { %v2521_v17 = vadd.f32 %v2520_v36, %v2519_v30  ;;  %2552 = vst [vmem:[%s3956_s3 + $0x10] sm:$0xff] %v2515_v43  ;;  %v2548_v53 = vrot.slane %v2547_v47, 1  ;;  %2555 = vst [vmem:[%s3957_s4 + $0x8] sm:$0xff] %v2537_v51 }
 0x214   : > { %v2543_v27 = vadd.f32 %v2542_v49, %v2541_v44 }
 0x215   : > { %2553 = vst [vmem:[%s3956_s3 + $0x18] sm:$0xff] %v2521_v17  ;;  %v2549_v54 = vadd.f32 %v2548_v53, %v2547_v47 }
 0x216   : > { %2556 = vst [vmem:[%s3957_s4 + $0x10] sm:$0xff] %v2543_v27 }
 0x217   : > { %2557 = vst [vmem:[%s3957_s4 + $0x18] sm:$0xff] %v2549_v54 }
 0x218 PF: > { %s15_s17 = sadd.s32 1, %s3502_s17   ;;  %s3958_s15 = smov %s3498_s16 }
 0x219   : > { %p12_p8 = scmp.ge.s32.totalorder %s15_s17, 4   ;;  %s3959_s16 = smov %s3961_s18 }
 0x21b   :  { %14 = sbr.rel (!%p12_p8) target bundleno = 2 (0x2), region = 93 }

// kernel: discriminator_forward.29
= control target key start
LH: loop header
LB: loop body
LE: loop exit
PB: predicated region body
PF: predicated region fallthrough
CT: control target
= control target key end

     0   :  { %s3620_s15 = smov 0   ;;  %s3622_s16 = smov 0   ;;  %s4057_s0 = inlined_call_operand.vmem [shape: bf16[2,4608], index: 0, kind: input, shape index: {}]   ;;  %s4058_s1 = inlined_call_operand.vmem [shape: bf16[4608,512], index: 1, kind: input, shape index: {}]   ;;  %s4059_s2 = inlined_call_operand.vmem [shape: bf16[2,512], index: 2, kind: output, shape index: {0}]   ;;  %s4060_s3 = inlined_call_operand.vmem [shape: f32[1,8,512], index: 3, kind: output, shape index: {1}]   ;;  %s4061_s4 = inlined_call_operand.vmem [shape: f32[1,8,512], index: 4, kind: output, shape index: {2}]  }
   0x1   :  { %s3624_s17 = smov 0  }
   0x2 LB: > { %s24_s18 = sadd.s32 1, %s3585_s16  ;;  %p2802_p0 = scmp.ge.s32.totalorder %s3589_s17, 1  ;;  %s3589_s17 = sphi %s3624_s17, %s15_s17   ;;  %s3585_s16 = sphi %s3622_s16, %s4063_s16   ;;  %s3581_s15 = sphi %s3620_s15, %s4062_s15  }
   0x3   : > { %p25_p1 = scmp.ge.s32.totalorder %s24_s18, 4  ;;  %p197_p2 = scmp.lt.s32.totalorder %s3589_s17, 5 }
   0x5   : > { %s4065_s18 = smov (%p25_p1, %s24_s18), 0  ;;  %p198_p3 = pnand %p2802_p0, %p197_p2 }
   0x6   : > { %s241_s19 = smul.u32 (!%p198_p3), 9, %s3581_s15  ;;  %p2805_p6 = scmp.ne.s32.totalorder (!%p198_p3), %s3581_s15, 0 }
   0x7   : > { %201 = sbr.rel (%p198_p3) target bundleno = 553 (0x229), region = 28 }
   0x8   : > { %s250_s20 = smul.u32 (!%p198_p3), 144, %s3581_s15  ;;  %p244_p4 = scmp.lt.s32.totalorder (!%p198_p3), %s241_s19, 35 }
   0xa   : > { %p251_p5 = scmp.lt.s32.totalorder (!%p198_p3), %s250_s20, 575 }
   0xc   : > { %s4067_s19 = smov (!%p244_p4, %s241_s19), 35  ;;  %s4069_s20 = smov (!%p251_p5, %s250_s20), 575 }
   0xd   : > { %s3645_s23 = scalar_lea.vmem %s4057_s0, %s4067_s19  ;;  %s3104_s24 = sshll.u32 %s4069_s20, 4 }
   0xe   : > { %s3650_s27 = scalar_lea.vmem %s4058_s1, %s3104_s24  ;;  %275 = sbr.rel (%p2805_p6) target bundleno = 21 (0x15), region = 32 }
  0x13   : > { %v3591_v0 = vmov 0.0  }
  0x14   : > { %276 = vst [vmem:[#allocation2] sm:$0xff] %v3591_v0 }
  0x15 PF: > { %v3133_v1 = vld [vmem:[%s3650_s27 + $0xe4] ss:$16 sps:$4 sm:$0xff]   ;;  %v3137_v3 = vld [vmem:[%s3650_s27 + $0xe0] ss:$16 sps:$4 sm:$0xff]   ;;  %v3592_v37 = vmov 1966171168   ;;  %v574_v39 = vlaneseq }
  0x16   : > { %v3135_v2 = vld [vmem:[%s3650_s27 + $0x2e4] ss:$16 sps:$4 sm:$0xff]   ;;  %2082 = vmatprep.subr.bf16.mxu0 %v3133_v1  ;;  %v3138_v4 = vld [vmem:[%s3650_s27 + $0x2e0] ss:$16 sps:$4 sm:$0xff]   ;;  %v572_v38 = vunpack.c.l.s4 %v3592_v37  ;;  %p3095_p7 = scmp.ne.s32.totalorder %s3581_s15, 3 }
  0x17   : > { %2123 = vmatprep.subr.bf16.mxu1 %v3135_v2  ;;  %v3139_v5 = vld [vmem:[%s3650_s27 + $0xc4] ss:$16 sps:$4 sm:$0xff]   ;;  %2083 = vmatpush1.bf16.msra.mxu0 %v3137_v3  ;;  %v3143_v7 = vld [vmem:[%s3650_s27 + $0xc0] ss:$16 sps:$4 sm:$0xff]   ;;  %v3692_v44 = vshrl.u32 %v574_v39, 7 }
  0x18   : > { %2124 = vmatpush1.bf16.msra.mxu1 %v3138_v4  ;;  %v3141_v6 = vld [vmem:[%s3650_s27 + $0x2c4] ss:$16 sps:$4 sm:$0xff]   ;;  %2084 = vmatprep.subr.bf16.mxu0 %v3139_v5  ;;  %v3144_v8 = vld [vmem:[%s3650_s27 + $0x2c0] ss:$16 sps:$4 sm:$0xff]   ;;  %v573_v43 = vunpack.c.0.s8 %v572_v38 }
  0x19   : > { %2125 = vmatprep.subr.bf16.mxu1 %v3141_v6  ;;  %v3145_v9 = vld [vmem:[%s3650_s27 + $0xa4] ss:$16 sps:$4 sm:$0xff]   ;;  %v3149_v11 = vld [vmem:[%s3650_s27 + $0xa0] ss:$16 sps:$4 sm:$0xff]  }
  0x1a   : > { %v3147_v10 = vld [vmem:[%s3650_s27 + $0x2a4] ss:$16 sps:$4 sm:$0xff]   ;;  %v3150_v12 = vld [vmem:[%s3650_s27 + $0x2a0] ss:$16 sps:$4 sm:$0xff]   ;;  %v3700_v50 = vsub.s32 %v573_v43, %v3692_v44 }
  0x1b   : > { %2085 = vmatpush1.bf16.msra.mxu0 %v3143_v7  ;;  %v3151_v13 = vld [vmem:[%s3650_s27 + $0x84] ss:$16 sps:$4 sm:$0xff]   ;;  %v3155_v15 = vld [vmem:[%s3650_s27 + $0x80] ss:$16 sps:$4 sm:$0xff]  }
  0x1c   : > { %2126 = vmatpush1.bf16.msra.mxu1 %v3144_v8  ;;  %2086 = vmatprep.subr.bf16.mxu0 %v3145_v9  ;;  %v3153_v14 = vld [vmem:[%s3650_s27 + $0x284] ss:$16 sps:$4 sm:$0xff]   ;;  %v3156_v16 = vld [vmem:[%s3650_s27 + $0x280] ss:$16 sps:$4 sm:$0xff]  }
  0x1d   : > { %2127 = vmatprep.subr.bf16.mxu1 %v3147_v10  ;;  %v3157_v17 = vld [vmem:[%s3650_s27 + $0x64] ss:$16 sps:$4 sm:$0xff]   ;;  %v3161_v19 = vld [vmem:[%s3650_s27 + $0x60] ss:$16 sps:$4 sm:$0xff]  }
  0x1e   : > { %v3159_v18 = vld [vmem:[%s3650_s27 + $0x264] ss:$16 sps:$4 sm:$0xff]   ;;  %v3162_v20 = vld [vmem:[%s3650_s27 + $0x260] ss:$16 sps:$4 sm:$0xff]  }
  0x1f   : > { %2087 = vmatpush1.bf16.msra.mxu0 %v3149_v11  ;;  %v3163_v21 = vld [vmem:[%s3650_s27 + $0x44] ss:$16 sps:$4 sm:$0xff]   ;;  %v3167_v23 = vld [vmem:[%s3650_s27 + $0x40] ss:$16 sps:$4 sm:$0xff]  }
  0x20   : > { %2128 = vmatpush1.bf16.msra.mxu1 %v3150_v12  ;;  %2088 = vmatprep.subr.bf16.mxu0 %v3151_v13  ;;  %v3165_v22 = vld [vmem:[%s3650_s27 + $0x244] ss:$16 sps:$4 sm:$0xff]   ;;  %v3168_v24 = vld [vmem:[%s3650_s27 + $0x240] ss:$16 sps:$4 sm:$0xff]  }
  0x21   : > { %2129 = vmatprep.subr.bf16.mxu1 %v3153_v14  ;;  %v3169_v25 = vld [vmem:[%s3650_s27 + $0x24] ss:$16 sps:$4 sm:$0xff]   ;;  %v3173_v27 = vld [vmem:[%s3650_s27 + $0x20] ss:$16 sps:$4 sm:$0xff]  }
  0x22   : > { %v3171_v26 = vld [vmem:[%s3650_s27 + $0x224] ss:$16 sps:$4 sm:$0xff]   ;;  %v3174_v28 = vld [vmem:[%s3650_s27 + $0x220] ss:$16 sps:$4 sm:$0xff]  }
  0x23   : > { %2089 = vmatpush1.bf16.msra.mxu0 %v3155_v15  ;;  %v3175_v29 = vld [vmem:[%s3650_s27 + $0x4] ss:$16 sps:$4 sm:$0xff]   ;;  %v3179_v31 = vld [vmem:[%s3650_s27] ss:$16 sps:$4 sm:$0xff]  }
  0x24   : > { %2130 = vmatpush1.bf16.msra.mxu1 %v3156_v16  ;;  %2090 = vmatprep.subr.bf16.mxu0 %v3157_v17  ;;  %v3177_v30 = vld [vmem:[%s3650_s27 + $0x204] ss:$16 sps:$4 sm:$0xff]   ;;  %v3180_v32 = vld [vmem:[%s3650_s27 + $0x200] ss:$16 sps:$4 sm:$0xff]  }
  0x25   : > { %2131 = vmatprep.subr.bf16.mxu1 %v3159_v18  ;;  %v3181_v33 = vld [vmem:[%s3650_s27 + $0x1e4] ss:$16 sps:$4 sm:$0xff]   ;;  %v3185_v35 = vld [vmem:[%s3650_s27 + $0x1e0] ss:$16 sps:$4 sm:$0xff]  }
  0x26   : > { %v3183_v34 = vld [vmem:[%s3650_s27 + $0x3e4] ss:$16 sps:$4 sm:$0xff]   ;;  %v3186_v36 = vld [vmem:[%s3650_s27 + $0x3e0] ss:$16 sps:$4 sm:$0xff]  }
  0x27   : > { %2091 = vmatpush1.bf16.msra.mxu0 %v3161_v19  ;;  %v3187_v40 = vld [vmem:[%s3650_s27 + $0x1c4] ss:$16 sps:$4 sm:$0xff]   ;;  %v3191_v42 = vld [vmem:[%s3650_s27 + $0x1c0] ss:$16 sps:$4 sm:$0xff]  }
  0x28   : > { %2132 = vmatpush1.bf16.msra.mxu1 %v3162_v20  ;;  %2092 = vmatprep.subr.bf16.mxu0 %v3163_v21  ;;  %v3189_v41 = vld [vmem:[%s3650_s27 + $0x3c4] ss:$16 sps:$4 sm:$0xff]   ;;  %v3192_v45 = vld [vmem:[%s3650_s27 + $0x3c0] ss:$16 sps:$4 sm:$0xff]  }
  0x29   : > { %2133 = vmatprep.subr.bf16.mxu1 %v3165_v22  ;;  %v3193_v46 = vld [vmem:[%s3650_s27 + $0x1a4] ss:$16 sps:$4 sm:$0xff]   ;;  %v3197_v48 = vld [vmem:[%s3650_s27 + $0x1a0] ss:$16 sps:$4 sm:$0xff]  }
  0x2a   : > { %v3195_v47 = vld [vmem:[%s3650_s27 + $0x3a4] ss:$16 sps:$4 sm:$0xff]   ;;  %v3198_v49 = vld [vmem:[%s3650_s27 + $0x3a0] ss:$16 sps:$4 sm:$0xff]  }
  0x2b   : > { %2093 = vmatpush1.bf16.msra.mxu0 %v3167_v23  ;;  %v3199_v51 = vld [vmem:[%s3650_s27 + $0x184] ss:$16 sps:$4 sm:$0xff]   ;;  %v3203_v54 = vld [vmem:[%s3650_s27 + $0x180] ss:$16 sps:$4 sm:$0xff]  }
  0x2c   : > { %2134 = vmatpush1.bf16.msra.mxu1 %v3168_v24  ;;  %2094 = vmatprep.subr.bf16.mxu0 %v3169_v25  ;;  %v3201_v52 = vld [vmem:[%s3650_s27 + $0x384] ss:$16 sps:$4 sm:$0xff]   ;;  %v3204_v56 = vld [vmem:[%s3650_s27 + $0x380] ss:$16 sps:$4 sm:$0xff]  }
  0x2d   : > { %2135 = vmatprep.subr.bf16.mxu1 %v3171_v26  ;;  %v278_v53 = vld [vmem:[%s3645_s23] sm:$0xff] }
  0x2e   : > { %v577_v55 = vrot.slane %v278_v53, %v3700_v50  ;;  %v3205_v57 = vld [vmem:[%s3650_s27 + $0x164] ss:$16 sps:$4 sm:$0xff]   ;;  %v3209_v60 = vld [vmem:[%s3650_s27 + $0x160] ss:$16 sps:$4 sm:$0xff]   ;;  %v570_v2 = vcombine.high %v278_v53, %v278_v53 }
  0x2f   : > { %2095 = vmatpush1.bf16.msra.mxu0 %v3173_v27  ;;  %v3207_v58 = vld [vmem:[%s3650_s27 + $0x364] ss:$16 sps:$4 sm:$0xff]   ;;  %v3210_v62 = vld [vmem:[%s3650_s27 + $0x360] ss:$16 sps:$4 sm:$0xff]  }
  0x30   : > { %2136 = vmatpush1.bf16.msra.mxu1 %v3174_v28  ;;  %2096 = vmatprep.subr.bf16.mxu0 %v3175_v29  ;;  %v585_v59 = vcombine.high %v577_v55, %v577_v55  ;;  %v3211_v63 = vld [vmem:[%s3650_s27 + $0x144] ss:$16 sps:$4 sm:$0xff]   ;;  %v3215_v3 = vld [vmem:[%s3650_s27 + $0x140] ss:$16 sps:$4 sm:$0xff]   ;;  %v3728_v7 = vrot.slane %v570_v2, %v3700_v50  ;;  %v3738_v14 = vrot.slane %v577_v55, %v3700_v50 }
  0x31   : > { %2137 = vmatprep.subr.bf16.mxu1 %v3177_v30  ;;  %v3213_v0 = vld [vmem:[%s3650_s27 + $0x344] ss:$16 sps:$4 sm:$0xff]   ;;  %v3216_v4 = vld [vmem:[%s3650_s27 + $0x340] ss:$16 sps:$4 sm:$0xff]  }
  0x32   : > { %v3712_v61 = vrot.slane %v585_v59, %v3700_v50  ;;  %v3217_v5 = vld [vmem:[%s3650_s27 + $0x124] ss:$16 sps:$4 sm:$0xff]   ;;  %v3221_v8 = vld [vmem:[%s3650_s27 + $0x120] ss:$16 sps:$4 sm:$0xff]   ;;  %v586_v12 = vcombine.high %v3728_v7, %v3728_v7  ;;  %v3748_v19 = vcombine.high %v3738_v14, %v3738_v14 }
  0x33   : > { %2097 = vmatpush1.bf16.msra.mxu0 %v3179_v31  ;;  %v3219_v6 = vld [vmem:[%s3650_s27 + $0x324] ss:$16 sps:$4 sm:$0xff]   ;;  %v3222_v9 = vld [vmem:[%s3650_s27 + $0x320] ss:$16 sps:$4 sm:$0xff]  }
  0x34   : > { %2138 = vmatpush1.bf16.msra.mxu1 %v3180_v32  ;;  %2098 = vmatprep.subr.bf16.mxu0 %v3181_v33  ;;  %v3719_v1 = vcombine.high %v3712_v61, %v3712_v61  ;;  %v3223_v10 = vld [vmem:[%s3650_s27 + $0x104] ss:$16 sps:$4 sm:$0xff]   ;;  %v3227_v13 = vld [vmem:[%s3650_s27 + $0x100] ss:$16 sps:$4 sm:$0xff]   ;;  %v3744_v18 = vrot.slane %v586_v12, %v3700_v50 }
  0x35   : > { %2139 = vmatprep.subr.bf16.mxu1 %v3183_v34  ;;  %2114 = vmatprep.mubr.bf16.mxu0 %v3712_v61  ;;  %v3225_v11 = vld [vmem:[%s3650_s27 + $0x304] ss:$16 sps:$4 sm:$0xff]   ;;  %v3228_v15 = vld [vmem:[%s3650_s27 + $0x300] ss:$16 sps:$4 sm:$0xff]  }
  0x36   : > { %2155 = vmatprep.mubr.bf16.mxu1 %v3719_v1  ;;  %v3231_v16 = vld [vmem:[%s3650_s27 + $0x4e4] ss:$16 sps:$4 sm:$0xff]   ;;  %v3229_v20 = vld [vmem:[%s3650_s27 + $0x4e0] ss:$16 sps:$4 sm:$0xff]   ;;  %v3756_v24 = vcombine.high %v3744_v18, %v3744_v18 }
  0x37   : > { %2099 = vmatpush2.bf16.msra.mxu0 %v3185_v35  ;;  %v3234_v17 = vld [vmem:[%s3650_s27 + $0x6e4] ss:$16 sps:$4 sm:$0xff]   ;;  %v3232_v21 = vld [vmem:[%s3650_s27 + $0x6e0] ss:$16 sps:$4 sm:$0xff]  }
  0x38   : > { %2140 = vmatpush2.bf16.msra.mxu1 %v3186_v36  ;;  %2100 = vmatprep.subr.bf16.mxu0 %v3187_v40  ;;  %v3237_v22 = vld [vmem:[%s3650_s27 + $0x4c4] ss:$16 sps:$4 sm:$0xff]   ;;  %v3235_v25 = vld [vmem:[%s3650_s27 + $0x4c0] ss:$16 sps:$4 sm:$0xff]  }
  0x39   : > { %2141 = vmatprep.subr.bf16.mxu1 %v3189_v41  ;;  %v3240_v23 = vld [vmem:[%s3650_s27 + $0x6c4] ss:$16 sps:$4 sm:$0xff]   ;;  %v3238_v26 = vld [vmem:[%s3650_s27 + $0x6c0] ss:$16 sps:$4 sm:$0xff]  }
  0x3a   : > { %v3243_v27 = vld [vmem:[%s3650_s27 + $0x4a4] ss:$16 sps:$4 sm:$0xff]   ;;  %v3241_v29 = vld [vmem:[%s3650_s27 + $0x4a0] ss:$16 sps:$4 sm:$0xff]  }
  0x3b   : > { %2101 = vmatpush2.bf16.msra.mxu0 %v3191_v42  ;;  %v3246_v28 = vld [vmem:[%s3650_s27 + $0x6a4] ss:$16 sps:$4 sm:$0xff]   ;;  %v3244_v30 = vld [vmem:[%s3650_s27 + $0x6a0] ss:$16 sps:$4 sm:$0xff]  }
  0x3c   : > { %2142 = vmatpush2.bf16.msra.mxu1 %v3192_v45  ;;  %2102 = vmatprep.subr.bf16.mxu0 %v3193_v46  ;;  %v3249_v31 = vld [vmem:[%s3650_s27 + $0x484] ss:$16 sps:$4 sm:$0xff]   ;;  %v3247_v33 = vld [vmem:[%s3650_s27 + $0x480] ss:$16 sps:$4 sm:$0xff]  }
  0x3d   : > { %2143 = vmatprep.subr.bf16.mxu1 %v3195_v47  ;;  %v3252_v32 = vld [vmem:[%s3650_s27 + $0x684] ss:$16 sps:$4 sm:$0xff]   ;;  %v3250_v34 = vld [vmem:[%s3650_s27 + $0x680] ss:$16 sps:$4 sm:$0xff]  }
  0x3e   : > { %v3255_v35 = vld [vmem:[%s3650_s27 + $0x464] ss:$16 sps:$4 sm:$0xff]   ;;  %v3253_v37 = vld [vmem:[%s3650_s27 + $0x460] ss:$16 sps:$4 sm:$0xff]  }
  0x3f   : > { %2103 = vmatpush2.bf16.msra.mxu0 %v3197_v48  ;;  %v3258_v36 = vld [vmem:[%s3650_s27 + $0x664] ss:$16 sps:$4 sm:$0xff]   ;;  %v3256_v38 = vld [vmem:[%s3650_s27 + $0x660] ss:$16 sps:$4 sm:$0xff]  }
  0x40   : > { %2144 = vmatpush2.bf16.msra.mxu1 %v3198_v49  ;;  %2104 = vmatprep.subr.bf16.mxu0 %v3199_v51  ;;  %v3261_v39 = vld [vmem:[%s3650_s27 + $0x444] ss:$16 sps:$4 sm:$0xff]   ;;  %v3259_v41 = vld [vmem:[%s3650_s27 + $0x440] ss:$16 sps:$4 sm:$0xff]  }
  0x41   : > { %2145 = vmatprep.subr.bf16.mxu1 %v3201_v52  ;;  %v3264_v40 = vld [vmem:[%s3650_s27 + $0x644] ss:$16 sps:$4 sm:$0xff]   ;;  %v3262_v42 = vld [vmem:[%s3650_s27 + $0x640] ss:$16 sps:$4 sm:$0xff]  }
  0x42   : > { %v3267_v43 = vld [vmem:[%s3650_s27 + $0x424] ss:$16 sps:$4 sm:$0xff]   ;;  %v3265_v46 = vld [vmem:[%s3650_s27 + $0x420] ss:$16 sps:$4 sm:$0xff]  }
  0x43   : > { %2105 = vmatpush2.bf16.msra.mxu0 %v3203_v54  ;;  %v3270_v45 = vld [vmem:[%s3650_s27 + $0x624] ss:$16 sps:$4 sm:$0xff]   ;;  %v3268_v47 = vld [vmem:[%s3650_s27 + $0x620] ss:$16 sps:$4 sm:$0xff]  }
  0x44   : > { %2146 = vmatpush2.bf16.msra.mxu1 %v3204_v56  ;;  %2106 = vmatprep.subr.bf16.mxu0 %v3205_v57  ;;  %v3273_v48 = vld [vmem:[%s3650_s27 + $0x404] ss:$16 sps:$4 sm:$0xff]   ;;  %v3271_v51 = vld [vmem:[%s3650_s27 + $0x400] ss:$16 sps:$4 sm:$0xff]  }
  0x45   : > { %2147 = vmatprep.subr.bf16.mxu1 %v3207_v58  ;;  %v3276_v49 = vld [vmem:[%s3650_s27 + $0x604] ss:$16 sps:$4 sm:$0xff]   ;;  %v3274_v52 = vld [vmem:[%s3650_s27 + $0x600] ss:$16 sps:$4 sm:$0xff]  }
  0x46   : > { %v3279_v53 = vld [vmem:[%s3650_s27 + $0x5e4] ss:$16 sps:$4 sm:$0xff]   ;;  %v3277_v55 = vld [vmem:[%s3650_s27 + $0x5e0] ss:$16 sps:$4 sm:$0xff]  }
  0x47   : > { %2107 = vmatpush2.bf16.msra.mxu0 %v3209_v60  ;;  %v3282_v54 = vld [vmem:[%s3650_s27 + $0x7e4] ss:$16 sps:$4 sm:$0xff]   ;;  %v3280_v56 = vld [vmem:[%s3650_s27 + $0x7e0] ss:$16 sps:$4 sm:$0xff]  }
  0x48   : > { %2148 = vmatpush2.bf16.msra.mxu1 %v3210_v62  ;;  %2108 = vmatprep.subr.bf16.mxu0 %v3211_v63  ;;  %v3285_v57 = vld [vmem:[%s3650_s27 + $0x5c4] ss:$16 sps:$4 sm:$0xff]   ;;  %v3283_v59 = vld [vmem:[%s3650_s27 + $0x5c0] ss:$16 sps:$4 sm:$0xff]  }
  0x49   : > { %2149 = vmatprep.subr.bf16.mxu1 %v3213_v0  ;;  %v3288_v58 = vld [vmem:[%s3650_s27 + $0x7c4] ss:$16 sps:$4 sm:$0xff]   ;;  %v3286_v60 = vld [vmem:[%s3650_s27 + $0x7c0] ss:$16 sps:$4 sm:$0xff]  }
  0x4a   : > { %v3291_v62 = vld [vmem:[%s3650_s27 + $0x5a4] ss:$16 sps:$4 sm:$0xff]   ;;  %v3289_v0 = vld [vmem:[%s3650_s27 + $0x5a0] ss:$16 sps:$4 sm:$0xff]  }
  0x4b   : > { %2109 = vmatpush2.bf16.msra.mxu0 %v3215_v3  ;;  %v3294_v63 = vld [vmem:[%s3650_s27 + $0x7a4] ss:$16 sps:$4 sm:$0xff]   ;;  %v3292_v2 = vld [vmem:[%s3650_s27 + $0x7a0] ss:$16 sps:$4 sm:$0xff]  }
  0x4c   : > { %2150 = vmatpush2.bf16.msra.mxu1 %v3216_v4  ;;  %2110 = vmatprep.subr.bf16.mxu0 %v3217_v5  ;;  %v3297_v3 = vld [vmem:[%s3650_s27 + $0x584] ss:$16 sps:$4 sm:$0xff]   ;;  %v3295_v5 = vld [vmem:[%s3650_s27 + $0x580] ss:$16 sps:$4 sm:$0xff]  }
  0x4d   : > { %2151 = vmatprep.subr.bf16.mxu1 %v3219_v6  ;;  %v3300_v4 = vld [vmem:[%s3650_s27 + $0x784] ss:$16 sps:$4 sm:$0xff]   ;;  %v3298_v6 = vld [vmem:[%s3650_s27 + $0x780] ss:$16 sps:$4 sm:$0xff]  }
  0x4e   : > { %v3309_v12 = vld [vmem:[%s3650_s27 + $0x544] ss:$16 sps:$4 sm:$0xff]  }
  0x4f   : > { %2111 = vmatpush2.bf16.msra.mxu0 %v3221_v8  ;;  %v3303_v8 = vld [vmem:[%s3650_s27 + $0x564] ss:$16 sps:$4 sm:$0xff]  }
  0x50   : > { %2152 = vmatpush2.bf16.msra.mxu1 %v3222_v9  ;;  %2112 = vmatprep.subr.bf16.mxu0 %v3223_v10  ;;  %v3306_v9 = vld [vmem:[%s3650_s27 + $0x764] ss:$16 sps:$4 sm:$0xff]   ;;  %v3301_v10 = vld [vmem:[%s3650_s27 + $0x560] ss:$16 sps:$4 sm:$0xff]  }
  0x51   : > { %2153 = vmatprep.subr.bf16.mxu1 %v3225_v11  ;;  %v3304_v11 = vld [vmem:[%s3650_s27 + $0x760] ss:$16 sps:$4 sm:$0xff]  }
  0x53   : > { %2113 = vmatpush2.bf16.msra.mxu0 %v3227_v13  ;;  %v3312_v13 = vld [vmem:[%s3650_s27 + $0x744] ss:$16 sps:$4 sm:$0xff]  }
  0x54   : > { %2154 = vmatpush2.bf16.msra.mxu1 %v3228_v15  ;;  %2164 = vmatprep.subr.bf16.mxu0 %v3231_v16  ;;  %v3307_v15 = vld [vmem:[%s3650_s27 + $0x540] ss:$16 sps:$4 sm:$0xff]  }
  0x55   : > { %2205 = vmatprep.subr.bf16.mxu1 %v3234_v17  ;;  %v3310_v16 = vld [vmem:[%s3650_s27 + $0x740] ss:$16 sps:$4 sm:$0xff]   ;;  %v3315_v17 = vld [vmem:[%s3650_s27 + $0x524] ss:$16 sps:$4 sm:$0xff]  }
  0x56   : > { %2115 = vmatmul.mubr.bf16.vlgmr.msra.gmra.mxu0 %v3738_v14 }
  0x57   : > { %2156 = vmatmul.mubr.bf16.vlgmr.msra.gmra.mxu1 %v3748_v19  ;;  %2165 = vmatpush1.bf16.msra.mxu0 %v3229_v20  ;;  %v3318_v20 = vld [vmem:[%s3650_s27 + $0x724] ss:$16 sps:$4 sm:$0xff]  }
  0x58   : > { %2206 = vmatpush1.bf16.msra.mxu1 %v3232_v21  ;;  %2166 = vmatprep.subr.bf16.mxu0 %v3237_v22  ;;  %v3313_v21 = vld [vmem:[%s3650_s27 + $0x520] ss:$16 sps:$4 sm:$0xff]  }
  0x59   : > { %2207 = vmatprep.subr.bf16.mxu1 %v3240_v23  ;;  %2196 = vmatprep.mubr.bf16.mxu0 %v3744_v18  ;;  %v3316_v22 = vld [vmem:[%s3650_s27 + $0x720] ss:$16 sps:$4 sm:$0xff]   ;;  %v3321_v23 = vld [vmem:[%s3650_s27 + $0x504] ss:$16 sps:$4 sm:$0xff]  }
  0x5a   : > { %2237 = vmatprep.mubr.bf16.mxu1 %v3756_v24 }
  0x5b   : > { %2167 = vmatpush1.bf16.msra.mxu0 %v3235_v25  ;;  %v3324_v25 = vld [vmem:[%s3650_s27 + $0x704] ss:$16 sps:$4 sm:$0xff]  }
  0x5c   : > { %2208 = vmatpush1.bf16.msra.mxu1 %v3238_v26  ;;  %2168 = vmatprep.subr.bf16.mxu0 %v3243_v27  ;;  %v3820_v26 = vrot.slane %v3728_v7, %v3700_v50  ;;  %v3319_v27 = vld [vmem:[%s3650_s27 + $0x500] ss:$16 sps:$4 sm:$0xff]  }
  0x5d   : > { %2209 = vmatprep.subr.bf16.mxu1 %v3246_v28  ;;  %v3322_v28 = vld [vmem:[%s3650_s27 + $0x700] ss:$16 sps:$4 sm:$0xff]  }
  0x5e   : > { %v3326_v7 = vld [vmem:[%s3650_s27 + $0x8e0] ss:$16 sps:$4 sm:$0xff]  }
  0x5f   : > { %2169 = vmatpush1.bf16.msra.mxu0 %v3241_v29  ;;  %v3328_v29 = vld [vmem:[%s3650_s27 + $0x8e4] ss:$16 sps:$4 sm:$0xff]  }
  0x60   : > { %2210 = vmatpush1.bf16.msra.mxu1 %v3244_v30  ;;  %2170 = vmatprep.subr.bf16.mxu0 %v3249_v31  ;;  %v3331_v30 = vld [vmem:[%s3650_s27 + $0xec] ss:$16 sps:$4 sm:$0xff]   ;;  %v3828_v31 = vcombine.high %v3820_v26, %v3820_v26 }
  0x61   : > { %2211 = vmatprep.subr.bf16.mxu1 %v3252_v32  ;;  %v3329_v32 = vld [vmem:[%s3650_s27 + $0xe8] ss:$16 sps:$4 sm:$0xff]  }
  0x63   : > { %2171 = vmatpush1.bf16.msra.mxu0 %v3247_v33  ;;  %v3334_v33 = vld [vmem:[%s3650_s27 + $0x8c4] ss:$16 sps:$4 sm:$0xff]  }
  0x64   : > { %2212 = vmatpush1.bf16.msra.mxu1 %v3250_v34  ;;  %2172 = vmatprep.subr.bf16.mxu0 %v3255_v35  ;;  %v3337_v34 = vld [vmem:[%s3650_s27 + $0xcc] ss:$16 sps:$4 sm:$0xff]   ;;  %v3332_v35 = vld [vmem:[%s3650_s27 + $0x8c0] ss:$16 sps:$4 sm:$0xff]  }
  0x65   : > { %2213 = vmatprep.subr.bf16.mxu1 %v3258_v36  ;;  %v3335_v36 = vld [vmem:[%s3650_s27 + $0xc8] ss:$16 sps:$4 sm:$0xff]  }
  0x67   : > { %2173 = vmatpush1.bf16.msra.mxu0 %v3253_v37  ;;  %v3340_v37 = vld [vmem:[%s3650_s27 + $0x8a4] ss:$16 sps:$4 sm:$0xff]  }
  0x68   : > { %2214 = vmatpush1.bf16.msra.mxu1 %v3256_v38  ;;  %2174 = vmatprep.subr.bf16.mxu0 %v3261_v39  ;;  %v3343_v38 = vld [vmem:[%s3650_s27 + $0xac] ss:$16 sps:$4 sm:$0xff]   ;;  %v3593_v39 = vmov 0  }
  0x69   : > { %2215 = vmatprep.subr.bf16.mxu1 %v3264_v40  ;;  %v3338_v40 = vld [vmem:[%s3650_s27 + $0x8a0] ss:$16 sps:$4 sm:$0xff]  }
  0x6b   : > { %2175 = vmatpush1.bf16.msra.mxu0 %v3259_v41  ;;  %v3341_v41 = vld [vmem:[%s3650_s27 + $0xa8] ss:$16 sps:$4 sm:$0xff]  }
  0x6c   : > { %2216 = vmatpush1.bf16.msra.mxu1 %v3262_v42  ;;  %2176 = vmatprep.subr.bf16.mxu0 %v3267_v43  ;;  %v3346_v42 = vld [vmem:[%s3650_s27 + $0x884] ss:$16 sps:$4 sm:$0xff]   ;;  %v3349_v43 = vld [vmem:[%s3650_s27 + $0x8c] ss:$16 sps:$4 sm:$0xff]  }
  0x6d   : > { %2217 = vmatprep.subr.bf16.mxu1 %v3270_v45  ;;  %v3344_v45 = vld [vmem:[%s3650_s27 + $0x880] ss:$16 sps:$4 sm:$0xff]  }
  0x6f   : > { %2177 = vmatpush1.bf16.msra.mxu0 %v3265_v46  ;;  %v3347_v46 = vld [vmem:[%s3650_s27 + $0x88] ss:$16 sps:$4 sm:$0xff]  }
  0x70   : > { %2218 = vmatpush1.bf16.msra.mxu1 %v3268_v47  ;;  %2178 = vmatprep.subr.bf16.mxu0 %v3273_v48  ;;  %v3355_v47 = vld [vmem:[%s3650_s27 + $0x6c] ss:$16 sps:$4 sm:$0xff]   ;;  %v3350_v48 = vld [vmem:[%s3650_s27 + $0x860] ss:$16 sps:$4 sm:$0xff]  }
  0x71   : > { %2219 = vmatprep.subr.bf16.mxu1 %v3276_v49  ;;  %v3353_v49 = vld [vmem:[%s3650_s27 + $0x68] ss:$16 sps:$4 sm:$0xff]  }
  0x73   : > { %2179 = vmatpush1.bf16.msra.mxu0 %v3271_v51  ;;  %v3358_v51 = vld [vmem:[%s3650_s27 + $0x844] ss:$16 sps:$4 sm:$0xff]  }
  0x74   : > { %2220 = vmatpush1.bf16.msra.mxu1 %v3274_v52  ;;  %2180 = vmatprep.subr.bf16.mxu0 %v3279_v53  ;;  %v3361_v52 = vld [vmem:[%s3650_s27 + $0x4c] ss:$16 sps:$4 sm:$0xff]   ;;  %v3356_v53 = vld [vmem:[%s3650_s27 + $0x840] ss:$16 sps:$4 sm:$0xff]  }
  0x75   : > { %2221 = vmatprep.subr.bf16.mxu1 %v3282_v54  ;;  %v3359_v54 = vld [vmem:[%s3650_s27 + $0x48] ss:$16 sps:$4 sm:$0xff]  }
  0x77   : > { %2181 = vmatpush2.bf16.msra.mxu0 %v3277_v55  ;;  %v3364_v55 = vld [vmem:[%s3650_s27 + $0x824] ss:$16 sps:$4 sm:$0xff]  }
  0x78   : > { %2222 = vmatpush2.bf16.msra.mxu1 %v3280_v56  ;;  %2182 = vmatprep.subr.bf16.mxu0 %v3285_v57  ;;  %v3367_v56 = vld [vmem:[%s3650_s27 + $0x2c] ss:$16 sps:$4 sm:$0xff]   ;;  %v3362_v57 = vld [vmem:[%s3650_s27 + $0x820] ss:$16 sps:$4 sm:$0xff]  }
  0x79   : > { %2223 = vmatprep.subr.bf16.mxu1 %v3288_v58  ;;  %v3365_v58 = vld [vmem:[%s3650_s27 + $0x28] ss:$16 sps:$4 sm:$0xff]  }
  0x7b   : > { %2183 = vmatpush2.bf16.msra.mxu0 %v3283_v59  ;;  %v3370_v59 = vld [vmem:[%s3650_s27 + $0x804] ss:$16 sps:$4 sm:$0xff]  }
  0x7c   : > { %2224 = vmatpush2.bf16.msra.mxu1 %v3286_v60  ;;  %2184 = vmatprep.subr.bf16.mxu0 %v3291_v62  ;;  %v3373_v60 = vld [vmem:[%s3650_s27 + $0xc] ss:$16 sps:$4 sm:$0xff]   ;;  %v3368_v62 = vld [vmem:[%s3650_s27 + $0x800] ss:$16 sps:$4 sm:$0xff]  }
  0x7d   : > { %2225 = vmatprep.subr.bf16.mxu1 %v3294_v63  ;;  %v3371_v63 = vld [vmem:[%s3650_s27 + $0x8] ss:$16 sps:$4 sm:$0xff]  }
  0x7f   : > { %2185 = vmatpush2.bf16.msra.mxu0 %v3289_v0  ;;  %v2806_v0 = vld.sshfl [vmem:[%s3645_s23 + $0x8] sm:$0x1 pattern:$0x75316420] }
  0x80   : > { %2226 = vmatpush2.bf16.msra.mxu1 %v3292_v2  ;;  %2186 = vmatprep.subr.bf16.mxu0 %v3297_v3  ;;  %v3376_v2 = vld [vmem:[%s3650_s27 + $0x1ec] ss:$16 sps:$4 sm:$0xff]  }
  0x81   : > { %2227 = vmatprep.subr.bf16.mxu1 %v3300_v4  ;;  %v3379_v3 = vld [vmem:[%s3650_s27 + $0x2ec] ss:$16 sps:$4 sm:$0xff]   ;;  %v3868_v4 = vrot.slane %v2806_v0, %v3700_v50  ;;  %v3455_v0 = vld [vmem:[%s3650_s27 + $0x448] ss:$16 sps:$4 sm:$0xff]  }
  0x83   : > { %2187 = vmatpush2.bf16.msra.mxu0 %v3295_v5  ;;  %v3374_v5 = vld [vmem:[%s3650_s27 + $0x1e8] ss:$16 sps:$4 sm:$0xff]  }
  0x84   : > { %2228 = vmatpush2.bf16.msra.mxu1 %v3298_v6  ;;  %2188 = vmatprep.subr.bf16.mxu0 %v3303_v8  ;;  %v3377_v6 = vld [vmem:[%s3650_s27 + $0x2e8] ss:$16 sps:$4 sm:$0xff]   ;;  %v3382_v8 = vld [vmem:[%s3650_s27 + $0x1cc] ss:$16 sps:$4 sm:$0xff]  }
  0x85   : > { %2229 = vmatprep.subr.bf16.mxu1 %v3306_v9  ;;  %v3385_v9 = vld [vmem:[%s3650_s27 + $0x2cc] ss:$16 sps:$4 sm:$0xff]  }
  0x87   : > { %2189 = vmatpush2.bf16.msra.mxu0 %v3301_v10  ;;  %v3380_v10 = vld [vmem:[%s3650_s27 + $0x1c8] ss:$16 sps:$4 sm:$0xff]  }
  0x88   : > { %2230 = vmatpush2.bf16.msra.mxu1 %v3304_v11  ;;  %2190 = vmatprep.subr.bf16.mxu0 %v3309_v12  ;;  %v3383_v11 = vld [vmem:[%s3650_s27 + $0x2c8] ss:$16 sps:$4 sm:$0xff]   ;;  %v3388_v12 = vld [vmem:[%s3650_s27 + $0x1ac] ss:$16 sps:$4 sm:$0xff]  }
  0x89   : > { %2231 = vmatprep.subr.bf16.mxu1 %v3312_v13  ;;  %v3391_v13 = vld [vmem:[%s3650_s27 + $0x2ac] ss:$16 sps:$4 sm:$0xff]  }
  0x8b   : > { %2191 = vmatpush2.bf16.msra.mxu0 %v3307_v15  ;;  %v3386_v15 = vld [vmem:[%s3650_s27 + $0x1a8] ss:$16 sps:$4 sm:$0xff]  }
  0x8c   : > { %2232 = vmatpush2.bf16.msra.mxu1 %v3310_v16  ;;  %2192 = vmatprep.subr.bf16.mxu0 %v3315_v17  ;;  %v3389_v16 = vld [vmem:[%s3650_s27 + $0x2a8] ss:$16 sps:$4 sm:$0xff]   ;;  %v3394_v17 = vld [vmem:[%s3650_s27 + $0x18c] ss:$16 sps:$4 sm:$0xff]  }
  0x8d   : > { %2233 = vmatprep.subr.bf16.mxu1 %v3318_v20  ;;  %v3397_v20 = vld [vmem:[%s3650_s27 + $0x28c] ss:$16 sps:$4 sm:$0xff]  }
  0x8f   : > { %2193 = vmatpush2.bf16.msra.mxu0 %v3313_v21  ;;  %v3392_v21 = vld [vmem:[%s3650_s27 + $0x188] ss:$16 sps:$4 sm:$0xff]  }
  0x90   : > { %2234 = vmatpush2.bf16.msra.mxu1 %v3316_v22  ;;  %2194 = vmatprep.subr.bf16.mxu0 %v3321_v23  ;;  %v3395_v22 = vld [vmem:[%s3650_s27 + $0x288] ss:$16 sps:$4 sm:$0xff]   ;;  %v3403_v23 = vld [vmem:[%s3650_s27 + $0x26c] ss:$16 sps:$4 sm:$0xff]  }
  0x91   : > { %2235 = vmatprep.subr.bf16.mxu1 %v3324_v25  ;;  %v3398_v25 = vld [vmem:[%s3650_s27 + $0x168] ss:$16 sps:$4 sm:$0xff]  }
  0x93   : > { %2195 = vmatpush2.bf16.msra.mxu0 %v3319_v27  ;;  %v3401_v27 = vld [vmem:[%s3650_s27 + $0x268] ss:$16 sps:$4 sm:$0xff]  }
  0x94   : > { %2236 = vmatpush2.bf16.msra.mxu1 %v3322_v28  ;;  %2246 = vmatprep.subr.bf16.mxu0 %v3328_v29  ;;  %v3406_v28 = vld [vmem:[%s3650_s27 + $0x14c] ss:$16 sps:$4 sm:$0xff]  }
  0x95   : > { %2287 = vmatprep.subr.bf16.mxu1 %v3331_v30  ;;  %v3409_v29 = vld [vmem:[%s3650_s27 + $0x24c] ss:$16 sps:$4 sm:$0xff]   ;;  %v3404_v30 = vld [vmem:[%s3650_s27 + $0x148] ss:$16 sps:$4 sm:$0xff]  }
  0x96   : > { %2197 = vmatmul.mubr.bf16.vlgmr.msra.gmra.mxu0 %v3820_v26 }
  0x97   : > { %2238 = vmatmul.mubr.bf16.vlgmr.msra.gmra.mxu1 %v3828_v31  ;;  %2247 = vmatpush1.bf16.msra.mxu0 %v3326_v7  ;;  %v3407_v7 = vld [vmem:[%s3650_s27 + $0x248] ss:$16 sps:$4 sm:$0xff]  }
  0x98   : > { %2288 = vmatpush1.bf16.msra.mxu1 %v3329_v32  ;;  %2248 = vmatprep.subr.bf16.mxu0 %v3334_v33  ;;  %v3412_v32 = vld [vmem:[%s3650_s27 + $0x12c] ss:$16 sps:$4 sm:$0xff]  }
  0x99   : > { %2289 = vmatprep.subr.bf16.mxu1 %v3337_v34  ;;  %2278 = vmatprep.mubr.bf16.mxu0 %v3593_v39  ;;  %v3415_v33 = vld [vmem:[%s3650_s27 + $0x22c] ss:$16 sps:$4 sm:$0xff]   ;;  %v3410_v34 = vld [vmem:[%s3650_s27 + $0x128] ss:$16 sps:$4 sm:$0xff]  }
  0x9a   : > { %2319 = vmatprep.mubr.bf16.mxu1 %v3712_v61  ;;  %v3352_v61 = vld [vmem:[%s3650_s27 + $0x864] ss:$16 sps:$4 sm:$0xff]  }
  0x9b   : > { %2249 = vmatpush1.bf16.msra.mxu0 %v3332_v35  ;;  %v3413_v35 = vld [vmem:[%s3650_s27 + $0x228] ss:$16 sps:$4 sm:$0xff]  }
  0x9c   : > { %2290 = vmatpush1.bf16.msra.mxu1 %v3335_v36  ;;  %2250 = vmatprep.subr.bf16.mxu0 %v3340_v37  ;;  %v3418_v36 = vld [vmem:[%s3650_s27 + $0x10c] ss:$16 sps:$4 sm:$0xff]  }
  0x9d   : > { %2291 = vmatprep.subr.bf16.mxu1 %v3343_v38  ;;  %v3421_v37 = vld [vmem:[%s3650_s27 + $0x20c] ss:$16 sps:$4 sm:$0xff]   ;;  %v3416_v38 = vld [vmem:[%s3650_s27 + $0x108] ss:$16 sps:$4 sm:$0xff]  }
  0x9f   : > { %2251 = vmatpush1.bf16.msra.mxu0 %v3338_v40  ;;  %v3419_v40 = vld [vmem:[%s3650_s27 + $0x208] ss:$16 sps:$4 sm:$0xff]  }
  0xa0   : > { %2292 = vmatpush1.bf16.msra.mxu1 %v3341_v41  ;;  %2252 = vmatprep.subr.bf16.mxu0 %v3346_v42  ;;  %v3424_v41 = vld [vmem:[%s3650_s27 + $0x3ec] ss:$16 sps:$4 sm:$0xff]  }
  0xa1   : > { %2293 = vmatprep.subr.bf16.mxu1 %v3349_v43  ;;  %v3427_v42 = vld [vmem:[%s3650_s27 + $0x4ec] ss:$16 sps:$4 sm:$0xff]   ;;  %v3422_v43 = vld [vmem:[%s3650_s27 + $0x3e8] ss:$16 sps:$4 sm:$0xff]  }
  0xa3   : > { %2253 = vmatpush1.bf16.msra.mxu0 %v3344_v45  ;;  %v3425_v45 = vld [vmem:[%s3650_s27 + $0x4e8] ss:$16 sps:$4 sm:$0xff]  }
  0xa4   : > { %2294 = vmatpush1.bf16.msra.mxu1 %v3347_v46  ;;  %2254 = vmatprep.subr.bf16.mxu0 %v3352_v61  ;;  %v3430_v46 = vld [vmem:[%s3650_s27 + $0x3cc] ss:$16 sps:$4 sm:$0xff]  }
  0xa5   : > { %2295 = vmatprep.subr.bf16.mxu1 %v3355_v47  ;;  %v3433_v61 = vld [vmem:[%s3650_s27 + $0x4cc] ss:$16 sps:$4 sm:$0xff]   ;;  %v3428_v47 = vld [vmem:[%s3650_s27 + $0x3c8] ss:$16 sps:$4 sm:$0xff]  }
  0xa7   : > { %2255 = vmatpush1.bf16.msra.mxu0 %v3350_v48  ;;  %v3431_v48 = vld [vmem:[%s3650_s27 + $0x4c8] ss:$16 sps:$4 sm:$0xff]  }
  0xa8   : > { %2296 = vmatpush1.bf16.msra.mxu1 %v3353_v49  ;;  %2256 = vmatprep.subr.bf16.mxu0 %v3358_v51  ;;  %v3436_v49 = vld [vmem:[%s3650_s27 + $0x3ac] ss:$16 sps:$4 sm:$0xff]  }
  0xa9   : > { %2297 = vmatprep.subr.bf16.mxu1 %v3361_v52  ;;  %v3439_v51 = vld [vmem:[%s3650_s27 + $0x4ac] ss:$16 sps:$4 sm:$0xff]   ;;  %v3434_v52 = vld [vmem:[%s3650_s27 + $0x3a8] ss:$16 sps:$4 sm:$0xff]  }
  0xab   : > { %2257 = vmatpush1.bf16.msra.mxu0 %v3356_v53  ;;  %v3442_v53 = vld [vmem:[%s3650_s27 + $0x38c] ss:$16 sps:$4 sm:$0xff]  }
  0xac   : > { %2298 = vmatpush1.bf16.msra.mxu1 %v3359_v54  ;;  %2258 = vmatprep.subr.bf16.mxu0 %v3364_v55  ;;  %v3445_v54 = vld [vmem:[%s3650_s27 + $0x48c] ss:$16 sps:$4 sm:$0xff]   ;;  %v3440_v55 = vld [vmem:[%s3650_s27 + $0x388] ss:$16 sps:$4 sm:$0xff]  }
  0xad   : > { %2299 = vmatprep.subr.bf16.mxu1 %v3367_v56  ;;  %v3443_v56 = vld [vmem:[%s3650_s27 + $0x488] ss:$16 sps:$4 sm:$0xff]  }
  0xaf   : > { %2259 = vmatpush1.bf16.msra.mxu0 %v3362_v57  ;;  %v3451_v57 = vld [vmem:[%s3650_s27 + $0x46c] ss:$16 sps:$4 sm:$0xff]  }
  0xb0   : > { %2300 = vmatpush1.bf16.msra.mxu1 %v3365_v58  ;;  %2260 = vmatprep.subr.bf16.mxu0 %v3370_v59  ;;  %v3446_v58 = vld [vmem:[%s3650_s27 + $0x368] ss:$16 sps:$4 sm:$0xff]  }
  0xb1   : > { %2301 = vmatprep.subr.bf16.mxu1 %v3373_v60  ;;  %v3449_v59 = vld [vmem:[%s3650_s27 + $0x468] ss:$16 sps:$4 sm:$0xff]   ;;  %v3454_v60 = vld [vmem:[%s3650_s27 + $0x34c] ss:$16 sps:$4 sm:$0xff]  }
  0xb3   : > { %2261 = vmatpush1.bf16.msra.mxu0 %v3368_v62  ;;  %v3457_v62 = vld [vmem:[%s3650_s27 + $0x44c] ss:$16 sps:$4 sm:$0xff]  }
  0xb4   : > { %2302 = vmatpush1.bf16.msra.mxu1 %v3371_v63  ;;  %2328 = vmatprep.subr.bf16.mxu0 %v3379_v3  ;;  %v3452_v63 = vld [vmem:[%s3650_s27 + $0x348] ss:$16 sps:$4 sm:$0xff]   ;;  %v3463_v3 = vld [vmem:[%s3650_s27 + $0x42c] ss:$16 sps:$4 sm:$0xff]  }
  0xb5   : > { %2303 = vmatprep.subr.bf16.mxu1 %v3376_v2  ;;  %v3460_v2 = vld [vmem:[%s3650_s27 + $0x32c] ss:$16 sps:$4 sm:$0xff]  }
  0xb6   : > { %2279 = vmatmul.mubr.bf16.vlgmr.msra.gmra.mxu0 %v3868_v4 }
  0xb7   : > { %2329 = vmatpush1.bf16.msra.mxu0 %v3377_v6  ;;  %2360 = vmatprep.mubr.bf16.mxu0 %v3719_v1  ;;  %v3400_v1 = vld [vmem:[%s3650_s27 + $0x16c] ss:$16 sps:$4 sm:$0xff]   ;;  %v3461_v6 = vld [vmem:[%s3650_s27 + $0x428] ss:$16 sps:$4 sm:$0xff]  }
  0xb8   : > { %2304 = vmatpush2.bf16.msra.mxu1 %v3374_v5  ;;  %2330 = vmatprep.subr.bf16.mxu0 %v3385_v9  ;;  %v3458_v5 = vld [vmem:[%s3650_s27 + $0x328] ss:$16 sps:$4 sm:$0xff]   ;;  %v3469_v9 = vld [vmem:[%s3650_s27 + $0x40c] ss:$16 sps:$4 sm:$0xff]  }
  0xb9   : > { %2305 = vmatprep.subr.bf16.mxu1 %v3382_v8  ;;  %v3466_v8 = vld [vmem:[%s3650_s27 + $0x30c] ss:$16 sps:$4 sm:$0xff]  }
  0xbb   : > { %2331 = vmatpush1.bf16.msra.mxu0 %v3383_v11  ;;  %v3467_v11 = vld [vmem:[%s3650_s27 + $0x408] ss:$16 sps:$4 sm:$0xff]  }
  0xbc   : > { %2306 = vmatpush2.bf16.msra.mxu1 %v3380_v10  ;;  %2332 = vmatprep.subr.bf16.mxu0 %v3391_v13  ;;  %v3464_v10 = vld [vmem:[%s3650_s27 + $0x308] ss:$16 sps:$4 sm:$0xff]   ;;  %v3475_v13 = vld [vmem:[%s3650_s27 + $0x6ec] ss:$16 sps:$4 sm:$0xff]  }
  0xbd   : > { %2307 = vmatprep.subr.bf16.mxu1 %v3388_v12  ;;  %v3472_v12 = vld [vmem:[%s3650_s27 + $0x5ec] ss:$16 sps:$4 sm:$0xff]  }
  0xbf   : > { %2333 = vmatpush1.bf16.msra.mxu0 %v3389_v16  ;;  %v3473_v16 = vld [vmem:[%s3650_s27 + $0x6e8] ss:$16 sps:$4 sm:$0xff]  }
  0xc0   : > { %2308 = vmatpush2.bf16.msra.mxu1 %v3386_v15  ;;  %2334 = vmatprep.subr.bf16.mxu0 %v3397_v20  ;;  %v3470_v15 = vld [vmem:[%s3650_s27 + $0x5e8] ss:$16 sps:$4 sm:$0xff]   ;;  %v3481_v20 = vld [vmem:[%s3650_s27 + $0x6cc] ss:$16 sps:$4 sm:$0xff]  }
  0xc1   : > { %2309 = vmatprep.subr.bf16.mxu1 %v3394_v17  ;;  %v3478_v17 = vld [vmem:[%s3650_s27 + $0x5cc] ss:$16 sps:$4 sm:$0xff]  }
  0xc3   : > { %2335 = vmatpush1.bf16.msra.mxu0 %v3395_v22  ;;  %v3479_v22 = vld [vmem:[%s3650_s27 + $0x6c8] ss:$16 sps:$4 sm:$0xff]  }
  0xc4   : > { %2310 = vmatpush2.bf16.msra.mxu1 %v3392_v21  ;;  %2336 = vmatprep.subr.bf16.mxu0 %v3403_v23  ;;  %v3476_v21 = vld [vmem:[%s3650_s27 + $0x5c8] ss:$16 sps:$4 sm:$0xff]   ;;  %v3487_v23 = vld [vmem:[%s3650_s27 + $0x6ac] ss:$16 sps:$4 sm:$0xff]  }
  0xc5   : > { %2311 = vmatprep.subr.bf16.mxu1 %v3400_v1  ;;  %v3484_v1 = vld [vmem:[%s3650_s27 + $0x5ac] ss:$16 sps:$4 sm:$0xff]  }
  0xc7   : > { %2337 = vmatpush1.bf16.msra.mxu0 %v3401_v27  ;;  %v3490_v27 = vld [vmem:[%s3650_s27 + $0x58c] ss:$16 sps:$4 sm:$0xff]  }
  0xc8   : > { %2312 = vmatpush2.bf16.msra.mxu1 %v3398_v25  ;;  %2338 = vmatprep.subr.bf16.mxu0 %v3409_v29  ;;  %v3482_v25 = vld [vmem:[%s3650_s27 + $0x5a8] ss:$16 sps:$4 sm:$0xff]  }
  0xc9   : > { %2313 = vmatprep.subr.bf16.mxu1 %v3406_v28  ;;  %v3493_v28 = vld [vmem:[%s3650_s27 + $0x68c] ss:$16 sps:$4 sm:$0xff]   ;;  %v3488_v29 = vld [vmem:[%s3650_s27 + $0x588] ss:$16 sps:$4 sm:$0xff]  }
  0xcb   : > { %2339 = vmatpush1.bf16.msra.mxu0 %v3407_v7  ;;  %v3499_v7 = vld [vmem:[%s3650_s27 + $0x66c] ss:$16 sps:$4 sm:$0xff]  }
  0xcc   : > { %2314 = vmatpush2.bf16.msra.mxu1 %v3404_v30  ;;  %2340 = vmatprep.subr.bf16.mxu0 %v3415_v33  ;;  %v3491_v30 = vld [vmem:[%s3650_s27 + $0x688] ss:$16 sps:$4 sm:$0xff]  }
  0xcd   : > { %2315 = vmatprep.subr.bf16.mxu1 %v3412_v32  ;;  %v3494_v32 = vld [vmem:[%s3650_s27 + $0x568] ss:$16 sps:$4 sm:$0xff]  }
  0xce   : > { %v3497_v33 = vld [vmem:[%s3650_s27 + $0x668] ss:$16 sps:$4 sm:$0xff]  }
  0xcf   : > { %2341 = vmatpush1.bf16.msra.mxu0 %v3413_v35  ;;  %v3505_v35 = vld [vmem:[%s3650_s27 + $0x64c] ss:$16 sps:$4 sm:$0xff]  }
  0xd0   : > { %2316 = vmatpush2.bf16.msra.mxu1 %v3410_v34  ;;  %2342 = vmatprep.subr.bf16.mxu0 %v3421_v37  ;;  %v3502_v34 = vld [vmem:[%s3650_s27 + $0x54c] ss:$16 sps:$4 sm:$0xff]   ;;  %v3503_v37 = vld [vmem:[%s3650_s27 + $0x648] ss:$16 sps:$4 sm:$0xff]  }
  0xd1   : > { %2317 = vmatprep.subr.bf16.mxu1 %v3418_v36  ;;  %v3500_v36 = vld [vmem:[%s3650_s27 + $0x548] ss:$16 sps:$4 sm:$0xff]  }
  0xd3   : > { %2343 = vmatpush1.bf16.msra.mxu0 %v3419_v40  ;;  %v3511_v40 = vld [vmem:[%s3650_s27 + $0x62c] ss:$16 sps:$4 sm:$0xff]  }
  0xd4   : > { %2318 = vmatpush2.bf16.msra.mxu1 %v3416_v38  ;;  %2344 = vmatprep.subr.bf16.mxu0 %v3424_v41  ;;  %v3508_v38 = vld [vmem:[%s3650_s27 + $0x52c] ss:$16 sps:$4 sm:$0xff]   ;;  %v3506_v41 = vld [vmem:[%s3650_s27 + $0x528] ss:$16 sps:$4 sm:$0xff]  }
  0xd5   : > { %2369 = vmatprep.subr.bf16.mxu1 %v3427_v42  ;;  %v3509_v42 = vld [vmem:[%s3650_s27 + $0x628] ss:$16 sps:$4 sm:$0xff]  }
  0xd7   : > { %2320 = vmatmul.mubr.bf16.vlgmr.msra.gmra.mxu1 %v3738_v14  ;;  %2345 = vmatpush2.bf16.msra.mxu0 %v3422_v43  ;;  %v3437_v14 = vld [vmem:[%s3650_s27 + $0x4a8] ss:$16 sps:$4 sm:$0xff]   ;;  %v3514_v43 = vld [vmem:[%s3650_s27 + $0x50c] ss:$16 sps:$4 sm:$0xff]  }
  0xd8   : > { %2370 = vmatpush1.bf16.msra.mxu1 %v3425_v45  ;;  %2346 = vmatprep.subr.bf16.mxu0 %v3430_v46  ;;  %v3517_v45 = vld [vmem:[%s3650_s27 + $0x60c] ss:$16 sps:$4 sm:$0xff]   ;;  %v3512_v46 = vld [vmem:[%s3650_s27 + $0x508] ss:$16 sps:$4 sm:$0xff]  }
  0xd9   : > { %2371 = vmatprep.subr.bf16.mxu1 %v3433_v61  ;;  %2401 = vmatprep.mubr.bf16.mxu1 %v3744_v18  ;;  %v3448_v18 = vld [vmem:[%s3650_s27 + $0x36c] ss:$16 sps:$4 sm:$0xff]   ;;  %v3515_v61 = vld [vmem:[%s3650_s27 + $0x608] ss:$16 sps:$4 sm:$0xff]  }
  0xdb   : > { %2347 = vmatpush2.bf16.msra.mxu0 %v3428_v47  ;;  %v3520_v47 = vld [vmem:[%s3650_s27 + $0x7ec] ss:$16 sps:$4 sm:$0xff]  }
  0xdc   : > { %2372 = vmatpush1.bf16.msra.mxu1 %v3431_v48  ;;  %2348 = vmatprep.subr.bf16.mxu0 %v3436_v49  ;;  %v3523_v48 = vld [vmem:[%s3650_s27 + $0x8ec] ss:$16 sps:$4 sm:$0xff]   ;;  %v3518_v49 = vld [vmem:[%s3650_s27 + $0x7e8] ss:$16 sps:$4 sm:$0xff]  }
  0xdd   : > { %2373 = vmatprep.subr.bf16.mxu1 %v3439_v51  ;;  %v3521_v51 = vld [vmem:[%s3650_s27 + $0x8e8] ss:$16 sps:$4 sm:$0xff]  }
  0xdf   : > { %2349 = vmatpush2.bf16.msra.mxu0 %v3434_v52  ;;  %v3526_v52 = vld [vmem:[%s3650_s27 + $0x7cc] ss:$16 sps:$4 sm:$0xff]  }
  0xe0   : > { %2374 = vmatpush1.bf16.msra.mxu1 %v3437_v14  ;;  %2350 = vmatprep.subr.bf16.mxu0 %v3442_v53  ;;  %v3529_v14 = vld [vmem:[%s3650_s27 + $0x8cc] ss:$16 sps:$4 sm:$0xff]  }
  0xe1   : > { %2375 = vmatprep.subr.bf16.mxu1 %v3445_v54 }
  0xe3   : > { %2351 = vmatpush2.bf16.msra.mxu0 %v3440_v55 }
  0xe4   : > { %2376 = vmatpush1.bf16.msra.mxu1 %v3443_v56  ;;  %2352 = vmatprep.subr.bf16.mxu0 %v3448_v18  ;;  %v3524_v56 = vld [vmem:[%s3650_s27 + $0x7c8] ss:$16 sps:$4 sm:$0xff]  }
  0xe5   : > { %2377 = vmatprep.subr.bf16.mxu1 %v3451_v57  ;;  %v3527_v18 = vld [vmem:[%s3650_s27 + $0x8c8] ss:$16 sps:$4 sm:$0xff]  }
  0xe7   : > { %2353 = vmatpush2.bf16.msra.mxu0 %v3446_v58 }
  0xe8   : > { %2378 = vmatpush1.bf16.msra.mxu1 %v3449_v59  ;;  %2354 = vmatprep.subr.bf16.mxu0 %v3454_v60  ;;  %v3532_v59 = vld [vmem:[%s3650_s27 + $0x7ac] ss:$16 sps:$4 sm:$0xff]  }
  0xe9   : > { %2379 = vmatprep.subr.bf16.mxu1 %v3457_v62  ;;  %v3535_v60 = vld [vmem:[%s3650_s27 + $0x8ac] ss:$16 sps:$4 sm:$0xff]  }
  0xeb   : > { %2355 = vmatpush2.bf16.msra.mxu0 %v3452_v63 }
  0xec   : > { %2380 = vmatpush1.bf16.msra.mxu1 %v3455_v0  ;;  %2356 = vmatprep.subr.bf16.mxu0 %v3460_v2  ;;  %v3530_v0 = vld [vmem:[%s3650_s27 + $0x7a8] ss:$16 sps:$4 sm:$0xff]  }
  0xed   : > { %2381 = vmatprep.subr.bf16.mxu1 %v3463_v3  ;;  %v3533_v2 = vld [vmem:[%s3650_s27 + $0x8a8] ss:$16 sps:$4 sm:$0xff]  }
  0xef   : > { %2357 = vmatpush2.bf16.msra.mxu0 %v3458_v5 }
  0xf0   : > { %2382 = vmatpush1.bf16.msra.mxu1 %v3461_v6  ;;  %2358 = vmatprep.subr.bf16.mxu0 %v3466_v8  ;;  %v3538_v6 = vld [vmem:[%s3650_s27 + $0x78c] ss:$16 sps:$4 sm:$0xff]  }
  0xf1   : > { %2383 = vmatprep.subr.bf16.mxu1 %v3469_v9  ;;  %v3541_v8 = vld [vmem:[%s3650_s27 + $0x88c] ss:$16 sps:$4 sm:$0xff]   ;;  %v3539_v9 = vld [vmem:[%s3650_s27 + $0x888] ss:$16 sps:$4 sm:$0xff]  }
  0xf3   : > { %2359 = vmatpush2.bf16.msra.mxu0 %v3464_v10  ;;  %v3544_v10 = vld [vmem:[%s3650_s27 + $0x76c] ss:$16 sps:$4 sm:$0xff]  }
  0xf4   : > { %2384 = vmatpush1.bf16.msra.mxu1 %v3467_v11  ;;  %2410 = vmatprep.subr.bf16.mxu0 %v3475_v13  ;;  %v3547_v11 = vld [vmem:[%s3650_s27 + $0x86c] ss:$16 sps:$4 sm:$0xff]   ;;  %v3545_v13 = vld [vmem:[%s3650_s27 + $0x868] ss:$16 sps:$4 sm:$0xff]  }
  0xf5   : > { %2385 = vmatprep.subr.bf16.mxu1 %v3472_v12  ;;  %v3542_v12 = vld [vmem:[%s3650_s27 + $0x768] ss:$16 sps:$4 sm:$0xff]  }
  0xf6   : > { %2361 = vmatmul.mubr.bf16.vlgmr.msra.gmra.mxu0 %v3748_v19  ;;  %v3485_v19 = vld [vmem:[%s3650_s27 + $0x6a8] ss:$16 sps:$4 sm:$0xff]  }
  0xf7   : > { %2411 = vmatpush1.bf16.msra.mxu0 %v3473_v16  ;;  %2442 = vmatprep.mubr.bf16.mxu0 %v3756_v24  ;;  %v3496_v24 = vld [vmem:[%s3650_s27 + $0x56c] ss:$16 sps:$4 sm:$0xff]  }
  0xf8   : > { %2386 = vmatpush2.bf16.msra.mxu1 %v3470_v15  ;;  %2412 = vmatprep.subr.bf16.mxu0 %v3481_v20  ;;  %v3550_v15 = vld [vmem:[%s3650_s27 + $0x74c] ss:$16 sps:$4 sm:$0xff]   ;;  %v3551_v20 = vld [vmem:[%s3650_s27 + $0x848] ss:$16 sps:$4 sm:$0xff]  }
  0xf9   : > { %2387 = vmatprep.subr.bf16.mxu1 %v3478_v17  ;;  %v3553_v16 = vld [vmem:[%s3650_s27 + $0x84c] ss:$16 sps:$4 sm:$0xff]   ;;  %v3548_v17 = vld [vmem:[%s3650_s27 + $0x748] ss:$16 sps:$4 sm:$0xff]  }
  0xfb   : > { %2413 = vmatpush1.bf16.msra.mxu0 %v3479_v22  ;;  %v3559_v22 = vld [vmem:[%s3650_s27 + $0x82c] ss:$16 sps:$4 sm:$0xff]  }
  0xfc   : > { %2388 = vmatpush2.bf16.msra.mxu1 %v3476_v21  ;;  %2414 = vmatprep.subr.bf16.mxu0 %v3487_v23  ;;  %v3556_v21 = vld [vmem:[%s3650_s27 + $0x72c] ss:$16 sps:$4 sm:$0xff]   ;;  %v3557_v23 = vld [vmem:[%s3650_s27 + $0x828] ss:$16 sps:$4 sm:$0xff]  }
  0xfd   : > { %2389 = vmatprep.subr.bf16.mxu1 %v3484_v1  ;;  %v3554_v1 = vld [vmem:[%s3650_s27 + $0x728] ss:$16 sps:$4 sm:$0xff]  }
  0xff   : > { %2415 = vmatpush1.bf16.msra.mxu0 %v3485_v19  ;;  %v3565_v19 = vld [vmem:[%s3650_s27 + $0x80c] ss:$16 sps:$4 sm:$0xff]  }
 0x100   : > { %2390 = vmatpush2.bf16.msra.mxu1 %v3482_v25  ;;  %2416 = vmatprep.subr.bf16.mxu0 %v3493_v28  ;;  %v3562_v25 = vld [vmem:[%s3650_s27 + $0x70c] ss:$16 sps:$4 sm:$0xff]   ;;  %v3563_v28 = vld [vmem:[%s3650_s27 + $0x808] ss:$16 sps:$4 sm:$0xff]  }
 0x101   : > { %2391 = vmatprep.subr.bf16.mxu1 %v3490_v27  ;;  %v3560_v27 = vld [vmem:[%s3650_s27 + $0x708] ss:$16 sps:$4 sm:$0xff]  }
 0x103   : > { %2417 = vmatpush1.bf16.msra.mxu0 %v3491_v30 }
 0x104   : > { %2392 = vmatpush2.bf16.msra.mxu1 %v3488_v29  ;;  %2418 = vmatprep.subr.bf16.mxu0 %v3499_v7 }
 0x105   : > { %2393 = vmatprep.subr.bf16.mxu1 %v3496_v24 }
 0x107   : > { %2419 = vmatpush1.bf16.msra.mxu0 %v3497_v33 }
 0x108   : > { %2394 = vmatpush2.bf16.msra.mxu1 %v3494_v32  ;;  %2420 = vmatprep.subr.bf16.mxu0 %v3505_v35 }
 0x109   : > { %2395 = vmatprep.subr.bf16.mxu1 %v3502_v34 }
 0x10b   : > { %2421 = vmatpush1.bf16.msra.mxu0 %v3503_v37 }
 0x10c   : > { %2396 = vmatpush2.bf16.msra.mxu1 %v3500_v36  ;;  %2422 = vmatprep.subr.bf16.mxu0 %v3511_v40 }
 0x10d   : > { %2397 = vmatprep.subr.bf16.mxu1 %v3508_v38 }
 0x10f   : > { %2423 = vmatpush1.bf16.msra.mxu0 %v3509_v42 }
 0x110   : > { %2398 = vmatpush2.bf16.msra.mxu1 %v3506_v41  ;;  %2424 = vmatprep.subr.bf16.mxu0 %v3517_v45 }
 0x111   : > { %2399 = vmatprep.subr.bf16.mxu1 %v3514_v43 }
 0x113   : > { %2425 = vmatpush1.bf16.msra.mxu0 %v3515_v61 }
 0x114   : > { %2400 = vmatpush2.bf16.msra.mxu1 %v3512_v46  ;;  %2426 = vmatprep.subr.bf16.mxu0 %v3520_v47 }
 0x115   : > { %2451 = vmatprep.subr.bf16.mxu1 %v3523_v48 }
 0x116   : > { %v2116_v53 = vpop.f32.mrf.mxu0 }
 0x117   : > { %v2157_v54 = vpop.f32.mrf.mxu1  ;;  %2402 = vmatmul.mubr.bf16.vlgmr.msra.gmra.mxu1 %v3820_v26  ;;  %2427 = vmatpush2.bf16.msra.mxu0 %v3518_v49 }
 0x118   : > { %v3977_v55 = vadd.f32 %v2157_v54, %v2116_v53  ;;  %2452 = vmatpush1.bf16.msra.mxu1 %v3521_v51  ;;  %v2118_v57 = vpop.f32.mrf.mxu0  ;;  %2428 = vmatprep.subr.bf16.mxu0 %v3526_v52 }
 0x119   : > { %v2159_v58 = vpop.f32.mrf.mxu1  ;;  %2453 = vmatprep.subr.bf16.mxu1 %v3529_v14  ;;  %2483 = vmatprep.mubr.bf16.mxu1 %v3593_v39  ;;  %v3536_v39 = vld [vmem:[%s3650_s27 + $0x788] ss:$16 sps:$4 sm:$0xff]  }
 0x11a   : > { %v2160_v62 = vadd.f32 %v2159_v58, %v2118_v57  ;;  %v2120_v26 = vpop.f32.mrf.mxu0  ;;  %v3594_v57 = vmov 1983009808  }
 0x11b   : > { %v2161_v63 = vpop.f32.mrf.mxu1  ;;  %2429 = vmatpush2.bf16.msra.mxu0 %v3524_v56  ;;  %v2499_v58 = vunpack.c.l.s4 %v3594_v57 }
 0x11c   : > { %2454 = vmatpush1.bf16.msra.mxu1 %v3527_v18  ;;  %v2121_v3 = vpop.f32.mrf.mxu0  ;;  %2430 = vmatprep.subr.bf16.mxu0 %v3532_v59 }
 0x11d   : > { %v2162_v5 = vpop.f32.mrf.mxu1  ;;  %2455 = vmatprep.subr.bf16.mxu1 %v3535_v60 }
 0x11f   : > { %2431 = vmatpush2.bf16.msra.mxu0 %v3530_v0  ;;  %v2500_v0 = vunpack.c.0.s8 %v2499_v58 }
 0x120   : > { %2456 = vmatpush1.bf16.msra.mxu1 %v3533_v2  ;;  %2432 = vmatprep.subr.bf16.mxu0 %v3538_v6 }
 0x121   : > { %2457 = vmatprep.subr.bf16.mxu1 %v3541_v8 }
 0x123   : > { %2433 = vmatpush2.bf16.msra.mxu0 %v3536_v39 }
 0x124   : > { %2458 = vmatpush1.bf16.msra.mxu1 %v3539_v9  ;;  %2434 = vmatprep.subr.bf16.mxu0 %v3544_v10  ;;  %v2503_v10 = vsub.s32 %v2500_v0, %v3692_v44 }
 0x125   : > { %2459 = vmatprep.subr.bf16.mxu1 %v3547_v11 }
 0x127   : > { %2435 = vmatpush2.bf16.msra.mxu0 %v3542_v12 }
 0x128   : > { %2460 = vmatpush1.bf16.msra.mxu1 %v3545_v13  ;;  %2436 = vmatprep.subr.bf16.mxu0 %v3550_v15 }
 0x129   : > { %2461 = vmatprep.subr.bf16.mxu1 %v3553_v16 }
 0x12b   : > { %2437 = vmatpush2.bf16.msra.mxu0 %v3548_v17 }
 0x12c   : > { %2462 = vmatpush1.bf16.msra.mxu1 %v3551_v20  ;;  %2438 = vmatprep.subr.bf16.mxu0 %v3556_v21  ;;  %v277_v21 = vld [vmem:[#allocation2] sm:$0xff] }
 0x12d   : > { %2463 = vmatprep.subr.bf16.mxu1 %v3559_v22 }
 0x12f   : > { %2439 = vmatpush2.bf16.msra.mxu0 %v3554_v1 }
 0x130   : > { %2464 = vmatpush1.bf16.msra.mxu1 %v3557_v23  ;;  %2440 = vmatprep.subr.bf16.mxu0 %v3562_v25 }
 0x131   : > { %2465 = vmatprep.subr.bf16.mxu1 %v3565_v19 }
 0x133   : > { %2441 = vmatpush2.bf16.msra.mxu0 %v3560_v27 }
 0x134   : > { %2466 = vmatpush1.bf16.msra.mxu1 %v3563_v28 }
 0x136   : > { %2443 = vmatmul.mubr.bf16.vlgmr.msra.gmra.mxu0 %v3828_v31 }
 0x137   : > { %2484 = vmatmul.mubr.bf16.vlgmr.msra.gmra.mxu1 %v3868_v4 }
 0x156   : > { %v2198_v29 = vpop.f32.mrf.mxu0 }
 0x157   : > { %v2239_v30 = vpop.f32.mrf.mxu1  ;;  %v2199_v24 = vadd.f32 %v2198_v29, %v3977_v55 }
 0x158   : > { %v2200_v7 = vpop.f32.mrf.mxu0 }
 0x159   : > { %v2241_v32 = vpop.f32.mrf.mxu1  ;;  %v2240_v33 = vadd.f32 %v2239_v30, %v2199_v24  ;;  %v2201_v34 = vadd.f32 %v2200_v7, %v2160_v62 }
 0x15a   : > { %v2202_v35 = vpop.f32.mrf.mxu0 }
 0x15b   : > { %v2243_v36 = vpop.f32.mrf.mxu1  ;;  %v2242_v37 = vadd.f32 %v2241_v32, %v2201_v34 }
 0x15c   : > { %v2203_v38 = vpop.f32.mrf.mxu0 }
 0x15d   : > { %v2244_v40 = vpop.f32.mrf.mxu1 }
 0x176   : > { %v2280_v41 = vpop.f32.mrf.mxu0 }
 0x177   : > { %v2281_v42 = vadd.f32 %v2280_v41, %v2240_v33 }
 0x178   : > { %v2282_v43 = vpop.f32.mrf.mxu0 }
 0x179   : > { %v2283_v45 = vadd.f32 %v2282_v43, %v2242_v37 }
 0x17a   : > { %v2284_v31 = vpop.f32.mrf.mxu0 }
 0x17b   : > { %v2496_v46 = vcombine.low %v2281_v42, %v2283_v45 }
 0x17c   : > { %v2285_v4 = vpop.f32.mrf.mxu0 }
 0x17d   : > { %v2504_v17 = vrot.slane %v2496_v46, %v2503_v10 }
 0x197   : > { %v2321_v61 = vpop.f32.mrf.mxu1 }
 0x199   : > { %v2323_v47 = vpop.f32.mrf.mxu1 }
 0x19b   : > { %v2325_v48 = vpop.f32.mrf.mxu1 }
 0x19d   : > { %v2326_v49 = vpop.f32.mrf.mxu1 }
 0x1b6   : > { %v2362_v51 = vpop.f32.mrf.mxu0 }
 0x1b7   : > { %v2363_v59 = vadd.f32 %v2362_v51, %v2321_v61 }
 0x1b8   : > { %v2364_v52 = vpop.f32.mrf.mxu0 }
 0x1b9   : > { %v2365_v60 = vadd.f32 %v2364_v52, %v2323_v47 }
 0x1ba   : > { %v2366_v14 = vpop.f32.mrf.mxu0 }
 0x1bc   : > { %v2367_v53 = vpop.f32.mrf.mxu0 }
 0x1d7   : > { %v2403_v54 = vpop.f32.mrf.mxu1 }
 0x1d8   : > { %v2404_v62 = vadd.f32 %v2403_v54, %v2363_v59 }
 0x1d9   : > { %v2405_v55 = vpop.f32.mrf.mxu1 }
 0x1da   : > { %v2406_v2 = vadd.f32 %v2405_v55, %v2365_v60 }
 0x1db   : > { %v2407_v56 = vpop.f32.mrf.mxu1 }
 0x1dd   : > { %v2408_v18 = vpop.f32.mrf.mxu1 }
 0x1f6   : > { %v2444_v26 = vpop.f32.mrf.mxu0 }
 0x1f7   : > { %v2485_v63 = vpop.f32.mrf.mxu1  ;;  %v2445_v3 = vadd.f32 %v2444_v26, %v2404_v62 }
 0x1f8   : > { %v2446_v5 = vpop.f32.mrf.mxu0 }
 0x1f9   : > { %v2487_v6 = vpop.f32.mrf.mxu1  ;;  %v2447_v8 = vadd.f32 %v2446_v5, %v2406_v2  ;;  %v2486_v11 = vadd.f32 %v2485_v63, %v2445_v3 }
 0x1fa   : > { %v2448_v39 = vpop.f32.mrf.mxu0 }
 0x1fb   : > { %v2489_v9 = vpop.f32.mrf.mxu1  ;;  %v2488_v12 = vadd.f32 %v2487_v6, %v2447_v8 }
 0x1fc   : > { %v2449_v13 = vpop.f32.mrf.mxu0 }
 0x1fd   : > { %v2490_v15 = vpop.f32.mrf.mxu1  ;;  %v2497_v16 = vcombine.low %v2486_v11, %v2488_v12 }
 0x1ff   : > { %v2511_v20 = vrot.slane %v2497_v16, %v2503_v10 }
 0x201   : > { %v2512_v22 = vcombine.low %v2504_v17, %v2511_v20  ;;  %2519 = sbr.rel (%p3095_p7) target bundleno = 553 (0x229), region = 36 }
 0x203   : > { %v2514_v1 = vadd.f32 %v2512_v22, %v277_v21 }
 0x205   : > { %2515 = vst [vmem:[#allocation2] sm:$0xff] %v2514_v1 }
 0x206   : > { %vm2577_vm0 = vcmask 1041408  }
 0x20c   : > { %v2520_v23 = vld [vmem:[#allocation2] sm:$0xff] }
 0x20d   : > { %v2522_v25 = vcombine.high %v2520_v23, %v2520_v23  ;;  %v2529_v19 = vrot.slane %v2520_v23, %v2503_v10  ;;  %v2606_v27 = vmul.f32 %v2520_v23, %v2520_v23 }
 0x20f   : > { %v2536_v44 = vrot.slane %v2522_v25, %v2503_v10  ;;  %v2537_v28 = vcombine.high %v2529_v19, %v2529_v19  ;;  %v2578_v29 = vsel %vm2577_vm0, %v2529_v19, 0.0  ;;  %v2615_v24 = vrot.slane %v2606_v27, %v2503_v10 }
 0x210   : > { %v2579_v30 = vrot.slane %v2578_v29, 4  ;;  %v2608_v7 = vcombine.high %v2606_v27, %v2606_v27 }
 0x211   : > { %v2538_v32 = vcombine.high %v2536_v44, %v2536_v44  ;;  %v3096_v33 = vpack.c.bf16 %v2537_v28, %v2529_v19  ;;  %v2585_v34 = vsel %vm2577_vm0, %v2537_v28, 0.0  ;;  %v2592_v35 = vsel %vm2577_vm0, %v2536_v44, 0.0 }
 0x212   : > { %v2580_v36 = vadd.f32 %v2579_v30, %v2578_v29  ;;  %v2586_v37 = vrot.slane %v2585_v34, 4  ;;  %v2593_v38 = vrot.slane %v2592_v35, 4  ;;  %v2629_v40 = vsel %vm2577_vm0, %v2615_v24, 0.0 }
 0x213   : > { %v3097_v41 = vpack.c.bf16 %v2538_v32, %v2536_v44  ;;  %v2559_v42 = vrot.slane %v3096_v33, %v3700_v50  ;;  %v2599_v43 = vsel %vm2577_vm0, %v2538_v32, 0.0  ;;  %v2630_v45 = vrot.slane %v2629_v40, 4 }
 0x214   : > { %v2581_v31 = vrot.slane %v2580_v36, 2  ;;  %v2587_v46 = vadd.f32 %v2586_v37, %v2585_v34  ;;  %v2594_v4 = vadd.f32 %v2593_v38, %v2592_v35  ;;  %v2600_v61 = vrot.slane %v2599_v43, 4 }
 0x215   : > { %v2566_v47 = vrot.slane %v3097_v41, %v3700_v50  ;;  %v2631_v48 = vadd.f32 %v2630_v45, %v2629_v40  ;;  %v2623_v49 = vcombine.high %v2615_v24, %v2615_v24  ;;  %v2622_v51 = vrot.slane %v2608_v7, %v2503_v10 }
 0x216   : > { %v2582_v52 = vadd.f32 %v2581_v31, %v2580_v36  ;;  %v2588_v14 = vrot.slane %v2587_v46, 2  ;;  %v2595_v53 = vrot.slane %v2594_v4, 2  ;;  %v2601_v54 = vadd.f32 %v2600_v61, %v2599_v43 }
 0x217   : > { %v2567_v55 = vcombine.low %v2559_v42, %v2566_v47  ;;  %v2632_v56 = vrot.slane %v2631_v48, 2  ;;  %v2636_v18 = vsel %vm2577_vm0, %v2623_v49, 0.0  ;;  %v2643_v57 = vsel %vm2577_vm0, %v2622_v51, 0.0 }
 0x218   : > { %v2583_v58 = vrot.slane %v2582_v52, 1  ;;  %v2589_v59 = vadd.f32 %v2588_v14, %v2587_v46  ;;  %v2596_v60 = vadd.f32 %v2595_v53, %v2594_v4  ;;  %v2602_v62 = vrot.slane %v2601_v54, 2 }
 0x219   : > { %3098 = vst.sshfl [vmem:[%s4059_s2] sm:$0x55 pattern:$0x73625140] %v2567_v55  ;;  %v2633_v50 = vadd.f32 %v2632_v56, %v2631_v48  ;;  %v2637_v26 = vrot.slane %v2636_v18, 4  ;;  %v2644_v63 = vrot.slane %v2643_v57, 4  ;;  %v2624_v0 = vcombine.high %v2622_v51, %v2622_v51 }
 0x21a   : > { %v2584_v2 = vadd.f32 %v2583_v58, %v2582_v52  ;;  %v2590_v3 = vrot.slane %v2589_v59, 1  ;;  %v2597_v5 = vrot.slane %v2596_v60, 1  ;;  %v2603_v6 = vadd.f32 %v2602_v62, %v2601_v54 }
 0x21b   : > { %v2634_v8 = vrot.slane %v2633_v50, 1  ;;  %v2638_v39 = vadd.f32 %v2637_v26, %v2636_v18  ;;  %v2645_v9 = vadd.f32 %v2644_v63, %v2643_v57  ;;  %v2650_v10 = vsel %vm2577_vm0, %v2624_v0, 0.0 }
 0x21c   : > { %2657 = vst [vmem:[%s4060_s3] sm:$0xff] %v2584_v2  ;;  %v2591_v11 = vadd.f32 %v2590_v3, %v2589_v59  ;;  %v2598_v12 = vadd.f32 %v2597_v5, %v2596_v60  ;;  %v2604_v13 = vrot.slane %v2603_v6, 1  ;;  %v2651_v15 = vrot.slane %v2650_v10, 4 }
 0x21d   : > { %v2635_v16 = vadd.f32 %v2634_v8, %v2633_v50  ;;  %v2639_v17 = vrot.slane %v2638_v39, 2  ;;  %v2646_v20 = vrot.slane %v2645_v9, 2 }
 0x21e   : > { %2658 = vst [vmem:[%s4060_s3 + $0x8] sm:$0xff] %v2591_v11  ;;  %2659 = vst [vmem:[%s4060_s3 + $0x10] sm:$0xff] %v2598_v12  ;;  %v2605_v21 = vadd.f32 %v2604_v13, %v2603_v6  ;;  %v2652_v22 = vadd.f32 %v2651_v15, %v2650_v10 }
 0x21f   : > { %2661 = vst [vmem:[%s4061_s4] sm:$0xff] %v2635_v16  ;;  %v2640_v1 = vadd.f32 %v2639_v17, %v2638_v39  ;;  %v2647_v23 = vadd.f32 %v2646_v20, %v2645_v9 }
 0x220   : > { %2660 = vst [vmem:[%s4060_s3 + $0x18] sm:$0xff] %v2605_v21  ;;  %v2653_v25 = vrot.slane %v2652_v22, 2 }
 0x221   : > { %v2641_v19 = vrot.slane %v2640_v1, 1  ;;  %v2648_v27 = vrot.slane %v2647_v23, 1 }
 0x222   : > { %v2654_v44 = vadd.f32 %v2653_v25, %v2652_v22 }
 0x223   : > { %v2642_v28 = vadd.f32 %v2641_v19, %v2640_v1  ;;  %v2649_v29 = vadd.f32 %v2648_v27, %v2647_v23 }
 0x224   : > { %v2655_v30 = vrot.slane %v2654_v44, 1 }
 0x225   : > { %2662 = vst [vmem:[%s4061_s4 + $0x8] sm:$0xff] %v2642_v28  ;;  %2663 = vst [vmem:[%s4061_s4 + $0x10] sm:$0xff] %v2649_v29 }
 0x226   : > { %v2656_v24 = vadd.f32 %v2655_v30, %v2654_v44 }
 0x228   : > { %2664 = vst [vmem:[%s4061_s4 + $0x18] sm:$0xff] %v2656_v24 }
 0x229 PF: > { %s15_s17 = sadd.s32 1, %s3589_s17   ;;  %s4062_s15 = smov %s3585_s16 }
 0x22a   : > { %p12_p8 = scmp.ge.s32.totalorder %s15_s17, 6   ;;  %s4063_s16 = smov %s4065_s18 }
 0x22c   :  { %14 = sbr.rel (!%p12_p8) target bundleno = 2 (0x2), region = 93 }

// kernel: discriminator_forward.31
= control target key start
LH: loop header
LB: loop body
LE: loop exit
PB: predicated region body
PF: predicated region fallthrough
CT: control target
= control target key end

     0   :  { %vm616_vm0 = vcmask 1041409   ;;  %vm1267_vm6 = vcmask 1041408   ;;  %vm1299_vm10 = vcmask 1024   ;;  %s2986_s1 = inlined_call_operand.vmem [shape: f32[512,1024], index: 1, kind: input, shape index: {}]   ;;  %s2987_s0 = inlined_call_operand.vmem [shape: bf16[2,1,512], index: 0, kind: input, shape index: {}]   ;;  %s2988_s4 = inlined_call_operand.<no memory space> [shape: f32[1,1], index: 4, kind: input, shape index: {}]   ;;  %s2989_s2 = inlined_call_operand.vmem [shape: f32[1,1024], index: 2, kind: input, shape index: {}]   ;;  %s2990_s3 = inlined_call_operand.vmem [shape: f32[1,1024], index: 3, kind: input, shape index: {}]   ;;  %s2991_s5 = inlined_call_operand.vmem [shape: f32[2,1], index: 5, kind: output, shape index: {}]  }
   0x1   :  { %v149_v0 = vld [vmem:[%s2986_s1 + $0x3c8] sm:$0xff]  ;;  %v148_v2 = vld [vmem:[%s2986_s1 + $0x3c0] sm:$0xff] }
   0x2   :  { %v405_v1 = vld [vmem:[%s2986_s1 + $0xbc8] sm:$0xff]  ;;  %625 = vmatprep.subr.mxu0 %v149_v0  ;;  %v404_v3 = vld [vmem:[%s2986_s1 + $0xbc0] sm:$0xff] }
   0x3   :  { %696 = vmatprep.subr.mxu1 %v405_v1  ;;  %v141_v4 = vld [vmem:[%s2986_s1 + $0x388] sm:$0xff]  ;;  %626 = vmatpush1.msra.mxu0 %v148_v2  ;;  %v140_v6 = vld [vmem:[%s2986_s1 + $0x380] sm:$0xff] }
   0x4   :  { %v397_v5 = vld [vmem:[%s2986_s1 + $0xb88] sm:$0xff]  ;;  %697 = vmatpush1.msra.mxu1 %v404_v3  ;;  %v396_v7 = vld [vmem:[%s2986_s1 + $0xb80] sm:$0xff]  ;;  %627 = vmatprep.subr.mxu0 %v141_v4 }
   0x5   :  { %v133_v8 = vld [vmem:[%s2986_s1 + $0x348] sm:$0xff]  ;;  %698 = vmatprep.subr.mxu1 %v397_v5  ;;  %v132_v10 = vld [vmem:[%s2986_s1 + $0x340] sm:$0xff]  ;;  %628 = vmatpush1.msra.mxu0 %v140_v6 }
   0x6   :  { %v389_v9 = vld [vmem:[%s2986_s1 + $0xb48] sm:$0xff]  ;;  %v388_v11 = vld [vmem:[%s2986_s1 + $0xb40] sm:$0xff]  ;;  %699 = vmatpush1.msra.mxu1 %v396_v7  ;;  %629 = vmatprep.subr.mxu0 %v133_v8 }
   0x7   :  { %v125_v12 = vld [vmem:[%s2986_s1 + $0x308] sm:$0xff]  ;;  %700 = vmatprep.subr.mxu1 %v389_v9  ;;  %v124_v14 = vld [vmem:[%s2986_s1 + $0x300] sm:$0xff]  ;;  %630 = vmatpush1.msra.mxu0 %v132_v10 }
   0x8   :  { %v381_v13 = vld [vmem:[%s2986_s1 + $0xb08] sm:$0xff]  ;;  %v380_v15 = vld [vmem:[%s2986_s1 + $0xb00] sm:$0xff]  ;;  %701 = vmatpush1.msra.mxu1 %v388_v11  ;;  %631 = vmatprep.subr.mxu0 %v125_v12 }
   0x9   :  { %v117_v16 = vld [vmem:[%s2986_s1 + $0x2c8] sm:$0xff]  ;;  %702 = vmatprep.subr.mxu1 %v381_v13  ;;  %v116_v18 = vld [vmem:[%s2986_s1 + $0x2c0] sm:$0xff]  ;;  %632 = vmatpush1.msra.mxu0 %v124_v14 }
   0xa   :  { %v373_v17 = vld [vmem:[%s2986_s1 + $0xac8] sm:$0xff]  ;;  %v372_v19 = vld [vmem:[%s2986_s1 + $0xac0] sm:$0xff]  ;;  %703 = vmatpush1.msra.mxu1 %v380_v15  ;;  %633 = vmatprep.subr.mxu0 %v117_v16 }
   0xb   :  { %v109_v20 = vld [vmem:[%s2986_s1 + $0x288] sm:$0xff]  ;;  %704 = vmatprep.subr.mxu1 %v373_v17  ;;  %v108_v22 = vld [vmem:[%s2986_s1 + $0x280] sm:$0xff]  ;;  %634 = vmatpush1.msra.mxu0 %v116_v18 }
   0xc   :  { %v365_v21 = vld [vmem:[%s2986_s1 + $0xa88] sm:$0xff]  ;;  %v364_v23 = vld [vmem:[%s2986_s1 + $0xa80] sm:$0xff]  ;;  %705 = vmatpush1.msra.mxu1 %v372_v19  ;;  %635 = vmatprep.subr.mxu0 %v109_v20 }
   0xd   :  { %v101_v24 = vld [vmem:[%s2986_s1 + $0x248] sm:$0xff]  ;;  %706 = vmatprep.subr.mxu1 %v365_v21  ;;  %v100_v26 = vld [vmem:[%s2986_s1 + $0x240] sm:$0xff]  ;;  %636 = vmatpush1.msra.mxu0 %v108_v22 }
   0xe   :  { %v357_v25 = vld [vmem:[%s2986_s1 + $0xa48] sm:$0xff]  ;;  %v356_v27 = vld [vmem:[%s2986_s1 + $0xa40] sm:$0xff]  ;;  %707 = vmatpush1.msra.mxu1 %v364_v23  ;;  %637 = vmatprep.subr.mxu0 %v101_v24 }
   0xf   :  { %v93_v28 = vld [vmem:[%s2986_s1 + $0x208] sm:$0xff]  ;;  %708 = vmatprep.subr.mxu1 %v357_v25  ;;  %v92_v30 = vld [vmem:[%s2986_s1 + $0x200] sm:$0xff]  ;;  %638 = vmatpush1.msra.mxu0 %v100_v26 }
  0x10   :  { %v349_v29 = vld [vmem:[%s2986_s1 + $0xa08] sm:$0xff]  ;;  %v348_v31 = vld [vmem:[%s2986_s1 + $0xa00] sm:$0xff]  ;;  %709 = vmatpush1.msra.mxu1 %v356_v27  ;;  %639 = vmatprep.subr.mxu0 %v93_v28 }
  0x11   :  { %v85_v32 = vld [vmem:[%s2986_s1 + $0x1c8] sm:$0xff]  ;;  %710 = vmatprep.subr.mxu1 %v349_v29  ;;  %v84_v34 = vld [vmem:[%s2986_s1 + $0x1c0] sm:$0xff]  ;;  %640 = vmatpush1.msra.mxu0 %v92_v30 }
  0x12   :  { %v341_v33 = vld [vmem:[%s2986_s1 + $0x9c8] sm:$0xff]  ;;  %v340_v35 = vld [vmem:[%s2986_s1 + $0x9c0] sm:$0xff]  ;;  %711 = vmatpush1.msra.mxu1 %v348_v31  ;;  %641 = vmatprep.subr.mxu0 %v85_v32  ;;  %v542_v32 = vlaneseq }
  0x13   :  { %v77_v36 = vld [vmem:[%s2986_s1 + $0x188] sm:$0xff]  ;;  %712 = vmatprep.subr.mxu1 %v341_v33  ;;  %v76_v38 = vld [vmem:[%s2986_s1 + $0x180] sm:$0xff]  ;;  %642 = vmatpush1.msra.mxu0 %v84_v34 }
  0x14   :  { %v333_v37 = vld [vmem:[%s2986_s1 + $0x988] sm:$0xff]  ;;  %v332_v39 = vld [vmem:[%s2986_s1 + $0x980] sm:$0xff]  ;;  %713 = vmatpush1.msra.mxu1 %v340_v35  ;;  %643 = vmatprep.subr.mxu0 %v77_v36 }
  0x15   :  { %v69_v40 = vld [vmem:[%s2986_s1 + $0x148] sm:$0xff]  ;;  %714 = vmatprep.subr.mxu1 %v333_v37  ;;  %v68_v42 = vld [vmem:[%s2986_s1 + $0x140] sm:$0xff]  ;;  %644 = vmatpush1.msra.mxu0 %v76_v38 }
  0x16   :  { %v325_v41 = vld [vmem:[%s2986_s1 + $0x948] sm:$0xff]  ;;  %v324_v43 = vld [vmem:[%s2986_s1 + $0x940] sm:$0xff]  ;;  %715 = vmatpush1.msra.mxu1 %v332_v39  ;;  %645 = vmatprep.subr.mxu0 %v69_v40 }
  0x17   :  { %v61_v44 = vld [vmem:[%s2986_s1 + $0x108] sm:$0xff]  ;;  %716 = vmatprep.subr.mxu1 %v325_v41  ;;  %v60_v46 = vld [vmem:[%s2986_s1 + $0x100] sm:$0xff]  ;;  %646 = vmatpush1.msra.mxu0 %v68_v42  ;;  %v1657_v41 = vshrl.u32 %v542_v32, 7  ;;  %v390_v32 = vld [vmem:[%s2986_s1 + $0xb50] sm:$0xff] }
  0x18   :  { %v317_v45 = vld [vmem:[%s2986_s1 + $0x908] sm:$0xff]  ;;  %v316_v47 = vld [vmem:[%s2986_s1 + $0x900] sm:$0xff]  ;;  %717 = vmatpush1.msra.mxu1 %v324_v43  ;;  %647 = vmatprep.subr.mxu0 %v61_v44 }
  0x19   :  { %v53_v48 = vld [vmem:[%s2986_s1 + $0xc8] sm:$0xff]  ;;  %718 = vmatprep.subr.mxu1 %v317_v45  ;;  %v52_v50 = vld [vmem:[%s2986_s1 + $0xc0] sm:$0xff]  ;;  %648 = vmatpush1.msra.mxu0 %v60_v46 }
  0x1a   :  { %v309_v49 = vld [vmem:[%s2986_s1 + $0x8c8] sm:$0xff]  ;;  %v308_v51 = vld [vmem:[%s2986_s1 + $0x8c0] sm:$0xff]  ;;  %719 = vmatpush1.msra.mxu1 %v316_v47  ;;  %649 = vmatprep.subr.mxu0 %v53_v48 }
  0x1b   :  { %v45_v52 = vld [vmem:[%s2986_s1 + $0x88] sm:$0xff]  ;;  %720 = vmatprep.subr.mxu1 %v309_v49  ;;  %v44_v54 = vld [vmem:[%s2986_s1 + $0x80] sm:$0xff]  ;;  %650 = vmatpush1.msra.mxu0 %v52_v50 }
  0x1c   :  { %v301_v53 = vld [vmem:[%s2986_s1 + $0x888] sm:$0xff]  ;;  %v300_v55 = vld [vmem:[%s2986_s1 + $0x880] sm:$0xff]  ;;  %721 = vmatpush1.msra.mxu1 %v308_v51  ;;  %651 = vmatprep.subr.mxu0 %v45_v52 }
  0x1d   :  { %v37_v56 = vld [vmem:[%s2986_s1 + $0x48] sm:$0xff]  ;;  %722 = vmatprep.subr.mxu1 %v301_v53  ;;  %v36_v58 = vld [vmem:[%s2986_s1 + $0x40] sm:$0xff]  ;;  %652 = vmatpush1.msra.mxu0 %v44_v54  ;;  %v1687_v53 = vsub.s32 2, %v1657_v41 }
  0x1e   :  { %v293_v57 = vld [vmem:[%s2986_s1 + $0x848] sm:$0xff]  ;;  %v292_v59 = vld [vmem:[%s2986_s1 + $0x840] sm:$0xff]  ;;  %723 = vmatpush1.msra.mxu1 %v300_v55  ;;  %653 = vmatprep.subr.mxu0 %v37_v56  ;;  %v1696_v56 = vsub.s32 0, %v1657_v41 }
  0x1f   :  { %v29_v60 = vld [vmem:[%s2986_s1 + $0x8] sm:$0xff]  ;;  %724 = vmatprep.subr.mxu1 %v293_v57  ;;  %v28_v62 = vld [vmem:[%s2986_s1] sm:$0xff]  ;;  %654 = vmatpush1.msra.mxu0 %v36_v58 }
  0x20   :  { %v285_v61 = vld [vmem:[%s2986_s1 + $0x808] sm:$0xff]  ;;  %v284_v63 = vld [vmem:[%s2986_s1 + $0x800] sm:$0xff]  ;;  %725 = vmatpush1.msra.mxu1 %v292_v59  ;;  %655 = vmatprep.subr.mxu0 %v29_v60  ;;  %v1705_v59 = vsub.s32 6, %v1657_v41 }
  0x21   :  { %v277_v0 = vld [vmem:[%s2986_s1 + $0x7c8] sm:$0xff]  ;;  %726 = vmatprep.subr.mxu1 %v285_v61  ;;  %v276_v2 = vld [vmem:[%s2986_s1 + $0x7c0] sm:$0xff]  ;;  %656 = vmatpush1.msra.mxu0 %v28_v62  ;;  %v1714_v62 = vsub.s32 4, %v1657_v41 }
  0x22   :  { %v533_v1 = vld [vmem:[%s2986_s1 + $0xfc8] sm:$0xff]  ;;  %v532_v3 = vld [vmem:[%s2986_s1 + $0xfc0] sm:$0xff]  ;;  %727 = vmatpush1.msra.mxu1 %v284_v63  ;;  %657 = vmatprep.subr.mxu0 %v277_v0 }
  0x23   :  { %v269_v4 = vld [vmem:[%s2986_s1 + $0x788] sm:$0xff]  ;;  %728 = vmatprep.subr.mxu1 %v533_v1  ;;  %v268_v6 = vld [vmem:[%s2986_s1 + $0x780] sm:$0xff]  ;;  %658 = vmatpush2.msra.mxu0 %v276_v2 }
  0x24   :  { %v525_v5 = vld [vmem:[%s2986_s1 + $0xf88] sm:$0xff]  ;;  %v524_v7 = vld [vmem:[%s2986_s1 + $0xf80] sm:$0xff]  ;;  %729 = vmatpush2.msra.mxu1 %v532_v3  ;;  %659 = vmatprep.subr.mxu0 %v269_v4 }
  0x25   :  { %v261_v8 = vld [vmem:[%s2986_s1 + $0x748] sm:$0xff]  ;;  %730 = vmatprep.subr.mxu1 %v525_v5  ;;  %v260_v10 = vld [vmem:[%s2986_s1 + $0x740] sm:$0xff]  ;;  %660 = vmatpush2.msra.mxu0 %v268_v6 }
  0x26   :  { %v517_v9 = vld [vmem:[%s2986_s1 + $0xf48] sm:$0xff]  ;;  %v516_v11 = vld [vmem:[%s2986_s1 + $0xf40] sm:$0xff]  ;;  %731 = vmatpush2.msra.mxu1 %v524_v7  ;;  %661 = vmatprep.subr.mxu0 %v261_v8 }
  0x27   :  { %v253_v12 = vld [vmem:[%s2986_s1 + $0x708] sm:$0xff]  ;;  %732 = vmatprep.subr.mxu1 %v517_v9  ;;  %v252_v14 = vld [vmem:[%s2986_s1 + $0x700] sm:$0xff]  ;;  %662 = vmatpush2.msra.mxu0 %v260_v10 }
  0x28   :  { %v509_v13 = vld [vmem:[%s2986_s1 + $0xf08] sm:$0xff]  ;;  %v508_v15 = vld [vmem:[%s2986_s1 + $0xf00] sm:$0xff]  ;;  %733 = vmatpush2.msra.mxu1 %v516_v11  ;;  %663 = vmatprep.subr.mxu0 %v253_v12 }
  0x29   :  { %v245_v16 = vld [vmem:[%s2986_s1 + $0x6c8] sm:$0xff]  ;;  %734 = vmatprep.subr.mxu1 %v509_v13  ;;  %v244_v18 = vld [vmem:[%s2986_s1 + $0x6c0] sm:$0xff]  ;;  %664 = vmatpush2.msra.mxu0 %v252_v14 }
  0x2a   :  { %v501_v17 = vld [vmem:[%s2986_s1 + $0xec8] sm:$0xff]  ;;  %v500_v19 = vld [vmem:[%s2986_s1 + $0xec0] sm:$0xff]  ;;  %735 = vmatpush2.msra.mxu1 %v508_v15  ;;  %665 = vmatprep.subr.mxu0 %v245_v16 }
  0x2b   :  { %v237_v20 = vld [vmem:[%s2986_s1 + $0x688] sm:$0xff]  ;;  %736 = vmatprep.subr.mxu1 %v501_v17  ;;  %v236_v22 = vld [vmem:[%s2986_s1 + $0x680] sm:$0xff]  ;;  %666 = vmatpush2.msra.mxu0 %v244_v18 }
  0x2c   :  { %v493_v21 = vld [vmem:[%s2986_s1 + $0xe88] sm:$0xff]  ;;  %v492_v23 = vld [vmem:[%s2986_s1 + $0xe80] sm:$0xff]  ;;  %737 = vmatpush2.msra.mxu1 %v500_v19  ;;  %667 = vmatprep.subr.mxu0 %v237_v20  ;;  %v151_v20 = vld [vmem:[%s2986_s1 + $0x3d8] sm:$0xff] }
  0x2d   :  { %v229_v24 = vld [vmem:[%s2986_s1 + $0x648] sm:$0xff]  ;;  %738 = vmatprep.subr.mxu1 %v493_v21  ;;  %v228_v26 = vld [vmem:[%s2986_s1 + $0x640] sm:$0xff]  ;;  %668 = vmatpush2.msra.mxu0 %v236_v22  ;;  %v407_v21 = vld [vmem:[%s2986_s1 + $0xbd8] sm:$0xff] }
  0x2e   :  { %v485_v25 = vld [vmem:[%s2986_s1 + $0xe48] sm:$0xff]  ;;  %v484_v27 = vld [vmem:[%s2986_s1 + $0xe40] sm:$0xff]  ;;  %739 = vmatpush2.msra.mxu1 %v492_v23  ;;  %669 = vmatprep.subr.mxu0 %v229_v24  ;;  %v150_v23 = vld [vmem:[%s2986_s1 + $0x3d0] sm:$0xff] }
  0x2f   :  { %v221_v28 = vld [vmem:[%s2986_s1 + $0x608] sm:$0xff]  ;;  %740 = vmatprep.subr.mxu1 %v485_v25  ;;  %v220_v30 = vld [vmem:[%s2986_s1 + $0x600] sm:$0xff]  ;;  %670 = vmatpush2.msra.mxu0 %v228_v26  ;;  %v406_v24 = vld [vmem:[%s2986_s1 + $0xbd0] sm:$0xff] }
  0x30   :  { %v477_v29 = vld [vmem:[%s2986_s1 + $0xe08] sm:$0xff]  ;;  %v476_v31 = vld [vmem:[%s2986_s1 + $0xe00] sm:$0xff]  ;;  %741 = vmatpush2.msra.mxu1 %v484_v27  ;;  %671 = vmatprep.subr.mxu0 %v221_v28  ;;  %v143_v25 = vld [vmem:[%s2986_s1 + $0x398] sm:$0xff] }
  0x31   :  { %v213_v33 = vld [vmem:[%s2986_s1 + $0x5c8] sm:$0xff]  ;;  %742 = vmatprep.subr.mxu1 %v477_v29  ;;  %v212_v35 = vld [vmem:[%s2986_s1 + $0x5c0] sm:$0xff]  ;;  %672 = vmatpush2.msra.mxu0 %v220_v30  ;;  %v399_v26 = vld [vmem:[%s2986_s1 + $0xb98] sm:$0xff] }
  0x32   :  { %v469_v34 = vld [vmem:[%s2986_s1 + $0xdc8] sm:$0xff]  ;;  %v468_v36 = vld [vmem:[%s2986_s1 + $0xdc0] sm:$0xff]  ;;  %743 = vmatpush2.msra.mxu1 %v476_v31  ;;  %673 = vmatprep.subr.mxu0 %v213_v33  ;;  %v142_v27 = vld [vmem:[%s2986_s1 + $0x390] sm:$0xff] }
  0x33   :  { %v205_v37 = vld [vmem:[%s2986_s1 + $0x588] sm:$0xff]  ;;  %744 = vmatprep.subr.mxu1 %v469_v34  ;;  %v204_v39 = vld [vmem:[%s2986_s1 + $0x580] sm:$0xff]  ;;  %674 = vmatpush2.msra.mxu0 %v212_v35  ;;  %v398_v28 = vld [vmem:[%s2986_s1 + $0xb90] sm:$0xff] }
  0x34   :  { %v461_v38 = vld [vmem:[%s2986_s1 + $0xd88] sm:$0xff]  ;;  %v460_v40 = vld [vmem:[%s2986_s1 + $0xd80] sm:$0xff]  ;;  %745 = vmatpush2.msra.mxu1 %v468_v36  ;;  %675 = vmatprep.subr.mxu0 %v205_v37  ;;  %v135_v29 = vld [vmem:[%s2986_s1 + $0x358] sm:$0xff] }
  0x35   :  { %v197_v42 = vld [vmem:[%s2986_s1 + $0x548] sm:$0xff]  ;;  %v1308_v44 = vld [vmem:[%s2987_s0] sm:$0xff]   ;;  %746 = vmatprep.subr.mxu1 %v461_v38  ;;  %676 = vmatpush2.msra.mxu0 %v204_v39  ;;  %v391_v30 = vld [vmem:[%s2986_s1 + $0xb58] sm:$0xff] }
  0x36   :  { %v453_v43 = vld [vmem:[%s2986_s1 + $0xd48] sm:$0xff]  ;;  %v196_v45 = vld [vmem:[%s2986_s1 + $0x540] sm:$0xff]  ;;  %747 = vmatpush2.msra.mxu1 %v460_v40  ;;  %677 = vmatprep.subr.mxu0 %v197_v42  ;;  %v1309_v51 = vunpack.c.l.bf16 %v1308_v44  ;;  %v1310_v52 = vunpack.c.h.bf16 %v1308_v44  ;;  %v134_v31 = vld [vmem:[%s2986_s1 + $0x350] sm:$0xff] }
  0x37   :  { %v452_v46 = vld [vmem:[%s2986_s1 + $0xd40] sm:$0xff]  ;;  %v189_v47 = vld [vmem:[%s2986_s1 + $0x508] sm:$0xff]  ;;  %748 = vmatprep.subr.mxu1 %v453_v43  ;;  %678 = vmatpush2.msra.mxu0 %v196_v45  ;;  %v127_v33 = vld [vmem:[%s2986_s1 + $0x318] sm:$0xff] }
  0x38   :  { %v445_v48 = vld [vmem:[%s2986_s1 + $0xd08] sm:$0xff]  ;;  %v188_v49 = vld [vmem:[%s2986_s1 + $0x500] sm:$0xff]  ;;  %749 = vmatpush2.msra.mxu1 %v452_v46  ;;  %679 = vmatprep.subr.mxu0 %v189_v47  ;;  %v591_v1 = vrot.slane %v1309_v51, %v1687_v53  ;;  %v607_v2 = vrot.slane %v1310_v52, %v1687_v53  ;;  %v587_v5 = vrot.slane %v1309_v51, %v1696_v56  ;;  %v383_v34 = vld [vmem:[%s2986_s1 + $0xb18] sm:$0xff] }
  0x39   :  { %v444_v50 = vld [vmem:[%s2986_s1 + $0xd00] sm:$0xff]  ;;  %v181_v54 = vld [vmem:[%s2986_s1 + $0x4c8] sm:$0xff]  ;;  %750 = vmatprep.subr.mxu1 %v445_v48  ;;  %680 = vmatpush2.msra.mxu0 %v188_v49  ;;  %v603_v6 = vrot.slane %v1310_v52, %v1696_v56  ;;  %v599_v9 = vrot.slane %v1309_v51, %v1705_v59  ;;  %v615_v10 = vrot.slane %v1310_v52, %v1705_v59  ;;  %v126_v35 = vld [vmem:[%s2986_s1 + $0x310] sm:$0xff] }
  0x3a   :  { %v437_v55 = vld [vmem:[%s2986_s1 + $0xcc8] sm:$0xff]  ;;  %v180_v57 = vld [vmem:[%s2986_s1 + $0x4c0] sm:$0xff]  ;;  %751 = vmatpush2.msra.mxu1 %v444_v50  ;;  %681 = vmatprep.subr.mxu0 %v181_v54  ;;  %v595_v13 = vrot.slane %v1309_v51, %v1714_v62  ;;  %v611_v14 = vrot.slane %v1310_v52, %v1714_v62  ;;  %v1752_v16 = vsel %vm616_vm0, %v607_v2, %v591_v1  ;;  %v382_v36 = vld [vmem:[%s2986_s1 + $0xb10] sm:$0xff] }
  0x3b   :  { %v436_v58 = vld [vmem:[%s2986_s1 + $0xcc0] sm:$0xff]  ;;  %v173_v60 = vld [vmem:[%s2986_s1 + $0x488] sm:$0xff]  ;;  %752 = vmatprep.subr.mxu1 %v437_v55  ;;  %682 = vmatpush2.msra.mxu0 %v180_v57  ;;  %v1758_v18 = vsel %vm616_vm0, %v603_v6, %v587_v5  ;;  %v1761_v19 = vsel %vm616_vm0, %v615_v10, %v599_v9  ;;  %v119_v37 = vld [vmem:[%s2986_s1 + $0x2d8] sm:$0xff] }
  0x3c   :  { %v429_v61 = vld [vmem:[%s2986_s1 + $0xc88] sm:$0xff]  ;;  %v172_v63 = vld [vmem:[%s2986_s1 + $0x480] sm:$0xff]  ;;  %753 = vmatpush2.msra.mxu1 %v436_v58  ;;  %683 = vmatprep.subr.mxu0 %v173_v60  ;;  %v1771_v22 = vsel %vm616_vm0, %v611_v14, %v595_v13  ;;  %v375_v38 = vld [vmem:[%s2986_s1 + $0xad8] sm:$0xff] }
  0x3d   :  { %v428_v0 = vld [vmem:[%s2986_s1 + $0xc80] sm:$0xff]  ;;  %v165_v3 = vld [vmem:[%s2986_s1 + $0x448] sm:$0xff]  ;;  %754 = vmatprep.subr.mxu1 %v429_v61  ;;  %684 = vmatpush2.msra.mxu0 %v172_v63  ;;  %v118_v39 = vld [vmem:[%s2986_s1 + $0x2d0] sm:$0xff] }
  0x3e   :  { %v421_v4 = vld [vmem:[%s2986_s1 + $0xc48] sm:$0xff]  ;;  %v164_v7 = vld [vmem:[%s2986_s1 + $0x440] sm:$0xff]  ;;  %755 = vmatpush2.msra.mxu1 %v428_v0  ;;  %685 = vmatprep.subr.mxu0 %v165_v3  ;;  %v374_v40 = vld [vmem:[%s2986_s1 + $0xad0] sm:$0xff] }
  0x3f   :  { %v420_v8 = vld [vmem:[%s2986_s1 + $0xc40] sm:$0xff]  ;;  %v157_v11 = vld [vmem:[%s2986_s1 + $0x408] sm:$0xff]  ;;  %756 = vmatprep.subr.mxu1 %v421_v4  ;;  %686 = vmatpush2.msra.mxu0 %v164_v7  ;;  %v111_v42 = vld [vmem:[%s2986_s1 + $0x298] sm:$0xff] }
  0x40   :  { %v413_v12 = vld [vmem:[%s2986_s1 + $0xc08] sm:$0xff]  ;;  %v156_v15 = vld [vmem:[%s2986_s1 + $0x400] sm:$0xff]  ;;  %757 = vmatpush2.msra.mxu1 %v420_v8  ;;  %687 = vmatprep.subr.mxu0 %v157_v11  ;;  %v367_v43 = vld [vmem:[%s2986_s1 + $0xa98] sm:$0xff] }
  0x41   :  { %v412_v17 = vld [vmem:[%s2986_s1 + $0xc00] sm:$0xff]  ;;  %758 = vmatprep.subr.mxu1 %v413_v12  ;;  %688 = vmatpush2.msra.mxu0 %v156_v15  ;;  %v110_v44 = vld [vmem:[%s2986_s1 + $0x290] sm:$0xff]  ;;  %v103_v46 = vld [vmem:[%s2986_s1 + $0x258] sm:$0xff] }
  0x42   :  { %689 = vmatprep.mubr.f32.mxu0 %v1752_v16  ;;  %759 = vmatpush2.msra.mxu1 %v412_v17  ;;  %v366_v45 = vld [vmem:[%s2986_s1 + $0xa90] sm:$0xff]  ;;  %v359_v47 = vld [vmem:[%s2986_s1 + $0xa58] sm:$0xff] }
  0x43   :  { %690 = vmatmul.mubr.f32.vlgmr.msra.gmra.mxu0 %v1758_v18  ;;  %760 = vmatprep.mubr.f32.mxu1 %v1761_v19  ;;  %v102_v48 = vld [vmem:[%s2986_s1 + $0x250] sm:$0xff]  ;;  %v95_v50 = vld [vmem:[%s2986_s1 + $0x218] sm:$0xff] }
  0x44   :  { %767 = vmatprep.subr.mxu0 %v151_v20  ;;  %838 = vmatprep.subr.mxu1 %v407_v21  ;;  %v358_v49 = vld [vmem:[%s2986_s1 + $0xa50] sm:$0xff]  ;;  %v351_v51 = vld [vmem:[%s2986_s1 + $0xa18] sm:$0xff] }
  0x45   :  { %761 = vmatmul.mubr.f32.vlgmr.msra.gmra.mxu1 %v1771_v22  ;;  %768 = vmatpush1.msra.mxu0 %v150_v23  ;;  %v94_v52 = vld [vmem:[%s2986_s1 + $0x210] sm:$0xff]  ;;  %v87_v55 = vld [vmem:[%s2986_s1 + $0x1d8] sm:$0xff] }
  0x46   :  { %839 = vmatpush1.msra.mxu1 %v406_v24  ;;  %769 = vmatprep.subr.mxu0 %v143_v25  ;;  %v350_v54 = vld [vmem:[%s2986_s1 + $0xa10] sm:$0xff]  ;;  %v343_v57 = vld [vmem:[%s2986_s1 + $0x9d8] sm:$0xff] }
  0x47   :  { %840 = vmatprep.subr.mxu1 %v399_v26  ;;  %770 = vmatpush1.msra.mxu0 %v142_v27  ;;  %v86_v58 = vld [vmem:[%s2986_s1 + $0x1d0] sm:$0xff]  ;;  %v79_v61 = vld [vmem:[%s2986_s1 + $0x198] sm:$0xff] }
  0x48   :  { %841 = vmatpush1.msra.mxu1 %v398_v28  ;;  %771 = vmatprep.subr.mxu0 %v135_v29  ;;  %v342_v60 = vld [vmem:[%s2986_s1 + $0x9d0] sm:$0xff]  ;;  %v335_v63 = vld [vmem:[%s2986_s1 + $0x998] sm:$0xff] }
  0x49   :  { %842 = vmatprep.subr.mxu1 %v391_v30  ;;  %772 = vmatpush1.msra.mxu0 %v134_v31  ;;  %v78_v0 = vld [vmem:[%s2986_s1 + $0x190] sm:$0xff]  ;;  %v71_v2 = vld [vmem:[%s2986_s1 + $0x158] sm:$0xff] }
  0x4a   :  { %843 = vmatpush1.msra.mxu1 %v390_v32  ;;  %773 = vmatprep.subr.mxu0 %v127_v33  ;;  %v334_v1 = vld [vmem:[%s2986_s1 + $0x990] sm:$0xff]  ;;  %v327_v3 = vld [vmem:[%s2986_s1 + $0x958] sm:$0xff] }
  0x4b   :  { %844 = vmatprep.subr.mxu1 %v383_v34  ;;  %774 = vmatpush1.msra.mxu0 %v126_v35  ;;  %v70_v4 = vld [vmem:[%s2986_s1 + $0x150] sm:$0xff]  ;;  %v63_v6 = vld [vmem:[%s2986_s1 + $0x118] sm:$0xff] }
  0x4c   :  { %845 = vmatpush1.msra.mxu1 %v382_v36  ;;  %775 = vmatprep.subr.mxu0 %v119_v37  ;;  %v326_v5 = vld [vmem:[%s2986_s1 + $0x950] sm:$0xff]  ;;  %v319_v7 = vld [vmem:[%s2986_s1 + $0x918] sm:$0xff] }
  0x4d   :  { %846 = vmatprep.subr.mxu1 %v375_v38  ;;  %776 = vmatpush1.msra.mxu0 %v118_v39  ;;  %v62_v8 = vld [vmem:[%s2986_s1 + $0x110] sm:$0xff]  ;;  %v55_v10 = vld [vmem:[%s2986_s1 + $0xd8] sm:$0xff] }
  0x4e   :  { %847 = vmatpush1.msra.mxu1 %v374_v40  ;;  %777 = vmatprep.subr.mxu0 %v111_v42  ;;  %v318_v9 = vld [vmem:[%s2986_s1 + $0x910] sm:$0xff]  ;;  %v311_v11 = vld [vmem:[%s2986_s1 + $0x8d8] sm:$0xff] }
  0x4f   :  { %848 = vmatprep.subr.mxu1 %v367_v43  ;;  %778 = vmatpush1.msra.mxu0 %v110_v44  ;;  %v54_v12 = vld [vmem:[%s2986_s1 + $0xd0] sm:$0xff]  ;;  %v47_v14 = vld [vmem:[%s2986_s1 + $0x98] sm:$0xff] }
  0x50   :  { %849 = vmatpush1.msra.mxu1 %v366_v45  ;;  %779 = vmatprep.subr.mxu0 %v103_v46  ;;  %v310_v13 = vld [vmem:[%s2986_s1 + $0x8d0] sm:$0xff]  ;;  %v303_v15 = vld [vmem:[%s2986_s1 + $0x898] sm:$0xff] }
  0x51   :  { %850 = vmatprep.subr.mxu1 %v359_v47  ;;  %780 = vmatpush1.msra.mxu0 %v102_v48  ;;  %v46_v17 = vld [vmem:[%s2986_s1 + $0x90] sm:$0xff]  ;;  %v39_v21 = vld [vmem:[%s2986_s1 + $0x58] sm:$0xff] }
  0x52   :  { %851 = vmatpush1.msra.mxu1 %v358_v49  ;;  %781 = vmatprep.subr.mxu0 %v95_v50  ;;  %v302_v20 = vld [vmem:[%s2986_s1 + $0x890] sm:$0xff]  ;;  %v295_v23 = vld [vmem:[%s2986_s1 + $0x858] sm:$0xff] }
  0x53   :  { %852 = vmatprep.subr.mxu1 %v351_v51  ;;  %782 = vmatpush1.msra.mxu0 %v94_v52  ;;  %v38_v24 = vld [vmem:[%s2986_s1 + $0x50] sm:$0xff]  ;;  %v31_v26 = vld [vmem:[%s2986_s1 + $0x18] sm:$0xff] }
  0x54   :  { %853 = vmatpush1.msra.mxu1 %v350_v54  ;;  %783 = vmatprep.subr.mxu0 %v87_v55  ;;  %v294_v25 = vld [vmem:[%s2986_s1 + $0x850] sm:$0xff]  ;;  %v287_v27 = vld [vmem:[%s2986_s1 + $0x818] sm:$0xff] }
  0x55   :  { %854 = vmatprep.subr.mxu1 %v343_v57  ;;  %784 = vmatpush1.msra.mxu0 %v86_v58  ;;  %v30_v28 = vld [vmem:[%s2986_s1 + $0x10] sm:$0xff]  ;;  %v279_v30 = vld [vmem:[%s2986_s1 + $0x7d8] sm:$0xff] }
  0x56   :  { %855 = vmatpush1.msra.mxu1 %v342_v60  ;;  %785 = vmatprep.subr.mxu0 %v79_v61  ;;  %v286_v29 = vld [vmem:[%s2986_s1 + $0x810] sm:$0xff]  ;;  %v535_v31 = vld [vmem:[%s2986_s1 + $0xfd8] sm:$0xff] }
  0x57   :  { %856 = vmatprep.subr.mxu1 %v335_v63  ;;  %786 = vmatpush1.msra.mxu0 %v78_v0  ;;  %v278_v32 = vld [vmem:[%s2986_s1 + $0x7d0] sm:$0xff]  ;;  %v271_v34 = vld [vmem:[%s2986_s1 + $0x798] sm:$0xff] }
  0x58   :  { %857 = vmatpush1.msra.mxu1 %v334_v1  ;;  %787 = vmatprep.subr.mxu0 %v71_v2  ;;  %v534_v33 = vld [vmem:[%s2986_s1 + $0xfd0] sm:$0xff]  ;;  %v527_v35 = vld [vmem:[%s2986_s1 + $0xf98] sm:$0xff] }
  0x59   :  { %858 = vmatprep.subr.mxu1 %v327_v3  ;;  %788 = vmatpush1.msra.mxu0 %v70_v4  ;;  %v270_v36 = vld [vmem:[%s2986_s1 + $0x790] sm:$0xff]  ;;  %v263_v38 = vld [vmem:[%s2986_s1 + $0x758] sm:$0xff] }
  0x5a   :  { %859 = vmatpush1.msra.mxu1 %v326_v5  ;;  %789 = vmatprep.subr.mxu0 %v63_v6  ;;  %v526_v37 = vld [vmem:[%s2986_s1 + $0xf90] sm:$0xff]  ;;  %v519_v39 = vld [vmem:[%s2986_s1 + $0xf58] sm:$0xff] }
  0x5b   :  { %860 = vmatprep.subr.mxu1 %v319_v7  ;;  %790 = vmatpush1.msra.mxu0 %v62_v8  ;;  %v262_v40 = vld [vmem:[%s2986_s1 + $0x750] sm:$0xff]  ;;  %v255_v43 = vld [vmem:[%s2986_s1 + $0x718] sm:$0xff] }
  0x5c   :  { %861 = vmatpush1.msra.mxu1 %v318_v9  ;;  %791 = vmatprep.subr.mxu0 %v55_v10  ;;  %v518_v42 = vld [vmem:[%s2986_s1 + $0xf50] sm:$0xff]  ;;  %v511_v44 = vld [vmem:[%s2986_s1 + $0xf18] sm:$0xff] }
  0x5d   :  { %862 = vmatprep.subr.mxu1 %v311_v11  ;;  %792 = vmatpush1.msra.mxu0 %v54_v12  ;;  %v254_v45 = vld [vmem:[%s2986_s1 + $0x710] sm:$0xff]  ;;  %v247_v47 = vld [vmem:[%s2986_s1 + $0x6d8] sm:$0xff] }
  0x5e   :  { %863 = vmatpush1.msra.mxu1 %v310_v13  ;;  %793 = vmatprep.subr.mxu0 %v47_v14  ;;  %v510_v46 = vld [vmem:[%s2986_s1 + $0xf10] sm:$0xff]  ;;  %v503_v48 = vld [vmem:[%s2986_s1 + $0xed8] sm:$0xff] }
  0x5f   :  { %864 = vmatprep.subr.mxu1 %v303_v15  ;;  %794 = vmatpush1.msra.mxu0 %v46_v17  ;;  %v246_v49 = vld [vmem:[%s2986_s1 + $0x6d0] sm:$0xff]  ;;  %v239_v51 = vld [vmem:[%s2986_s1 + $0x698] sm:$0xff] }
  0x60   :  { %865 = vmatpush1.msra.mxu1 %v302_v20  ;;  %795 = vmatprep.subr.mxu0 %v39_v21  ;;  %v502_v50 = vld [vmem:[%s2986_s1 + $0xed0] sm:$0xff]  ;;  %v495_v52 = vld [vmem:[%s2986_s1 + $0xe98] sm:$0xff] }
  0x61   :  { %866 = vmatprep.subr.mxu1 %v295_v23  ;;  %796 = vmatpush1.msra.mxu0 %v38_v24  ;;  %v238_v54 = vld [vmem:[%s2986_s1 + $0x690] sm:$0xff]  ;;  %v231_v57 = vld [vmem:[%s2986_s1 + $0x658] sm:$0xff] }
  0x62   :  { %867 = vmatpush1.msra.mxu1 %v294_v25  ;;  %797 = vmatprep.subr.mxu0 %v31_v26  ;;  %v494_v55 = vld [vmem:[%s2986_s1 + $0xe90] sm:$0xff]  ;;  %v487_v58 = vld [vmem:[%s2986_s1 + $0xe58] sm:$0xff] }
  0x63   :  { %868 = vmatprep.subr.mxu1 %v287_v27  ;;  %798 = vmatpush1.msra.mxu0 %v30_v28  ;;  %v230_v60 = vld [vmem:[%s2986_s1 + $0x650] sm:$0xff]  ;;  %v223_v63 = vld [vmem:[%s2986_s1 + $0x618] sm:$0xff] }
  0x64   :  { %869 = vmatpush1.msra.mxu1 %v286_v29  ;;  %799 = vmatprep.subr.mxu0 %v279_v30  ;;  %v486_v61 = vld [vmem:[%s2986_s1 + $0xe50] sm:$0xff]  ;;  %v479_v0 = vld [vmem:[%s2986_s1 + $0xe18] sm:$0xff] }
  0x65   :  { %870 = vmatprep.subr.mxu1 %v535_v31  ;;  %800 = vmatpush2.msra.mxu0 %v278_v32  ;;  %v222_v1 = vld [vmem:[%s2986_s1 + $0x610] sm:$0xff]  ;;  %v215_v3 = vld [vmem:[%s2986_s1 + $0x5d8] sm:$0xff] }
  0x66   :  { %871 = vmatpush2.msra.mxu1 %v534_v33  ;;  %801 = vmatprep.subr.mxu0 %v271_v34  ;;  %v478_v2 = vld [vmem:[%s2986_s1 + $0xe10] sm:$0xff]  ;;  %v471_v4 = vld [vmem:[%s2986_s1 + $0xdd8] sm:$0xff] }
  0x67   :  { %872 = vmatprep.subr.mxu1 %v527_v35  ;;  %802 = vmatpush2.msra.mxu0 %v270_v36  ;;  %v214_v5 = vld [vmem:[%s2986_s1 + $0x5d0] sm:$0xff]  ;;  %v207_v7 = vld [vmem:[%s2986_s1 + $0x598] sm:$0xff] }
  0x68   :  { %873 = vmatpush2.msra.mxu1 %v526_v37  ;;  %803 = vmatprep.subr.mxu0 %v263_v38  ;;  %v470_v6 = vld [vmem:[%s2986_s1 + $0xdd0] sm:$0xff]  ;;  %v463_v8 = vld [vmem:[%s2986_s1 + $0xd98] sm:$0xff] }
  0x69   :  { %874 = vmatprep.subr.mxu1 %v519_v39  ;;  %804 = vmatpush2.msra.mxu0 %v262_v40  ;;  %v206_v9 = vld [vmem:[%s2986_s1 + $0x590] sm:$0xff]  ;;  %v199_v11 = vld [vmem:[%s2986_s1 + $0x558] sm:$0xff]  ;;  %v153_v39 = vld [vmem:[%s2986_s1 + $0x3e8] sm:$0xff] }
  0x6a   :  { %875 = vmatpush2.msra.mxu1 %v518_v42  ;;  %805 = vmatprep.subr.mxu0 %v255_v43  ;;  %v462_v10 = vld [vmem:[%s2986_s1 + $0xd90] sm:$0xff]  ;;  %v455_v12 = vld [vmem:[%s2986_s1 + $0xd58] sm:$0xff]  ;;  %v409_v40 = vld [vmem:[%s2986_s1 + $0xbe8] sm:$0xff] }
  0x6b   :  { %876 = vmatprep.subr.mxu1 %v511_v44  ;;  %806 = vmatpush2.msra.mxu0 %v254_v45  ;;  %v198_v13 = vld [vmem:[%s2986_s1 + $0x550] sm:$0xff]  ;;  %v191_v15 = vld [vmem:[%s2986_s1 + $0x518] sm:$0xff]  ;;  %v152_v42 = vld [vmem:[%s2986_s1 + $0x3e0] sm:$0xff] }
  0x6c   :  { %877 = vmatpush2.msra.mxu1 %v510_v46  ;;  %807 = vmatprep.subr.mxu0 %v247_v47  ;;  %v454_v14 = vld [vmem:[%s2986_s1 + $0xd50] sm:$0xff]  ;;  %v447_v17 = vld [vmem:[%s2986_s1 + $0xd18] sm:$0xff]  ;;  %v408_v43 = vld [vmem:[%s2986_s1 + $0xbe0] sm:$0xff] }
  0x6d   :  { %878 = vmatprep.subr.mxu1 %v503_v48  ;;  %808 = vmatpush2.msra.mxu0 %v246_v49  ;;  %v190_v20 = vld [vmem:[%s2986_s1 + $0x510] sm:$0xff]  ;;  %v183_v23 = vld [vmem:[%s2986_s1 + $0x4d8] sm:$0xff]  ;;  %v145_v44 = vld [vmem:[%s2986_s1 + $0x3a8] sm:$0xff] }
  0x6e   :  { %879 = vmatpush2.msra.mxu1 %v502_v50  ;;  %809 = vmatprep.subr.mxu0 %v239_v51  ;;  %v446_v21 = vld [vmem:[%s2986_s1 + $0xd10] sm:$0xff]  ;;  %v439_v24 = vld [vmem:[%s2986_s1 + $0xcd8] sm:$0xff]  ;;  %v401_v45 = vld [vmem:[%s2986_s1 + $0xba8] sm:$0xff] }
  0x6f   :  { %880 = vmatprep.subr.mxu1 %v495_v52  ;;  %810 = vmatpush2.msra.mxu0 %v238_v54  ;;  %v182_v25 = vld [vmem:[%s2986_s1 + $0x4d0] sm:$0xff]  ;;  %v175_v27 = vld [vmem:[%s2986_s1 + $0x498] sm:$0xff]  ;;  %v144_v46 = vld [vmem:[%s2986_s1 + $0x3a0] sm:$0xff] }
  0x70   :  { %881 = vmatpush2.msra.mxu1 %v494_v55  ;;  %811 = vmatprep.subr.mxu0 %v231_v57  ;;  %v438_v26 = vld [vmem:[%s2986_s1 + $0xcd0] sm:$0xff]  ;;  %v431_v28 = vld [vmem:[%s2986_s1 + $0xc98] sm:$0xff]  ;;  %v400_v47 = vld [vmem:[%s2986_s1 + $0xba0] sm:$0xff] }
  0x71   :  { %882 = vmatprep.subr.mxu1 %v487_v58  ;;  %812 = vmatpush2.msra.mxu0 %v230_v60  ;;  %v174_v29 = vld [vmem:[%s2986_s1 + $0x490] sm:$0xff]  ;;  %v167_v31 = vld [vmem:[%s2986_s1 + $0x458] sm:$0xff]  ;;  %v137_v48 = vld [vmem:[%s2986_s1 + $0x368] sm:$0xff] }
  0x72   :  { %883 = vmatpush2.msra.mxu1 %v486_v61  ;;  %813 = vmatprep.subr.mxu0 %v223_v63  ;;  %v430_v30 = vld [vmem:[%s2986_s1 + $0xc90] sm:$0xff]  ;;  %v423_v32 = vld [vmem:[%s2986_s1 + $0xc58] sm:$0xff]  ;;  %v393_v49 = vld [vmem:[%s2986_s1 + $0xb68] sm:$0xff] }
  0x73   :  { %884 = vmatprep.subr.mxu1 %v479_v0  ;;  %814 = vmatpush2.msra.mxu0 %v222_v1  ;;  %v166_v33 = vld [vmem:[%s2986_s1 + $0x450] sm:$0xff]  ;;  %v159_v35 = vld [vmem:[%s2986_s1 + $0x418] sm:$0xff]  ;;  %v136_v50 = vld [vmem:[%s2986_s1 + $0x360] sm:$0xff] }
  0x74   :  { %885 = vmatpush2.msra.mxu1 %v478_v2  ;;  %815 = vmatprep.subr.mxu0 %v215_v3  ;;  %v422_v34 = vld [vmem:[%s2986_s1 + $0xc50] sm:$0xff]  ;;  %v415_v36 = vld [vmem:[%s2986_s1 + $0xc18] sm:$0xff]  ;;  %v392_v51 = vld [vmem:[%s2986_s1 + $0xb60] sm:$0xff] }
  0x75   :  { %886 = vmatprep.subr.mxu1 %v471_v4  ;;  %816 = vmatpush2.msra.mxu0 %v214_v5  ;;  %v158_v37 = vld [vmem:[%s2986_s1 + $0x410] sm:$0xff]  ;;  %v129_v52 = vld [vmem:[%s2986_s1 + $0x328] sm:$0xff]  ;;  %v128_v55 = vld [vmem:[%s2986_s1 + $0x320] sm:$0xff] }
  0x76   :  { %887 = vmatpush2.msra.mxu1 %v470_v6  ;;  %817 = vmatprep.subr.mxu0 %v207_v7  ;;  %v414_v38 = vld [vmem:[%s2986_s1 + $0xc10] sm:$0xff]  ;;  %v385_v54 = vld [vmem:[%s2986_s1 + $0xb28] sm:$0xff]  ;;  %v384_v57 = vld [vmem:[%s2986_s1 + $0xb20] sm:$0xff] }
  0x77   :  { %888 = vmatprep.subr.mxu1 %v463_v8  ;;  %818 = vmatpush2.msra.mxu0 %v206_v9  ;;  %v121_v58 = vld [vmem:[%s2986_s1 + $0x2e8] sm:$0xff]  ;;  %v120_v61 = vld [vmem:[%s2986_s1 + $0x2e0] sm:$0xff] }
  0x78   :  { %889 = vmatpush2.msra.mxu1 %v462_v10  ;;  %819 = vmatprep.subr.mxu0 %v199_v11  ;;  %v377_v60 = vld [vmem:[%s2986_s1 + $0xae8] sm:$0xff]  ;;  %v376_v63 = vld [vmem:[%s2986_s1 + $0xae0] sm:$0xff] }
  0x79   :  { %890 = vmatprep.subr.mxu1 %v455_v12  ;;  %820 = vmatpush2.msra.mxu0 %v198_v13  ;;  %v113_v0 = vld [vmem:[%s2986_s1 + $0x2a8] sm:$0xff]  ;;  %v112_v2 = vld [vmem:[%s2986_s1 + $0x2a0] sm:$0xff] }
  0x7a   :  { %891 = vmatpush2.msra.mxu1 %v454_v14  ;;  %821 = vmatprep.subr.mxu0 %v191_v15  ;;  %v369_v1 = vld [vmem:[%s2986_s1 + $0xaa8] sm:$0xff]  ;;  %v368_v3 = vld [vmem:[%s2986_s1 + $0xaa0] sm:$0xff] }
  0x7b   :  { %892 = vmatprep.subr.mxu1 %v447_v17  ;;  %822 = vmatpush2.msra.mxu0 %v190_v20  ;;  %v105_v4 = vld [vmem:[%s2986_s1 + $0x268] sm:$0xff]  ;;  %v104_v6 = vld [vmem:[%s2986_s1 + $0x260] sm:$0xff] }
  0x7c   :  { %893 = vmatpush2.msra.mxu1 %v446_v21  ;;  %823 = vmatprep.subr.mxu0 %v183_v23  ;;  %v361_v5 = vld [vmem:[%s2986_s1 + $0xa68] sm:$0xff]  ;;  %v360_v7 = vld [vmem:[%s2986_s1 + $0xa60] sm:$0xff] }
  0x7d   :  { %894 = vmatprep.subr.mxu1 %v439_v24  ;;  %824 = vmatpush2.msra.mxu0 %v182_v25  ;;  %v97_v8 = vld [vmem:[%s2986_s1 + $0x228] sm:$0xff]  ;;  %v96_v10 = vld [vmem:[%s2986_s1 + $0x220] sm:$0xff] }
  0x7e   :  { %895 = vmatpush2.msra.mxu1 %v438_v26  ;;  %825 = vmatprep.subr.mxu0 %v175_v27  ;;  %v353_v9 = vld [vmem:[%s2986_s1 + $0xa28] sm:$0xff]  ;;  %v352_v11 = vld [vmem:[%s2986_s1 + $0xa20] sm:$0xff] }
  0x7f   :  { %896 = vmatprep.subr.mxu1 %v431_v28  ;;  %826 = vmatpush2.msra.mxu0 %v174_v29  ;;  %v89_v12 = vld [vmem:[%s2986_s1 + $0x1e8] sm:$0xff]  ;;  %v88_v14 = vld [vmem:[%s2986_s1 + $0x1e0] sm:$0xff] }
  0x80   :  { %897 = vmatpush2.msra.mxu1 %v430_v30  ;;  %827 = vmatprep.subr.mxu0 %v167_v31  ;;  %v345_v13 = vld [vmem:[%s2986_s1 + $0x9e8] sm:$0xff]  ;;  %v344_v15 = vld [vmem:[%s2986_s1 + $0x9e0] sm:$0xff] }
  0x81   :  { %898 = vmatprep.subr.mxu1 %v423_v32  ;;  %828 = vmatpush2.msra.mxu0 %v166_v33  ;;  %v81_v17 = vld [vmem:[%s2986_s1 + $0x1a8] sm:$0xff]  ;;  %v80_v21 = vld [vmem:[%s2986_s1 + $0x1a0] sm:$0xff] }
  0x82   :  { %899 = vmatpush2.msra.mxu1 %v422_v34  ;;  %829 = vmatprep.subr.mxu0 %v159_v35  ;;  %v337_v20 = vld [vmem:[%s2986_s1 + $0x9a8] sm:$0xff]  ;;  %v336_v23 = vld [vmem:[%s2986_s1 + $0x9a0] sm:$0xff] }
  0x83   :  { %900 = vmatprep.subr.mxu1 %v415_v36  ;;  %830 = vmatpush2.msra.mxu0 %v158_v37  ;;  %v73_v24 = vld [vmem:[%s2986_s1 + $0x168] sm:$0xff]  ;;  %v72_v26 = vld [vmem:[%s2986_s1 + $0x160] sm:$0xff] }
  0x84   :  { %831 = vmatprep.mubr.f32.mxu0 %v1752_v16  ;;  %901 = vmatpush2.msra.mxu1 %v414_v38  ;;  %v329_v25 = vld [vmem:[%s2986_s1 + $0x968] sm:$0xff]  ;;  %v328_v27 = vld [vmem:[%s2986_s1 + $0x960] sm:$0xff] }
  0x85   :  { %832 = vmatmul.mubr.f32.vlgmr.msra.gmra.mxu0 %v1758_v18  ;;  %902 = vmatprep.mubr.f32.mxu1 %v1761_v19  ;;  %v65_v28 = vld [vmem:[%s2986_s1 + $0x128] sm:$0xff]  ;;  %v64_v30 = vld [vmem:[%s2986_s1 + $0x120] sm:$0xff] }
  0x86   :  { %909 = vmatprep.subr.mxu0 %v153_v39  ;;  %980 = vmatprep.subr.mxu1 %v409_v40  ;;  %v321_v29 = vld [vmem:[%s2986_s1 + $0x928] sm:$0xff]  ;;  %v320_v31 = vld [vmem:[%s2986_s1 + $0x920] sm:$0xff] }
  0x87   :  { %903 = vmatmul.mubr.f32.vlgmr.msra.gmra.mxu1 %v1771_v22  ;;  %910 = vmatpush1.msra.mxu0 %v152_v42  ;;  %v57_v32 = vld [vmem:[%s2986_s1 + $0xe8] sm:$0xff]  ;;  %v56_v34 = vld [vmem:[%s2986_s1 + $0xe0] sm:$0xff] }
  0x88   :  { %981 = vmatpush1.msra.mxu1 %v408_v43  ;;  %911 = vmatprep.subr.mxu0 %v145_v44  ;;  %v313_v33 = vld [vmem:[%s2986_s1 + $0x8e8] sm:$0xff]  ;;  %v312_v35 = vld [vmem:[%s2986_s1 + $0x8e0] sm:$0xff] }
  0x89   :  { %982 = vmatprep.subr.mxu1 %v401_v45  ;;  %912 = vmatpush1.msra.mxu0 %v144_v46  ;;  %v49_v36 = vld [vmem:[%s2986_s1 + $0xa8] sm:$0xff]  ;;  %v48_v38 = vld [vmem:[%s2986_s1 + $0xa0] sm:$0xff] }
  0x8a   :  { %983 = vmatpush1.msra.mxu1 %v400_v47  ;;  %913 = vmatprep.subr.mxu0 %v137_v48  ;;  %v305_v37 = vld [vmem:[%s2986_s1 + $0x8a8] sm:$0xff]  ;;  %v304_v39 = vld [vmem:[%s2986_s1 + $0x8a0] sm:$0xff] }
  0x8b   :  { %984 = vmatprep.subr.mxu1 %v393_v49  ;;  %914 = vmatpush1.msra.mxu0 %v136_v50  ;;  %v41_v40 = vld [vmem:[%s2986_s1 + $0x68] sm:$0xff]  ;;  %v40_v43 = vld [vmem:[%s2986_s1 + $0x60] sm:$0xff] }
  0x8c   :  { %985 = vmatpush1.msra.mxu1 %v392_v51  ;;  %915 = vmatprep.subr.mxu0 %v129_v52  ;;  %v297_v42 = vld [vmem:[%s2986_s1 + $0x868] sm:$0xff]  ;;  %v296_v44 = vld [vmem:[%s2986_s1 + $0x860] sm:$0xff] }
  0x8d   :  { %986 = vmatprep.subr.mxu1 %v385_v54  ;;  %916 = vmatpush1.msra.mxu0 %v128_v55  ;;  %v33_v45 = vld [vmem:[%s2986_s1 + $0x28] sm:$0xff]  ;;  %v32_v47 = vld [vmem:[%s2986_s1 + $0x20] sm:$0xff] }
  0x8e   :  { %987 = vmatpush1.msra.mxu1 %v384_v57  ;;  %917 = vmatprep.subr.mxu0 %v121_v58  ;;  %v289_v46 = vld [vmem:[%s2986_s1 + $0x828] sm:$0xff]  ;;  %v288_v48 = vld [vmem:[%s2986_s1 + $0x820] sm:$0xff] }
  0x8f   :  { %988 = vmatprep.subr.mxu1 %v377_v60  ;;  %918 = vmatpush1.msra.mxu0 %v120_v61  ;;  %v281_v49 = vld [vmem:[%s2986_s1 + $0x7e8] sm:$0xff]  ;;  %v280_v51 = vld [vmem:[%s2986_s1 + $0x7e0] sm:$0xff] }
  0x90   :  { %989 = vmatpush1.msra.mxu1 %v376_v63  ;;  %919 = vmatprep.subr.mxu0 %v113_v0  ;;  %v537_v50 = vld [vmem:[%s2986_s1 + $0xfe8] sm:$0xff]  ;;  %v536_v52 = vld [vmem:[%s2986_s1 + $0xfe0] sm:$0xff] }
  0x91   :  { %990 = vmatprep.subr.mxu1 %v369_v1  ;;  %920 = vmatpush1.msra.mxu0 %v112_v2  ;;  %v273_v54 = vld [vmem:[%s2986_s1 + $0x7a8] sm:$0xff]  ;;  %v272_v57 = vld [vmem:[%s2986_s1 + $0x7a0] sm:$0xff] }
  0x92   :  { %991 = vmatpush1.msra.mxu1 %v368_v3  ;;  %921 = vmatprep.subr.mxu0 %v105_v4  ;;  %v529_v55 = vld [vmem:[%s2986_s1 + $0xfa8] sm:$0xff]  ;;  %v528_v58 = vld [vmem:[%s2986_s1 + $0xfa0] sm:$0xff] }
  0x93   :  { %992 = vmatprep.subr.mxu1 %v361_v5  ;;  %922 = vmatpush1.msra.mxu0 %v104_v6  ;;  %v265_v60 = vld [vmem:[%s2986_s1 + $0x768] sm:$0xff]  ;;  %v264_v63 = vld [vmem:[%s2986_s1 + $0x760] sm:$0xff] }
  0x94   :  { %993 = vmatpush1.msra.mxu1 %v360_v7  ;;  %923 = vmatprep.subr.mxu0 %v97_v8  ;;  %v521_v61 = vld [vmem:[%s2986_s1 + $0xf68] sm:$0xff]  ;;  %v520_v0 = vld [vmem:[%s2986_s1 + $0xf60] sm:$0xff] }
  0x95   :  { %994 = vmatprep.subr.mxu1 %v353_v9  ;;  %924 = vmatpush1.msra.mxu0 %v96_v10  ;;  %v257_v1 = vld [vmem:[%s2986_s1 + $0x728] sm:$0xff]  ;;  %v256_v3 = vld [vmem:[%s2986_s1 + $0x720] sm:$0xff] }
  0x96   :  { %995 = vmatpush1.msra.mxu1 %v352_v11  ;;  %925 = vmatprep.subr.mxu0 %v89_v12  ;;  %v513_v2 = vld [vmem:[%s2986_s1 + $0xf28] sm:$0xff]  ;;  %v512_v4 = vld [vmem:[%s2986_s1 + $0xf20] sm:$0xff] }
  0x97   :  { %996 = vmatprep.subr.mxu1 %v345_v13  ;;  %926 = vmatpush1.msra.mxu0 %v88_v14  ;;  %v249_v5 = vld [vmem:[%s2986_s1 + $0x6e8] sm:$0xff]  ;;  %v248_v7 = vld [vmem:[%s2986_s1 + $0x6e0] sm:$0xff] }
  0x98   :  { %997 = vmatpush1.msra.mxu1 %v344_v15  ;;  %927 = vmatprep.subr.mxu0 %v81_v17  ;;  %v505_v6 = vld [vmem:[%s2986_s1 + $0xee8] sm:$0xff]  ;;  %v504_v8 = vld [vmem:[%s2986_s1 + $0xee0] sm:$0xff] }
  0x99   :  { %998 = vmatprep.subr.mxu1 %v337_v20  ;;  %928 = vmatpush1.msra.mxu0 %v80_v21  ;;  %v241_v9 = vld [vmem:[%s2986_s1 + $0x6a8] sm:$0xff]  ;;  %v240_v11 = vld [vmem:[%s2986_s1 + $0x6a0] sm:$0xff] }
  0x9a   :  { %999 = vmatpush1.msra.mxu1 %v336_v23  ;;  %929 = vmatprep.subr.mxu0 %v73_v24  ;;  %v497_v10 = vld [vmem:[%s2986_s1 + $0xea8] sm:$0xff]  ;;  %v496_v12 = vld [vmem:[%s2986_s1 + $0xea0] sm:$0xff] }
  0x9b   :  { %1000 = vmatprep.subr.mxu1 %v329_v25  ;;  %930 = vmatpush1.msra.mxu0 %v72_v26  ;;  %v233_v13 = vld [vmem:[%s2986_s1 + $0x668] sm:$0xff]  ;;  %v232_v15 = vld [vmem:[%s2986_s1 + $0x660] sm:$0xff] }
  0x9c   :  { %1001 = vmatpush1.msra.mxu1 %v328_v27  ;;  %931 = vmatprep.subr.mxu0 %v65_v28  ;;  %v489_v14 = vld [vmem:[%s2986_s1 + $0xe68] sm:$0xff]  ;;  %v488_v17 = vld [vmem:[%s2986_s1 + $0xe60] sm:$0xff] }
  0x9d   :  { %1002 = vmatprep.subr.mxu1 %v321_v29  ;;  %932 = vmatpush1.msra.mxu0 %v64_v30  ;;  %v225_v20 = vld [vmem:[%s2986_s1 + $0x628] sm:$0xff]  ;;  %v224_v23 = vld [vmem:[%s2986_s1 + $0x620] sm:$0xff] }
  0x9e   :  { %1003 = vmatpush1.msra.mxu1 %v320_v31  ;;  %933 = vmatprep.subr.mxu0 %v57_v32  ;;  %v481_v21 = vld [vmem:[%s2986_s1 + $0xe28] sm:$0xff]  ;;  %v480_v24 = vld [vmem:[%s2986_s1 + $0xe20] sm:$0xff] }
  0x9f   :  { %1004 = vmatprep.subr.mxu1 %v313_v33  ;;  %934 = vmatpush1.msra.mxu0 %v56_v34  ;;  %v217_v25 = vld [vmem:[%s2986_s1 + $0x5e8] sm:$0xff]  ;;  %v216_v27 = vld [vmem:[%s2986_s1 + $0x5e0] sm:$0xff] }
  0xa0   :  { %1005 = vmatpush1.msra.mxu1 %v312_v35  ;;  %935 = vmatprep.subr.mxu0 %v49_v36  ;;  %v473_v26 = vld [vmem:[%s2986_s1 + $0xde8] sm:$0xff]  ;;  %v472_v28 = vld [vmem:[%s2986_s1 + $0xde0] sm:$0xff] }
  0xa1   :  { %1006 = vmatprep.subr.mxu1 %v305_v37  ;;  %936 = vmatpush1.msra.mxu0 %v48_v38  ;;  %v209_v29 = vld [vmem:[%s2986_s1 + $0x5a8] sm:$0xff]  ;;  %v208_v31 = vld [vmem:[%s2986_s1 + $0x5a0] sm:$0xff] }
  0xa2   :  { %1007 = vmatpush1.msra.mxu1 %v304_v39  ;;  %937 = vmatprep.subr.mxu0 %v41_v40  ;;  %v465_v30 = vld [vmem:[%s2986_s1 + $0xda8] sm:$0xff]  ;;  %v464_v32 = vld [vmem:[%s2986_s1 + $0xda0] sm:$0xff] }
  0xa3   :  { %1008 = vmatprep.subr.mxu1 %v297_v42  ;;  %938 = vmatpush1.msra.mxu0 %v40_v43  ;;  %v201_v33 = vld [vmem:[%s2986_s1 + $0x568] sm:$0xff]  ;;  %v200_v35 = vld [vmem:[%s2986_s1 + $0x560] sm:$0xff] }
  0xa4   :  { %1009 = vmatpush1.msra.mxu1 %v296_v44  ;;  %939 = vmatprep.subr.mxu0 %v33_v45  ;;  %v457_v34 = vld [vmem:[%s2986_s1 + $0xd68] sm:$0xff]  ;;  %v456_v36 = vld [vmem:[%s2986_s1 + $0xd60] sm:$0xff] }
  0xa5   :  { %1010 = vmatprep.subr.mxu1 %v289_v46  ;;  %940 = vmatpush1.msra.mxu0 %v32_v47  ;;  %v193_v37 = vld [vmem:[%s2986_s1 + $0x528] sm:$0xff]  ;;  %v192_v39 = vld [vmem:[%s2986_s1 + $0x520] sm:$0xff] }
  0xa6   :  { %1011 = vmatpush1.msra.mxu1 %v288_v48  ;;  %941 = vmatprep.subr.mxu0 %v281_v49  ;;  %v449_v38 = vld [vmem:[%s2986_s1 + $0xd28] sm:$0xff]  ;;  %v448_v40 = vld [vmem:[%s2986_s1 + $0xd20] sm:$0xff] }
  0xa7   :  { %1012 = vmatprep.subr.mxu1 %v537_v50  ;;  %942 = vmatpush2.msra.mxu0 %v280_v51  ;;  %v185_v42 = vld [vmem:[%s2986_s1 + $0x4e8] sm:$0xff]  ;;  %v184_v44 = vld [vmem:[%s2986_s1 + $0x4e0] sm:$0xff] }
  0xa8   :  { %1013 = vmatpush2.msra.mxu1 %v536_v52  ;;  %943 = vmatprep.subr.mxu0 %v273_v54  ;;  %v441_v43 = vld [vmem:[%s2986_s1 + $0xce8] sm:$0xff]  ;;  %v440_v45 = vld [vmem:[%s2986_s1 + $0xce0] sm:$0xff] }
  0xa9   :  { %1014 = vmatprep.subr.mxu1 %v529_v55  ;;  %944 = vmatpush2.msra.mxu0 %v272_v57  ;;  %v177_v46 = vld [vmem:[%s2986_s1 + $0x4a8] sm:$0xff]  ;;  %v176_v48 = vld [vmem:[%s2986_s1 + $0x4a0] sm:$0xff] }
  0xaa   :  { %1015 = vmatpush2.msra.mxu1 %v528_v58  ;;  %945 = vmatprep.subr.mxu0 %v265_v60  ;;  %v433_v47 = vld [vmem:[%s2986_s1 + $0xca8] sm:$0xff]  ;;  %v432_v49 = vld [vmem:[%s2986_s1 + $0xca0] sm:$0xff] }
  0xab   :  { %1016 = vmatprep.subr.mxu1 %v521_v61  ;;  %946 = vmatpush2.msra.mxu0 %v264_v63  ;;  %v169_v50 = vld [vmem:[%s2986_s1 + $0x468] sm:$0xff]  ;;  %v168_v52 = vld [vmem:[%s2986_s1 + $0x460] sm:$0xff]  ;;  %v155_v61 = vld [vmem:[%s2986_s1 + $0x3f8] sm:$0xff] }
  0xac   :  { %1017 = vmatpush2.msra.mxu1 %v520_v0  ;;  %947 = vmatprep.subr.mxu0 %v257_v1  ;;  %v425_v51 = vld [vmem:[%s2986_s1 + $0xc68] sm:$0xff]  ;;  %v424_v54 = vld [vmem:[%s2986_s1 + $0xc60] sm:$0xff]  ;;  %v411_v63 = vld [vmem:[%s2986_s1 + $0xbf8] sm:$0xff] }
  0xad   :  { %1018 = vmatprep.subr.mxu1 %v513_v2  ;;  %948 = vmatpush2.msra.mxu0 %v256_v3  ;;  %v161_v55 = vld [vmem:[%s2986_s1 + $0x428] sm:$0xff]  ;;  %v160_v58 = vld [vmem:[%s2986_s1 + $0x420] sm:$0xff]  ;;  %v154_v0 = vld [vmem:[%s2986_s1 + $0x3f0] sm:$0xff] }
  0xae   :  { %1019 = vmatpush2.msra.mxu1 %v512_v4  ;;  %949 = vmatprep.subr.mxu0 %v249_v5  ;;  %v417_v57 = vld [vmem:[%s2986_s1 + $0xc28] sm:$0xff]  ;;  %v416_v60 = vld [vmem:[%s2986_s1 + $0xc20] sm:$0xff]  ;;  %v410_v1 = vld [vmem:[%s2986_s1 + $0xbf0] sm:$0xff] }
  0xaf   :  { %1020 = vmatprep.subr.mxu1 %v505_v6  ;;  %950 = vmatpush2.msra.mxu0 %v248_v7  ;;  %v147_v2 = vld [vmem:[%s2986_s1 + $0x3b8] sm:$0xff]  ;;  %v146_v4 = vld [vmem:[%s2986_s1 + $0x3b0] sm:$0xff] }
  0xb0   :  { %1021 = vmatpush2.msra.mxu1 %v504_v8  ;;  %951 = vmatprep.subr.mxu0 %v241_v9  ;;  %v403_v3 = vld [vmem:[%s2986_s1 + $0xbb8] sm:$0xff]  ;;  %v402_v5 = vld [vmem:[%s2986_s1 + $0xbb0] sm:$0xff] }
  0xb1   :  { %1022 = vmatprep.subr.mxu1 %v497_v10  ;;  %952 = vmatpush2.msra.mxu0 %v240_v11  ;;  %v139_v6 = vld [vmem:[%s2986_s1 + $0x378] sm:$0xff]  ;;  %v138_v8 = vld [vmem:[%s2986_s1 + $0x370] sm:$0xff] }
  0xb2   :  { %1023 = vmatpush2.msra.mxu1 %v496_v12  ;;  %953 = vmatprep.subr.mxu0 %v233_v13  ;;  %v395_v7 = vld [vmem:[%s2986_s1 + $0xb78] sm:$0xff]  ;;  %v394_v9 = vld [vmem:[%s2986_s1 + $0xb70] sm:$0xff] }
  0xb3   :  { %1024 = vmatprep.subr.mxu1 %v489_v14  ;;  %954 = vmatpush2.msra.mxu0 %v232_v15  ;;  %v131_v10 = vld [vmem:[%s2986_s1 + $0x338] sm:$0xff]  ;;  %v130_v12 = vld [vmem:[%s2986_s1 + $0x330] sm:$0xff] }
  0xb4   :  { %1025 = vmatpush2.msra.mxu1 %v488_v17  ;;  %955 = vmatprep.subr.mxu0 %v225_v20  ;;  %v387_v11 = vld [vmem:[%s2986_s1 + $0xb38] sm:$0xff]  ;;  %v386_v13 = vld [vmem:[%s2986_s1 + $0xb30] sm:$0xff] }
  0xb5   :  { %1026 = vmatprep.subr.mxu1 %v481_v21  ;;  %956 = vmatpush2.msra.mxu0 %v224_v23  ;;  %v123_v14 = vld [vmem:[%s2986_s1 + $0x2f8] sm:$0xff]  ;;  %v122_v17 = vld [vmem:[%s2986_s1 + $0x2f0] sm:$0xff] }
  0xb6   :  { %1027 = vmatpush2.msra.mxu1 %v480_v24  ;;  %957 = vmatprep.subr.mxu0 %v217_v25  ;;  %v379_v15 = vld [vmem:[%s2986_s1 + $0xaf8] sm:$0xff]  ;;  %v378_v20 = vld [vmem:[%s2986_s1 + $0xaf0] sm:$0xff] }
  0xb7   :  { %1028 = vmatprep.subr.mxu1 %v473_v26  ;;  %958 = vmatpush2.msra.mxu0 %v216_v27  ;;  %v115_v21 = vld [vmem:[%s2986_s1 + $0x2b8] sm:$0xff]  ;;  %v114_v24 = vld [vmem:[%s2986_s1 + $0x2b0] sm:$0xff] }
  0xb8   :  { %1029 = vmatpush2.msra.mxu1 %v472_v28  ;;  %959 = vmatprep.subr.mxu0 %v209_v29  ;;  %v371_v23 = vld [vmem:[%s2986_s1 + $0xab8] sm:$0xff]  ;;  %v370_v25 = vld [vmem:[%s2986_s1 + $0xab0] sm:$0xff] }
  0xb9   :  { %1030 = vmatprep.subr.mxu1 %v465_v30  ;;  %960 = vmatpush2.msra.mxu0 %v208_v31  ;;  %v107_v26 = vld [vmem:[%s2986_s1 + $0x278] sm:$0xff]  ;;  %v106_v28 = vld [vmem:[%s2986_s1 + $0x270] sm:$0xff] }
  0xba   :  { %1031 = vmatpush2.msra.mxu1 %v464_v32  ;;  %961 = vmatprep.subr.mxu0 %v201_v33  ;;  %v363_v27 = vld [vmem:[%s2986_s1 + $0xa78] sm:$0xff]  ;;  %v362_v29 = vld [vmem:[%s2986_s1 + $0xa70] sm:$0xff] }
  0xbb   :  { %1032 = vmatprep.subr.mxu1 %v457_v34  ;;  %962 = vmatpush2.msra.mxu0 %v200_v35  ;;  %v99_v30 = vld [vmem:[%s2986_s1 + $0x238] sm:$0xff]  ;;  %v98_v32 = vld [vmem:[%s2986_s1 + $0x230] sm:$0xff] }
  0xbc   :  { %1033 = vmatpush2.msra.mxu1 %v456_v36  ;;  %963 = vmatprep.subr.mxu0 %v193_v37  ;;  %v355_v31 = vld [vmem:[%s2986_s1 + $0xa38] sm:$0xff]  ;;  %v354_v33 = vld [vmem:[%s2986_s1 + $0xa30] sm:$0xff] }
  0xbd   :  { %1034 = vmatprep.subr.mxu1 %v449_v38  ;;  %964 = vmatpush2.msra.mxu0 %v192_v39  ;;  %v91_v34 = vld [vmem:[%s2986_s1 + $0x1f8] sm:$0xff]  ;;  %v90_v36 = vld [vmem:[%s2986_s1 + $0x1f0] sm:$0xff] }
  0xbe   :  { %1035 = vmatpush2.msra.mxu1 %v448_v40  ;;  %965 = vmatprep.subr.mxu0 %v185_v42  ;;  %v347_v35 = vld [vmem:[%s2986_s1 + $0x9f8] sm:$0xff]  ;;  %v346_v37 = vld [vmem:[%s2986_s1 + $0x9f0] sm:$0xff] }
  0xbf   :  { %1036 = vmatprep.subr.mxu1 %v441_v43  ;;  %966 = vmatpush2.msra.mxu0 %v184_v44  ;;  %v83_v38 = vld [vmem:[%s2986_s1 + $0x1b8] sm:$0xff]  ;;  %v82_v40 = vld [vmem:[%s2986_s1 + $0x1b0] sm:$0xff] }
  0xc0   :  { %1037 = vmatpush2.msra.mxu1 %v440_v45  ;;  %967 = vmatprep.subr.mxu0 %v177_v46  ;;  %v339_v39 = vld [vmem:[%s2986_s1 + $0x9b8] sm:$0xff]  ;;  %v338_v42 = vld [vmem:[%s2986_s1 + $0x9b0] sm:$0xff] }
  0xc1   :  { %1038 = vmatprep.subr.mxu1 %v433_v47  ;;  %968 = vmatpush2.msra.mxu0 %v176_v48  ;;  %v75_v43 = vld [vmem:[%s2986_s1 + $0x178] sm:$0xff]  ;;  %v74_v45 = vld [vmem:[%s2986_s1 + $0x170] sm:$0xff] }
  0xc2   :  { %1039 = vmatpush2.msra.mxu1 %v432_v49  ;;  %969 = vmatprep.subr.mxu0 %v169_v50  ;;  %v331_v44 = vld [vmem:[%s2986_s1 + $0x978] sm:$0xff]  ;;  %v330_v46 = vld [vmem:[%s2986_s1 + $0x970] sm:$0xff] }
  0xc3   :  { %1040 = vmatprep.subr.mxu1 %v425_v51  ;;  %970 = vmatpush2.msra.mxu0 %v168_v52  ;;  %v67_v47 = vld [vmem:[%s2986_s1 + $0x138] sm:$0xff]  ;;  %v66_v49 = vld [vmem:[%s2986_s1 + $0x130] sm:$0xff] }
  0xc4   :  { %1041 = vmatpush2.msra.mxu1 %v424_v54  ;;  %971 = vmatprep.subr.mxu0 %v161_v55  ;;  %v323_v48 = vld [vmem:[%s2986_s1 + $0x938] sm:$0xff]  ;;  %v322_v50 = vld [vmem:[%s2986_s1 + $0x930] sm:$0xff] }
  0xc5   :  { %1042 = vmatprep.subr.mxu1 %v417_v57  ;;  %972 = vmatpush2.msra.mxu0 %v160_v58  ;;  %v59_v51 = vld [vmem:[%s2986_s1 + $0xf8] sm:$0xff]  ;;  %v58_v54 = vld [vmem:[%s2986_s1 + $0xf0] sm:$0xff] }
  0xc6   :  { %973 = vmatprep.mubr.f32.mxu0 %v1752_v16  ;;  %1043 = vmatpush2.msra.mxu1 %v416_v60  ;;  %v315_v52 = vld [vmem:[%s2986_s1 + $0x8f8] sm:$0xff]  ;;  %v314_v55 = vld [vmem:[%s2986_s1 + $0x8f0] sm:$0xff] }
  0xc7   :  { %974 = vmatmul.mubr.f32.vlgmr.msra.gmra.mxu0 %v1758_v18  ;;  %1044 = vmatprep.mubr.f32.mxu1 %v1761_v19  ;;  %v51_v57 = vld [vmem:[%s2986_s1 + $0xb8] sm:$0xff]  ;;  %v50_v60 = vld [vmem:[%s2986_s1 + $0xb0] sm:$0xff] }
  0xc8   :  { %1051 = vmatprep.subr.mxu0 %v155_v61  ;;  %1122 = vmatprep.subr.mxu1 %v411_v63  ;;  %v307_v58 = vld [vmem:[%s2986_s1 + $0x8b8] sm:$0xff]  ;;  %v306_v61 = vld [vmem:[%s2986_s1 + $0x8b0] sm:$0xff] }
  0xc9   :  { %1045 = vmatmul.mubr.f32.vlgmr.msra.gmra.mxu1 %v1771_v22  ;;  %1052 = vmatpush1.msra.mxu0 %v154_v0  ;;  %v43_v63 = vld [vmem:[%s2986_s1 + $0x78] sm:$0xff] }
  0xca   :  { %1123 = vmatpush1.msra.mxu1 %v410_v1  ;;  %1053 = vmatprep.subr.mxu0 %v147_v2  ;;  %v299_v0 = vld [vmem:[%s2986_s1 + $0x878] sm:$0xff]  ;;  %v42_v1 = vld [vmem:[%s2986_s1 + $0x70] sm:$0xff] }
  0xcb   :  { %1124 = vmatprep.subr.mxu1 %v403_v3  ;;  %1054 = vmatpush1.msra.mxu0 %v146_v4  ;;  %v298_v2 = vld [vmem:[%s2986_s1 + $0x870] sm:$0xff]  ;;  %v35_v3 = vld [vmem:[%s2986_s1 + $0x38] sm:$0xff] }
  0xcc   :  { %1125 = vmatpush1.msra.mxu1 %v402_v5  ;;  %1055 = vmatprep.subr.mxu0 %v139_v6  ;;  %v291_v4 = vld [vmem:[%s2986_s1 + $0x838] sm:$0xff]  ;;  %v34_v5 = vld [vmem:[%s2986_s1 + $0x30] sm:$0xff] }
  0xcd   :  { %1126 = vmatprep.subr.mxu1 %v395_v7  ;;  %1056 = vmatpush1.msra.mxu0 %v138_v8  ;;  %v290_v6 = vld [vmem:[%s2986_s1 + $0x830] sm:$0xff]  ;;  %v283_v7 = vld [vmem:[%s2986_s1 + $0x7f8] sm:$0xff] }
  0xce   :  { %1127 = vmatpush1.msra.mxu1 %v394_v9  ;;  %1057 = vmatprep.subr.mxu0 %v131_v10  ;;  %v539_v8 = vld [vmem:[%s2986_s1 + $0xff8] sm:$0xff]  ;;  %v282_v9 = vld [vmem:[%s2986_s1 + $0x7f0] sm:$0xff] }
  0xcf   :  { %1128 = vmatprep.subr.mxu1 %v387_v11  ;;  %1058 = vmatpush1.msra.mxu0 %v130_v12  ;;  %v538_v10 = vld [vmem:[%s2986_s1 + $0xff0] sm:$0xff]  ;;  %v275_v11 = vld [vmem:[%s2986_s1 + $0x7b8] sm:$0xff] }
  0xd0   :  { %1129 = vmatpush1.msra.mxu1 %v386_v13  ;;  %1059 = vmatprep.subr.mxu0 %v123_v14  ;;  %v531_v12 = vld [vmem:[%s2986_s1 + $0xfb8] sm:$0xff]  ;;  %v274_v13 = vld [vmem:[%s2986_s1 + $0x7b0] sm:$0xff] }
  0xd1   :  { %1130 = vmatprep.subr.mxu1 %v379_v15  ;;  %1060 = vmatpush1.msra.mxu0 %v122_v17  ;;  %v530_v14 = vld [vmem:[%s2986_s1 + $0xfb0] sm:$0xff]  ;;  %v267_v15 = vld [vmem:[%s2986_s1 + $0x778] sm:$0xff] }
  0xd2   :  { %1131 = vmatpush1.msra.mxu1 %v378_v20  ;;  %1061 = vmatprep.subr.mxu0 %v115_v21  ;;  %v523_v17 = vld [vmem:[%s2986_s1 + $0xf78] sm:$0xff]  ;;  %v266_v20 = vld [vmem:[%s2986_s1 + $0x770] sm:$0xff] }
  0xd3   :  { %1132 = vmatprep.subr.mxu1 %v371_v23  ;;  %1062 = vmatpush1.msra.mxu0 %v114_v24  ;;  %v522_v21 = vld [vmem:[%s2986_s1 + $0xf70] sm:$0xff]  ;;  %v259_v23 = vld [vmem:[%s2986_s1 + $0x738] sm:$0xff] }
  0xd4   :  { %1133 = vmatpush1.msra.mxu1 %v370_v25  ;;  %1063 = vmatprep.subr.mxu0 %v107_v26  ;;  %v515_v24 = vld [vmem:[%s2986_s1 + $0xf38] sm:$0xff]  ;;  %v258_v25 = vld [vmem:[%s2986_s1 + $0x730] sm:$0xff] }
  0xd5   :  { %1134 = vmatprep.subr.mxu1 %v363_v27  ;;  %1064 = vmatpush1.msra.mxu0 %v106_v28  ;;  %v514_v26 = vld [vmem:[%s2986_s1 + $0xf30] sm:$0xff]  ;;  %v251_v27 = vld [vmem:[%s2986_s1 + $0x6f8] sm:$0xff] }
  0xd6   :  { %1135 = vmatpush1.msra.mxu1 %v362_v29  ;;  %1065 = vmatprep.subr.mxu0 %v99_v30  ;;  %v507_v28 = vld [vmem:[%s2986_s1 + $0xef8] sm:$0xff]  ;;  %v250_v29 = vld [vmem:[%s2986_s1 + $0x6f0] sm:$0xff] }
  0xd7   :  { %1136 = vmatprep.subr.mxu1 %v355_v31  ;;  %1066 = vmatpush1.msra.mxu0 %v98_v32  ;;  %v506_v30 = vld [vmem:[%s2986_s1 + $0xef0] sm:$0xff]  ;;  %v243_v31 = vld [vmem:[%s2986_s1 + $0x6b8] sm:$0xff] }
  0xd8   :  { %1137 = vmatpush1.msra.mxu1 %v354_v33  ;;  %1067 = vmatprep.subr.mxu0 %v91_v34  ;;  %v499_v32 = vld [vmem:[%s2986_s1 + $0xeb8] sm:$0xff]  ;;  %v242_v33 = vld [vmem:[%s2986_s1 + $0x6b0] sm:$0xff] }
  0xd9   :  { %1138 = vmatprep.subr.mxu1 %v347_v35  ;;  %1068 = vmatpush1.msra.mxu0 %v90_v36  ;;  %v498_v34 = vld [vmem:[%s2986_s1 + $0xeb0] sm:$0xff]  ;;  %v235_v35 = vld [vmem:[%s2986_s1 + $0x678] sm:$0xff] }
  0xda   :  { %1139 = vmatpush1.msra.mxu1 %v346_v37  ;;  %1069 = vmatprep.subr.mxu0 %v83_v38  ;;  %v491_v36 = vld [vmem:[%s2986_s1 + $0xe78] sm:$0xff]  ;;  %v234_v37 = vld [vmem:[%s2986_s1 + $0x670] sm:$0xff] }
  0xdb   :  { %1140 = vmatprep.subr.mxu1 %v339_v39  ;;  %1070 = vmatpush1.msra.mxu0 %v82_v40  ;;  %v490_v38 = vld [vmem:[%s2986_s1 + $0xe70] sm:$0xff]  ;;  %v227_v39 = vld [vmem:[%s2986_s1 + $0x638] sm:$0xff] }
  0xdc   :  { %1141 = vmatpush1.msra.mxu1 %v338_v42  ;;  %1071 = vmatprep.subr.mxu0 %v75_v43  ;;  %v483_v40 = vld [vmem:[%s2986_s1 + $0xe38] sm:$0xff]  ;;  %v226_v42 = vld [vmem:[%s2986_s1 + $0x630] sm:$0xff] }
  0xdd   :  { %1142 = vmatprep.subr.mxu1 %v331_v44  ;;  %1072 = vmatpush1.msra.mxu0 %v74_v45  ;;  %v482_v43 = vld [vmem:[%s2986_s1 + $0xe30] sm:$0xff]  ;;  %v219_v44 = vld [vmem:[%s2986_s1 + $0x5f8] sm:$0xff] }
  0xde   :  { %1143 = vmatpush1.msra.mxu1 %v330_v46  ;;  %1073 = vmatprep.subr.mxu0 %v67_v47  ;;  %v475_v45 = vld [vmem:[%s2986_s1 + $0xdf8] sm:$0xff]  ;;  %v218_v46 = vld [vmem:[%s2986_s1 + $0x5f0] sm:$0xff] }
  0xdf   :  { %1144 = vmatprep.subr.mxu1 %v323_v48  ;;  %1074 = vmatpush1.msra.mxu0 %v66_v49  ;;  %v474_v47 = vld [vmem:[%s2986_s1 + $0xdf0] sm:$0xff]  ;;  %v211_v48 = vld [vmem:[%s2986_s1 + $0x5b8] sm:$0xff] }
  0xe0   :  { %1145 = vmatpush1.msra.mxu1 %v322_v50  ;;  %1075 = vmatprep.subr.mxu0 %v59_v51  ;;  %v467_v49 = vld [vmem:[%s2986_s1 + $0xdb8] sm:$0xff]  ;;  %v210_v50 = vld [vmem:[%s2986_s1 + $0x5b0] sm:$0xff] }
  0xe1   :  { %1146 = vmatprep.subr.mxu1 %v315_v52  ;;  %1076 = vmatpush1.msra.mxu0 %v58_v54  ;;  %v466_v51 = vld [vmem:[%s2986_s1 + $0xdb0] sm:$0xff]  ;;  %v203_v52 = vld [vmem:[%s2986_s1 + $0x578] sm:$0xff] }
  0xe2   :  { %1147 = vmatpush1.msra.mxu1 %v314_v55  ;;  %1077 = vmatprep.subr.mxu0 %v51_v57  ;;  %v459_v54 = vld [vmem:[%s2986_s1 + $0xd78] sm:$0xff]  ;;  %v202_v55 = vld [vmem:[%s2986_s1 + $0x570] sm:$0xff] }
  0xe3   :  { %1148 = vmatprep.subr.mxu1 %v307_v58  ;;  %1078 = vmatpush1.msra.mxu0 %v50_v60  ;;  %v458_v57 = vld [vmem:[%s2986_s1 + $0xd70] sm:$0xff]  ;;  %v195_v58 = vld [vmem:[%s2986_s1 + $0x538] sm:$0xff] }
  0xe4   :  { %1149 = vmatpush1.msra.mxu1 %v306_v61  ;;  %1079 = vmatprep.subr.mxu0 %v43_v63  ;;  %v451_v60 = vld [vmem:[%s2986_s1 + $0xd38] sm:$0xff]  ;;  %v194_v61 = vld [vmem:[%s2986_s1 + $0x530] sm:$0xff] }
  0xe5   :  { %1150 = vmatprep.subr.mxu1 %v299_v0  ;;  %1080 = vmatpush1.msra.mxu0 %v42_v1  ;;  %v450_v63 = vld [vmem:[%s2986_s1 + $0xd30] sm:$0xff]  ;;  %v187_v0 = vld [vmem:[%s2986_s1 + $0x4f8] sm:$0xff] }
  0xe6   :  { %1151 = vmatpush1.msra.mxu1 %v298_v2  ;;  %1081 = vmatprep.subr.mxu0 %v35_v3  ;;  %v443_v1 = vld [vmem:[%s2986_s1 + $0xcf8] sm:$0xff]  ;;  %v186_v2 = vld [vmem:[%s2986_s1 + $0x4f0] sm:$0xff] }
  0xe7   :  { %1152 = vmatprep.subr.mxu1 %v291_v4  ;;  %1082 = vmatpush1.msra.mxu0 %v34_v5  ;;  %v442_v3 = vld [vmem:[%s2986_s1 + $0xcf0] sm:$0xff]  ;;  %v179_v4 = vld [vmem:[%s2986_s1 + $0x4b8] sm:$0xff] }
  0xe8   :  { %1153 = vmatpush1.msra.mxu1 %v290_v6  ;;  %1083 = vmatprep.subr.mxu0 %v283_v7  ;;  %v435_v5 = vld [vmem:[%s2986_s1 + $0xcb8] sm:$0xff]  ;;  %v178_v6 = vld [vmem:[%s2986_s1 + $0x4b0] sm:$0xff] }
  0xe9   :  { %1154 = vmatprep.subr.mxu1 %v539_v8  ;;  %1084 = vmatpush2.msra.mxu0 %v282_v9  ;;  %v434_v7 = vld [vmem:[%s2986_s1 + $0xcb0] sm:$0xff]  ;;  %v171_v8 = vld [vmem:[%s2986_s1 + $0x478] sm:$0xff] }
  0xea   :  { %1155 = vmatpush2.msra.mxu1 %v538_v10  ;;  %1085 = vmatprep.subr.mxu0 %v275_v11  ;;  %v427_v9 = vld [vmem:[%s2986_s1 + $0xc78] sm:$0xff]  ;;  %v170_v10 = vld [vmem:[%s2986_s1 + $0x470] sm:$0xff] }
  0xeb   :  { %1156 = vmatprep.subr.mxu1 %v531_v12  ;;  %1086 = vmatpush2.msra.mxu0 %v274_v13  ;;  %v426_v11 = vld [vmem:[%s2986_s1 + $0xc70] sm:$0xff]  ;;  %v163_v12 = vld [vmem:[%s2986_s1 + $0x438] sm:$0xff] }
  0xec   :  { %1157 = vmatpush2.msra.mxu1 %v530_v14  ;;  %1087 = vmatprep.subr.mxu0 %v267_v15  ;;  %v419_v13 = vld [vmem:[%s2986_s1 + $0xc38] sm:$0xff]  ;;  %v162_v14 = vld [vmem:[%s2986_s1 + $0x430] sm:$0xff] }
  0xed   :  { %1158 = vmatprep.subr.mxu1 %v523_v17  ;;  %1088 = vmatpush2.msra.mxu0 %v266_v20  ;;  %v418_v15 = vld [vmem:[%s2986_s1 + $0xc30] sm:$0xff]  ;;  %v10_v17 = vstv %s2988_s4  ;;  %v548_v20 = vsub.s32 1, %v1657_v41 }
  0xee   :  { %1159 = vmatpush2.msra.mxu1 %v522_v21  ;;  %1089 = vmatprep.subr.mxu0 %v259_v23  ;;  %11 = vst [vmem:[#allocation2] sm:$0x1] %v10_v17  ;;  %v2941_v23 = vld [vmem:[%s2989_s2] sm:$0xff] }
  0xef   :  { %1160 = vmatprep.subr.mxu1 %v515_v24  ;;  %1090 = vmatpush2.msra.mxu0 %v258_v25  ;;  %v556_v25 = vsub.s32 3, %v1657_v41  ;;  %v569_v17 = vrot.slane %v2941_v23, %v1705_v59 }
  0xf0   :  { %1161 = vmatpush2.msra.mxu1 %v514_v26  ;;  %1091 = vmatprep.subr.mxu0 %v251_v27 }
  0xf1   :  { %1162 = vmatprep.subr.mxu1 %v507_v28  ;;  %1092 = vmatpush2.msra.mxu0 %v250_v29 }
  0xf2   :  { %1163 = vmatpush2.msra.mxu1 %v506_v30  ;;  %1093 = vmatprep.subr.mxu0 %v243_v31  ;;  %v557_v31 = vrot.slane %v2941_v23, %v556_v25 }
  0xf3   :  { %1164 = vmatprep.subr.mxu1 %v499_v32  ;;  %1094 = vmatpush2.msra.mxu0 %v242_v33 }
  0xf4   :  { %1165 = vmatpush2.msra.mxu1 %v498_v34  ;;  %1095 = vmatprep.subr.mxu0 %v235_v35  ;;  %v561_v35 = vrot.slane %v2941_v23, %v1714_v62 }
  0xf5   :  { %1166 = vmatprep.subr.mxu1 %v491_v36  ;;  %1096 = vmatpush2.msra.mxu0 %v234_v37  ;;  %v564_v36 = vsub.s32 5, %v1657_v41 }
  0xf6   :  { %1167 = vmatpush2.msra.mxu1 %v490_v38  ;;  %1097 = vmatprep.subr.mxu0 %v227_v39 }
  0xf7   :  { %1168 = vmatprep.subr.mxu1 %v483_v40  ;;  %1098 = vmatpush2.msra.mxu0 %v226_v42 }
  0xf8   :  { %1169 = vmatpush2.msra.mxu1 %v482_v43  ;;  %1099 = vmatprep.subr.mxu0 %v219_v44 }
  0xf9   :  { %1170 = vmatprep.subr.mxu1 %v475_v45  ;;  %1100 = vmatpush2.msra.mxu0 %v218_v46  ;;  %v565_v45 = vrot.slane %v2941_v23, %v564_v36 }
  0xfa   :  { %1171 = vmatpush2.msra.mxu1 %v474_v47  ;;  %1101 = vmatprep.subr.mxu0 %v211_v48 }
  0xfb   :  { %1172 = vmatprep.subr.mxu1 %v467_v49  ;;  %1102 = vmatpush2.msra.mxu0 %v210_v50  ;;  %v2957_v49 = vld [vmem:[%s2990_s3] sm:$0xff] }
  0xfc   :  { %1173 = vmatpush2.msra.mxu1 %v466_v51  ;;  %1103 = vmatprep.subr.mxu0 %v203_v52  ;;  %v1226_v52 = vrot.slane %v2957_v49, %v548_v20 }
  0xfd   :  { %1174 = vmatprep.subr.mxu1 %v459_v54  ;;  %1104 = vmatpush2.msra.mxu0 %v202_v55 }
  0xfe   :  { %1175 = vmatpush2.msra.mxu1 %v458_v57  ;;  %1105 = vmatprep.subr.mxu0 %v195_v58  ;;  %v1222_v58 = vrot.slane %v2957_v49, %v1696_v56 }
  0xff   :  { %1176 = vmatprep.subr.mxu1 %v451_v60  ;;  %1106 = vmatpush2.msra.mxu0 %v194_v61  ;;  %v1230_v60 = vrot.slane %v2957_v49, %v1687_v53 }
 0x100   :  { %1177 = vmatpush2.msra.mxu1 %v450_v63  ;;  %1107 = vmatprep.subr.mxu0 %v187_v0 }
 0x101   :  { %1178 = vmatprep.subr.mxu1 %v443_v1  ;;  %1108 = vmatpush2.msra.mxu0 %v186_v2 }
 0x102   :  { %1179 = vmatpush2.msra.mxu1 %v442_v3  ;;  %1109 = vmatprep.subr.mxu0 %v179_v4 }
 0x103   :  { %1180 = vmatprep.subr.mxu1 %v435_v5  ;;  %1110 = vmatpush2.msra.mxu0 %v178_v6  ;;  %v691_v21 = vpop.f32.mrf.mxu0 }
 0x104   :  { %1181 = vmatpush2.msra.mxu1 %v434_v7  ;;  %1111 = vmatprep.subr.mxu0 %v171_v8  ;;  %v1234_v7 = vrot.slane %v2957_v49, %v556_v25 }
 0x105   :  { %1182 = vmatprep.subr.mxu1 %v427_v9  ;;  %1112 = vmatpush2.msra.mxu0 %v170_v10  ;;  %v693_v24 = vpop.f32.mrf.mxu0 }
 0x106   :  { %1183 = vmatpush2.msra.mxu1 %v426_v11  ;;  %1113 = vmatprep.subr.mxu0 %v163_v12  ;;  %v572_v11 = vsub.s32 7, %v1657_v41 }
 0x107   :  { %1184 = vmatprep.subr.mxu1 %v419_v13  ;;  %1114 = vmatpush2.msra.mxu0 %v162_v14 }
 0x108   :  { %1115 = vmatprep.mubr.f32.mxu0 %v1752_v16  ;;  %1185 = vmatpush2.msra.mxu1 %v418_v15  ;;  %v549_v16 = vrot.slane %v2941_v23, %v548_v20 }
 0x109   :  { %1186 = vmatprep.mubr.f32.mxu1 %v1761_v19  ;;  %1116 = vmatmul.mubr.f32.vlgmr.msra.gmra.mxu0 %v1758_v18  ;;  %v762_v19 = vpop.f32.mrf.mxu1  ;;  %v545_v18 = vrot.slane %v2941_v23, %v1696_v56 }
 0x10a   :  { %1187 = vmatmul.mubr.f32.vlgmr.msra.gmra.mxu1 %v1771_v22  ;;  %v553_v22 = vrot.slane %v2941_v23, %v1687_v53  ;;  %v694_v27 = vadd.f32 %v693_v24, %v549_v16  ;;  %v1238_v53 = vrot.slane %v2957_v49, %v1714_v62  ;;  %v573_v62 = vrot.slane %v2941_v23, %v572_v11 }
 0x10b   :  { %v764_v28 = vpop.f32.mrf.mxu1  ;;  %v692_v29 = vadd.f32 %v691_v21, %v545_v18  ;;  %v1242_v21 = vrot.slane %v2957_v49, %v564_v36 }
 0x10c   :  { %v765_v34 = vadd.f32 %v764_v28, %v694_v27 }
 0x10d   :  { %v763_v38 = vadd.f32 %v762_v19, %v692_v29 }
 0x10e   :  { %v1202_v43 = vmul.f32 0.2, %v765_v34  ;;  %vm1194_vm1 = vcmp.ge.f32.partialorder %v765_v34, 0.0 }
 0x10f   :  { %v1201_v48 = vmul.f32 0.2, %v763_v38  ;;  %vm1193_vm2 = vcmp.ge.f32.partialorder %v763_v38, 0.0 }
 0x110   :  { %v1210_v54 = vsel %vm1194_vm1, %v765_v34, %v1202_v43 }
 0x111   :  { %v1209_v63 = vsel %vm1193_vm2, %v763_v38, %v1201_v48  ;;  %v1260_v2 = vmul.f32 %v1226_v52, %v1210_v54 }
 0x112   :  { %v1259_v5 = vmul.f32 %v1222_v58, %v1209_v63 }
 0x113   :  { %v1269_v56 = vsel %vm1267_vm6, %v1260_v2, 0.0 }
 0x114   :  { %v1268_v12 = vsel %vm1267_vm6, %v1259_v5, 0.0 }
 0x115   :  { %v1270_v15 = vadd.f32 %v1269_v56, %v1268_v12 }
 0x145   :  { %v833_v26 = vpop.f32.mrf.mxu0 }
 0x146   :  { %v834_v30 = vadd.f32 %v833_v26, %v553_v22 }
 0x147   :  { %v904_v32 = vpop.f32.mrf.mxu1  ;;  %v835_v33 = vpop.f32.mrf.mxu0 }
 0x148   :  { %v905_v39 = vadd.f32 %v904_v32, %v834_v30  ;;  %v836_v40 = vadd.f32 %v835_v33, %v557_v31  ;;  %v1246_v32 = vrot.slane %v2957_v49, %v1705_v59 }
 0x149   :  { %v906_v42 = vpop.f32.mrf.mxu1 }
 0x14a   :  { %v1203_v50 = vmul.f32 0.2, %v905_v39  ;;  %v907_v51 = vadd.f32 %v906_v42, %v836_v40  ;;  %vm1195_vm3 = vcmp.ge.f32.partialorder %v905_v39, 0.0 }
 0x14c   :  { %v1211_v0 = vsel %vm1195_vm3, %v905_v39, %v1203_v50  ;;  %v1204_v1 = vmul.f32 0.2, %v907_v51  ;;  %vm1196_vm4 = vcmp.ge.f32.partialorder %v907_v51, 0.0 }
 0x14d   :  { %v1261_v6 = vmul.f32 %v1230_v60, %v1211_v0 }
 0x14e   :  { %v1212_v8 = vsel %vm1196_vm4, %v907_v51, %v1204_v1 }
 0x14f   :  { %v1271_v13 = vsel %vm1267_vm6, %v1261_v6, 0.0  ;;  %v1262_v14 = vmul.f32 %v1234_v7, %v1212_v8 }
 0x150   :  { %v1272_v16 = vadd.f32 %v1271_v13, %v1270_v15 }
 0x151   :  { %v1273_v24 = vsel %vm1267_vm6, %v1262_v14, 0.0 }
 0x152   :  { %v1274_v30 = vadd.f32 %v1273_v24, %v1272_v16 }
 0x187   :  { %v975_v37 = vpop.f32.mrf.mxu0 }
 0x188   :  { %v976_v44 = vadd.f32 %v975_v37, %v561_v35  ;;  %v1250_v35 = vrot.slane %v2957_v49, %v572_v11 }
 0x189   :  { %v1046_v46 = vpop.f32.mrf.mxu1  ;;  %v977_v47 = vpop.f32.mrf.mxu0 }
 0x18a   :  { %v1047_v55 = vadd.f32 %v1046_v46, %v976_v44  ;;  %v978_v57 = vadd.f32 %v977_v47, %v565_v45  ;;  %v1305_v47 = vld [vmem:[#allocation2] ss:$0 sm:$0xff] }
 0x18b   :  { %v1048_v61 = vpop.f32.mrf.mxu1 }
 0x18c   :  { %v1205_v3 = vmul.f32 0.2, %v1047_v55  ;;  %v1049_v4 = vadd.f32 %v1048_v61, %v978_v57  ;;  %vm1197_vm5 = vcmp.ge.f32.partialorder %v1047_v55, 0.0 }
 0x18e   :  { %v1213_v9 = vsel %vm1197_vm5, %v1047_v55, %v1205_v3  ;;  %v1206_v10 = vmul.f32 0.2, %v1049_v4  ;;  %vm1198_vm7 = vcmp.ge.f32.partialorder %v1049_v4, 0.0 }
 0x18f   :  { %v1263_v20 = vmul.f32 %v1238_v53, %v1213_v9 }
 0x190   :  { %v1214_v19 = vsel %vm1198_vm7, %v1049_v4, %v1206_v10 }
 0x191   :  { %v1264_v25 = vmul.f32 %v1242_v21, %v1214_v19  ;;  %v1275_v27 = vsel %vm1267_vm6, %v1263_v20, 0.0 }
 0x192   :  { %v1276_v23 = vadd.f32 %v1275_v27, %v1274_v30 }
 0x193   :  { %v1277_v36 = vsel %vm1267_vm6, %v1264_v25, 0.0 }
 0x194   :  { %v1278_v42 = vadd.f32 %v1277_v36, %v1276_v23 }
 0x1c9   :  { %v1117_v41 = vpop.f32.mrf.mxu0 }
 0x1ca   :  { %v1188_v18 = vpop.f32.mrf.mxu1  ;;  %v1118_v22 = vadd.f32 %v1117_v41, %v569_v17 }
 0x1cb   :  { %v1119_v26 = vpop.f32.mrf.mxu0 }
 0x1cc   :  { %v1189_v28 = vadd.f32 %v1188_v18, %v1118_v22  ;;  %v1120_v29 = vadd.f32 %v1119_v26, %v573_v62  ;;  %v1190_v31 = vpop.f32.mrf.mxu1 }
 0x1ce   :  { %vm1199_vm8 = vcmp.ge.f32.partialorder %v1189_v28, 0.0  ;;  %v1207_v33 = vmul.f32 0.2, %v1189_v28  ;;  %v1191_v34 = vadd.f32 %v1190_v31, %v1120_v29 }
 0x1d0   :  { %v1215_v37 = vsel %vm1199_vm8, %v1189_v28, %v1207_v33  ;;  %vm1200_vm9 = vcmp.ge.f32.partialorder %v1191_v34, 0.0  ;;  %v1208_v38 = vmul.f32 0.2, %v1191_v34 }
 0x1d1   :  { %v1265_v39 = vmul.f32 %v1246_v32, %v1215_v37 }
 0x1d2   :  { %v1216_v40 = vsel %vm1200_vm9, %v1191_v34, %v1208_v38 }
 0x1d3   :  { %v1266_v43 = vmul.f32 %v1250_v35, %v1216_v40  ;;  %v1279_v44 = vsel %vm1267_vm6, %v1265_v39, 0.0 }
 0x1d4   :  { %v1280_v45 = vadd.f32 %v1279_v44, %v1278_v42 }
 0x1d5   :  { %v1281_v59 = vsel %vm1267_vm6, %v1266_v43, 0.0 }
 0x1d6   :  { %v1282_v46 = vadd.f32 %v1281_v59, %v1280_v45 }
 0x1d8   :  { %1283 = vadd.xlane.f32.xlu0 %v1282_v46 }
 0x261   :  { %v1284_v48 = vpop.xlane.xlu0 %1283 }
 0x262   :  { %v1292_v50 = vadd.f32 %v1305_v47, %v1284_v48 }
 0x264   :  { %v1306_v49 = vmul.f32 -1.442695, %v1292_v50 }
 0x266   :  { %1311 = vpow2.f32 %v1306_v49 }
 0x273   :  { %v1312_v51 = vpop.eup %1311 }
 0x274   :  { %v1296_v52 = vadd.f32 1.0, %v1312_v51 }
 0x276   :  { %1313 = vrcp.f32 %v1296_v52 }
 0x283   :  { %v1314_v54 = vpop.eup %1313 }
 0x284   :  { %1300 = vst.msk [vmem:[%s2991_s5] sm:$0x3] %vm1299_vm10, %v1314_v54 }

</bundles_post_ra>
